<compile_context>
chip_gen: v7x
topology: tpu7x:2x2x1
jax: 0.10.0
libtpu: 0.0.40
codegen_flags: <defaults>
</compile_context>

<pallas_src>
import functools

import jax
import jax.numpy as jnp
from jax.experimental import pallas as pl
from jax.experimental.pallas import tpu as pltpu


def _round_up(x, m):
    return ((x + m - 1) // m) * m


@functools.lru_cache(maxsize=None)
def _vmem_limit_bytes():
    """75% of physical VMEM (v7x: ~48 MiB, v5e/v6e: ~96 MiB), capped at 100 MiB."""
    cap = 64 * 1024 * 1024
    try:
        cap = int(pltpu.get_tpu_info().vmem_capacity_bytes)
    except Exception:
        pass
    return min((cap * 3) // 4, 100 * 1024 * 1024)


def _tile_and_pad(dim, tile, align):
    """Return (padded_dim, block) with block | padded_dim and block aligned."""
    d = _round_up(dim, align)
    if d <= tile:
        return d, d
    return _round_up(d, tile), tile


# ----------------------------------------------------------------------------
# Pallas kernel: GEMM + bias  (hoisted, direction-fused input projection)
#   out = x @ w_t + b     (x: (M,K) bf16, w_t: (K,N) bf16, b: (1,N) f32)
# Grid is (M//tm, N//tn) with M outer: x (the large operand) is read from HBM
# once; W is re-read M//tm times, amortized by tm=512.
# TODO(synk): add a K ("arbitrary") reduction axis + f32 accumulator scratch if
#             K ever grows beyond a few thousand.
# ----------------------------------------------------------------------------
def proj_bias_kernel(x_ref, w_ref, b_ref, o_ref):
    acc = jnp.dot(x_ref[...], w_ref[...], preferred_element_type=jnp.float32)
    o_ref[...] = (acc + b_ref[...]).astype(o_ref.dtype)


def run_proj_bias(x, w_t, b, out_dtype=jnp.float32, tile_m=512, tile_n=512):
    M, K = x.shape
    N = w_t.shape[1]
    M_pad, tm = _tile_and_pad(M, tile_m, 16)     # sublane (bf16 packs 16)
    N_pad, tn = _tile_and_pad(N, tile_n, 128)    # lane-dense
    if M_pad != M:
        x = jnp.pad(x, ((0, M_pad - M), (0, 0)))
    if N_pad != N:
        w_t = jnp.pad(w_t, ((0, 0), (0, N_pad - N)))
        b = jnp.pad(b, ((0, 0), (0, N_pad - N)))
    grid = (M_pad // tm, N_pad // tn)
    out = pl.pallas_call(
        proj_bias_kernel,
        grid=grid,
        in_specs=[
            pl.BlockSpec((tm, K), lambda i, j: (i, 0)),
            pl.BlockSpec((K, tn), lambda i, j: (0, j)),
            pl.BlockSpec((1, tn), lambda i, j: (0, j)),
        ],
        out_specs=pl.BlockSpec((tm, tn), lambda i, j: (i, j)),
        out_shape=jax.ShapeDtypeStruct((M_pad, N_pad), out_dtype),
        compiler_params=pltpu.CompilerParams(
            dimension_semantics=("parallel", "parallel"),
            vmem_limit_bytes=_vmem_limit_bytes()),
    )(x, w_t, b)
    if M_pad != M or N_pad != N:
        out = out[:M, :N]
    return out


# ----------------------------------------------------------------------------
# Pallas kernel: two-input GEMM + bias (bidirectional concat folded into split
# weights): out = xf @ wf_t + xb @ wb_t + b
# ----------------------------------------------------------------------------
def proj2_bias_kernel(xf_ref, xb_ref, wf_ref, wb_ref, b_ref, o_ref):
    acc = jnp.dot(xf_ref[...], wf_ref[...], preferred_element_type=jnp.float32)
    acc = acc + jnp.dot(xb_ref[...], wb_ref[...], preferred_element_type=jnp.float32)
    o_ref[...] = (acc + b_ref[...]).astype(o_ref.dtype)


def run_proj2_bias(xf, xb, wf_t, wb_t, b, out_dtype=jnp.float32,
                   tile_m=512, tile_n=512):
    M, Kf = xf.shape
    Kb = xb.shape[1]
    N = wf_t.shape[1]
    M_pad, tm = _tile_and_pad(M, tile_m, 16)
    N_pad, tn = _tile_and_pad(N, tile_n, 128)
    if M_pad != M:
        xf = jnp.pad(xf, ((0, M_pad - M), (0, 0)))
        xb = jnp.pad(xb, ((0, M_pad - M), (0, 0)))
    if N_pad != N:
        wf_t = jnp.pad(wf_t, ((0, 0), (0, N_pad - N)))
        wb_t = jnp.pad(wb_t, ((0, 0), (0, N_pad - N)))
        b = jnp.pad(b, ((0, 0), (0, N_pad - N)))
    grid = (M_pad // tm, N_pad // tn)
    out = pl.pallas_call(
        proj2_bias_kernel,
        grid=grid,
        in_specs=[
            pl.BlockSpec((tm, Kf), lambda i, j: (i, 0)),
            pl.BlockSpec((tm, Kb), lambda i, j: (i, 0)),
            pl.BlockSpec((Kf, tn), lambda i, j: (0, j)),
            pl.BlockSpec((Kb, tn), lambda i, j: (0, j)),
            pl.BlockSpec((1, tn), lambda i, j: (0, j)),
        ],
        out_specs=pl.BlockSpec((tm, tn), lambda i, j: (i, j)),
        out_shape=jax.ShapeDtypeStruct((M_pad, N_pad), out_dtype),
        compiler_params=pltpu.CompilerParams(
            dimension_semantics=("parallel", "parallel"),
            vmem_limit_bytes=_vmem_limit_bytes()),
    )(xf, xb, wf_t, wb_t, b)
    if M_pad != M or N_pad != N:
        out = out[:M, :N]
    return out


# ----------------------------------------------------------------------------
# Pallas kernel: fused bidirectional LSTM recurrence, Tc timesteps per grid step.
# grid = (T//Tc,) sequential. Forward reads gx[s*Tc + i, :, :4H]; backward reads
# gx[T-1-(s*Tc+i), :, 4H:8H] via index_maps + in-block reversal.  W_hh / h0 / c0
# are HBM (pl.ANY) inputs copied once into VMEM scratch at grid step 0.
# ----------------------------------------------------------------------------
def bilstm_kernel(gxf_ref, gxb_ref, whhf_hbm, whhb_hbm, h0_hbm, c0_hbm,
                  outf_ref, outb_ref, hN_ref, cN_ref,
                  whhf_sc, whhb_sc, hf_sc, cf_sc, hb_sc, cb_sc, dma_sem):
    s = pl.program_id(0)
    Tc = gxf_ref.shape[0]
    H = hf_sc.shape[1]

    @pl.when(s == 0)
    def _load_residents():
        # Single (non-double-buffered) copies of the loop-invariant operands.
        copies = (
            pltpu.make_async_copy(whhf_hbm, whhf_sc, dma_sem.at[0]),
            pltpu.make_async_copy(whhb_hbm, whhb_sc, dma_sem.at[1]),
            pltpu.make_async_copy(h0_hbm.at[0], hf_sc, dma_sem.at[2]),
            pltpu.make_async_copy(h0_hbm.at[1], hb_sc, dma_sem.at[3]),
            pltpu.make_async_copy(c0_hbm.at[0], cf_sc, dma_sem.at[4]),
            pltpu.make_async_copy(c0_hbm.at[1], cb_sc, dma_sem.at[5]),
        )
        for c in copies:
            c.start()
        for c in copies:
            c.wait()

    hf = hf_sc[...]          # bf16 state (fed straight to the MXU)
    cf = cf_sc[...]          # f32 state
    hb = hb_sc[...]
    cb = cb_sc[...]

    def cell(gx, h, c, whh_sc):
        # gx already contains x @ W_ih^T + b_ih + b_hh (hoisted GEMM), stored bf16.
        gates = gx.astype(jnp.float32) + jnp.dot(
            h, whh_sc[...], preferred_element_type=jnp.float32)
        # Gate order (i, f, g, o), PyTorch convention; H is a multiple of 128,
        # so these slices are lane-tile aligned (no XLU shuffles).
        i_g = jax.nn.sigmoid(gates[:, 0 * H:1 * H])
        f_g = jax.nn.sigmoid(gates[:, 1 * H:2 * H])
        g_g = jnp.tanh(gates[:, 2 * H:3 * H])
        o_g = jax.nn.sigmoid(gates[:, 3 * H:4 * H])
        c_new = f_g * c + i_g * g_g
        h_new = (o_g * jnp.tanh(c_new)).astype(outf_ref.dtype)
        return h_new, c_new

    # Statically unrolled Tc-step inner recurrence: amortizes per-grid-step
    # pipeline overhead and keeps the serial dependence chain visible to the
    # scheduler; outputs are written with static (dense) indices.
    for i in range(Tc):
        hf, cf = cell(gxf_ref[i], hf, cf, whhf_sc)
        outf_ref[i] = hf
        hb, cb = cell(gxb_ref[Tc - 1 - i], hb, cb, whhb_sc)
        outb_ref[Tc - 1 - i] = hb

    hf_sc[...] = hf
    cf_sc[...] = cf
    hb_sc[...] = hb
    cb_sc[...] = cb

    @pl.when(s == pl.num_programs(0) - 1)
    def _write_final_state():
        hN_ref[0] = hf.astype(hN_ref.dtype)
        cN_ref[0] = cf
        hN_ref[1] = hb.astype(hN_ref.dtype)
        cN_ref[1] = cb


def _pick_time_block(T, B, H, budget_bytes=24 * 1024 * 1024):
    """Largest Tc in {32,16,8,4,2,1} dividing T whose pipelined blocks fit budget."""
    # per timestep: gx 2 dirs x (B,4H) bf16 x 2 buffers + out 2 dirs x (B,H) bf16 x 2
    per_step = B * H * 2 * (2 * 4 * 2 + 2 * 2)
    for tc in (32, 16, 8, 4, 2, 1):
        if T % tc == 0 and tc * per_step <= budget_bytes:
            return tc
    return 1


def run_bilstm_layer(gx, whh_f_t, whh_b_t, h0, c0, out_dtype=jnp.bfloat16):
    T, B, G8 = gx.shape
    H = G8 // 8
    Tc = _pick_time_block(T, B, H)
    Sb = T // Tc
    return pl.pallas_call(
        bilstm_kernel,
        grid=(Sb,),
        in_specs=[
            pl.BlockSpec((Tc, B, 4 * H), lambda s: (s, 0, 0)),            # gx fwd half
            pl.BlockSpec((Tc, B, 4 * H), lambda s: (Sb - 1 - s, 0, 1)),   # gx bwd half, reversed time
            pl.BlockSpec(memory_space=pl.ANY),                            # W_hh^T fwd (HBM)
            pl.BlockSpec(memory_space=pl.ANY),                            # W_hh^T bwd (HBM)
            pl.BlockSpec(memory_space=pl.ANY),                            # h0 (fwd,bwd) bf16
            pl.BlockSpec(memory_space=pl.ANY),                            # c0 (fwd,bwd) f32
        ],
        out_specs=[
            pl.BlockSpec((Tc, B, H), lambda s: (s, 0, 0)),                # out fwd
            pl.BlockSpec((Tc, B, H), lambda s: (Sb - 1 - s, 0, 0)),       # out bwd (time-ordered)
            pl.BlockSpec((2, B, H), lambda s: (0, 0, 0)),                 # h_n
            pl.BlockSpec((2, B, H), lambda s: (0, 0, 0)),                 # c_n
        ],
        out_shape=[
            jax.ShapeDtypeStruct((T, B, H), out_dtype),
            jax.ShapeDtypeStruct((T, B, H), out_dtype),
            jax.ShapeDtypeStruct((2, B, H), jnp.float32),
            jax.ShapeDtypeStruct((2, B, H), jnp.float32),
        ],
        scratch_shapes=[
            pltpu.VMEM((H, 4 * H), whh_f_t.dtype),   # resident W_hh fwd (single copy)
            pltpu.VMEM((H, 4 * H), whh_b_t.dtype),   # resident W_hh bwd
            pltpu.VMEM((B, H), out_dtype),           # h fwd (bf16, MXU-ready)
            pltpu.VMEM((B, H), jnp.float32),         # c fwd
            pltpu.VMEM((B, H), out_dtype),           # h bwd
            pltpu.VMEM((B, H), jnp.float32),         # c bwd
            pltpu.SemaphoreType.DMA((6,)),
        ],
        compiler_params=pltpu.CompilerParams(
            dimension_semantics=("arbitrary",),
            vmem_limit_bytes=_vmem_limit_bytes()),
    )(gx, gx, whh_f_t, whh_b_t, h0, c0)


# ----------------------------------------------------------------------------
# Parameter initialization (PyTorch-like init) + kernel-friendly layout:
# transposed, per-gate zero-padded to H_pad = round_up(H, 128), directions fused
# along N, bf16 weights / f32 biases.
# ----------------------------------------------------------------------------
def _pad_gate_cols(w, H, H_pad):
    """(..., 4*H) -> (..., 4*H_pad) with per-gate zero column padding."""
    lead = w.shape[:-1]
    w4 = w.reshape(lead + (4, H))
    w4 = jnp.pad(w4, [(0, 0)] * len(lead) + [(0, 0), (0, H_pad - H)])
    return w4.reshape(lead + (4 * H_pad,))


def init_params(key, vocab_size, embedding_dim, hidden_dim, n_layers,
                compute_dtype=jnp.bfloat16):
    H = hidden_dim
    H_pad = _round_up(H, 128)
    params = {}
    k_emb, k_lstm, k_fc = jax.random.split(key, 3)

    # nn.Embedding default: N(0, 1)
    params["embedding"] = jax.random.normal(
        k_emb, (vocab_size, embedding_dim), jnp.float32)

    # nn.LSTM default: U(-1/sqrt(H), 1/sqrt(H)); gate order (i, f, g, o)
    bound = 1.0 / jnp.sqrt(hidden_dim)
    keys = jax.random.split(k_lstm, n_layers * 2 * 4)
    ki = 0
    layers = []
    for layer in range(n_layers):
        e_in = embedding_dim if layer == 0 else 2 * hidden_dim
        dirs = []
        for _d in range(2):
            w_ih = jax.random.uniform(keys[ki], (4 * H, e_in),
                                      jnp.float32, -bound, bound); ki += 1
            w_hh = jax.random.uniform(keys[ki], (4 * H, H),
                                      jnp.float32, -bound, bound); ki += 1
            b_ih = jax.random.uniform(keys[ki], (4 * H,),
                                      jnp.float32, -bound, bound); ki += 1
            b_hh = jax.random.uniform(keys[ki], (4 * H,),
                                      jnp.float32, -bound, bound); ki += 1

            wih_t = _pad_gate_cols(jnp.transpose(w_ih), H, H_pad)    # (e_in, 4H_pad)
            if layer > 0:
                # Rows are [fwd features | bwd features]; pad each half H -> H_pad.
                wih_t = wih_t.reshape(2, H, 4 * H_pad)
                wih_t = jnp.pad(wih_t, ((0, 0), (0, H_pad - H), (0, 0)))
                wih_t = wih_t.reshape(2 * H_pad, 4 * H_pad)
            whh_t = _pad_gate_cols(jnp.transpose(w_hh), H, H_pad)    # (H, 4H_pad)
            whh_t = jnp.pad(whh_t, ((0, H_pad - H), (0, 0)))         # (H_pad, 4H_pad)
            bias = _pad_gate_cols((b_ih + b_hh).reshape(1, 4 * H), H, H_pad)  # (1, 4H_pad) f32
            dirs.append((wih_t, whh_t, bias))

        (wih_f, whh_f, b_f), (wih_b, whh_b, b_b) = dirs
        entry = {
            "whh_f_t": whh_f.astype(compute_dtype),
            "whh_b_t": whh_b.astype(compute_dtype),
            "bias_fused": jnp.concatenate([b_f, b_b], axis=1),       # (1, 8H_pad) f32
        }
        if layer == 0:
            entry["wih_fused"] = jnp.concatenate(
                [wih_f, wih_b], axis=1).astype(compute_dtype)        # (E, 8H_pad)
        else:
            entry["wih_top"] = jnp.concatenate(
                [wih_f[:H_pad], wih_b[:H_pad]], axis=1).astype(compute_dtype)   # (H_pad, 8H_pad)
            entry["wih_bot"] = jnp.concatenate(
                [wih_f[H_pad:], wih_b[H_pad:]], axis=1).astype(compute_dtype)   # (H_pad, 8H_pad)
        layers.append(entry)
    params["lstm"] = layers

    # nn.Linear default: U(-1/sqrt(fan_in), 1/sqrt(fan_in))
    fan_in = 2 * hidden_dim
    fc_bound = 1.0 / jnp.sqrt(fan_in)
    kw, kb = jax.random.split(k_fc)
    fc_w = jax.random.uniform(kw, (vocab_size, fan_in), jnp.float32,
                              -fc_bound, fc_bound)
    fc_b = jax.random.uniform(kb, (vocab_size,), jnp.float32,
                              -fc_bound, fc_bound)
    fc_w_t = jnp.transpose(fc_w).reshape(2, H, vocab_size)            # [fwd rows | bwd rows]
    fc_w_t = jnp.pad(fc_w_t, ((0, 0), (0, H_pad - H), (0, 0)))        # (2, H_pad, V)
    params["fc_w_top_t"] = fc_w_t[0].astype(compute_dtype)            # (H_pad, V)
    params["fc_w_bot_t"] = fc_w_t[1].astype(compute_dtype)            # (H_pad, V)
    params["fc_b"] = fc_b.reshape(1, vocab_size)                      # f32
    return params


# ----------------------------------------------------------------------------
# Full forward pass (matches LSTM.forward semantics, eval-mode dropout)
# ----------------------------------------------------------------------------
def lstm_model_forward(params, tokens, hidden, *, n_layers, hidden_dim,
                       compute_dtype=jnp.bfloat16):
    h0_all, c0_all = hidden                       # each (2L, B, H), f32
    B, T = tokens.shape
    H = hidden_dim
    H_pad = _round_up(H, 128)                     # lane-align the gate axis
    B_pad = _round_up(max(B, 16), 16)             # bf16 sublane packing = 16

    # Embedding gather directly into time-major layout (T, B, E) -- glue op in XLA.
    emb = params["embedding"][tokens.T].astype(compute_dtype)          # (T, B, E)
    pad_b, pad_h = B_pad - B, H_pad - H
    if pad_b:
        emb = jnp.pad(emb, ((0, 0), (0, pad_b), (0, 0)))
    if pad_b or pad_h:
        h0_all = jnp.pad(h0_all, ((0, 0), (0, pad_b), (0, pad_h)))
        c0_all = jnp.pad(c0_all, ((0, 0), (0, pad_b), (0, pad_h)))

    out_f = out_b = None
    hN_list, cN_list = [], []
    for layer in range(n_layers):
        p = params["lstm"][layer]
        h0 = h0_all[2 * layer: 2 * layer + 2].astype(compute_dtype)    # (2, B_pad, H_pad) bf16
        c0 = c0_all[2 * layer: 2 * layer + 2]                          # (2, B_pad, H_pad) f32

        # Hoisted, direction-fused input projection (one GEMM per layer, bf16 out).
        if layer == 0:
            x2d = emb.reshape(T * B_pad, -1)
            gx = run_proj_bias(x2d, p["wih_fused"], p["bias_fused"],
                               out_dtype=compute_dtype)
        else:
            xf2d = out_f.reshape(T * B_pad, H_pad)
            xb2d = out_b.reshape(T * B_pad, H_pad)
            gx = run_proj2_bias(xf2d, xb2d, p["wih_top"], p["wih_bot"],
                                p["bias_fused"], out_dtype=compute_dtype)
        gx = gx.reshape(T, B_pad, 8 * H_pad)

        # Fused bidirectional recurrence (Tc timesteps per grid step).
        out_f, out_b, hN, cN = run_bilstm_layer(
            gx, p["whh_f_t"], p["whh_b_t"], h0, c0, out_dtype=compute_dtype)
        hN_list.append(hN)
        cN_list.append(cN)
        # TODO(synk): inter-layer LSTM dropout is identity (eval mode).

    # lstm_out[:, -1] == concat(fwd h at t=T-1, bwd h output at original time T-1)
    last_f = out_f[T - 1]                          # (B_pad, H_pad) bf16
    last_b = out_b[T - 1]
    # self.dropout: identity (eval mode)
    fc_out = run_proj2_bias(last_f, last_b, params["fc_w_top_t"],
                            params["fc_w_bot_t"], params["fc_b"],
                            out_dtype=jnp.float32)                     # (B_pad, V)

    h_n = jnp.concatenate(hN_list, axis=0)[:, :B, :H]                  # (2L, B, H)
    c_n = jnp.concatenate(cN_list, axis=0)[:, :B, :H]
    return fc_out[:B], (h_n, c_n)


if __name__ == "__main__":
    # Small deterministic config
    vocab_size = 64
    embedding_dim = 16
    hidden_dim = 32
    n_layers = 2
    batch = 2
    seq = 8

    key = jax.random.PRNGKey(0)
    k_param, k_tok = jax.random.split(key)

    params = init_params(k_param, vocab_size, embedding_dim, hidden_dim, n_layers)
    tokens = jax.random.randint(k_tok, (batch, seq), 0, vocab_size, dtype=jnp.int32)

    # init_hidden(batch_size)
    hidden = (jnp.zeros((n_layers * 2, batch, hidden_dim), jnp.float32),
              jnp.zeros((n_layers * 2, batch, hidden_dim), jnp.float32))

    fwd = jax.jit(functools.partial(lstm_model_forward,
                                    n_layers=n_layers, hidden_dim=hidden_dim))
    fc_out, (h_n, c_n) = fwd(params, tokens, hidden)
    jax.block_until_ready((fc_out, h_n, c_n))

    assert fc_out.shape == (batch, vocab_size)
    assert h_n.shape == (n_layers * 2, batch, hidden_dim)
    assert c_n.shape == (n_layers * 2, batch, hidden_dim)
    assert bool(jnp.all(jnp.isfinite(fc_out)))
    print("KERNEL_OK")
</pallas_src>

<mosaic_0001>
module attributes {stable_mosaic.version = 11 : i64} {
  func.func @proj_bias_kernel(%arg0: i32, %arg1: i32, %arg2: memref<128x16xbf16, #tpu.memory_space<vmem>>, %arg3: memref<16x512xbf16, #tpu.memory_space<vmem>>, %arg4: memref<1x512xf32, #tpu.memory_space<vmem>>, %arg5: memref<128x512xbf16, #tpu.memory_space<vmem>>) attributes {dimension_semantics = [#tpu.dimension_semantics<parallel>, #tpu.dimension_semantics<parallel>], iteration_bounds = array<i64: 1, 2>, scalar_prefetch = 0 : i64, scratch_operands = 0 : i64, tpu.core_type = #tpu.core_type<tc>, window_params = [{transform_indices = @transform_0, window_bounds = array<i64: 128, 16>}, {transform_indices = @transform_1, window_bounds = array<i64: 16, 512>}, {transform_indices = @transform_2, window_bounds = array<i64: 1, 512>}, {transform_indices = @transform_3, window_bounds = array<i64: 128, 512>}]} {
    %c0 = arith.constant 0 : index
    %c0_0 = arith.constant 0 : index
    %0 = vector.load %arg2[%c0, %c0_0] : memref<128x16xbf16, #tpu.memory_space<vmem>>, vector<128x16xbf16>
    %c0_1 = arith.constant 0 : index
    %c0_2 = arith.constant 0 : index
    %1 = vector.load %arg3[%c0_1, %c0_2] : memref<16x512xbf16, #tpu.memory_space<vmem>>, vector<16x512xbf16>
    %cst = arith.constant dense<0.000000e+00> : vector<128x512xf32>
    %2 = tpu.matmul %0, %1, %cst {dimension_numbers = #tpu.dot_dimension_numbers<[1], [0], [0], [1], [0, 0, 1, 1], [], []>} : vector<128x16xbf16>, vector<16x512xbf16>, vector<128x512xf32> -> vector<128x512xf32>
    %c0_3 = arith.constant 0 : index
    %c0_4 = arith.constant 0 : index
    %3 = vector.load %arg4[%c0_3, %c0_4] : memref<1x512xf32, #tpu.memory_space<vmem>>, vector<1x512xf32>
    %4 = vector.broadcast %3 : vector<1x512xf32> to vector<128x512xf32>
    %5 = arith.addf %2, %4 : vector<128x512xf32>
    %6 = arith.truncf %5 : vector<128x512xf32> to vector<128x512xbf16>
    %c0_5 = arith.constant 0 : index
    %c0_6 = arith.constant 0 : index
    %7 = vector.load %arg5[%c0_5, %c0_6] : memref<128x512xbf16, #tpu.memory_space<vmem>>, vector<128x512xbf16>
    tpu.vector_store %arg5[%c0_5, %c0_6], %6 {strides = array<i32>} : memref<128x512xbf16, #tpu.memory_space<vmem>>, vector<128x512xbf16>,
    return
  }
  func.func @transform_0(%arg0: i32, %arg1: i32) -> (i32, i32) {
    %c0_i32 = arith.constant 0 : i32
    %c0_i32_0 = arith.constant 0 : i32
    return %arg0, %c0_i32 : i32, i32
  }
  func.func @transform_1(%arg0: i32, %arg1: i32) -> (i32, i32) {
    %c0_i32 = arith.constant 0 : i32
    %c0_i32_0 = arith.constant 0 : i32
    return %c0_i32, %arg1 : i32, i32
  }
  func.func @transform_2(%arg0: i32, %arg1: i32) -> (i32, i32) {
    %c0_i32 = arith.constant 0 : i32
    %c0_i32_0 = arith.constant 0 : i32
    return %c0_i32, %arg1 : i32, i32
  }
  func.func @transform_3(%arg0: i32, %arg1: i32) -> (i32, i32) {
    %c0_i32 = arith.constant 0 : i32
    return %arg0, %arg1 : i32, i32
  }
}

module attributes {stable_mosaic.version = 11 : i64} {
  func.func @bilstm_kernel(%arg0: i32, %arg1: memref<8x16x512xbf16, #tpu.memory_space<vmem>>, %arg2: memref<8x16x512xbf16, #tpu.memory_space<vmem>>, %arg3: memref<128x512xbf16, #tpu.memory_space<any>>, %arg4: memref<128x512xbf16, #tpu.memory_space<any>>, %arg5: memref<2x16x128xbf16, #tpu.memory_space<any>>, %arg6: memref<2x16x128xf32, #tpu.memory_space<any>>, %arg7: memref<8x16x128xbf16, #tpu.memory_space<vmem>>, %arg8: memref<8x16x128xbf16, #tpu.memory_space<vmem>>, %arg9: memref<2x16x128xf32, #tpu.memory_space<vmem>>, %arg10: memref<2x16x128xf32, #tpu.memory_space<vmem>>, %arg11: memref<128x512xbf16, #tpu.memory_space<vmem>>, %arg12: memref<128x512xbf16, #tpu.memory_space<vmem>>, %arg13: memref<16x128xbf16, #tpu.memory_space<vmem>>, %arg14: memref<16x128xf32, #tpu.memory_space<vmem>>, %arg15: memref<16x128xbf16, #tpu.memory_space<vmem>>, %arg16: memref<16x128xf32, #tpu.memory_space<vmem>>, %arg17: memref<6x!tpu.dma_semaphore, #tpu.memory_space<semaphore_mem>>) attributes {dimension_semantics = [#tpu.dimension_semantics<arbitrary>], iteration_bounds = array<i64: 1>, scalar_prefetch = 0 : i64, scratch_operands = 7 : i64, tpu.core_type = #tpu.core_type<tc>, window_params = [{transform_indices = @transform_0, window_bounds = array<i64: 8, 16, 512>}, {transform_indices = @transform_1, window_bounds = array<i64: 8, 16, 512>}, {}, {}, {}, {}, {transform_indices = @transform_6, window_bounds = array<i64: 8, 16, 128>}, {transform_indices = @transform_7, window_bounds = array<i64: 8, 16, 128>}, {pipeline_mode = #tpu.pipeline_mode<synchronous>, transform_indices = @transform_8, window_bounds = array<i64: 2, 16, 128>}, {pipeline_mode = #tpu.pipeline_mode<synchronous>, transform_indices = @transform_9, window_bounds = array<i64: 2, 16, 128>}]} {
    %c0_i32 = arith.constant 0 : i32
    %0 = arith.cmpi eq, %arg0, %c0_i32 : i32
    %1 = arith.extui %0 : i1 to i32
    %c0_i32_0 = arith.constant 0 : i32
    %2 = arith.cmpi ne, %1, %c0_i32_0 : i32
    scf.if %2 {
      %c0_i32_202 = arith.constant 0 : i32
      %574 = tpu.memref_slice %arg17[%c0_i32_202] : memref<6x!tpu.dma_semaphore, #tpu.memory_space<semaphore_mem>> -> memref<1x!tpu.dma_semaphore, #tpu.memory_space<semaphore_mem>>
      %575 = tpu.memref_squeeze %574 : memref<1x!tpu.dma_semaphore, #tpu.memory_space<semaphore_mem>> -> memref<!tpu.dma_semaphore, #tpu.memory_space<semaphore_mem>>
      tpu.enqueue_dma source(%arg3 : memref<128x512xbf16, #tpu.memory_space<any>>) target(%arg11 : memref<128x512xbf16, #tpu.memory_space<vmem>>) target_semaphore(%575 : memref<!tpu.dma_semaphore, #tpu.memory_space<semaphore_mem>>)
      %c1_i32 = arith.constant 1 : i32
      %576 = tpu.memref_slice %arg17[%c1_i32] : memref<6x!tpu.dma_semaphore, #tpu.memory_space<semaphore_mem>> -> memref<1x!tpu.dma_semaphore, #tpu.memory_space<semaphore_mem>>
      %577 = tpu.memref_squeeze %576 : memref<1x!tpu.dma_semaphore, #tpu.memory_space<semaphore_mem>> -> memref<!tpu.dma_semaphore, #tpu.memory_space<semaphore_mem>>
      tpu.enqueue_dma source(%arg4 : memref<128x512xbf16, #tpu.memory_space<any>>) target(%arg12 : memref<128x512xbf16, #tpu.memory_space<vmem>>) target_semaphore(%577 : memref<!tpu.dma_semaphore, #tpu.memory_space<semaphore_mem>>)
      %c0_i32_203 = arith.constant 0 : i32
      %c2_i32 = arith.constant 2 : i32
      %c0_i32_204 = arith.constant 0 : i32
      %c0_i32_205 = arith.constant 0 : i32
      %578 = tpu.memref_slice %arg5[%c0_i32_203, %c0_i32_204, %c0_i32_205] : memref<2x16x128xbf16, #tpu.memory_space<any>> -> memref<1x16x128xbf16, #tpu.memory_space<any>>
      %579 = tpu.memref_squeeze %578 : memref<1x16x128xbf16, #tpu.memory_space<any>> -> memref<16x128xbf16, #tpu.memory_space<any>>
      %580 = tpu.memref_slice %arg17[%c2_i32] : memref<6x!tpu.dma_semaphore, #tpu.memory_space<semaphore_mem>> -> memref<1x!tpu.dma_semaphore, #tpu.memory_space<semaphore_mem>>
      %581 = tpu.memref_squeeze %580 : memref<1x!tpu.dma_semaphore, #tpu.memory_space<semaphore_mem>> -> memref<!tpu.dma_semaphore, #tpu.memory_space<semaphore_mem>>
      tpu.enqueue_dma source(%579 : memref<16x128xbf16, #tpu.memory_space<any>>) target(%arg13 : memref<16x128xbf16, #tpu.memory_space<vmem>>) target_semaphore(%581 : memref<!tpu.dma_semaphore, #tpu.memory_space<semaphore_mem>>)
      %c1_i32_206 = arith.constant 1 : i32
      %c3_i32 = arith.constant 3 : i32
      %c0_i32_207 = arith.constant 0 : i32
      %c0_i32_208 = arith.constant 0 : i32
      %582 = tpu.memref_slice %arg5[%c1_i32_206, %c0_i32_207, %c0_i32_208] : memref<2x16x128xbf16, #tpu.memory_space<any>> -> memref<1x16x128xbf16, #tpu.memory_space<any>>
      %583 = tpu.memref_squeeze %582 : memref<1x16x128xbf16, #tpu.memory_space<any>> -> memref<16x128xbf16, #tpu.memory_space<any>>
      %584 = tpu.memref_slice %arg17[%c3_i32] : memref<6x!tpu.dma_semaphore, #tpu.memory_space<semaphore_mem>> -> memref<1x!tpu.dma_semaphore, #tpu.memory_space<semaphore_mem>>
      %585 = tpu.memref_squeeze %584 : memref<1x!tpu.dma_semaphore, #tpu.memory_space<semaphore_mem>> -> memref<!tpu.dma_semaphore, #tpu.memory_space<semaphore_mem>>
      tpu.enqueue_dma source(%583 : memref<16x128xbf16, #tpu.memory_space<any>>) target(%arg15 : memref<16x128xbf16, #tpu.memory_space<vmem>>) target_semaphore(%585 : memref<!tpu.dma_semaphore, #tpu.memory_space<semaphore_mem>>)
      %c0_i32_209 = arith.constant 0 : i32
      %c4_i32 = arith.constant 4 : i32
      %c0_i32_210 = arith.constant 0 : i32
      %c0_i32_211 = arith.constant 0 : i32
      %586 = tpu.memref_slice %arg6[%c0_i32_209, %c0_i32_210, %c0_i32_211] : memref<2x16x128xf32, #tpu.memory_space<any>> -> memref<1x16x128xf32, #tpu.memory_space<any>>
      %587 = tpu.memref_squeeze %586 : memref<1x16x128xf32, #tpu.memory_space<any>> -> memref<16x128xf32, #tpu.memory_space<any>>
      %588 = tpu.memref_slice %arg17[%c4_i32] : memref<6x!tpu.dma_semaphore, #tpu.memory_space<semaphore_mem>> -> memref<1x!tpu.dma_semaphore, #tpu.memory_space<semaphore_mem>>
      %589 = tpu.memref_squeeze %588 : memref<1x!tpu.dma_semaphore, #tpu.memory_space<semaphore_mem>> -> memref<!tpu.dma_semaphore, #tpu.memory_space<semaphore_mem>>
      tpu.enqueue_dma source(%587 : memref<16x128xf32, #tpu.memory_space<any>>) target(%arg14 : memref<16x128xf32, #tpu.memory_space<vmem>>) target_semaphore(%589 : memref<!tpu.dma_semaphore, #tpu.memory_space<semaphore_mem>>)
      %c1_i32_212 = arith.constant 1 : i32
      %c5_i32 = arith.constant 5 : i32
      %c0_i32_213 = arith.constant 0 : i32
      %c0_i32_214 = arith.constant 0 : i32
      %590 = tpu.memref_slice %arg6[%c1_i32_212, %c0_i32_213, %c0_i32_214] : memref<2x16x128xf32, #tpu.memory_space<any>> -> memref<1x16x128xf32, #tpu.memory_space<any>>
      %591 = tpu.memref_squeeze %590 : memref<1x16x128xf32, #tpu.memory_space<any>> -> memref<16x128xf32, #tpu.memory_space<any>>
      %592 = tpu.memref_slice %arg17[%c5_i32] : memref<6x!tpu.dma_semaphore, #tpu.memory_space<semaphore_mem>> -> memref<1x!tpu.dma_semaphore, #tpu.memory_space<semaphore_mem>>
      %593 = tpu.memref_squeeze %592 : memref<1x!tpu.dma_semaphore, #tpu.memory_space<semaphore_mem>> -> memref<!tpu.dma_semaphore, #tpu.memory_space<semaphore_mem>>
      tpu.enqueue_dma source(%591 : memref<16x128xf32, #tpu.memory_space<any>>) target(%arg16 : memref<16x128xf32, #tpu.memory_space<vmem>>) target_semaphore(%593 : memref<!tpu.dma_semaphore, #tpu.memory_space<semaphore_mem>>)
      %c0_i32_215 = arith.constant 0 : i32
      %594 = tpu.memref_slice %arg17[%c0_i32_215] : memref<6x!tpu.dma_semaphore, #tpu.memory_space<semaphore_mem>> -> memref<1x!tpu.dma_semaphore, #tpu.memory_space<semaphore_mem>>
      %595 = tpu.memref_squeeze %594 : memref<1x!tpu.dma_semaphore, #tpu.memory_space<semaphore_mem>> -> memref<!tpu.dma_semaphore, #tpu.memory_space<semaphore_mem>>
      tpu.wait_dma2 semaphore(%595 : memref<!tpu.dma_semaphore, #tpu.memory_space<semaphore_mem>>) src(%arg3 : memref<128x512xbf16, #tpu.memory_space<any>>) dst(%arg11 : memref<128x512xbf16, #tpu.memory_space<vmem>>)
      %c1_i32_216 = arith.constant 1 : i32
      %596 = tpu.memref_slice %arg17[%c1_i32_216] : memref<6x!tpu.dma_semaphore, #tpu.memory_space<semaphore_mem>> -> memref<1x!tpu.dma_semaphore, #tpu.memory_space<semaphore_mem>>
      %597 = tpu.memref_squeeze %596 : memref<1x!tpu.dma_semaphore, #tpu.memory_space<semaphore_mem>> -> memref<!tpu.dma_semaphore, #tpu.memory_space<semaphore_mem>>
      tpu.wait_dma2 semaphore(%597 : memref<!tpu.dma_semaphore, #tpu.memory_space<semaphore_mem>>) src(%arg4 : memref<128x512xbf16, #tpu.memory_space<any>>) dst(%arg12 : memref<128x512xbf16, #tpu.memory_space<vmem>>)
      %c0_i32_217 = arith.constant 0 : i32
      %c2_i32_218 = arith.constant 2 : i32
      %c0_i32_219 = arith.constant 0 : i32
      %c0_i32_220 = arith.constant 0 : i32
      %598 = tpu.memref_slice %arg5[%c0_i32_217, %c0_i32_219, %c0_i32_220] : memref<2x16x128xbf16, #tpu.memory_space<any>> -> memref<1x16x128xbf16, #tpu.memory_space<any>>
      %599 = tpu.memref_squeeze %598 : memref<1x16x128xbf16, #tpu.memory_space<any>> -> memref<16x128xbf16, #tpu.memory_space<any>>
      %600 = tpu.memref_slice %arg17[%c2_i32_218] : memref<6x!tpu.dma_semaphore, #tpu.memory_space<semaphore_mem>> -> memref<1x!tpu.dma_semaphore, #tpu.memory_space<semaphore_mem>>
      %601 = tpu.memref_squeeze %600 : memref<1x!tpu.dma_semaphore, #tpu.memory_space<semaphore_mem>> -> memref<!tpu.dma_semaphore, #tpu.memory_space<semaphore_mem>>
      tpu.wait_dma2 semaphore(%601 : memref<!tpu.dma_semaphore, #tpu.memory_space<semaphore_mem>>) src(%599 : memref<16x128xbf16, #tpu.memory_space<any>>) dst(%arg13 : memref<16x128xbf16, #tpu.memory_space<vmem>>)
      %c1_i32_221 = arith.constant 1 : i32
      %c3_i32_222 = arith.constant 3 : i32
      %c0_i32_223 = arith.constant 0 : i32
      %c0_i32_224 = arith.constant 0 : i32
      %602 = tpu.memref_slice %arg5[%c1_i32_221, %c0_i32_223, %c0_i32_224] : memref<2x16x128xbf16, #tpu.memory_space<any>> -> memref<1x16x128xbf16, #tpu.memory_space<any>>
      %603 = tpu.memref_squeeze %602 : memref<1x16x128xbf16, #tpu.memory_space<any>> -> memref<16x128xbf16, #tpu.memory_space<any>>
      %604 = tpu.memref_slice %arg17[%c3_i32_222] : memref<6x!tpu.dma_semaphore, #tpu.memory_space<semaphore_mem>> -> memref<1x!tpu.dma_semaphore, #tpu.memory_space<semaphore_mem>>
      %605 = tpu.memref_squeeze %604 : memref<1x!tpu.dma_semaphore, #tpu.memory_space<semaphore_mem>> -> memref<!tpu.dma_semaphore, #tpu.memory_space<semaphore_mem>>
      tpu.wait_dma2 semaphore(%605 : memref<!tpu.dma_semaphore, #tpu.memory_space<semaphore_mem>>) src(%603 : memref<16x128xbf16, #tpu.memory_space<any>>) dst(%arg15 : memref<16x128xbf16, #tpu.memory_space<vmem>>)
      %c0_i32_225 = arith.constant 0 : i32
      %c4_i32_226 = arith.constant 4 : i32
      %c0_i32_227 = arith.constant 0 : i32
      %c0_i32_228 = arith.constant 0 : i32
      %606 = tpu.memref_slice %arg6[%c0_i32_225, %c0_i32_227, %c0_i32_228] : memref<2x16x128xf32, #tpu.memory_space<any>> -> memref<1x16x128xf32, #tpu.memory_space<any>>
      %607 = tpu.memref_squeeze %606 : memref<1x16x128xf32, #tpu.memory_space<any>> -> memref<16x128xf32, #tpu.memory_space<any>>
      %608 = tpu.memref_slice %arg17[%c4_i32_226] : memref<6x!tpu.dma_semaphore, #tpu.memory_space<semaphore_mem>> -> memref<1x!tpu.dma_semaphore, #tpu.memory_space<semaphore_mem>>
      %609 = tpu.memref_squeeze %608 : memref<1x!tpu.dma_semaphore, #tpu.memory_space<semaphore_mem>> -> memref<!tpu.dma_semaphore, #tpu.memory_space<semaphore_mem>>
      tpu.wait_dma2 semaphore(%609 : memref<!tpu.dma_semaphore, #tpu.memory_space<semaphore_mem>>) src(%607 : memref<16x128xf32, #tpu.memory_space<any>>) dst(%arg14 : memref<16x128xf32, #tpu.memory_space<vmem>>)
      %c1_i32_229 = arith.constant 1 : i32
      %c5_i32_230 = arith.constant 5 : i32
      %c0_i32_231 = arith.constant 0 : i32
      %c0_i32_232 = arith.constant 0 : i32
      %610 = tpu.memref_slice %arg6[%c1_i32_229, %c0_i32_231, %c0_i32_232] : memref<2x16x128xf32, #tpu.memory_space<any>> -> memref<1x16x128xf32, #tpu.memory_space<any>>
      %611 = tpu.memref_squeeze %610 : memref<1x16x128xf32, #tpu.memory_space<any>> -> memref<16x128xf32, #tpu.memory_space<any>>
      %612 = tpu.memref_slice %arg17[%c5_i32_230] : memref<6x!tpu.dma_semaphore, #tpu.memory_space<semaphore_mem>> -> memref<1x!tpu.dma_semaphore, #tpu.memory_space<semaphore_mem>>
      %613 = tpu.memref_squeeze %612 : memref<1x!tpu.dma_semaphore, #tpu.memory_space<semaphore_mem>> -> memref<!tpu.dma_semaphore, #tpu.memory_space<semaphore_mem>>
      tpu.wait_dma2 semaphore(%613 : memref<!tpu.dma_semaphore, #tpu.memory_space<semaphore_mem>>) src(%611 : memref<16x128xf32, #tpu.memory_space<any>>) dst(%arg16 : memref<16x128xf32, #tpu.memory_space<vmem>>)
    } else {
    }
    %c0 = arith.constant 0 : index
    %c0_1 = arith.constant 0 : index
    %3 = vector.load %arg13[%c0, %c0_1] : memref<16x128xbf16, #tpu.memory_space<vmem>>, vector<16x128xbf16>
    %c0_2 = arith.constant 0 : index
    %c0_3 = arith.constant 0 : index
    %4 = vector.load %arg14[%c0_2, %c0_3] : memref<16x128xf32, #tpu.memory_space<vmem>>, vector<16x128xf32>
    %c0_4 = arith.constant 0 : index
    %c0_5 = arith.constant 0 : index
    %5 = vector.load %arg15[%c0_4, %c0_5] : memref<16x128xbf16, #tpu.memory_space<vmem>>, vector<16x128xbf16>
    %c0_6 = arith.constant 0 : index
    %c0_7 = arith.constant 0 : index
    %6 = vector.load %arg16[%c0_6, %c0_7] : memref<16x128xf32, #tpu.memory_space<vmem>>, vector<16x128xf32>
    %c0_8 = arith.constant 0 : index
    %c0_9 = arith.constant 0 : index
    %c0_10 = arith.constant 0 : index
    %7 = vector.load %arg1[%c0_8, %c0_9, %c0_10] : memref<8x16x512xbf16, #tpu.memory_space<vmem>>, vector<1x16x512xbf16>
    %8 = vector.shape_cast %7 : vector<1x16x512xbf16> to vector<16x512xbf16>
    %9 = arith.extf %8 : vector<16x512xbf16> to vector<16x512xf32>
    %c0_11 = arith.constant 0 : index
    %c0_12 = arith.constant 0 : index
    %10 = vector.load %arg11[%c0_11, %c0_12] : memref<128x512xbf16, #tpu.memory_space<vmem>>, vector<128x512xbf16>
    %cst = arith.constant dense<0.000000e+00> : vector<16x512xf32>
    %11 = tpu.matmul %3, %10, %cst {dimension_numbers = #tpu.dot_dimension_numbers<[1], [0], [0], [1], [0, 0, 1, 1], [], []>} : vector<16x128xbf16>, vector<128x512xbf16>, vector<16x512xf32> -> vector<16x512xf32>
    %12 = arith.addf %9, %11 : vector<16x512xf32>
    %13 = vector.extract_strided_slice %12 {offsets = [0, 0], sizes = [16, 128], strides = [1, 1]} : vector<16x512xf32> to vector<16x128xf32>
    %14 = arith.negf %13 : vector<16x128xf32>
    %15 = math.exp %14 : vector<16x128xf32>
    %cst_13 = arith.constant 1.000000e+00 : f32
    %16 = vector.broadcast %cst_13 : f32 to vector<16x128xf32>
    %17 = arith.addf %16, %15 : vector<16x128xf32>
    %18 = arith.divf %16, %17 : vector<16x128xf32>
    %19 = vector.extract_strided_slice %12 {offsets = [0, 128], sizes = [16, 128], strides = [1, 1]} : vector<16x512xf32> to vector<16x128xf32>
    %20 = arith.negf %19 : vector<16x128xf32>
    %21 = math.exp %20 : vector<16x128xf32>
    %cst_14 = arith.constant 1.000000e+00 : f32
    %22 = vector.broadcast %cst_14 : f32 to vector<16x128xf32>
    %23 = arith.addf %22, %21 : vector<16x128xf32>
    %24 = arith.divf %22, %23 : vector<16x128xf32>
    %25 = vector.extract_strided_slice %12 {offsets = [0, 256], sizes = [16, 128], strides = [1, 1]} : vector<16x512xf32> to vector<16x128xf32>
    %26 = math.tanh %25 : vector<16x128xf32>
    %27 = vector.extract_strided_slice %12 {offsets = [0, 384], sizes = [16, 128], strides = [1, 1]} : vector<16x512xf32> to vector<16x128xf32>
    %28 = arith.negf %27 : vector<16x128xf32>
    %29 = math.exp %28 : vector<16x128xf32>
    %cst_15 = arith.constant 1.000000e+00 : f32
    %30 = vector.broadcast %cst_15 : f32 to vector<16x128xf32>
    %31 = arith.addf %30, %29 : vector<16x128xf32>
    %32 = arith.divf %30, %31 : vector<16x128xf32>
    %33 = arith.mulf %24, %4 : vector<16x128xf32>
    %34 = arith.mulf %18, %26 : vector<16x128xf32>
    %35 = arith.addf %33, %34 : vector<16x128xf32>
    %36 = math.tanh %35 : vector<16x128xf32>
    %37 = arith.mulf %32, %36 : vector<16x128xf32>
    %38 = arith.truncf %37 : vector<16x128xf32> to vector<16x128xbf16>
    %c0_16 = arith.constant 0 : index
    %c0_17 = arith.constant 0 : index
    %c0_18 = arith.constant 0 : index
    %39 = vector.load %arg7[%c0_16, %c0_17, %c0_18] : memref<8x16x128xbf16, #tpu.memory_space<vmem>>, vector<1x16x128xbf16>
    %40 = vector.shape_cast %39 : vector<1x16x128xbf16> to vector<16x128xbf16>
    %41 = vector.shape_cast %38 : vector<16x128xbf16> to vector<1x16x128xbf16>
    tpu.vector_store %arg7[%c0_16, %c0_17, %c0_18], %41 {strides = array<i32>} : memref<8x16x128xbf16, #tpu.memory_space<vmem>>, vector<1x16x128xbf16>,
    %c7 = arith.constant 7 : index
    %c0_19 = arith.constant 0 : index
    %c0_20 = arith.constant 0 : index
    %42 = vector.load %arg2[%c7, %c0_19, %c0_20] : memref<8x16x512xbf16, #tpu.memory_space<vmem>>, vector<1x16x512xbf16>
    %43 = vector.shape_cast %42 : vector<1x16x512xbf16> to vector<16x512xbf16>
    %44 = arith.extf %43 : vector<16x512xbf16> to vector<16x512xf32>
    %c0_21 = arith.constant 0 : index
    %c0_22 = arith.constant 0 : index
    %45 = vector.load %arg12[%c0_21, %c0_22] : memref<128x512xbf16, #tpu.memory_space<vmem>>, vector<128x512xbf16>
    %cst_23 = arith.constant dense<0.000000e+00> : vector<16x512xf32>
    %46 = tpu.matmul %5, %45, %cst_23 {dimension_numbers = #tpu.dot_dimension_numbers<[1], [0], [0], [1], [0, 0, 1, 1], [], []>} : vector<16x128xbf16>, vector<128x512xbf16>, vector<16x512xf32> -> vector<16x512xf32>
    %47 = arith.addf %44, %46 : vector<16x512xf32>
    %48 = vector.extract_strided_slice %47 {offsets = [0, 0], sizes = [16, 128], strides = [1, 1]} : vector<16x512xf32> to vector<16x128xf32>
    %49 = arith.negf %48 : vector<16x128xf32>
    %50 = math.exp %49 : vector<16x128xf32>
    %cst_24 = arith.constant 1.000000e+00 : f32
    %51 = vector.broadcast %cst_24 : f32 to vector<16x128xf32>
    %52 = arith.addf %51, %50 : vector<16x128xf32>
    %53 = arith.divf %51, %52 : vector<16x128xf32>
    %54 = vector.extract_strided_slice %47 {offsets = [0, 128], sizes = [16, 128], strides = [1, 1]} : vector<16x512xf32> to vector<16x128xf32>
    %55 = arith.negf %54 : vector<16x128xf32>
    %56 = math.exp %55 : vector<16x128xf32>
    %cst_25 = arith.constant 1.000000e+00 : f32
    %57 = vector.broadcast %cst_25 : f32 to vector<16x128xf32>
    %58 = arith.addf %57, %56 : vector<16x128xf32>
    %59 = arith.divf %57, %58 : vector<16x128xf32>
    %60 = vector.extract_strided_slice %47 {offsets = [0, 256], sizes = [16, 128], strides = [1, 1]} : vector<16x512xf32> to vector<16x128xf32>
    %61 = math.tanh %60 : vector<16x128xf32>
    %62 = vector.extract_strided_slice %47 {offsets = [0, 384], sizes = [16, 128], strides = [1, 1]} : vector<16x512xf32> to vector<16x128xf32>
    %63 = arith.negf %62 : vector<16x128xf32>
    %64 = math.exp %63 : vector<16x128xf32>
    %cst_26 = arith.constant 1.000000e+00 : f32
    %65 = vector.broadcast %cst_26 : f32 to vector<16x128xf32>
    %66 = arith.addf %65, %64 : vector<16x128xf32>
    %67 = arith.divf %65, %66 : vector<16x128xf32>
    %68 = arith.mulf %59, %6 : vector<16x128xf32>
    %69 = arith.mulf %53, %61 : vector<16x128xf32>
    %70 = arith.addf %68, %69 : vector<16x128xf32>
    %71 = math.tanh %70 : vector<16x128xf32>
    %72 = arith.mulf %67, %71 : vector<16x128xf32>
    %73 = arith.truncf %72 : vector<16x128xf32> to vector<16x128xbf16>
    %c7_27 = arith.constant 7 : index
    %c0_28 = arith.constant 0 : index
    %c0_29 = arith.constant 0 : index
    %74 = vector.load %arg8[%c7_27, %c0_28, %c0_29] : memref<8x16x128xbf16, #tpu.memory_space<vmem>>, vector<1x16x128xbf16>
    %75 = vector.shape_cast %74 : vector<1x16x128xbf16> to vector<16x128xbf16>
    %76 = vector.shape_cast %73 : vector<16x128xbf16> to vector<1x16x128xbf16>
    tpu.vector_store %arg8[%c7_27, %c0_28, %c0_29], %76 {strides = array<i32>} : memref<8x16x128xbf16, #tpu.memory_space<vmem>>, vector<1x16x128xbf16>,
    %c1 = arith.constant 1 : index
    %c0_30 = arith.constant 0 : index
    %c0_31 = arith.constant 0 : index
    %77 = vector.load %arg1[%c1, %c0_30, %c0_31] : memref<8x16x512xbf16, #tpu.memory_space<vmem>>, vector<1x16x512xbf16>
    %78 = vector.shape_cast %77 : vector<1x16x512xbf16> to vector<16x512xbf16>
    %79 = arith.extf %78 : vector<16x512xbf16> to vector<16x512xf32>
    %c0_32 = arith.constant 0 : index
    %c0_33 = arith.constant 0 : index
    %80 = vector.load %arg11[%c0_32, %c0_33] : memref<128x512xbf16, #tpu.memory_space<vmem>>, vector<128x512xbf16>
    %cst_34 = arith.constant dense<0.000000e+00> : vector<16x512xf32>
    %81 = tpu.matmul %38, %80, %cst_34 {dimension_numbers = #tpu.dot_dimension_numbers<[1], [0], [0], [1], [0, 0, 1, 1], [], []>} : vector<16x128xbf16>, vector<128x512xbf16>, vector<16x512xf32> -> vector<16x512xf32>
    %82 = arith.addf %79, %81 : vector<16x512xf32>
    %83 = vector.extract_strided_slice %82 {offsets = [0, 0], sizes = [16, 128], strides = [1, 1]} : vector<16x512xf32> to vector<16x128xf32>
    %84 = arith.negf %83 : vector<16x128xf32>
    %85 = math.exp %84 : vector<16x128xf32>
    %cst_35 = arith.constant 1.000000e+00 : f32
    %86 = vector.broadcast %cst_35 : f32 to vector<16x128xf32>
    %87 = arith.addf %86, %85 : vector<16x128xf32>
    %88 = arith.divf %86, %87 : vector<16x128xf32>
    %89 = vector.extract_strided_slice %82 {offsets = [0, 128], sizes = [16, 128], strides = [1, 1]} : vector<16x512xf32> to vector<16x128xf32>
    %90 = arith.negf %89 : vector<16x128xf32>
    %91 = math.exp %90 : vector<16x128xf32>
    %cst_36 = arith.constant 1.000000e+00 : f32
    %92 = vector.broadcast %cst_36 : f32 to vector<16x128xf32>
    %93 = arith.addf %92, %91 : vector<16x128xf32>
    %94 = arith.divf %92, %93 : vector<16x128xf32>
    %95 = vector.extract_strided_slice %82 {offsets = [0, 256], sizes = [16, 128], strides = [1, 1]} : vector<16x512xf32> to vector<16x128xf32>
    %96 = math.tanh %95 : vector<16x128xf32>
    %97 = vector.extract_strided_slice %82 {offsets = [0, 384], sizes = [16, 128], strides = [1, 1]} : vector<16x512xf32> to vector<16x128xf32>
    %98 = arith.negf %97 : vector<16x128xf32>
    %99 = math.exp %98 : vector<16x128xf32>
    %cst_37 = arith.constant 1.000000e+00 : f32
    %100 = vector.broadcast %cst_37 : f32 to vector<16x128xf32>
    %101 = arith.addf %100, %99 : vector<16x128xf32>
    %102 = arith.divf %100, %101 : vector<16x128xf32>
    %103 = arith.mulf %94, %35 : vector<16x128xf32>
    %104 = arith.mulf %88, %96 : vector<16x128xf32>
    %105 = arith.addf %103, %104 : vector<16x128xf32>
    %106 = math.tanh %105 : vector<16x128xf32>
    %107 = arith.mulf %102, %106 : vector<16x128xf32>
    %108 = arith.truncf %107 : vector<16x128xf32> to vector<16x128xbf16>
    %c1_38 = arith.constant 1 : index
    %c0_39 = arith.constant 0 : index
    %c0_40 = arith.constant 0 : index
    %109 = vector.load %arg7[%c1_38, %c0_39, %c0_40] : memref<8x16x128xbf16, #tpu.memory_space<vmem>>, vector<1x16x128xbf16>
    %110 = vector.shape_cast %109 : vector<1x16x128xbf16> to vector<16x128xbf16>
    %111 = vector.shape_cast %108 : vector<16x128xbf16> to vector<1x16x128xbf16>
    tpu.vector_store %arg7[%c1_38, %c0_39, %c0_40], %111 {strides = array<i32>} : memref<8x16x128xbf16, #tpu.memory_space<vmem>>, vector<1x16x128xbf16>,
    %c6 = arith.constant 6 : index
    %c0_41 = arith.constant 0 : index
    %c0_42 = arith.constant 0 : index
    %112 = vector.load %arg2[%c6, %c0_41, %c0_42] : memref<8x16x512xbf16, #tpu.memory_space<vmem>>, vector<1x16x512xbf16>
    %113 = vector.shape_cast %112 : vector<1x16x512xbf16> to vector<16x512xbf16>
    %114 = arith.extf %113 : vector<16x512xbf16> to vector<16x512xf32>
    %c0_43 = arith.constant 0 : index
    %c0_44 = arith.constant 0 : index
    %115 = vector.load %arg12[%c0_43, %c0_44] : memref<128x512xbf16, #tpu.memory_space<vmem>>, vector<128x512xbf16>
    %cst_45 = arith.constant dense<0.000000e+00> : vector<16x512xf32>
    %116 = tpu.matmul %73, %115, %cst_45 {dimension_numbers = #tpu.dot_dimension_numbers<[1], [0], [0], [1], [0, 0, 1, 1], [], []>} : vector<16x128xbf16>, vector<128x512xbf16>, vector<16x512xf32> -> vector<16x512xf32>
    %117 = arith.addf %114, %116 : vector<16x512xf32>
    %118 = vector.extract_strided_slice %117 {offsets = [0, 0], sizes = [16, 128], strides = [1, 1]} : vector<16x512xf32> to vector<16x128xf32>
    %119 = arith.negf %118 : vector<16x128xf32>
    %120 = math.exp %119 : vector<16x128xf32>
    %cst_46 = arith.constant 1.000000e+00 : f32
    %121 = vector.broadcast %cst_46 : f32 to vector<16x128xf32>
    %122 = arith.addf %121, %120 : vector<16x128xf32>
    %123 = arith.divf %121, %122 : vector<16x128xf32>
    %124 = vector.extract_strided_slice %117 {offsets = [0, 128], sizes = [16, 128], strides = [1, 1]} : vector<16x512xf32> to vector<16x128xf32>
    %125 = arith.negf %124 : vector<16x128xf32>
    %126 = math.exp %125 : vector<16x128xf32>
    %cst_47 = arith.constant 1.000000e+00 : f32
    %127 = vector.broadcast %cst_47 : f32 to vector<16x128xf32>
    %128 = arith.addf %127, %126 : vector<16x128xf32>
    %129 = arith.divf %127, %128 : vector<16x128xf32>
    %130 = vector.extract_strided_slice %117 {offsets = [0, 256], sizes = [16, 128], strides = [1, 1]} : vector<16x512xf32> to vector<16x128xf32>
    %131 = math.tanh %130 : vector<16x128xf32>
    %132 = vector.extract_strided_slice %117 {offsets = [0, 384], sizes = [16, 128], strides = [1, 1]} : vector<16x512xf32> to vector<16x128xf32>
    %133 = arith.negf %132 : vector<16x128xf32>
    %134 = math.exp %133 : vector<16x128xf32>
    %cst_48 = arith.constant 1.000000e+00 : f32
    %135 = vector.broadcast %cst_48 : f32 to vector<16x128xf32>
    %136 = arith.addf %135, %134 : vector<16x128xf32>
    %137 = arith.divf %135, %136 : vector<16x128xf32>
    %138 = arith.mulf %129, %70 : vector<16x128xf32>
    %139 = arith.mulf %123, %131 : vector<16x128xf32>
    %140 = arith.addf %138, %139 : vector<16x128xf32>
    %141 = math.tanh %140 : vector<16x128xf32>
    %142 = arith.mulf %137, %141 : vector<16x128xf32>
    %143 = arith.truncf %142 : vector<16x128xf32> to vector<16x128xbf16>
    %c6_49 = arith.constant 6 : index
    %c0_50 = arith.constant 0 : index
    %c0_51 = arith.constant 0 : index
    %144 = vector.load %arg8[%c6_49, %c0_50, %c0_51] : memref<8x16x128xbf16, #tpu.memory_space<vmem>>, vector<1x16x128xbf16>
    %145 = vector.shape_cast %144 : vector<1x16x128xbf16> to vector<16x128xbf16>
    %146 = vector.shape_cast %143 : vector<16x128xbf16> to vector<1x16x128xbf16>
    tpu.vector_store %arg8[%c6_49, %c0_50, %c0_51], %146 {strides = array<i32>} : memref<8x16x128xbf16, #tpu.memory_space<vmem>>, vector<1x16x128xbf16>,
    %c2 = arith.constant 2 : index
    %c0_52 = arith.constant 0 : index
    %c0_53 = arith.constant 0 : index
    %147 = vector.load %arg1[%c2, %c0_52, %c0_53] : memref<8x16x512xbf16, #tpu.memory_space<vmem>>, vector<1x16x512xbf16>
    %148 = vector.shape_cast %147 : vector<1x16x512xbf16> to vector<16x512xbf16>
    %149 = arith.extf %148 : vector<16x512xbf16> to vector<16x512xf32>
    %c0_54 = arith.constant 0 : index
    %c0_55 = arith.constant 0 : index
    %150 = vector.load %arg11[%c0_54, %c0_55] : memref<128x512xbf16, #tpu.memory_space<vmem>>, vector<128x512xbf16>
    %cst_56 = arith.constant dense<0.000000e+00> : vector<16x512xf32>
    %151 = tpu.matmul %108, %150, %cst_56 {dimension_numbers = #tpu.dot_dimension_numbers<[1], [0], [0], [1], [0, 0, 1, 1], [], []>} : vector<16x128xbf16>, vector<128x512xbf16>, vector<16x512xf32> -> vector<16x512xf32>
    %152 = arith.addf %149, %151 : vector<16x512xf32>
    %153 = vector.extract_strided_slice %152 {offsets = [0, 0], sizes = [16, 128], strides = [1, 1]} : vector<16x512xf32> to vector<16x128xf32>
    %154 = arith.negf %153 : vector<16x128xf32>
    %155 = math.exp %154 : vector<16x128xf32>
    %cst_57 = arith.constant 1.000000e+00 : f32
    %156 = vector.broadcast %cst_57 : f32 to vector<16x128xf32>
    %157 = arith.addf %156, %155 : vector<16x128xf32>
    %158 = arith.divf %156, %157 : vector<16x128xf32>
    %159 = vector.extract_strided_slice %152 {offsets = [0, 128], sizes = [16, 128], strides = [1, 1]} : vector<16x512xf32> to vector<16x128xf32>
    %160 = arith.negf %159 : vector<16x128xf32>
    %161 = math.exp %160 : vector<16x128xf32>
    %cst_58 = arith.constant 1.000000e+00 : f32
    %162 = vector.broadcast %cst_58 : f32 to vector<16x128xf32>
    %163 = arith.addf %162, %161 : vector<16x128xf32>
    %164 = arith.divf %162, %163 : vector<16x128xf32>
    %165 = vector.extract_strided_slice %152 {offsets = [0, 256], sizes = [16, 128], strides = [1, 1]} : vector<16x512xf32> to vector<16x128xf32>
    %166 = math.tanh %165 : vector<16x128xf32>
    %167 = vector.extract_strided_slice %152 {offsets = [0, 384], sizes = [16, 128], strides = [1, 1]} : vector<16x512xf32> to vector<16x128xf32>
    %168 = arith.negf %167 : vector<16x128xf32>
    %169 = math.exp %168 : vector<16x128xf32>
    %cst_59 = arith.constant 1.000000e+00 : f32
    %170 = vector.broadcast %cst_59 : f32 to vector<16x128xf32>
    %171 = arith.addf %170, %169 : vector<16x128xf32>
    %172 = arith.divf %170, %171 : vector<16x128xf32>
    %173 = arith.mulf %164, %105 : vector<16x128xf32>
    %174 = arith.mulf %158, %166 : vector<16x128xf32>
    %175 = arith.addf %173, %174 : vector<16x128xf32>
    %176 = math.tanh %175 : vector<16x128xf32>
    %177 = arith.mulf %172, %176 : vector<16x128xf32>
    %178 = arith.truncf %177 : vector<16x128xf32> to vector<16x128xbf16>
    %c2_60 = arith.constant 2 : index
    %c0_61 = arith.constant 0 : index
    %c0_62 = arith.constant 0 : index
    %179 = vector.load %arg7[%c2_60, %c0_61, %c0_62] : memref<8x16x128xbf16, #tpu.memory_space<vmem>>, vector<1x16x128xbf16>
    %180 = vector.shape_cast %179 : vector<1x16x128xbf16> to vector<16x128xbf16>
    %181 = vector.shape_cast %178 : vector<16x128xbf16> to vector<1x16x128xbf16>
    tpu.vector_store %arg7[%c2_60, %c0_61, %c0_62], %181 {strides = array<i32>} : memref<8x16x128xbf16, #tpu.memory_space<vmem>>, vector<1x16x128xbf16>,
    %c5 = arith.constant 5 : index
    %c0_63 = arith.constant 0 : index
    %c0_64 = arith.constant 0 : index
    %182 = vector.load %arg2[%c5, %c0_63, %c0_64] : memref<8x16x512xbf16, #tpu.memory_space<vmem>>, vector<1x16x512xbf16>
    %183 = vector.shape_cast %182 : vector<1x16x512xbf16> to vector<16x512xbf16>
    %184 = arith.extf %183 : vector<16x512xbf16> to vector<16x512xf32>
    %c0_65 = arith.constant 0 : index
    %c0_66 = arith.constant 0 : index
    %185 = vector.load %arg12[%c0_65, %c0_66] : memref<128x512xbf16, #tpu.memory_space<vmem>>, vector<128x512xbf16>
    %cst_67 = arith.constant dense<0.000000e+00> : vector<16x512xf32>
    %186 = tpu.matmul %143, %185, %cst_67 {dimension_numbers = #tpu.dot_dimension_numbers<[1], [0], [0], [1], [0, 0, 1, 1], [], []>} : vector<16x128xbf16>, vector<128x512xbf16>, vector<16x512xf32> -> vector<16x512xf32>
    %187 = arith.addf %184, %186 : vector<16x512xf32>
    %188 = vector.extract_strided_slice %187 {offsets = [0, 0], sizes = [16, 128], strides = [1, 1]} : vector<16x512xf32> to vector<16x128xf32>
    %189 = arith.negf %188 : vector<16x128xf32>
    %190 = math.exp %189 : vector<16x128xf32>
    %cst_68 = arith.constant 1.000000e+00 : f32
    %191 = vector.broadcast %cst_68 : f32 to vector<16x128xf32>
    %192 = arith.addf %191, %190 : vector<16x128xf32>
    %193 = arith.divf %191, %192 : vector<16x128xf32>
    %194 = vector.extract_strided_slice %187 {offsets = [0, 128], sizes = [16, 128], strides = [1, 1]} : vector<16x512xf32> to vector<16x128xf32>
    %195 = arith.negf %194 : vector<16x128xf32>
    %196 = math.exp %195 : vector<16x128xf32>
    %cst_69 = arith.constant 1.000000e+00 : f32
    %197 = vector.broadcast %cst_69 : f32 to vector<16x128xf32>
    %198 = arith.addf %197, %196 : vector<16x128xf32>
    %199 = arith.divf %197, %198 : vector<16x128xf32>
    %200 = vector.extract_strided_slice %187 {offsets = [0, 256], sizes = [16, 128], strides = [1, 1]} : vector<16x512xf32> to vector<16x128xf32>
    %201 = math.tanh %200 : vector<16x128xf32>
    %202 = vector.extract_strided_slice %187 {offsets = [0, 384], sizes = [16, 128], strides = [1, 1]} : vector<16x512xf32> to vector<16x128xf32>
    %203 = arith.negf %202 : vector<16x128xf32>
    %204 = math.exp %203 : vector<16x128xf32>
    %cst_70 = arith.constant 1.000000e+00 : f32
    %205 = vector.broadcast %cst_70 : f32 to vector<16x128xf32>
    %206 = arith.addf %205, %204 : vector<16x128xf32>
    %207 = arith.divf %205, %206 : vector<16x128xf32>
    %208 = arith.mulf %199, %140 : vector<16x128xf32>
    %209 = arith.mulf %193, %201 : vector<16x128xf32>
    %210 = arith.addf %208, %209 : vector<16x128xf32>
    %211 = math.tanh %210 : vector<16x128xf32>
    %212 = arith.mulf %207, %211 : vector<16x128xf32>
    %213 = arith.truncf %212 : vector<16x128xf32> to vector<16x128xbf16>
    %c5_71 = arith.constant 5 : index
    %c0_72 = arith.constant 0 : index
    %c0_73 = arith.constant 0 : index
    %214 = vector.load %arg8[%c5_71, %c0_72, %c0_73] : memref<8x16x128xbf16, #tpu.memory_space<vmem>>, vector<1x16x128xbf16>
    %215 = vector.shape_cast %214 : vector<1x16x128xbf16> to vector<16x128xbf16>
    %216 = vector.shape_cast %213 : vector<16x128xbf16> to vector<1x16x128xbf16>
    tpu.vector_store %arg8[%c5_71, %c0_72, %c0_73], %216 {strides = array<i32>} : memref<8x16x128xbf16, #tpu.memory_space<vmem>>, vector<1x16x128xbf16>,
    %c3 = arith.constant 3 : index
    %c0_74 = arith.constant 0 : index
    %c0_75 = arith.constant 0 : index
    %217 = vector.load %arg1[%c3, %c0_74, %c0_75] : memref<8x16x512xbf16, #tpu.memory_space<vmem>>, vector<1x16x512xbf16>
    %218 = vector.shape_cast %217 : vector<1x16x512xbf16> to vector<16x512xbf16>
    %219 = arith.extf %218 : vector<16x512xbf16> to vector<16x512xf32>
    %c0_76 = arith.constant 0 : index
    %c0_77 = arith.constant 0 : index
    %220 = vector.load %arg11[%c0_76, %c0_77] : memref<128x512xbf16, #tpu.memory_space<vmem>>, vector<128x512xbf16>
    %cst_78 = arith.constant dense<0.000000e+00> : vector<16x512xf32>
    %221 = tpu.matmul %178, %220, %cst_78 {dimension_numbers = #tpu.dot_dimension_numbers<[1], [0], [0], [1], [0, 0, 1, 1], [], []>} : vector<16x128xbf16>, vector<128x512xbf16>, vector<16x512xf32> -> vector<16x512xf32>
    %222 = arith.addf %219, %221 : vector<16x512xf32>
    %223 = vector.extract_strided_slice %222 {offsets = [0, 0], sizes = [16, 128], strides = [1, 1]} : vector<16x512xf32> to vector<16x128xf32>
    %224 = arith.negf %223 : vector<16x128xf32>
    %225 = math.exp %224 : vector<16x128xf32>
    %cst_79 = arith.constant 1.000000e+00 : f32
    %226 = vector.broadcast %cst_79 : f32 to vector<16x128xf32>
    %227 = arith.addf %226, %225 : vector<16x128xf32>
    %228 = arith.divf %226, %227 : vector<16x128xf32>
    %229 = vector.extract_strided_slice %222 {offsets = [0, 128], sizes = [16, 128], strides = [1, 1]} : vector<16x512xf32> to vector<16x128xf32>
    %230 = arith.negf %229 : vector<16x128xf32>
    %231 = math.exp %230 : vector<16x128xf32>
    %cst_80 = arith.constant 1.000000e+00 : f32
    %232 = vector.broadcast %cst_80 : f32 to vector<16x128xf32>
    %233 = arith.addf %232, %231 : vector<16x128xf32>
    %234 = arith.divf %232, %233 : vector<16x128xf32>
    %235 = vector.extract_strided_slice %222 {offsets = [0, 256], sizes = [16, 128], strides = [1, 1]} : vector<16x512xf32> to vector<16x128xf32>
    %236 = math.tanh %235 : vector<16x128xf32>
    %237 = vector.extract_strided_slice %222 {offsets = [0, 384], sizes = [16, 128], strides = [1, 1]} : vector<16x512xf32> to vector<16x128xf32>
    %238 = arith.negf %237 : vector<16x128xf32>
    %239 = math.exp %238 : vector<16x128xf32>
    %cst_81 = arith.constant 1.000000e+00 : f32
    %240 = vector.broadcast %cst_81 : f32 to vector<16x128xf32>
    %241 = arith.addf %240, %239 : vector<16x128xf32>
    %242 = arith.divf %240, %241 : vector<16x128xf32>
    %243 = arith.mulf %234, %175 : vector<16x128xf32>
    %244 = arith.mulf %228, %236 : vector<16x128xf32>
    %245 = arith.addf %243, %244 : vector<16x128xf32>
    %246 = math.tanh %245 : vector<16x128xf32>
    %247 = arith.mulf %242, %246 : vector<16x128xf32>
    %248 = arith.truncf %247 : vector<16x128xf32> to vector<16x128xbf16>
    %c3_82 = arith.constant 3 : index
    %c0_83 = arith.constant 0 : index
    %c0_84 = arith.constant 0 : index
    %249 = vector.load %arg7[%c3_82, %c0_83, %c0_84] : memref<8x16x128xbf16, #tpu.memory_space<vmem>>, vector<1x16x128xbf16>
    %250 = vector.shape_cast %249 : vector<1x16x128xbf16> to vector<16x128xbf16>
    %251 = vector.shape_cast %248 : vector<16x128xbf16> to vector<1x16x128xbf16>
    tpu.vector_store %arg7[%c3_82, %c0_83, %c0_84], %251 {strides = array<i32>} : memref<8x16x128xbf16, #tpu.memory_space<vmem>>, vector<1x16x128xbf16>,
    %c4 = arith.constant 4 : index
    %c0_85 = arith.constant 0 : index
    %c0_86 = arith.constant 0 : index
    %252 = vector.load %arg2[%c4, %c0_85, %c0_86] : memref<8x16x512xbf16, #tpu.memory_space<vmem>>, vector<1x16x512xbf16>
    %253 = vector.shape_cast %252 : vector<1x16x512xbf16> to vector<16x512xbf16>
    %254 = arith.extf %253 : vector<16x512xbf16> to vector<16x512xf32>
    %c0_87 = arith.constant 0 : index
    %c0_88 = arith.constant 0 : index
    %255 = vector.load %arg12[%c0_87, %c0_88] : memref<128x512xbf16, #tpu.memory_space<vmem>>, vector<128x512xbf16>
    %cst_89 = arith.constant dense<0.000000e+00> : vector<16x512xf32>
    %256 = tpu.matmul %213, %255, %cst_89 {dimension_numbers = #tpu.dot_dimension_numbers<[1], [0], [0], [1], [0, 0, 1, 1], [], []>} : vector<16x128xbf16>, vector<128x512xbf16>, vector<16x512xf32> -> vector<16x512xf32>
    %257 = arith.addf %254, %256 : vector<16x512xf32>
    %258 = vector.extract_strided_slice %257 {offsets = [0, 0], sizes = [16, 128], strides = [1, 1]} : vector<16x512xf32> to vector<16x128xf32>
    %259 = arith.negf %258 : vector<16x128xf32>
    %260 = math.exp %259 : vector<16x128xf32>
    %cst_90 = arith.constant 1.000000e+00 : f32
    %261 = vector.broadcast %cst_90 : f32 to vector<16x128xf32>
    %262 = arith.addf %261, %260 : vector<16x128xf32>
    %263 = arith.divf %261, %262 : vector<16x128xf32>
    %264 = vector.extract_strided_slice %257 {offsets = [0, 128], sizes = [16, 128], strides = [1, 1]} : vector<16x512xf32> to vector<16x128xf32>
    %265 = arith.negf %264 : vector<16x128xf32>
    %266 = math.exp %265 : vector<16x128xf32>
    %cst_91 = arith.constant 1.000000e+00 : f32
    %267 = vector.broadcast %cst_91 : f32 to vector<16x128xf32>
    %268 = arith.addf %267, %266 : vector<16x128xf32>
    %269 = arith.divf %267, %268 : vector<16x128xf32>
    %270 = vector.extract_strided_slice %257 {offsets = [0, 256], sizes = [16, 128], strides = [1, 1]} : vector<16x512xf32> to vector<16x128xf32>
    %271 = math.tanh %270 : vector<16x128xf32>
    %272 = vector.extract_strided_slice %257 {offsets = [0, 384], sizes = [16, 128], strides = [1, 1]} : vector<16x512xf32> to vector<16x128xf32>
    %273 = arith.negf %272 : vector<16x128xf32>
    %274 = math.exp %273 : vector<16x128xf32>
    %cst_92 = arith.constant 1.000000e+00 : f32
    %275 = vector.broadcast %cst_92 : f32 to vector<16x128xf32>
    %276 = arith.addf %275, %274 : vector<16x128xf32>
    %277 = arith.divf %275, %276 : vector<16x128xf32>
    %278 = arith.mulf %269, %210 : vector<16x128xf32>
    %279 = arith.mulf %263, %271 : vector<16x128xf32>
    %280 = arith.addf %278, %279 : vector<16x128xf32>
    %281 = math.tanh %280 : vector<16x128xf32>
    %282 = arith.mulf %277, %281 : vector<16x128xf32>
    %283 = arith.truncf %282 : vector<16x128xf32> to vector<16x128xbf16>
    %c4_93 = arith.constant 4 : index
    %c0_94 = arith.constant 0 : index
    %c0_95 = arith.constant 0 : index
    %284 = vector.load %arg8[%c4_93, %c0_94, %c0_95] : memref<8x16x128xbf16, #tpu.memory_space<vmem>>, vector<1x16x128xbf16>
    %285 = vector.shape_cast %284 : vector<1x16x128xbf16> to vector<16x128xbf16>
    %286 = vector.shape_cast %283 : vector<16x128xbf16> to vector<1x16x128xbf16>
    tpu.vector_store %arg8[%c4_93, %c0_94, %c0_95], %286 {strides = array<i32>} : memref<8x16x128xbf16, #tpu.memory_space<vmem>>, vector<1x16x128xbf16>,
    %c4_96 = arith.constant 4 : index
    %c0_97 = arith.constant 0 : index
    %c0_98 = arith.constant 0 : index
    %287 = vector.load %arg1[%c4_96, %c0_97, %c0_98] : memref<8x16x512xbf16, #tpu.memory_space<vmem>>, vector<1x16x512xbf16>
    %288 = vector.shape_cast %287 : vector<1x16x512xbf16> to vector<16x512xbf16>
    %289 = arith.extf %288 : vector<16x512xbf16> to vector<16x512xf32>
    %c0_99 = arith.constant 0 : index
    %c0_100 = arith.constant 0 : index
    %290 = vector.load %arg11[%c0_99, %c0_100] : memref<128x512xbf16, #tpu.memory_space<vmem>>, vector<128x512xbf16>
    %cst_101 = arith.constant dense<0.000000e+00> : vector<16x512xf32>
    %291 = tpu.matmul %248, %290, %cst_101 {dimension_numbers = #tpu.dot_dimension_numbers<[1], [0], [0], [1], [0, 0, 1, 1], [], []>} : vector<16x128xbf16>, vector<128x512xbf16>, vector<16x512xf32> -> vector<16x512xf32>
    %292 = arith.addf %289, %291 : vector<16x512xf32>
    %293 = vector.extract_strided_slice %292 {offsets = [0, 0], sizes = [16, 128], strides = [1, 1]} : vector<16x512xf32> to vector<16x128xf32>
    %294 = arith.negf %293 : vector<16x128xf32>
    %295 = math.exp %294 : vector<16x128xf32>
    %cst_102 = arith.constant 1.000000e+00 : f32
    %296 = vector.broadcast %cst_102 : f32 to vector<16x128xf32>
    %297 = arith.addf %296, %295 : vector<16x128xf32>
    %298 = arith.divf %296, %297 : vector<16x128xf32>
    %299 = vector.extract_strided_slice %292 {offsets = [0, 128], sizes = [16, 128], strides = [1, 1]} : vector<16x512xf32> to vector<16x128xf32>
    %300 = arith.negf %299 : vector<16x128xf32>
    %301 = math.exp %300 : vector<16x128xf32>
    %cst_103 = arith.constant 1.000000e+00 : f32
    %302 = vector.broadcast %cst_103 : f32 to vector<16x128xf32>
    %303 = arith.addf %302, %301 : vector<16x128xf32>
    %304 = arith.divf %302, %303 : vector<16x128xf32>
    %305 = vector.extract_strided_slice %292 {offsets = [0, 256], sizes = [16, 128], strides = [1, 1]} : vector<16x512xf32> to vector<16x128xf32>
    %306 = math.tanh %305 : vector<16x128xf32>
    %307 = vector.extract_strided_slice %292 {offsets = [0, 384], sizes = [16, 128], strides = [1, 1]} : vector<16x512xf32> to vector<16x128xf32>
    %308 = arith.negf %307 : vector<16x128xf32>
    %309 = math.exp %308 : vector<16x128xf32>
    %cst_104 = arith.constant 1.000000e+00 : f32
    %310 = vector.broadcast %cst_104 : f32 to vector<16x128xf32>
    %311 = arith.addf %310, %309 : vector<16x128xf32>
    %312 = arith.divf %310, %311 : vector<16x128xf32>
    %313 = arith.mulf %304, %245 : vector<16x128xf32>
    %314 = arith.mulf %298, %306 : vector<16x128xf32>
    %315 = arith.addf %313, %314 : vector<16x128xf32>
    %316 = math.tanh %315 : vector<16x128xf32>
    %317 = arith.mulf %312, %316 : vector<16x128xf32>
    %318 = arith.truncf %317 : vector<16x128xf32> to vector<16x128xbf16>
    %c4_105 = arith.constant 4 : index
    %c0_106 = arith.constant 0 : index
    %c0_107 = arith.constant 0 : index
    %319 = vector.load %arg7[%c4_105, %c0_106, %c0_107] : memref<8x16x128xbf16, #tpu.memory_space<vmem>>, vector<1x16x128xbf16>
    %320 = vector.shape_cast %319 : vector<1x16x128xbf16> to vector<16x128xbf16>
    %321 = vector.shape_cast %318 : vector<16x128xbf16> to vector<1x16x128xbf16>
    tpu.vector_store %arg7[%c4_105, %c0_106, %c0_107], %321 {strides = array<i32>} : memref<8x16x128xbf16, #tpu.memory_space<vmem>>, vector<1x16x128xbf16>,
    %c3_108 = arith.constant 3 : index
    %c0_109 = arith.constant 0 : index
    %c0_110 = arith.constant 0 : index
    %322 = vector.load %arg2[%c3_108, %c0_109, %c0_110] : memref<8x16x512xbf16, #tpu.memory_space<vmem>>, vector<1x16x512xbf16>
    %323 = vector.shape_cast %322 : vector<1x16x512xbf16> to vector<16x512xbf16>
    %324 = arith.extf %323 : vector<16x512xbf16> to vector<16x512xf32>
    %c0_111 = arith.constant 0 : index
    %c0_112 = arith.constant 0 : index
    %325 = vector.load %arg12[%c0_111, %c0_112] : memref<128x512xbf16, #tpu.memory_space<vmem>>, vector<128x512xbf16>
    %cst_113 = arith.constant dense<0.000000e+00> : vector<16x512xf32>
    %326 = tpu.matmul %283, %325, %cst_113 {dimension_numbers = #tpu.dot_dimension_numbers<[1], [0], [0], [1], [0, 0, 1, 1], [], []>} : vector<16x128xbf16>, vector<128x512xbf16>, vector<16x512xf32> -> vector<16x512xf32>
    %327 = arith.addf %324, %326 : vector<16x512xf32>
    %328 = vector.extract_strided_slice %327 {offsets = [0, 0], sizes = [16, 128], strides = [1, 1]} : vector<16x512xf32> to vector<16x128xf32>
    %329 = arith.negf %328 : vector<16x128xf32>
    %330 = math.exp %329 : vector<16x128xf32>
    %cst_114 = arith.constant 1.000000e+00 : f32
    %331 = vector.broadcast %cst_114 : f32 to vector<16x128xf32>
    %332 = arith.addf %331, %330 : vector<16x128xf32>
    %333 = arith.divf %331, %332 : vector<16x128xf32>
    %334 = vector.extract_strided_slice %327 {offsets = [0, 128], sizes = [16, 128], strides = [1, 1]} : vector<16x512xf32> to vector<16x128xf32>
    %335 = arith.negf %334 : vector<16x128xf32>
    %336 = math.exp %335 : vector<16x128xf32>
    %cst_115 = arith.constant 1.000000e+00 : f32
    %337 = vector.broadcast %cst_115 : f32 to vector<16x128xf32>
    %338 = arith.addf %337, %336 : vector<16x128xf32>
    %339 = arith.divf %337, %338 : vector<16x128xf32>
    %340 = vector.extract_strided_slice %327 {offsets = [0, 256], sizes = [16, 128], strides = [1, 1]} : vector<16x512xf32> to vector<16x128xf32>
    %341 = math.tanh %340 : vector<16x128xf32>
    %342 = vector.extract_strided_slice %327 {offsets = [0, 384], sizes = [16, 128], strides = [1, 1]} : vector<16x512xf32> to vector<16x128xf32>
    %343 = arith.negf %342 : vector<16x128xf32>
    %344 = math.exp %343 : vector<16x128xf32>
    %cst_116 = arith.constant 1.000000e+00 : f32
    %345 = vector.broadcast %cst_116 : f32 to vector<16x128xf32>
    %346 = arith.addf %345, %344 : vector<16x128xf32>
    %347 = arith.divf %345, %346 : vector<16x128xf32>
    %348 = arith.mulf %339, %280 : vector<16x128xf32>
    %349 = arith.mulf %333, %341 : vector<16x128xf32>
    %350 = arith.addf %348, %349 : vector<16x128xf32>
    %351 = math.tanh %350 : vector<16x128xf32>
    %352 = arith.mulf %347, %351 : vector<16x128xf32>
    %353 = arith.truncf %352 : vector<16x128xf32> to vector<16x128xbf16>
    %c3_117 = arith.constant 3 : index
    %c0_118 = arith.constant 0 : index
    %c0_119 = arith.constant 0 : index
    %354 = vector.load %arg8[%c3_117, %c0_118, %c0_119] : memref<8x16x128xbf16, #tpu.memory_space<vmem>>, vector<1x16x128xbf16>
    %355 = vector.shape_cast %354 : vector<1x16x128xbf16> to vector<16x128xbf16>
    %356 = vector.shape_cast %353 : vector<16x128xbf16> to vector<1x16x128xbf16>
    tpu.vector_store %arg8[%c3_117, %c0_118, %c0_119], %356 {strides = array<i32>} : memref<8x16x128xbf16, #tpu.memory_space<vmem>>, vector<1x16x128xbf16>,
    %c5_120 = arith.constant 5 : index
    %c0_121 = arith.constant 0 : index
    %c0_122 = arith.constant 0 : index
    %357 = vector.load %arg1[%c5_120, %c0_121, %c0_122] : memref<8x16x512xbf16, #tpu.memory_space<vmem>>, vector<1x16x512xbf16>
    %358 = vector.shape_cast %357 : vector<1x16x512xbf16> to vector<16x512xbf16>
    %359 = arith.extf %358 : vector<16x512xbf16> to vector<16x512xf32>
    %c0_123 = arith.constant 0 : index
    %c0_124 = arith.constant 0 : index
    %360 = vector.load %arg11[%c0_123, %c0_124] : memref<128x512xbf16, #tpu.memory_space<vmem>>, vector<128x512xbf16>
    %cst_125 = arith.constant dense<0.000000e+00> : vector<16x512xf32>
    %361 = tpu.matmul %318, %360, %cst_125 {dimension_numbers = #tpu.dot_dimension_numbers<[1], [0], [0], [1], [0, 0, 1, 1], [], []>} : vector<16x128xbf16>, vector<128x512xbf16>, vector<16x512xf32> -> vector<16x512xf32>
    %362 = arith.addf %359, %361 : vector<16x512xf32>
    %363 = vector.extract_strided_slice %362 {offsets = [0, 0], sizes = [16, 128], strides = [1, 1]} : vector<16x512xf32> to vector<16x128xf32>
    %364 = arith.negf %363 : vector<16x128xf32>
    %365 = math.exp %364 : vector<16x128xf32>
    %cst_126 = arith.constant 1.000000e+00 : f32
    %366 = vector.broadcast %cst_126 : f32 to vector<16x128xf32>
    %367 = arith.addf %366, %365 : vector<16x128xf32>
    %368 = arith.divf %366, %367 : vector<16x128xf32>
    %369 = vector.extract_strided_slice %362 {offsets = [0, 128], sizes = [16, 128], strides = [1, 1]} : vector<16x512xf32> to vector<16x128xf32>
    %370 = arith.negf %369 : vector<16x128xf32>
    %371 = math.exp %370 : vector<16x128xf32>
    %cst_127 = arith.constant 1.000000e+00 : f32
    %372 = vector.broadcast %cst_127 : f32 to vector<16x128xf32>
    %373 = arith.addf %372, %371 : vector<16x128xf32>
    %374 = arith.divf %372, %373 : vector<16x128xf32>
    %375 = vector.extract_strided_slice %362 {offsets = [0, 256], sizes = [16, 128], strides = [1, 1]} : vector<16x512xf32> to vector<16x128xf32>
    %376 = math.tanh %375 : vector<16x128xf32>
    %377 = vector.extract_strided_slice %362 {offsets = [0, 384], sizes = [16, 128], strides = [1, 1]} : vector<16x512xf32> to vector<16x128xf32>
    %378 = arith.negf %377 : vector<16x128xf32>
    %379 = math.exp %378 : vector<16x128xf32>
    %cst_128 = arith.constant 1.000000e+00 : f32
    %380 = vector.broadcast %cst_128 : f32 to vector<16x128xf32>
    %381 = arith.addf %380, %379 : vector<16x128xf32>
    %382 = arith.divf %380, %381 : vector<16x128xf32>
    %383 = arith.mulf %374, %315 : vector<16x128xf32>
    %384 = arith.mulf %368, %376 : vector<16x128xf32>
    %385 = arith.addf %383, %384 : vector<16x128xf32>
    %386 = math.tanh %385 : vector<16x128xf32>
    %387 = arith.mulf %382, %386 : vector<16x128xf32>
    %388 = arith.truncf %387 : vector<16x128xf32> to vector<16x128xbf16>
    %c5_129 = arith.constant 5 : index
    %c0_130 = arith.constant 0 : index
    %c0_131 = arith.constant 0 : index
    %389 = vector.load %arg7[%c5_129, %c0_130, %c0_131] : memref<8x16x128xbf16, #tpu.memory_space<vmem>>, vector<1x16x128xbf16>
    %390 = vector.shape_cast %389 : vector<1x16x128xbf16> to vector<16x128xbf16>
    %391 = vector.shape_cast %388 : vector<16x128xbf16> to vector<1x16x128xbf16>
    tpu.vector_store %arg7[%c5_129, %c0_130, %c0_131], %391 {strides = array<i32>} : memref<8x16x128xbf16, #tpu.memory_space<vmem>>, vector<1x16x128xbf16>,
    %c2_132 = arith.constant 2 : index
    %c0_133 = arith.constant 0 : index
    %c0_134 = arith.constant 0 : index
    %392 = vector.load %arg2[%c2_132, %c0_133, %c0_134] : memref<8x16x512xbf16, #tpu.memory_space<vmem>>, vector<1x16x512xbf16>
    %393 = vector.shape_cast %392 : vector<1x16x512xbf16> to vector<16x512xbf16>
    %394 = arith.extf %393 : vector<16x512xbf16> to vector<16x512xf32>
    %c0_135 = arith.constant 0 : index
    %c0_136 = arith.constant 0 : index
    %395 = vector.load %arg12[%c0_135, %c0_136] : memref<128x512xbf16, #tpu.memory_space<vmem>>, vector<128x512xbf16>
    %cst_137 = arith.constant dense<0.000000e+00> : vector<16x512xf32>
    %396 = tpu.matmul %353, %395, %cst_137 {dimension_numbers = #tpu.dot_dimension_numbers<[1], [0], [0], [1], [0, 0, 1, 1], [], []>} : vector<16x128xbf16>, vector<128x512xbf16>, vector<16x512xf32> -> vector<16x512xf32>
    %397 = arith.addf %394, %396 : vector<16x512xf32>
    %398 = vector.extract_strided_slice %397 {offsets = [0, 0], sizes = [16, 128], strides = [1, 1]} : vector<16x512xf32> to vector<16x128xf32>
    %399 = arith.negf %398 : vector<16x128xf32>
    %400 = math.exp %399 : vector<16x128xf32>
    %cst_138 = arith.constant 1.000000e+00 : f32
    %401 = vector.broadcast %cst_138 : f32 to vector<16x128xf32>
    %402 = arith.addf %401, %400 : vector<16x128xf32>
    %403 = arith.divf %401, %402 : vector<16x128xf32>
    %404 = vector.extract_strided_slice %397 {offsets = [0, 128], sizes = [16, 128], strides = [1, 1]} : vector<16x512xf32> to vector<16x128xf32>
    %405 = arith.negf %404 : vector<16x128xf32>
    %406 = math.exp %405 : vector<16x128xf32>
    %cst_139 = arith.constant 1.000000e+00 : f32
    %407 = vector.broadcast %cst_139 : f32 to vector<16x128xf32>
    %408 = arith.addf %407, %406 : vector<16x128xf32>
    %409 = arith.divf %407, %408 : vector<16x128xf32>
    %410 = vector.extract_strided_slice %397 {offsets = [0, 256], sizes = [16, 128], strides = [1, 1]} : vector<16x512xf32> to vector<16x128xf32>
    %411 = math.tanh %410 : vector<16x128xf32>
    %412 = vector.extract_strided_slice %397 {offsets = [0, 384], sizes = [16, 128], strides = [1, 1]} : vector<16x512xf32> to vector<16x128xf32>
    %413 = arith.negf %412 : vector<16x128xf32>
    %414 = math.exp %413 : vector<16x128xf32>
    %cst_140 = arith.constant 1.000000e+00 : f32
    %415 = vector.broadcast %cst_140 : f32 to vector<16x128xf32>
    %416 = arith.addf %415, %414 : vector<16x128xf32>
    %417 = arith.divf %415, %416 : vector<16x128xf32>
    %418 = arith.mulf %409, %350 : vector<16x128xf32>
    %419 = arith.mulf %403, %411 : vector<16x128xf32>
    %420 = arith.addf %418, %419 : vector<16x128xf32>
    %421 = math.tanh %420 : vector<16x128xf32>
    %422 = arith.mulf %417, %421 : vector<16x128xf32>
    %423 = arith.truncf %422 : vector<16x128xf32> to vector<16x128xbf16>
    %c2_141 = arith.constant 2 : index
    %c0_142 = arith.constant 0 : index
    %c0_143 = arith.constant 0 : index
    %424 = vector.load %arg8[%c2_141, %c0_142, %c0_143] : memref<8x16x128xbf16, #tpu.memory_space<vmem>>, vector<1x16x128xbf16>
    %425 = vector.shape_cast %424 : vector<1x16x128xbf16> to vector<16x128xbf16>
    %426 = vector.shape_cast %423 : vector<16x128xbf16> to vector<1x16x128xbf16>
    tpu.vector_store %arg8[%c2_141, %c0_142, %c0_143], %426 {strides = array<i32>} : memref<8x16x128xbf16, #tpu.memory_space<vmem>>, vector<1x16x128xbf16>,
    %c6_144 = arith.constant 6 : index
    %c0_145 = arith.constant 0 : index
    %c0_146 = arith.constant 0 : index
    %427 = vector.load %arg1[%c6_144, %c0_145, %c0_146] : memref<8x16x512xbf16, #tpu.memory_space<vmem>>, vector<1x16x512xbf16>
    %428 = vector.shape_cast %427 : vector<1x16x512xbf16> to vector<16x512xbf16>
    %429 = arith.extf %428 : vector<16x512xbf16> to vector<16x512xf32>
    %c0_147 = arith.constant 0 : index
    %c0_148 = arith.constant 0 : index
    %430 = vector.load %arg11[%c0_147, %c0_148] : memref<128x512xbf16, #tpu.memory_space<vmem>>, vector<128x512xbf16>
    %cst_149 = arith.constant dense<0.000000e+00> : vector<16x512xf32>
    %431 = tpu.matmul %388, %430, %cst_149 {dimension_numbers = #tpu.dot_dimension_numbers<[1], [0], [0], [1], [0, 0, 1, 1], [], []>} : vector<16x128xbf16>, vector<128x512xbf16>, vector<16x512xf32> -> vector<16x512xf32>
    %432 = arith.addf %429, %431 : vector<16x512xf32>
    %433 = vector.extract_strided_slice %432 {offsets = [0, 0], sizes = [16, 128], strides = [1, 1]} : vector<16x512xf32> to vector<16x128xf32>
    %434 = arith.negf %433 : vector<16x128xf32>
    %435 = math.exp %434 : vector<16x128xf32>
    %cst_150 = arith.constant 1.000000e+00 : f32
    %436 = vector.broadcast %cst_150 : f32 to vector<16x128xf32>
    %437 = arith.addf %436, %435 : vector<16x128xf32>
    %438 = arith.divf %436, %437 : vector<16x128xf32>
    %439 = vector.extract_strided_slice %432 {offsets = [0, 128], sizes = [16, 128], strides = [1, 1]} : vector<16x512xf32> to vector<16x128xf32>
    %440 = arith.negf %439 : vector<16x128xf32>
    %441 = math.exp %440 : vector<16x128xf32>
    %cst_151 = arith.constant 1.000000e+00 : f32
    %442 = vector.broadcast %cst_151 : f32 to vector<16x128xf32>
    %443 = arith.addf %442, %441 : vector<16x128xf32>
    %444 = arith.divf %442, %443 : vector<16x128xf32>
    %445 = vector.extract_strided_slice %432 {offsets = [0, 256], sizes = [16, 128], strides = [1, 1]} : vector<16x512xf32> to vector<16x128xf32>
    %446 = math.tanh %445 : vector<16x128xf32>
    %447 = vector.extract_strided_slice %432 {offsets = [0, 384], sizes = [16, 128], strides = [1, 1]} : vector<16x512xf32> to vector<16x128xf32>
    %448 = arith.negf %447 : vector<16x128xf32>
    %449 = math.exp %448 : vector<16x128xf32>
    %cst_152 = arith.constant 1.000000e+00 : f32
    %450 = vector.broadcast %cst_152 : f32 to vector<16x128xf32>
    %451 = arith.addf %450, %449 : vector<16x128xf32>
    %452 = arith.divf %450, %451 : vector<16x128xf32>
    %453 = arith.mulf %444, %385 : vector<16x128xf32>
    %454 = arith.mulf %438, %446 : vector<16x128xf32>
    %455 = arith.addf %453, %454 : vector<16x128xf32>
    %456 = math.tanh %455 : vector<16x128xf32>
    %457 = arith.mulf %452, %456 : vector<16x128xf32>
    %458 = arith.truncf %457 : vector<16x128xf32> to vector<16x128xbf16>
    %c6_153 = arith.constant 6 : index
    %c0_154 = arith.constant 0 : index
    %c0_155 = arith.constant 0 : index
    %459 = vector.load %arg7[%c6_153, %c0_154, %c0_155] : memref<8x16x128xbf16, #tpu.memory_space<vmem>>, vector<1x16x128xbf16>
    %460 = vector.shape_cast %459 : vector<1x16x128xbf16> to vector<16x128xbf16>
    %461 = vector.shape_cast %458 : vector<16x128xbf16> to vector<1x16x128xbf16>
    tpu.vector_store %arg7[%c6_153, %c0_154, %c0_155], %461 {strides = array<i32>} : memref<8x16x128xbf16, #tpu.memory_space<vmem>>, vector<1x16x128xbf16>,
    %c1_156 = arith.constant 1 : index
    %c0_157 = arith.constant 0 : index
    %c0_158 = arith.constant 0 : index
    %462 = vector.load %arg2[%c1_156, %c0_157, %c0_158] : memref<8x16x512xbf16, #tpu.memory_space<vmem>>, vector<1x16x512xbf16>
    %463 = vector.shape_cast %462 : vector<1x16x512xbf16> to vector<16x512xbf16>
    %464 = arith.extf %463 : vector<16x512xbf16> to vector<16x512xf32>
    %c0_159 = arith.constant 0 : index
    %c0_160 = arith.constant 0 : index
    %465 = vector.load %arg12[%c0_159, %c0_160] : memref<128x512xbf16, #tpu.memory_space<vmem>>, vector<128x512xbf16>
    %cst_161 = arith.constant dense<0.000000e+00> : vector<16x512xf32>
    %466 = tpu.matmul %423, %465, %cst_161 {dimension_numbers = #tpu.dot_dimension_numbers<[1], [0], [0], [1], [0, 0, 1, 1], [], []>} : vector<16x128xbf16>, vector<128x512xbf16>, vector<16x512xf32> -> vector<16x512xf32>
    %467 = arith.addf %464, %466 : vector<16x512xf32>
    %468 = vector.extract_strided_slice %467 {offsets = [0, 0], sizes = [16, 128], strides = [1, 1]} : vector<16x512xf32> to vector<16x128xf32>
    %469 = arith.negf %468 : vector<16x128xf32>
    %470 = math.exp %469 : vector<16x128xf32>
    %cst_162 = arith.constant 1.000000e+00 : f32
    %471 = vector.broadcast %cst_162 : f32 to vector<16x128xf32>
    %472 = arith.addf %471, %470 : vector<16x128xf32>
    %473 = arith.divf %471, %472 : vector<16x128xf32>
    %474 = vector.extract_strided_slice %467 {offsets = [0, 128], sizes = [16, 128], strides = [1, 1]} : vector<16x512xf32> to vector<16x128xf32>
    %475 = arith.negf %474 : vector<16x128xf32>
    %476 = math.exp %475 : vector<16x128xf32>
    %cst_163 = arith.constant 1.000000e+00 : f32
    %477 = vector.broadcast %cst_163 : f32 to vector<16x128xf32>
    %478 = arith.addf %477, %476 : vector<16x128xf32>
    %479 = arith.divf %477, %478 : vector<16x128xf32>
    %480 = vector.extract_strided_slice %467 {offsets = [0, 256], sizes = [16, 128], strides = [1, 1]} : vector<16x512xf32> to vector<16x128xf32>
    %481 = math.tanh %480 : vector<16x128xf32>
    %482 = vector.extract_strided_slice %467 {offsets = [0, 384], sizes = [16, 128], strides = [1, 1]} : vector<16x512xf32> to vector<16x128xf32>
    %483 = arith.negf %482 : vector<16x128xf32>
    %484 = math.exp %483 : vector<16x128xf32>
    %cst_164 = arith.constant 1.000000e+00 : f32
    %485 = vector.broadcast %cst_164 : f32 to vector<16x128xf32>
    %486 = arith.addf %485, %484 : vector<16x128xf32>
    %487 = arith.divf %485, %486 : vector<16x128xf32>
    %488 = arith.mulf %479, %420 : vector<16x128xf32>
    %489 = arith.mulf %473, %481 : vector<16x128xf32>
    %490 = arith.addf %488, %489 : vector<16x128xf32>
    %491 = math.tanh %490 : vector<16x128xf32>
    %492 = arith.mulf %487, %491 : vector<16x128xf32>
    %493 = arith.truncf %492 : vector<16x128xf32> to vector<16x128xbf16>
    %c1_165 = arith.constant 1 : index
    %c0_166 = arith.constant 0 : index
    %c0_167 = arith.constant 0 : index
    %494 = vector.load %arg8[%c1_165, %c0_166, %c0_167] : memref<8x16x128xbf16, #tpu.memory_space<vmem>>, vector<1x16x128xbf16>
    %495 = vector.shape_cast %494 : vector<1x16x128xbf16> to vector<16x128xbf16>
    %496 = vector.shape_cast %493 : vector<16x128xbf16> to vector<1x16x128xbf16>
    tpu.vector_store %arg8[%c1_165, %c0_166, %c0_167], %496 {strides = array<i32>} : memref<8x16x128xbf16, #tpu.memory_space<vmem>>, vector<1x16x128xbf16>,
    %c7_168 = arith.constant 7 : index
    %c0_169 = arith.constant 0 : index
    %c0_170 = arith.constant 0 : index
    %497 = vector.load %arg1[%c7_168, %c0_169, %c0_170] : memref<8x16x512xbf16, #tpu.memory_space<vmem>>, vector<1x16x512xbf16>
    %498 = vector.shape_cast %497 : vector<1x16x512xbf16> to vector<16x512xbf16>
    %499 = arith.extf %498 : vector<16x512xbf16> to vector<16x512xf32>
    %c0_171 = arith.constant 0 : index
    %c0_172 = arith.constant 0 : index
    %500 = vector.load %arg11[%c0_171, %c0_172] : memref<128x512xbf16, #tpu.memory_space<vmem>>, vector<128x512xbf16>
    %cst_173 = arith.constant dense<0.000000e+00> : vector<16x512xf32>
    %501 = tpu.matmul %458, %500, %cst_173 {dimension_numbers = #tpu.dot_dimension_numbers<[1], [0], [0], [1], [0, 0, 1, 1], [], []>} : vector<16x128xbf16>, vector<128x512xbf16>, vector<16x512xf32> -> vector<16x512xf32>
    %502 = arith.addf %499, %501 : vector<16x512xf32>
    %503 = vector.extract_strided_slice %502 {offsets = [0, 0], sizes = [16, 128], strides = [1, 1]} : vector<16x512xf32> to vector<16x128xf32>
    %504 = arith.negf %503 : vector<16x128xf32>
    %505 = math.exp %504 : vector<16x128xf32>
    %cst_174 = arith.constant 1.000000e+00 : f32
    %506 = vector.broadcast %cst_174 : f32 to vector<16x128xf32>
    %507 = arith.addf %506, %505 : vector<16x128xf32>
    %508 = arith.divf %506, %507 : vector<16x128xf32>
    %509 = vector.extract_strided_slice %502 {offsets = [0, 128], sizes = [16, 128], strides = [1, 1]} : vector<16x512xf32> to vector<16x128xf32>
    %510 = arith.negf %509 : vector<16x128xf32>
    %511 = math.exp %510 : vector<16x128xf32>
    %cst_175 = arith.constant 1.000000e+00 : f32
    %512 = vector.broadcast %cst_175 : f32 to vector<16x128xf32>
    %513 = arith.addf %512, %511 : vector<16x128xf32>
    %514 = arith.divf %512, %513 : vector<16x128xf32>
    %515 = vector.extract_strided_slice %502 {offsets = [0, 256], sizes = [16, 128], strides = [1, 1]} : vector<16x512xf32> to vector<16x128xf32>
    %516 = math.tanh %515 : vector<16x128xf32>
    %517 = vector.extract_strided_slice %502 {offsets = [0, 384], sizes = [16, 128], strides = [1, 1]} : vector<16x512xf32> to vector<16x128xf32>
    %518 = arith.negf %517 : vector<16x128xf32>
    %519 = math.exp %518 : vector<16x128xf32>
    %cst_176 = arith.constant 1.000000e+00 : f32
    %520 = vector.broadcast %cst_176 : f32 to vector<16x128xf32>
    %521 = arith.addf %520, %519 : vector<16x128xf32>
    %522 = arith.divf %520, %521 : vector<16x128xf32>
    %523 = arith.mulf %514, %455 : vector<16x128xf32>
    %524 = arith.mulf %508, %516 : vector<16x128xf32>
    %525 = arith.addf %523, %524 : vector<16x128xf32>
    %526 = math.tanh %525 : vector<16x128xf32>
    %527 = arith.mulf %522, %526 : vector<16x128xf32>
    %528 = arith.truncf %527 : vector<16x128xf32> to vector<16x128xbf16>
    %c7_177 = arith.constant 7 : index
    %c0_178 = arith.constant 0 : index
    %c0_179 = arith.constant 0 : index
    %529 = vector.load %arg7[%c7_177, %c0_178, %c0_179] : memref<8x16x128xbf16, #tpu.memory_space<vmem>>, vector<1x16x128xbf16>
    %530 = vector.shape_cast %529 : vector<1x16x128xbf16> to vector<16x128xbf16>
    %531 = vector.shape_cast %528 : vector<16x128xbf16> to vector<1x16x128xbf16>
    tpu.vector_store %arg7[%c7_177, %c0_178, %c0_179], %531 {strides = array<i32>} : memref<8x16x128xbf16, #tpu.memory_space<vmem>>, vector<1x16x128xbf16>,
    %c0_180 = arith.constant 0 : index
    %c0_181 = arith.constant 0 : index
    %c0_182 = arith.constant 0 : index
    %532 = vector.load %arg2[%c0_180, %c0_181, %c0_182] : memref<8x16x512xbf16, #tpu.memory_space<vmem>>, vector<1x16x512xbf16>
    %533 = vector.shape_cast %532 : vector<1x16x512xbf16> to vector<16x512xbf16>
    %534 = arith.extf %533 : vector<16x512xbf16> to vector<16x512xf32>
    %c0_183 = arith.constant 0 : index
    %c0_184 = arith.constant 0 : index
    %535 = vector.load %arg12[%c0_183, %c0_184] : memref<128x512xbf16, #tpu.memory_space<vmem>>, vector<128x512xbf16>
    %cst_185 = arith.constant dense<0.000000e+00> : vector<16x512xf32>
    %536 = tpu.matmul %493, %535, %cst_185 {dimension_numbers = #tpu.dot_dimension_numbers<[1], [0], [0], [1], [0, 0, 1, 1], [], []>} : vector<16x128xbf16>, vector<128x512xbf16>, vector<16x512xf32> -> vector<16x512xf32>
    %537 = arith.addf %534, %536 : vector<16x512xf32>
    %538 = vector.extract_strided_slice %537 {offsets = [0, 0], sizes = [16, 128], strides = [1, 1]} : vector<16x512xf32> to vector<16x128xf32>
    %539 = arith.negf %538 : vector<16x128xf32>
    %540 = math.exp %539 : vector<16x128xf32>
    %cst_186 = arith.constant 1.000000e+00 : f32
    %541 = vector.broadcast %cst_186 : f32 to vector<16x128xf32>
    %542 = arith.addf %541, %540 : vector<16x128xf32>
    %543 = arith.divf %541, %542 : vector<16x128xf32>
    %544 = vector.extract_strided_slice %537 {offsets = [0, 128], sizes = [16, 128], strides = [1, 1]} : vector<16x512xf32> to vector<16x128xf32>
    %545 = arith.negf %544 : vector<16x128xf32>
    %546 = math.exp %545 : vector<16x128xf32>
    %cst_187 = arith.constant 1.000000e+00 : f32
    %547 = vector.broadcast %cst_187 : f32 to vector<16x128xf32>
    %548 = arith.addf %547, %546 : vector<16x128xf32>
    %549 = arith.divf %547, %548 : vector<16x128xf32>
    %550 = vector.extract_strided_slice %537 {offsets = [0, 256], sizes = [16, 128], strides = [1, 1]} : vector<16x512xf32> to vector<16x128xf32>
    %551 = math.tanh %550 : vector<16x128xf32>
    %552 = vector.extract_strided_slice %537 {offsets = [0, 384], sizes = [16, 128], strides = [1, 1]} : vector<16x512xf32> to vector<16x128xf32>
    %553 = arith.negf %552 : vector<16x128xf32>
    %554 = math.exp %553 : vector<16x128xf32>
    %cst_188 = arith.constant 1.000000e+00 : f32
    %555 = vector.broadcast %cst_188 : f32 to vector<16x128xf32>
    %556 = arith.addf %555, %554 : vector<16x128xf32>
    %557 = arith.divf %555, %556 : vector<16x128xf32>
    %558 = arith.mulf %549, %490 : vector<16x128xf32>
    %559 = arith.mulf %543, %551 : vector<16x128xf32>
    %560 = arith.addf %558, %559 : vector<16x128xf32>
    %561 = math.tanh %560 : vector<16x128xf32>
    %562 = arith.mulf %557, %561 : vector<16x128xf32>
    %563 = arith.truncf %562 : vector<16x128xf32> to vector<16x128xbf16>
    %c0_189 = arith.constant 0 : index
    %c0_190 = arith.constant 0 : index
    %c0_191 = arith.constant 0 : index
    %564 = vector.load %arg8[%c0_189, %c0_190, %c0_191] : memref<8x16x128xbf16, #tpu.memory_space<vmem>>, vector<1x16x128xbf16>
    %565 = vector.shape_cast %564 : vector<1x16x128xbf16> to vector<16x128xbf16>
    %566 = vector.shape_cast %563 : vector<16x128xbf16> to vector<1x16x128xbf16>
    tpu.vector_store %arg8[%c0_189, %c0_190, %c0_191], %566 {strides = array<i32>} : memref<8x16x128xbf16, #tpu.memory_space<vmem>>, vector<1x16x128xbf16>,
    %c0_192 = arith.constant 0 : index
    %c0_193 = arith.constant 0 : index
    %567 = vector.load %arg13[%c0_192, %c0_193] : memref<16x128xbf16, #tpu.memory_space<vmem>>, vector<16x128xbf16>
    tpu.vector_store %arg13[%c0_192, %c0_193], %528 {strides = array<i32>} : memref<16x128xbf16, #tpu.memory_space<vmem>>, vector<16x128xbf16>,
    %c0_194 = arith.constant 0 : index
    %c0_195 = arith.constant 0 : index
    %568 = vector.load %arg14[%c0_194, %c0_195] : memref<16x128xf32, #tpu.memory_space<vmem>>, vector<16x128xf32>
    tpu.vector_store %arg14[%c0_194, %c0_195], %525 {strides = array<i32>} : memref<16x128xf32, #tpu.memory_space<vmem>>, vector<16x128xf32>,
    %c0_196 = arith.constant 0 : index
    %c0_197 = arith.constant 0 : index
    %569 = vector.load %arg15[%c0_196, %c0_197] : memref<16x128xbf16, #tpu.memory_space<vmem>>, vector<16x128xbf16>
    tpu.vector_store %arg15[%c0_196, %c0_197], %563 {strides = array<i32>} : memref<16x128xbf16, #tpu.memory_space<vmem>>, vector<16x128xbf16>,
    %c0_198 = arith.constant 0 : index
    %c0_199 = arith.constant 0 : index
    %570 = vector.load %arg16[%c0_198, %c0_199] : memref<16x128xf32, #tpu.memory_space<vmem>>, vector<16x128xf32>
    tpu.vector_store %arg16[%c0_198, %c0_199], %560 {strides = array<i32>} : memref<16x128xf32, #tpu.memory_space<vmem>>, vector<16x128xf32>,
    %c0_i32_200 = arith.constant 0 : i32
    %571 = arith.cmpi eq, %arg0, %c0_i32_200 : i32
    %572 = arith.extui %571 : i1 to i32
    %c0_i32_201 = arith.constant 0 : i32
    %573 = arith.cmpi ne, %572, %c0_i32_201 : i32
    scf.if %573 {
      %574 = arith.extf %528 : vector<16x128xbf16> to vector<16x128xf32>
      %c0_202 = arith.constant 0 : index
      %c0_203 = arith.constant 0 : index
      %c0_204 = arith.constant 0 : index
      %575 = vector.load %arg9[%c0_202, %c0_203, %c0_204] : memref<2x16x128xf32, #tpu.memory_space<vmem>>, vector<1x16x128xf32>
      %576 = vector.shape_cast %575 : vector<1x16x128xf32> to vector<16x128xf32>
      %577 = vector.shape_cast %574 : vector<16x128xf32> to vector<1x16x128xf32>
      tpu.vector_store %arg9[%c0_202, %c0_203, %c0_204], %577 {strides = array<i32>} : memref<2x16x128xf32, #tpu.memory_space<vmem>>, vector<1x16x128xf32>,
      %c0_205 = arith.constant 0 : index
      %c0_206 = arith.constant 0 : index
      %c0_207 = arith.constant 0 : index
      %578 = vector.load %arg10[%c0_205, %c0_206, %c0_207] : memref<2x16x128xf32, #tpu.memory_space<vmem>>, vector<1x16x128xf32>
      %579 = vector.shape_cast %578 : vector<1x16x128xf32> to vector<16x128xf32>
      %580 = vector.shape_cast %525 : vector<16x128xf32> to vector<1x16x128xf32>
      tpu.vector_store %arg10[%c0_205, %c0_206, %c0_207], %580 {strides = array<i32>} : memref<2x16x128xf32, #tpu.memory_space<vmem>>, vector<1x16x128xf32>,
      %581 = arith.extf %563 : vector<16x128xbf16> to vector<16x128xf32>
      %c1_208 = arith.constant 1 : index
      %c0_209 = arith.constant 0 : index
      %c0_210 = arith.constant 0 : index
      %582 = vector.load %arg9[%c1_208, %c0_209, %c0_210] : memref<2x16x128xf32, #tpu.memory_space<vmem>>, vector<1x16x128xf32>
      %583 = vector.shape_cast %582 : vector<1x16x128xf32> to vector<16x128xf32>
      %584 = vector.shape_cast %581 : vector<16x128xf32> to vector<1x16x128xf32>
      tpu.vector_store %arg9[%c1_208, %c0_209, %c0_210], %584 {strides = array<i32>} : memref<2x16x128xf32, #tpu.memory_space<vmem>>, vector<1x16x128xf32>,
      %c1_211 = arith.constant 1 : index
      %c0_212 = arith.constant 0 : index
      %c0_213 = arith.constant 0 : index
      %585 = vector.load %arg10[%c1_211, %c0_212, %c0_213] : memref<2x16x128xf32, #tpu.memory_space<vmem>>, vector<1x16x128xf32>
      %586 = vector.shape_cast %585 : vector<1x16x128xf32> to vector<16x128xf32>
      %587 = vector.shape_cast %560 : vector<16x128xf32> to vector<1x16x128xf32>
      tpu.vector_store %arg10[%c1_211, %c0_212, %c0_213], %587 {strides = array<i32>} : memref<2x16x128xf32, #tpu.memory_space<vmem>>, vector<1x16x128xf32>,
    } else {
    }
    return
  }
  func.func @transform_0(%arg0: i32) -> (i32, i32, i32) {
    %c0_i32 = arith.constant 0 : i32
    %c0_i32_0 = arith.constant 0 : i32
    %c0_i32_1 = arith.constant 0 : i32
    return %arg0, %c0_i32, %c0_i32_0 : i32, i32, i32
  }
  func.func @transform_1(%arg0: i32) -> (i32, i32, i32) {
    %c0_i32 = arith.constant 0 : i32
    %0 = arith.subi %c0_i32, %arg0 : i32
    %c0_i32_0 = arith.constant 0 : i32
    %c1_i32 = arith.constant 1 : i32
    %c0_i32_1 = arith.constant 0 : i32
    return %0, %c0_i32_0, %c1_i32 : i32, i32, i32
  }
  func.func @transform_6(%arg0: i32) -> (i32, i32, i32) {
    %c0_i32 = arith.constant 0 : i32
    %c0_i32_0 = arith.constant 0 : i32
    %c0_i32_1 = arith.constant 0 : i32
    return %arg0, %c0_i32, %c0_i32_0 : i32, i32, i32
  }
  func.func @transform_7(%arg0: i32) -> (i32, i32, i32) {
    %c0_i32 = arith.constant 0 : i32
    %0 = arith.subi %c0_i32, %arg0 : i32
    %c0_i32_0 = arith.constant 0 : i32
    %c0_i32_1 = arith.constant 0 : i32
    %c0_i32_2 = arith.constant 0 : i32
    return %0, %c0_i32_0, %c0_i32_1 : i32, i32, i32
  }
  func.func @transform_8(%arg0: i32) -> (i32, i32, i32) {
    %c0_i32 = arith.constant 0 : i32
    %c0_i32_0 = arith.constant 0 : i32
    %c0_i32_1 = arith.constant 0 : i32
    %c0_i32_2 = arith.constant 0 : i32
    return %c0_i32, %c0_i32_0, %c0_i32_1 : i32, i32, i32
  }
  func.func @transform_9(%arg0: i32) -> (i32, i32, i32) {
    %c0_i32 = arith.constant 0 : i32
    %c0_i32_0 = arith.constant 0 : i32
    %c0_i32_1 = arith.constant 0 : i32
    %c0_i32_2 = arith.constant 0 : i32
    return %c0_i32, %c0_i32_0, %c0_i32_1 : i32, i32, i32
  }
}

module attributes {stable_mosaic.version = 11 : i64} {
  func.func @proj2_bias_kernel(%arg0: i32, %arg1: i32, %arg2: memref<128x128xbf16, #tpu.memory_space<vmem>>, %arg3: memref<128x128xbf16, #tpu.memory_space<vmem>>, %arg4: memref<128x512xbf16, #tpu.memory_space<vmem>>, %arg5: memref<128x512xbf16, #tpu.memory_space<vmem>>, %arg6: memref<1x512xf32, #tpu.memory_space<vmem>>, %arg7: memref<128x512xbf16, #tpu.memory_space<vmem>>) attributes {dimension_semantics = [#tpu.dimension_semantics<parallel>, #tpu.dimension_semantics<parallel>], iteration_bounds = array<i64: 1, 2>, scalar_prefetch = 0 : i64, scratch_operands = 0 : i64, tpu.core_type = #tpu.core_type<tc>, window_params = [{transform_indices = @transform_0, window_bounds = array<i64: 128, 128>}, {transform_indices = @transform_1, window_bounds = array<i64: 128, 128>}, {transform_indices = @transform_2, window_bounds = array<i64: 128, 512>}, {transform_indices = @transform_3, window_bounds = array<i64: 128, 512>}, {transform_indices = @transform_4, window_bounds = array<i64: 1, 512>}, {transform_indices = @transform_5, window_bounds = array<i64: 128, 512>}]} {
    %c0 = arith.constant 0 : index
    %c0_0 = arith.constant 0 : index
    %0 = vector.load %arg2[%c0, %c0_0] : memref<128x128xbf16, #tpu.memory_space<vmem>>, vector<128x128xbf16>
    %c0_1 = arith.constant 0 : index
    %c0_2 = arith.constant 0 : index
    %1 = vector.load %arg4[%c0_1, %c0_2] : memref<128x512xbf16, #tpu.memory_space<vmem>>, vector<128x512xbf16>
    %cst = arith.constant dense<0.000000e+00> : vector<128x512xf32>
    %2 = tpu.matmul %0, %1, %cst {dimension_numbers = #tpu.dot_dimension_numbers<[1], [0], [0], [1], [0, 0, 1, 1], [], []>} : vector<128x128xbf16>, vector<128x512xbf16>, vector<128x512xf32> -> vector<128x512xf32>
    %c0_3 = arith.constant 0 : index
    %c0_4 = arith.constant 0 : index
    %3 = vector.load %arg3[%c0_3, %c0_4] : memref<128x128xbf16, #tpu.memory_space<vmem>>, vector<128x128xbf16>
    %c0_5 = arith.constant 0 : index
    %c0_6 = arith.constant 0 : index
    %4 = vector.load %arg5[%c0_5, %c0_6] : memref<128x512xbf16, #tpu.memory_space<vmem>>, vector<128x512xbf16>
    %cst_7 = arith.constant dense<0.000000e+00> : vector<128x512xf32>
    %5 = tpu.matmul %3, %4, %cst_7 {dimension_numbers = #tpu.dot_dimension_numbers<[1], [0], [0], [1], [0, 0, 1, 1], [], []>} : vector<128x128xbf16>, vector<128x512xbf16>, vector<128x512xf32> -> vector<128x512xf32>
    %6 = arith.addf %2, %5 : vector<128x512xf32>
    %c0_8 = arith.constant 0 : index
    %c0_9 = arith.constant 0 : index
    %7 = vector.load %arg6[%c0_8, %c0_9] : memref<1x512xf32, #tpu.memory_space<vmem>>, vector<1x512xf32>
    %8 = vector.broadcast %7 : vector<1x512xf32> to vector<128x512xf32>
    %9 = arith.addf %6, %8 : vector<128x512xf32>
    %10 = arith.truncf %9 : vector<128x512xf32> to vector<128x512xbf16>
    %c0_10 = arith.constant 0 : index
    %c0_11 = arith.constant 0 : index
    %11 = vector.load %arg7[%c0_10, %c0_11] : memref<128x512xbf16, #tpu.memory_space<vmem>>, vector<128x512xbf16>
    tpu.vector_store %arg7[%c0_10, %c0_11], %10 {strides = array<i32>} : memref<128x512xbf16, #tpu.memory_space<vmem>>, vector<128x512xbf16>,
    return
  }
  func.func @transform_0(%arg0: i32, %arg1: i32) -> (i32, i32) {
    %c0_i32 = arith.constant 0 : i32
    %c0_i32_0 = arith.constant 0 : i32
    return %arg0, %c0_i32 : i32, i32
  }
  func.func @transform_1(%arg0: i32, %arg1: i32) -> (i32, i32) {
    %c0_i32 = arith.constant 0 : i32
    %c0_i32_0 = arith.constant 0 : i32
    return %arg0, %c0_i32 : i32, i32
  }
  func.func @transform_2(%arg0: i32, %arg1: i32) -> (i32, i32) {
    %c0_i32 = arith.constant 0 : i32
    %c0_i32_0 = arith.constant 0 : i32
    return %c0_i32, %arg1 : i32, i32
  }
  func.func @transform_3(%arg0: i32, %arg1: i32) -> (i32, i32) {
    %c0_i32 = arith.constant 0 : i32
    %c0_i32_0 = arith.constant 0 : i32
    return %c0_i32, %arg1 : i32, i32
  }
  func.func @transform_4(%arg0: i32, %arg1: i32) -> (i32, i32) {
    %c0_i32 = arith.constant 0 : i32
    %c0_i32_0 = arith.constant 0 : i32
    return %c0_i32, %arg1 : i32, i32
  }
  func.func @transform_5(%arg0: i32, %arg1: i32) -> (i32, i32) {
    %c0_i32 = arith.constant 0 : i32
    return %arg0, %arg1 : i32, i32
  }
}

module attributes {stable_mosaic.version = 11 : i64} {
  func.func @proj2_bias_kernel(%arg0: i32, %arg1: i32, %arg2: memref<16x128xbf16, #tpu.memory_space<vmem>>, %arg3: memref<16x128xbf16, #tpu.memory_space<vmem>>, %arg4: memref<128x128xbf16, #tpu.memory_space<vmem>>, %arg5: memref<128x128xbf16, #tpu.memory_space<vmem>>, %arg6: memref<1x128xf32, #tpu.memory_space<vmem>>, %arg7: memref<16x128xf32, #tpu.memory_space<vmem>>) attributes {dimension_semantics = [#tpu.dimension_semantics<parallel>, #tpu.dimension_semantics<parallel>], iteration_bounds = array<i64: 1, 1>, scalar_prefetch = 0 : i64, scratch_operands = 0 : i64, tpu.core_type = #tpu.core_type<tc>, window_params = [{transform_indices = @transform_0, window_bounds = array<i64: 16, 128>}, {transform_indices = @transform_1, window_bounds = array<i64: 16, 128>}, {transform_indices = @transform_2, window_bounds = array<i64: 128, 128>}, {transform_indices = @transform_3, window_bounds = array<i64: 128, 128>}, {transform_indices = @transform_4, window_bounds = array<i64: 1, 128>}, {transform_indices = @transform_5, window_bounds = array<i64: 16, 128>}]} {
    %c0 = arith.constant 0 : index
    %c0_0 = arith.constant 0 : index
    %0 = vector.load %arg2[%c0, %c0_0] : memref<16x128xbf16, #tpu.memory_space<vmem>>, vector<16x128xbf16>
    %c0_1 = arith.constant 0 : index
    %c0_2 = arith.constant 0 : index
    %1 = vector.load %arg4[%c0_1, %c0_2] : memref<128x128xbf16, #tpu.memory_space<vmem>>, vector<128x128xbf16>
    %cst = arith.constant dense<0.000000e+00> : vector<16x128xf32>
    %2 = tpu.matmul %0, %1, %cst {dimension_numbers = #tpu.dot_dimension_numbers<[1], [0], [0], [1], [0, 0, 1, 1], [], []>} : vector<16x128xbf16>, vector<128x128xbf16>, vector<16x128xf32> -> vector<16x128xf32>
    %c0_3 = arith.constant 0 : index
    %c0_4 = arith.constant 0 : index
    %3 = vector.load %arg3[%c0_3, %c0_4] : memref<16x128xbf16, #tpu.memory_space<vmem>>, vector<16x128xbf16>
    %c0_5 = arith.constant 0 : index
    %c0_6 = arith.constant 0 : index
    %4 = vector.load %arg5[%c0_5, %c0_6] : memref<128x128xbf16, #tpu.memory_space<vmem>>, vector<128x128xbf16>
    %cst_7 = arith.constant dense<0.000000e+00> : vector<16x128xf32>
    %5 = tpu.matmul %3, %4, %cst_7 {dimension_numbers = #tpu.dot_dimension_numbers<[1], [0], [0], [1], [0, 0, 1, 1], [], []>} : vector<16x128xbf16>, vector<128x128xbf16>, vector<16x128xf32> -> vector<16x128xf32>
    %6 = arith.addf %2, %5 : vector<16x128xf32>
    %c0_8 = arith.constant 0 : index
    %c0_9 = arith.constant 0 : index
    %7 = vector.load %arg6[%c0_8, %c0_9] : memref<1x128xf32, #tpu.memory_space<vmem>>, vector<1x128xf32>
    %8 = vector.broadcast %7 : vector<1x128xf32> to vector<16x128xf32>
    %9 = arith.addf %6, %8 : vector<16x128xf32>
    %c0_10 = arith.constant 0 : index
    %c0_11 = arith.constant 0 : index
    %10 = vector.load %arg7[%c0_10, %c0_11] : memref<16x128xf32, #tpu.memory_space<vmem>>, vector<16x128xf32>
    tpu.vector_store %arg7[%c0_10, %c0_11], %9 {strides = array<i32>} : memref<16x128xf32, #tpu.memory_space<vmem>>, vector<16x128xf32>,
    return
  }
  func.func @transform_0(%arg0: i32, %arg1: i32) -> (i32, i32) {
    %c0_i32 = arith.constant 0 : i32
    %c0_i32_0 = arith.constant 0 : i32
    return %arg0, %c0_i32 : i32, i32
  }
  func.func @transform_1(%arg0: i32, %arg1: i32) -> (i32, i32) {
    %c0_i32 = arith.constant 0 : i32
    %c0_i32_0 = arith.constant 0 : i32
    return %arg0, %c0_i32 : i32, i32
  }
  func.func @transform_2(%arg0: i32, %arg1: i32) -> (i32, i32) {
    %c0_i32 = arith.constant 0 : i32
    %c0_i32_0 = arith.constant 0 : i32
    return %c0_i32, %arg1 : i32, i32
  }
  func.func @transform_3(%arg0: i32, %arg1: i32) -> (i32, i32) {
    %c0_i32 = arith.constant 0 : i32
    %c0_i32_0 = arith.constant 0 : i32
    return %c0_i32, %arg1 : i32, i32
  }
  func.func @transform_4(%arg0: i32, %arg1: i32) -> (i32, i32) {
    %c0_i32 = arith.constant 0 : i32
    %c0_i32_0 = arith.constant 0 : i32
    return %c0_i32, %arg1 : i32, i32
  }
  func.func @transform_5(%arg0: i32, %arg1: i32) -> (i32, i32) {
    %c0_i32 = arith.constant 0 : i32
    return %arg0, %arg1 : i32, i32
  }
}

</mosaic_0001>

<bundles_post_ra>
// kernel: lstm_model_forward.9
= control target key start
LH: loop header
LB: loop body
LE: loop exit
PB: predicated region body
PF: predicated region fallthrough
CT: control target
= control target key end

     0   :  { %v359_v0 = vmov 0.0   ;;  %vm360_vm0 = vmmov 0   ;;  %s454_s3 = inlined_call_operand.vmem [shape: bf16[128,128], index: 3, kind: input, shape index: {}]   ;;  %s455_s2 = inlined_call_operand.vmem [shape: bf16[128,128], index: 2, kind: input, shape index: {}]   ;;  %s456_s1 = inlined_call_operand.vmem [shape: bf16[16,128], index: 1, kind: input, shape index: {}]   ;;  %s457_s0 = inlined_call_operand.vmem [shape: bf16[16,128], index: 0, kind: input, shape index: {}]   ;;  %s458_s4 = inlined_call_operand.vmem [shape: f32[1,128], index: 4, kind: input, shape index: {}]   ;;  %s459_s5 = inlined_call_operand.vmem [shape: f32[16,128], index: 5, kind: output, shape index: {}]  }
   0x1   :  { %299 = vmatprep.subr.bf16.mxu0 %v359_v0  ;;  %319 = vmatprep.subr.bf16.mxu1 %v359_v0  ;;  %v341_v1 = vld [vmem:[%s454_s3] sm:$0xff]   ;;  %v343_v3 = vld [vmem:[%s454_s3 + $0x8] sm:$0xff]   ;;  %v345_v5 = vld [vmem:[%s454_s3 + $0x10] sm:$0xff]  }
   0x2   :  { %v342_v2 = vld [vmem:[%s455_s2] sm:$0xff]   ;;  %315 = vmatprep.mubr.msk.bf16.mxu0 %vm360_vm0, %v359_v0  ;;  %335 = vmatprep.mubr.msk.bf16.mxu1 %vm360_vm0, %v359_v0  ;;  %v344_v4 = vld [vmem:[%s455_s2 + $0x8] sm:$0xff]   ;;  %v346_v6 = vld [vmem:[%s455_s2 + $0x10] sm:$0xff]  }
   0x3   :  { %300 = vmatpush3.bf16.msra.mxu0 %v341_v1  ;;  %320 = vmatpush3.bf16.msra.mxu1 %v342_v2  ;;  %v347_v7 = vld [vmem:[%s454_s3 + $0x18] sm:$0xff]   ;;  %v349_v9 = vld [vmem:[%s454_s3 + $0x20] sm:$0xff]   ;;  %v351_v11 = vld [vmem:[%s454_s3 + $0x28] sm:$0xff]  }
   0x4   :  { %301 = vmatprep.subr.bf16.mxu0 %v359_v0  ;;  %321 = vmatprep.subr.bf16.mxu1 %v359_v0  ;;  %v348_v8 = vld [vmem:[%s455_s2 + $0x18] sm:$0xff]   ;;  %v350_v10 = vld [vmem:[%s455_s2 + $0x20] sm:$0xff]   ;;  %v352_v12 = vld [vmem:[%s455_s2 + $0x28] sm:$0xff]  }
   0x5   :  { %v353_v13 = vld [vmem:[%s454_s3 + $0x30] sm:$0xff]   ;;  %v355_v15 = vld [vmem:[%s454_s3 + $0x38] sm:$0xff]   ;;  %v357_v17 = vld [vmem:[%s456_s1] sm:$0xff]  }
   0x6   :  { %v354_v14 = vld [vmem:[%s455_s2 + $0x30] sm:$0xff]   ;;  %v356_v16 = vld [vmem:[%s455_s2 + $0x38] sm:$0xff]   ;;  %v358_v18 = vld [vmem:[%s457_s0] sm:$0xff]  }
   0x7   :  { %302 = vmatpush3.bf16.msra.mxu0 %v343_v3  ;;  %322 = vmatpush3.bf16.msra.mxu1 %v344_v4  ;;  %v280_v21 = vld [vmem:[%s458_s4] ss:$0 sm:$0xff] }
   0x8   :  { %303 = vmatprep.subr.bf16.mxu0 %v359_v0  ;;  %323 = vmatprep.subr.bf16.mxu1 %v359_v0 }
   0xb   :  { %304 = vmatpush3.bf16.msra.mxu0 %v345_v5  ;;  %324 = vmatpush3.bf16.msra.mxu1 %v346_v6 }
   0xc   :  { %305 = vmatprep.subr.bf16.mxu0 %v359_v0  ;;  %325 = vmatprep.subr.bf16.mxu1 %v359_v0 }
   0xf   :  { %306 = vmatpush3.bf16.msra.mxu0 %v347_v7  ;;  %326 = vmatpush3.bf16.msra.mxu1 %v348_v8 }
  0x10   :  { %307 = vmatprep.subr.bf16.mxu0 %v359_v0  ;;  %327 = vmatprep.subr.bf16.mxu1 %v359_v0 }
  0x13   :  { %308 = vmatpush3.bf16.msra.mxu0 %v349_v9  ;;  %328 = vmatpush3.bf16.msra.mxu1 %v350_v10 }
  0x14   :  { %309 = vmatprep.subr.bf16.mxu0 %v359_v0  ;;  %329 = vmatprep.subr.bf16.mxu1 %v359_v0 }
  0x17   :  { %310 = vmatpush3.bf16.msra.mxu0 %v351_v11  ;;  %330 = vmatpush3.bf16.msra.mxu1 %v352_v12 }
  0x18   :  { %311 = vmatprep.subr.bf16.mxu0 %v359_v0  ;;  %331 = vmatprep.subr.bf16.mxu1 %v359_v0 }
  0x1b   :  { %312 = vmatpush3.bf16.msra.mxu0 %v353_v13  ;;  %332 = vmatpush3.bf16.msra.mxu1 %v354_v14 }
  0x1c   :  { %313 = vmatprep.subr.bf16.mxu0 %v359_v0  ;;  %333 = vmatprep.subr.bf16.mxu1 %v359_v0 }
  0x1f   :  { %314 = vmatpush3.bf16.msra.mxu0 %v355_v15  ;;  %334 = vmatpush3.bf16.msra.mxu1 %v356_v16 }
  0x22   :  { %316 = vmatmul.mubr.bf16.vlgmr.msra.gmra.mrb[0].mxu0 %v357_v17  ;;  %336 = vmatmul.mubr.bf16.vlgmr.msra.gmra.mrb[0].mxu1 %v358_v18 }
  0xf5   :  { %v145_v19 = vpop.f32.mrb[0].mxu0  ;;  %v240_v20 = vpop.f32.mrb[0].mxu1 }
  0xf6   :  { %v317_v22 = vpop.f32.mrb[1].mxu0  ;;  %v241_v23 = vadd.f32 %v240_v20, %v145_v19  ;;  %v337_v24 = vpop.f32.mrb[1].mxu1 }
  0xf7   :  { %v148_v25 = vpop.f32.mrb[2].mxu0  ;;  %v243_v26 = vpop.f32.mrb[2].mxu1 }
  0xf8   :  { %v318_v27 = vpop.f32.mrb[3].mxu0  ;;  %v254_v28 = vadd.f32 %v280_v21, %v241_v23  ;;  %v244_v29 = vadd.f32 %v243_v26, %v148_v25  ;;  %v338_v30 = vpop.f32.mrb[3].mxu1 }
  0xfa   :  { %256 = vst [vmem:[%s459_s5] sm:$0xff] %v254_v28  ;;  %v255_v31 = vadd.f32 %v280_v21, %v244_v29 }
  0xfc   :  { %257 = vst [vmem:[%s459_s5 + $0x8] sm:$0xff] %v255_v31 }

// kernel: lstm_model_forward.5
= control target key start
LH: loop header
LB: loop body
LE: loop exit
PB: predicated region body
PF: predicated region fallthrough
CT: control target
= control target key end

     0   :  { %s1238_s12 = smov 0   ;;  %s1240_s13 = smov 0   ;;  %s1530_s0 = inlined_call_operand.vmem [shape: bf16[128,16], index: 0, kind: input, shape index: {}]   ;;  %s1531_s1 = inlined_call_operand.vmem [shape: bf16[16,1024], index: 1, kind: input, shape index: {}]   ;;  %s1532_s2 = inlined_call_operand.vmem [shape: f32[1,1024], index: 2, kind: input, shape index: {}]   ;;  %s1533_s3 = inlined_call_operand.vmem [shape: bf16[128,1024], index: 3, kind: output, shape index: {}]  }
   0x1   :  { %s1242_s14 = smov 0   ;;  %s1244_s15 = smov 0  }
   0x2   :  { %s1246_s16 = smov 0  }
   0x3 LB: > { %s22_s17 = sadd.s32 1, %s1211_s15  ;;  %s1011_s18 = sadd.s32 4294967295, %s1215_s16   ;;  %s1215_s16 = sphi %s1246_s16, %s13_s16   ;;  %s1211_s15 = sphi %s1244_s15, %s1538_s15   ;;  %s1207_s14 = sphi %s1242_s14, %s1537_s14   ;;  %s1203_s13 = sphi %s1240_s13, %s1536_s13   ;;  %s1199_s12 = sphi %s1238_s12, %s1535_s12  }
   0x4   : > { %p23_p0 = scmp.ge.s32.totalorder %s22_s17, 2  ;;  %p65_p1 = scmp.ne.s32.totalorder %s1203_s13, %s1199_s12 }
   0x5   : > { %p66_p2 = scmp.eq.s32.totalorder %s1215_s16, 0  ;;  %p123_p4 = scmp.eq.s32.totalorder %s1011_s18, 1 }
   0x6   : > { %s1540_s17 = smov (%p23_p0, %s22_s17), 0  ;;  %s58_s20 = sadd.s32 1, %s1203_s13 }
   0x7   : > { %p67_p3 = por %p66_p2, %p65_p1  ;;  %s55_s19 = ssub.s32 %s1211_s15, %s1540_s17 }
   0x8   : > { %p56_p5 = scmp.eq.s32.totalorder %s55_s19, 0  ;;  %p1273_p6 = por %p123_p4, %p65_p1 }
   0x9   : > { %p1015_p7 = scmp.ge.s32.totalorder %s1215_s16, 2 }
   0xa   : > { %s1278_s22 = scalar_select %p56_p5, %s1203_s13, %s58_s20  }
   0xb   : > { %154 = sbr.rel (%p1015_p7) target bundleno = 25 (0x19), region = 20 }
  0x12   : > { %157 = sbr.rel (!%p67_p3) target bundleno = 25 (0x19), region = 24  ;;  %s159_s23 = sand.u32 (%p67_p3), 1, %s1203_s13  }
  0x13   : > { %s1088_s24 = sshll.u32 (%p67_p3), %s1211_s15, 4  ;;  %s1016_s25 = sshll.u32 (%p67_p3), %s159_s23, 5 }
  0x14   : > { %s164_s28 = scalar_lea.vmem (%p67_p3), %s1531_s1, %s1088_s24  ;;  %s161_s29 = scalar_lea.vmem (%p67_p3), [#allocation2], %s1016_s25 }
  0x15   : > { %v177_v0 = vld [vmem:[%s164_s28] sm:$0xff] (%p67_p3)  ;;  %v179_v1 = vld [vmem:[%s164_s28 + $0x8] sm:$0xff] (%p67_p3) }
  0x16   : > { %v181_v2 = vld [vmem:[%s164_s28 + $0x20] sm:$0xff] (%p67_p3)  ;;  %178 = vst [vmem:[%s161_s29] sm:$0xff] (%p67_p3), %v177_v0  ;;  %180 = vst [vmem:[%s161_s29 + $0x8] sm:$0xff] (%p67_p3), %v179_v1  ;;  %v183_v3 = vld [vmem:[%s164_s28 + $0x28] sm:$0xff] (%p67_p3) }
  0x17   : > { %182 = vst [vmem:[%s161_s29 + $0x10] sm:$0xff] (%p67_p3), %v181_v2  ;;  %184 = vst [vmem:[%s161_s29 + $0x18] sm:$0xff] (%p67_p3), %v183_v3 }
  0x19 PF: > { %p1019_p8 = scmp.ge.s32.totalorder %s1215_s16, 1  ;;  %p197_p9 = scmp.lt.s32.totalorder %s1215_s16, 3 }
  0x1b   : > { %p198_p10 = pnand %p1019_p8, %p197_p9 }
  0x1c   : > { %s204_s30 = sand.u32 (!%p198_p10), 1, %s1199_s12   ;;  %v1217_v4 = vmov (!%p198_p10), 0   ;;  %v1169_v9 = vld [vmem:[%s1530_s0] sm:$0xff] (!%p198_p10)   ;;  %vm352_vm0 = vcmask (!%p198_p10), 130048   ;;  %v1170_v10 = vld [vmem:[%s1530_s0 + $0x8] sm:$0xff] (!%p198_p10)   ;;  %v1171_v11 = vld [vmem:[%s1530_s0 + $0x10] sm:$0xff] (!%p198_p10)   ;;  %v272_v17 = vlaneseq (!%p198_p10) }
  0x1d   : > { %201 = sbr.rel (%p198_p10) target bundleno = 320 (0x140), region = 51  ;;  %s1020_s4 = sshll.u32 (!%p198_p10), %s204_s30, 5  ;;  %409 = vmatprep.mubr.bf16.mxu0 (!%p198_p10), %v1217_v4  ;;  %522 = vmatprep.mubr.bf16.mxu1 (!%p198_p10), %v1217_v4  ;;  %v1172_v12 = vld [vmem:[%s1530_s0 + $0x18] sm:$0xff] (!%p198_p10)   ;;  %v1173_v13 = vld [vmem:[%s1530_s0 + $0x20] sm:$0xff] (!%p198_p10)   ;;  %v1174_v14 = vld [vmem:[%s1530_s0 + $0x28] sm:$0xff] (!%p198_p10)  }
  0x1e   : > { %s206_s5 = scalar_lea.vmem (!%p198_p10), [#allocation2], %s1020_s4  ;;  %v1175_v15 = vld [vmem:[%s1530_s0 + $0x30] sm:$0xff] (!%p198_p10)   ;;  %v1176_v16 = vld [vmem:[%s1530_s0 + $0x38] sm:$0xff] (!%p198_p10)   ;;  %s1022_s4 = sshll.u32 (!%p198_p10), %s1207_s14, 2  ;;  %v273_v18 = vshrl.u32 (!%p198_p10), %v272_v17, 7 }
  0x1f   : > { %v1163_v5 = vld [vmem:[%s206_s5 + $0x4] ss:$16 sps:$4 sm:$0xff] (!%p198_p10)   ;;  %v1165_v6 = vld [vmem:[%s206_s5 + $0xc] ss:$16 sps:$4 sm:$0xff] (!%p198_p10)   ;;  %v1167_v7 = vld [vmem:[%s206_s5] ss:$16 sps:$4 sm:$0xff] (!%p198_p10)  }
  0x20   : > { %377 = vmatprep.subr.bf16.mxu0 (!%p198_p10), %v1163_v5  ;;  %v1168_v8 = vld [vmem:[%s206_s5 + $0x8] ss:$16 sps:$4 sm:$0xff] (!%p198_p10)   ;;  %490 = vmatprep.subr.bf16.mxu1 (!%p198_p10), %v1165_v6  ;;  %p243_p11 = scmp.lt.s32.totalorder (!%p198_p10), %s1022_s4, 7  ;;  %v274_v19 = vsub.s32 (!%p198_p10), 0, %v273_v18  ;;  %v282_v20 = vsub.s32 (!%p198_p10), 2, %v273_v18  ;;  %v278_v22 = vsub.s32 (!%p198_p10), 1, %v273_v18 }
  0x21   : > { %378 = vmatpush1.bf16.msra.mxu0 (!%p198_p10), %v1167_v7  ;;  %491 = vmatpush1.bf16.msra.mxu1 (!%p198_p10), %v1168_v8  ;;  %v286_v23 = vsub.s32 (!%p198_p10), 3, %v273_v18  ;;  %s1021_s8 = sshll.u32 (!%p198_p10), %s204_s30, 8 }
  0x22   : > { %s1353_s12 = scalar_lea.vmem (!%p198_p10), [#allocation3], %s1021_s8 }
  0x24   : > { %1035 = vmatmul.mubr.msk.bf16.vlgmr.msra.gmra.mrb[0].mxu0 %vm352_vm0, %v1169_v9  ;;  %1043 = vmatmul.mubr.msk.bf16.vlgmr.msra.gmra.mrb[0].mxu1 %vm352_vm0, %v1169_v9  ;;  %s1542_s4 = smov (!%p243_p11, %s1022_s4), 7  ;;  %s1121_s30 = sshll.u32 (%p1273_p6), %s1207_s14, 4 }
  0x25   : > { %419 = vmatprep.mubr.bf16.mxu0 %v1217_v4  ;;  %532 = vmatprep.mubr.bf16.mxu1 %v1217_v4  ;;  %s245_s7 = scalar_lea.vmem %s1532_s2, %s1542_s4  ;;  %s1452_s11 = scalar_lea.vmem (%p1273_p6), %s1533_s3, %s1121_s30 }
  0x26   : > { %v270_v21 = vld [vmem:[%s245_s7] sm:$0xf] }
  0x27   : > { %v1335_v24 = vrot.slane %v270_v21, %v274_v19  ;;  %v1337_v25 = vrot.slane %v270_v21, %v282_v20  ;;  %v1339_v26 = vrot.slane %v270_v21, %v278_v22  ;;  %v1341_v27 = vrot.slane %v270_v21, %v286_v23 }
  0x2c   : > { %1036 = vmatmul.mubr.msk.bf16.gmra.mrb[4].mxu0 %vm352_vm0, %v1170_v10  ;;  %1044 = vmatmul.mubr.msk.bf16.gmra.mrb[4].mxu1 %vm352_vm0, %v1170_v10 }
  0x2d   : > { %429 = vmatprep.mubr.bf16.mxu0 %v1217_v4  ;;  %542 = vmatprep.mubr.bf16.mxu1 %v1217_v4 }
  0x34   : > { %1037 = vmatmul.mubr.msk.bf16.gmra.mrb[8].mxu0 %vm352_vm0, %v1171_v11  ;;  %1045 = vmatmul.mubr.msk.bf16.gmra.mrb[8].mxu1 %vm352_vm0, %v1171_v11 }
  0x35   : > { %439 = vmatprep.mubr.bf16.mxu0 %v1217_v4  ;;  %552 = vmatprep.mubr.bf16.mxu1 %v1217_v4 }
  0x3c   : > { %1038 = vmatmul.mubr.msk.bf16.gmra.mrb[12].mxu0 %vm352_vm0, %v1172_v12  ;;  %1046 = vmatmul.mubr.msk.bf16.gmra.mrb[12].mxu1 %vm352_vm0, %v1172_v12 }
  0x3d   : > { %449 = vmatprep.mubr.bf16.mxu0 %v1217_v4  ;;  %562 = vmatprep.mubr.bf16.mxu1 %v1217_v4 }
  0x44   : > { %1039 = vmatmul.mubr.msk.bf16.gmra.mrb[16].mxu0 %vm352_vm0, %v1173_v13  ;;  %1047 = vmatmul.mubr.msk.bf16.gmra.mrb[16].mxu1 %vm352_vm0, %v1173_v13 }
  0x45   : > { %459 = vmatprep.mubr.bf16.mxu0 %v1217_v4  ;;  %572 = vmatprep.mubr.bf16.mxu1 %v1217_v4 }
  0x4c   : > { %1040 = vmatmul.mubr.msk.bf16.gmra.mrb[20].mxu0 %vm352_vm0, %v1174_v14  ;;  %1048 = vmatmul.mubr.msk.bf16.gmra.mrb[20].mxu1 %vm352_vm0, %v1174_v14 }
  0x4d   : > { %469 = vmatprep.mubr.bf16.mxu0 %v1217_v4  ;;  %582 = vmatprep.mubr.bf16.mxu1 %v1217_v4 }
  0x54   : > { %1041 = vmatmul.mubr.msk.bf16.gmra.mrb[24].mxu0 %vm352_vm0, %v1175_v15  ;;  %1049 = vmatmul.mubr.msk.bf16.gmra.mrb[24].mxu1 %vm352_vm0, %v1175_v15 }
  0x55   : > { %479 = vmatprep.mubr.bf16.mxu0 %v1217_v4  ;;  %592 = vmatprep.mubr.bf16.mxu1 %v1217_v4 }
  0x5c   : > { %1042 = vmatmul.mubr.msk.bf16.gmra.mrb[28].mxu0 %vm352_vm0, %v1176_v16  ;;  %1050 = vmatmul.mubr.msk.bf16.gmra.mrb[28].mxu1 %vm352_vm0, %v1176_v16 }
  0xf7   : > { %v411_v28 = vpop.f32.mrb[0].mxu0  ;;  %v524_v29 = vpop.f32.mrb[0].mxu1 }
  0xf8   : > { %v412_v30 = vadd.f32 %v411_v28, %v1335_v24  ;;  %v525_v31 = vadd.f32 %v524_v29, %v1337_v25  ;;  %v413_v32 = vpop.f32.mrb[1].mxu0  ;;  %v526_v33 = vpop.f32.mrb[1].mxu1 }
  0xf9   : > { %v414_v34 = vadd.f32 %v413_v32, %v1339_v26  ;;  %v527_v35 = vadd.f32 %v526_v33, %v1341_v27  ;;  %v415_v36 = vpop.f32.mrb[2].mxu0  ;;  %v528_v37 = vpop.f32.mrb[2].mxu1 }
  0xfa   : > { %v416_v38 = vadd.f32 %v415_v36, %v1335_v24  ;;  %v529_v39 = vadd.f32 %v528_v37, %v1337_v25  ;;  %v417_v40 = vpop.f32.mrb[3].mxu0  ;;  %v530_v41 = vpop.f32.mrb[3].mxu1 }
  0xfb   : > { %v1089_v42 = vpack.c.bf16 %v414_v34, %v412_v30  ;;  %v1090_v43 = vpack.c.bf16 %v527_v35, %v525_v31  ;;  %v418_v44 = vadd.f32 %v417_v40, %v1339_v26  ;;  %v531_v45 = vadd.f32 %v530_v41, %v1341_v27 }
  0xfd   : > { %795 = vst [vmem:[%s1353_s12] sm:$0xff] %v1089_v42  ;;  %796 = vst [vmem:[%s1353_s12 + $0x8] sm:$0xff] %v1090_v43  ;;  %v1091_v46 = vpack.c.bf16 %v418_v44, %v416_v38  ;;  %v1092_v47 = vpack.c.bf16 %v531_v45, %v529_v39 }
  0xff   : > { %797 = vst [vmem:[%s1353_s12 + $0x10] sm:$0xff] %v1091_v46  ;;  %798 = vst [vmem:[%s1353_s12 + $0x18] sm:$0xff] %v1092_v47  ;;  %v421_v48 = vpop.f32.mrb[4].mxu0  ;;  %v534_v49 = vpop.f32.mrb[4].mxu1 }
 0x100   : > { %v422_v50 = vadd.f32 %v421_v48, %v1335_v24  ;;  %v535_v51 = vadd.f32 %v534_v49, %v1337_v25  ;;  %v423_v52 = vpop.f32.mrb[5].mxu0  ;;  %v536_v53 = vpop.f32.mrb[5].mxu1 }
 0x101   : > { %v424_v54 = vadd.f32 %v423_v52, %v1339_v26  ;;  %v537_v55 = vadd.f32 %v536_v53, %v1341_v27  ;;  %v425_v56 = vpop.f32.mrb[6].mxu0  ;;  %v538_v57 = vpop.f32.mrb[6].mxu1 }
 0x102   : > { %v426_v58 = vadd.f32 %v425_v56, %v1335_v24  ;;  %v539_v59 = vadd.f32 %v538_v57, %v1337_v25  ;;  %v427_v60 = vpop.f32.mrb[7].mxu0  ;;  %v540_v61 = vpop.f32.mrb[7].mxu1 }
 0x103   : > { %v1093_v62 = vpack.c.bf16 %v424_v54, %v422_v50  ;;  %v1094_v63 = vpack.c.bf16 %v537_v55, %v535_v51  ;;  %v428_v0 = vadd.f32 %v427_v60, %v1339_v26  ;;  %v541_v1 = vadd.f32 %v540_v61, %v1341_v27 }
 0x105   : > { %799 = vst [vmem:[%s1353_s12 + $0x20] sm:$0xff] %v1093_v62  ;;  %800 = vst [vmem:[%s1353_s12 + $0x28] sm:$0xff] %v1094_v63  ;;  %v1095_v2 = vpack.c.bf16 %v428_v0, %v426_v58  ;;  %v1096_v3 = vpack.c.bf16 %v541_v1, %v539_v59 }
 0x107   : > { %801 = vst [vmem:[%s1353_s12 + $0x30] sm:$0xff] %v1095_v2  ;;  %802 = vst [vmem:[%s1353_s12 + $0x38] sm:$0xff] %v1096_v3  ;;  %v431_v4 = vpop.f32.mrb[8].mxu0  ;;  %v544_v5 = vpop.f32.mrb[8].mxu1 }
 0x108   : > { %v432_v6 = vadd.f32 %v431_v4, %v1335_v24  ;;  %v545_v7 = vadd.f32 %v544_v5, %v1337_v25  ;;  %v433_v8 = vpop.f32.mrb[9].mxu0  ;;  %v546_v9 = vpop.f32.mrb[9].mxu1 }
 0x109   : > { %v434_v10 = vadd.f32 %v433_v8, %v1339_v26  ;;  %v547_v11 = vadd.f32 %v546_v9, %v1341_v27  ;;  %v435_v12 = vpop.f32.mrb[10].mxu0  ;;  %v548_v13 = vpop.f32.mrb[10].mxu1 }
 0x10a   : > { %v436_v14 = vadd.f32 %v435_v12, %v1335_v24  ;;  %v549_v15 = vadd.f32 %v548_v13, %v1337_v25  ;;  %v437_v16 = vpop.f32.mrb[11].mxu0  ;;  %v550_v17 = vpop.f32.mrb[11].mxu1 }
 0x10b   : > { %v1097_v18 = vpack.c.bf16 %v434_v10, %v432_v6  ;;  %v1098_v19 = vpack.c.bf16 %v547_v11, %v545_v7  ;;  %v438_v20 = vadd.f32 %v437_v16, %v1339_v26  ;;  %v551_v21 = vadd.f32 %v550_v17, %v1341_v27 }
 0x10d   : > { %803 = vst [vmem:[%s1353_s12 + $0x40] sm:$0xff] %v1097_v18  ;;  %804 = vst [vmem:[%s1353_s12 + $0x48] sm:$0xff] %v1098_v19  ;;  %v1099_v22 = vpack.c.bf16 %v438_v20, %v436_v14  ;;  %v1100_v23 = vpack.c.bf16 %v551_v21, %v549_v15 }
 0x10f   : > { %805 = vst [vmem:[%s1353_s12 + $0x50] sm:$0xff] %v1099_v22  ;;  %806 = vst [vmem:[%s1353_s12 + $0x58] sm:$0xff] %v1100_v23  ;;  %v441_v28 = vpop.f32.mrb[12].mxu0  ;;  %v554_v29 = vpop.f32.mrb[12].mxu1 }
 0x110   : > { %v442_v30 = vadd.f32 %v441_v28, %v1335_v24  ;;  %v555_v31 = vadd.f32 %v554_v29, %v1337_v25  ;;  %v443_v32 = vpop.f32.mrb[13].mxu0  ;;  %v556_v33 = vpop.f32.mrb[13].mxu1 }
 0x111   : > { %v444_v34 = vadd.f32 %v443_v32, %v1339_v26  ;;  %v557_v35 = vadd.f32 %v556_v33, %v1341_v27  ;;  %v445_v36 = vpop.f32.mrb[14].mxu0  ;;  %v558_v37 = vpop.f32.mrb[14].mxu1 }
 0x112   : > { %v446_v38 = vadd.f32 %v445_v36, %v1335_v24  ;;  %v559_v39 = vadd.f32 %v558_v37, %v1337_v25  ;;  %v447_v40 = vpop.f32.mrb[15].mxu0  ;;  %v560_v41 = vpop.f32.mrb[15].mxu1 }
 0x113   : > { %v1101_v42 = vpack.c.bf16 %v444_v34, %v442_v30  ;;  %v1102_v43 = vpack.c.bf16 %v557_v35, %v555_v31  ;;  %v448_v44 = vadd.f32 %v447_v40, %v1339_v26  ;;  %v561_v45 = vadd.f32 %v560_v41, %v1341_v27 }
 0x115   : > { %807 = vst [vmem:[%s1353_s12 + $0x60] sm:$0xff] %v1101_v42  ;;  %808 = vst [vmem:[%s1353_s12 + $0x68] sm:$0xff] %v1102_v43  ;;  %v1103_v46 = vpack.c.bf16 %v448_v44, %v446_v38  ;;  %v1104_v47 = vpack.c.bf16 %v561_v45, %v559_v39 }
 0x117   : > { %809 = vst [vmem:[%s1353_s12 + $0x70] sm:$0xff] %v1103_v46  ;;  %810 = vst [vmem:[%s1353_s12 + $0x78] sm:$0xff] %v1104_v47  ;;  %v451_v48 = vpop.f32.mrb[16].mxu0  ;;  %v564_v49 = vpop.f32.mrb[16].mxu1 }
 0x118   : > { %v452_v50 = vadd.f32 %v451_v48, %v1335_v24  ;;  %v565_v51 = vadd.f32 %v564_v49, %v1337_v25  ;;  %v453_v52 = vpop.f32.mrb[17].mxu0  ;;  %v566_v53 = vpop.f32.mrb[17].mxu1 }
 0x119   : > { %v454_v54 = vadd.f32 %v453_v52, %v1339_v26  ;;  %v567_v55 = vadd.f32 %v566_v53, %v1341_v27  ;;  %v455_v56 = vpop.f32.mrb[18].mxu0  ;;  %v568_v57 = vpop.f32.mrb[18].mxu1 }
 0x11a   : > { %v456_v58 = vadd.f32 %v455_v56, %v1335_v24  ;;  %v569_v59 = vadd.f32 %v568_v57, %v1337_v25  ;;  %v457_v60 = vpop.f32.mrb[19].mxu0  ;;  %v570_v61 = vpop.f32.mrb[19].mxu1 }
 0x11b   : > { %v1105_v62 = vpack.c.bf16 %v454_v54, %v452_v50  ;;  %v1106_v63 = vpack.c.bf16 %v567_v55, %v565_v51  ;;  %v458_v0 = vadd.f32 %v457_v60, %v1339_v26  ;;  %v571_v1 = vadd.f32 %v570_v61, %v1341_v27 }
 0x11d   : > { %811 = vst [vmem:[%s1353_s12 + $0x80] sm:$0xff] %v1105_v62  ;;  %812 = vst [vmem:[%s1353_s12 + $0x88] sm:$0xff] %v1106_v63  ;;  %v1107_v2 = vpack.c.bf16 %v458_v0, %v456_v58  ;;  %v1108_v3 = vpack.c.bf16 %v571_v1, %v569_v59 }
 0x11f   : > { %813 = vst [vmem:[%s1353_s12 + $0x90] sm:$0xff] %v1107_v2  ;;  %814 = vst [vmem:[%s1353_s12 + $0x98] sm:$0xff] %v1108_v3  ;;  %v461_v4 = vpop.f32.mrb[20].mxu0  ;;  %v574_v5 = vpop.f32.mrb[20].mxu1 }
 0x120   : > { %v462_v6 = vadd.f32 %v461_v4, %v1335_v24  ;;  %v575_v7 = vadd.f32 %v574_v5, %v1337_v25  ;;  %v463_v8 = vpop.f32.mrb[21].mxu0  ;;  %v576_v9 = vpop.f32.mrb[21].mxu1  ;;  %v860_v4 = vld [vmem:[%s1353_s12 + $0x20] sm:$0xff] (%p1273_p6)  ;;  %v862_v5 = vld [vmem:[%s1353_s12 + $0x28] sm:$0xff] (%p1273_p6) }
 0x121   : > { %v464_v10 = vadd.f32 %v463_v8, %v1339_v26  ;;  %v577_v11 = vadd.f32 %v576_v9, %v1341_v27  ;;  %v465_v12 = vpop.f32.mrb[22].mxu0  ;;  %v578_v13 = vpop.f32.mrb[22].mxu1  ;;  %861 = vst [vmem:[%s1452_s11 + $0x40] sm:$0xff] (%p1273_p6), %v860_v4  ;;  %863 = vst [vmem:[%s1452_s11 + $0x48] sm:$0xff] (%p1273_p6), %v862_v5  ;;  %v868_v8 = vld [vmem:[%s1353_s12 + $0x40] sm:$0xff] (%p1273_p6)  ;;  %v870_v9 = vld [vmem:[%s1353_s12 + $0x48] sm:$0xff] (%p1273_p6) }
 0x122   : > { %v466_v14 = vadd.f32 %v465_v12, %v1335_v24  ;;  %v579_v15 = vadd.f32 %v578_v13, %v1337_v25  ;;  %v467_v16 = vpop.f32.mrb[23].mxu0  ;;  %v580_v17 = vpop.f32.mrb[23].mxu1  ;;  %869 = vst [vmem:[%s1452_s11 + $0x80] sm:$0xff] (%p1273_p6), %v868_v8  ;;  %871 = vst [vmem:[%s1452_s11 + $0x88] sm:$0xff] (%p1273_p6), %v870_v9  ;;  %v876_v12 = vld [vmem:[%s1353_s12 + $0x60] sm:$0xff] (%p1273_p6)  ;;  %v878_v13 = vld [vmem:[%s1353_s12 + $0x68] sm:$0xff] (%p1273_p6) }
 0x123   : > { %v1109_v18 = vpack.c.bf16 %v464_v10, %v462_v6  ;;  %v1110_v19 = vpack.c.bf16 %v577_v11, %v575_v7  ;;  %v468_v20 = vadd.f32 %v467_v16, %v1339_v26  ;;  %v581_v21 = vadd.f32 %v580_v17, %v1341_v27  ;;  %v864_v6 = vld [vmem:[%s1353_s12 + $0x30] sm:$0xff] (%p1273_p6)  ;;  %v866_v7 = vld [vmem:[%s1353_s12 + $0x38] sm:$0xff] (%p1273_p6)  ;;  %877 = vst [vmem:[%s1452_s11 + $0xc0] sm:$0xff] (%p1273_p6), %v876_v12 }
 0x124   : > { %865 = vst [vmem:[%s1452_s11 + $0x60] sm:$0xff] (%p1273_p6), %v864_v6  ;;  %867 = vst [vmem:[%s1452_s11 + $0x68] sm:$0xff] (%p1273_p6), %v866_v7  ;;  %v872_v10 = vld [vmem:[%s1353_s12 + $0x50] sm:$0xff] (%p1273_p6)  ;;  %v874_v11 = vld [vmem:[%s1353_s12 + $0x58] sm:$0xff] (%p1273_p6) }
 0x125   : > { %815 = vst [vmem:[%s1353_s12 + $0xa0] sm:$0xff] %v1109_v18  ;;  %816 = vst [vmem:[%s1353_s12 + $0xa8] sm:$0xff] %v1110_v19  ;;  %v1111_v22 = vpack.c.bf16 %v468_v20, %v466_v14  ;;  %v1112_v23 = vpack.c.bf16 %v581_v21, %v579_v15  ;;  %v880_v14 = vld [vmem:[%s1353_s12 + $0x70] sm:$0xff] (%p1273_p6)  ;;  %v882_v15 = vld [vmem:[%s1353_s12 + $0x78] sm:$0xff] (%p1273_p6) }
 0x126   : > { %873 = vst [vmem:[%s1452_s11 + $0xa0] sm:$0xff] (%p1273_p6), %v872_v10  ;;  %875 = vst [vmem:[%s1452_s11 + $0xa8] sm:$0xff] (%p1273_p6), %v874_v11  ;;  %v884_v16 = vld [vmem:[%s1353_s12 + $0x80] sm:$0xff] (%p1273_p6)  ;;  %v886_v17 = vld [vmem:[%s1353_s12 + $0x88] sm:$0xff] (%p1273_p6) }
 0x127   : > { %817 = vst [vmem:[%s1353_s12 + $0xb0] sm:$0xff] %v1111_v22  ;;  %818 = vst [vmem:[%s1353_s12 + $0xb8] sm:$0xff] %v1112_v23  ;;  %v471_v28 = vpop.f32.mrb[24].mxu0  ;;  %v584_v29 = vpop.f32.mrb[24].mxu1  ;;  %v888_v18 = vld [vmem:[%s1353_s12 + $0x90] sm:$0xff] (%p1273_p6)  ;;  %v890_v19 = vld [vmem:[%s1353_s12 + $0x98] sm:$0xff] (%p1273_p6) }
 0x128   : > { %v472_v30 = vadd.f32 %v471_v28, %v1335_v24  ;;  %v585_v31 = vadd.f32 %v584_v29, %v1337_v25  ;;  %v473_v32 = vpop.f32.mrb[25].mxu0  ;;  %v586_v33 = vpop.f32.mrb[25].mxu1  ;;  %879 = vst [vmem:[%s1452_s11 + $0xc8] sm:$0xff] (%p1273_p6), %v878_v13  ;;  %881 = vst [vmem:[%s1452_s11 + $0xe0] sm:$0xff] (%p1273_p6), %v880_v14 }
 0x129   : > { %v474_v34 = vadd.f32 %v473_v32, %v1339_v26  ;;  %v587_v35 = vadd.f32 %v586_v33, %v1341_v27  ;;  %v475_v36 = vpop.f32.mrb[26].mxu0  ;;  %v588_v37 = vpop.f32.mrb[26].mxu1  ;;  %883 = vst [vmem:[%s1452_s11 + $0xe8] sm:$0xff] (%p1273_p6), %v882_v15  ;;  %885 = vst [vmem:[%s1452_s11 + $0x100] sm:$0xff] (%p1273_p6), %v884_v16 }
 0x12a   : > { %v476_v38 = vadd.f32 %v475_v36, %v1335_v24  ;;  %v589_v39 = vadd.f32 %v588_v37, %v1337_v25  ;;  %v477_v40 = vpop.f32.mrb[27].mxu0  ;;  %v590_v41 = vpop.f32.mrb[27].mxu1  ;;  %887 = vst [vmem:[%s1452_s11 + $0x108] sm:$0xff] (%p1273_p6), %v886_v17  ;;  %889 = vst [vmem:[%s1452_s11 + $0x120] sm:$0xff] (%p1273_p6), %v888_v18 }
 0x12b   : > { %v1113_v42 = vpack.c.bf16 %v474_v34, %v472_v30  ;;  %v1114_v43 = vpack.c.bf16 %v587_v35, %v585_v31  ;;  %v478_v44 = vadd.f32 %v477_v40, %v1339_v26  ;;  %v591_v45 = vadd.f32 %v590_v41, %v1341_v27  ;;  %891 = vst [vmem:[%s1452_s11 + $0x128] sm:$0xff] (%p1273_p6), %v890_v19 }
 0x12c   : > { %v892_v20 = vld [vmem:[%s1353_s12 + $0xa0] sm:$0xff] (%p1273_p6)  ;;  %v894_v21 = vld [vmem:[%s1353_s12 + $0xa8] sm:$0xff] (%p1273_p6) }
 0x12d   : > { %819 = vst [vmem:[%s1353_s12 + $0xc0] sm:$0xff] %v1113_v42  ;;  %820 = vst [vmem:[%s1353_s12 + $0xc8] sm:$0xff] %v1114_v43  ;;  %v1115_v46 = vpack.c.bf16 %v478_v44, %v476_v38  ;;  %v1116_v47 = vpack.c.bf16 %v591_v45, %v589_v39 }
 0x12e   : > { %893 = vst [vmem:[%s1452_s11 + $0x140] sm:$0xff] (%p1273_p6), %v892_v20  ;;  %v896_v22 = vld [vmem:[%s1353_s12 + $0xb0] sm:$0xff] (%p1273_p6)  ;;  %v898_v23 = vld [vmem:[%s1353_s12 + $0xb8] sm:$0xff] (%p1273_p6)  ;;  %895 = vst [vmem:[%s1452_s11 + $0x148] sm:$0xff] (%p1273_p6), %v894_v21 }
 0x12f   : > { %821 = vst [vmem:[%s1353_s12 + $0xd0] sm:$0xff] %v1115_v46  ;;  %822 = vst [vmem:[%s1353_s12 + $0xd8] sm:$0xff] %v1116_v47  ;;  %v481_v48 = vpop.f32.mrb[28].mxu0  ;;  %v594_v49 = vpop.f32.mrb[28].mxu1 }
 0x130   : > { %v482_v50 = vadd.f32 %v481_v48, %v1335_v24  ;;  %v595_v51 = vadd.f32 %v594_v49, %v1337_v25  ;;  %v483_v52 = vpop.f32.mrb[29].mxu0  ;;  %v596_v53 = vpop.f32.mrb[29].mxu1  ;;  %897 = vst [vmem:[%s1452_s11 + $0x160] sm:$0xff] (%p1273_p6), %v896_v22  ;;  %899 = vst [vmem:[%s1452_s11 + $0x168] sm:$0xff] (%p1273_p6), %v898_v23 }
 0x131   : > { %v484_v54 = vadd.f32 %v483_v52, %v1339_v26  ;;  %v597_v55 = vadd.f32 %v596_v53, %v1341_v27  ;;  %v485_v56 = vpop.f32.mrb[30].mxu0  ;;  %v598_v57 = vpop.f32.mrb[30].mxu1  ;;  %833 = sbr.rel (!%p1273_p6) target bundleno = 320 (0x140), region = 59 }
 0x132   : > { %v486_v58 = vadd.f32 %v485_v56, %v1335_v24  ;;  %v599_v59 = vadd.f32 %v598_v57, %v1337_v25  ;;  %v487_v60 = vpop.f32.mrb[31].mxu0  ;;  %v600_v61 = vpop.f32.mrb[31].mxu1  ;;  %v852_v24 = vld [vmem:[%s1353_s12] sm:$0xff] (%p1273_p6)  ;;  %v854_v25 = vld [vmem:[%s1353_s12 + $0x8] sm:$0xff] (%p1273_p6) }
 0x133   : > { %v1117_v62 = vpack.c.bf16 %v484_v54, %v482_v50  ;;  %v1118_v63 = vpack.c.bf16 %v597_v55, %v595_v51  ;;  %v488_v0 = vadd.f32 %v487_v60, %v1339_v26  ;;  %v601_v1 = vadd.f32 %v600_v61, %v1341_v27  ;;  %v856_v26 = vld [vmem:[%s1353_s12 + $0x10] sm:$0xff] (%p1273_p6)  ;;  %v858_v27 = vld [vmem:[%s1353_s12 + $0x18] sm:$0xff] (%p1273_p6)  ;;  %853 = vst [vmem:[%s1452_s11] sm:$0xff] (%p1273_p6), %v852_v24 }
 0x134   : > { %855 = vst [vmem:[%s1452_s11 + $0x8] sm:$0xff] (%p1273_p6), %v854_v25  ;;  %857 = vst [vmem:[%s1452_s11 + $0x20] sm:$0xff] (%p1273_p6), %v856_v26  ;;  %v900_v28 = vld [vmem:[%s1353_s12 + $0xc0] sm:$0xff] (%p1273_p6)  ;;  %v902_v29 = vld [vmem:[%s1353_s12 + $0xc8] sm:$0xff] (%p1273_p6) }
 0x135   : > { %823 = vst [vmem:[%s1353_s12 + $0xe0] sm:$0xff] %v1117_v62  ;;  %824 = vst [vmem:[%s1353_s12 + $0xe8] sm:$0xff] %v1118_v63  ;;  %v1119_v2 = vpack.c.bf16 %v488_v0, %v486_v58  ;;  %v1120_v3 = vpack.c.bf16 %v601_v1, %v599_v59 }
 0x136   : > { %859 = vst [vmem:[%s1452_s11 + $0x28] sm:$0xff] (%p1273_p6), %v858_v27  ;;  %v904_v30 = vld [vmem:[%s1353_s12 + $0xd0] sm:$0xff] (%p1273_p6)  ;;  %901 = vst [vmem:[%s1452_s11 + $0x180] sm:$0xff] (%p1273_p6), %v900_v28  ;;  %v906_v31 = vld [vmem:[%s1353_s12 + $0xd8] sm:$0xff] (%p1273_p6) }
 0x137   : > { %825 = vst [vmem:[%s1353_s12 + $0xf0] sm:$0xff] %v1119_v2  ;;  %826 = vst [vmem:[%s1353_s12 + $0xf8] sm:$0xff] %v1120_v3 }
 0x138   : > { %903 = vst [vmem:[%s1452_s11 + $0x188] sm:$0xff] %v902_v29  ;;  %905 = vst [vmem:[%s1452_s11 + $0x1a0] sm:$0xff] %v904_v30 }
 0x139   : > { %907 = vst [vmem:[%s1452_s11 + $0x1a8] sm:$0xff] %v906_v31 }
 0x13c   : > { %v908_v32 = vld [vmem:[%s1353_s12 + $0xe0] sm:$0xff]  ;;  %v910_v33 = vld [vmem:[%s1353_s12 + $0xe8] sm:$0xff] }
 0x13d   : > { %909 = vst [vmem:[%s1452_s11 + $0x1c0] sm:$0xff] %v908_v32  ;;  %911 = vst [vmem:[%s1452_s11 + $0x1c8] sm:$0xff] %v910_v33 }
 0x13e   : > { %v912_v34 = vld [vmem:[%s1353_s12 + $0xf0] sm:$0xff]  ;;  %v914_v35 = vld [vmem:[%s1353_s12 + $0xf8] sm:$0xff] }
 0x13f   : > { %913 = vst [vmem:[%s1452_s11 + $0x1e0] sm:$0xff] %v912_v34  ;;  %915 = vst [vmem:[%s1452_s11 + $0x1e8] sm:$0xff] %v914_v35 }
 0x140 PF: > { %s13_s16 = sadd.s32 1, %s1215_s16   ;;  %s1535_s12 = smov %s1203_s13 }
 0x141   : > { %p10_p12 = scmp.ge.s32.totalorder %s13_s16, 4   ;;  %s1536_s13 = smov %s1278_s22 }
 0x142   : > { %s1537_s14 = smov %s1211_s15  ;;  %s1538_s15 = smov %s1540_s17 }
 0x143   :  { %12 = sbr.rel (!%p10_p12) target bundleno = 3 (0x3), region = 119 }

// kernel: lstm_model_forward.7
= control target key start
LH: loop header
LB: loop body
LE: loop exit
PB: predicated region body
PF: predicated region fallthrough
CT: control target
= control target key end

     0   :  { %s2433_s18 = smov 0   ;;  %s2435_s19 = smov 0   ;;  %s2983_s0 = inlined_call_operand.vmem [shape: bf16[128,128], index: 0, kind: input, shape index: {}]   ;;  %s2984_s1 = inlined_call_operand.vmem [shape: bf16[128,128], index: 1, kind: input, shape index: {}]   ;;  %s2985_s2 = inlined_call_operand.vmem [shape: bf16[128,1024], index: 2, kind: input, shape index: {}]   ;;  %s2986_s3 = inlined_call_operand.vmem [shape: bf16[128,1024], index: 3, kind: input, shape index: {}]   ;;  %s2987_s4 = inlined_call_operand.vmem [shape: f32[1,1024], index: 4, kind: input, shape index: {}]   ;;  %s2988_s5 = inlined_call_operand.vmem [shape: bf16[128,1024], index: 5, kind: output, shape index: {}]  }
   0x1   :  { %s2437_s20 = smov 0   ;;  %s2439_s21 = smov 0  }
   0x2   :  { %s2441_s22 = smov 0  }
   0x3 LB: > { %s24_s23 = sadd.s32 1, %s2396_s21  ;;  %s1976_s24 = sadd.s32 4294967295, %s2400_s22   ;;  %s2400_s22 = sphi %s2441_s22, %s15_s22   ;;  %s2396_s21 = sphi %s2439_s21, %s2994_s21   ;;  %s2392_s20 = sphi %s2437_s20, %s2993_s20   ;;  %s2388_s19 = sphi %s2435_s19, %s2992_s19   ;;  %s2384_s18 = sphi %s2433_s18, %s2991_s18  }
   0x4   : > { %p25_p0 = scmp.ge.s32.totalorder %s24_s23, 2  ;;  %p93_p1 = scmp.ne.s32.totalorder %s2388_s19, %s2384_s18 }
   0x5   : > { %p94_p2 = scmp.eq.s32.totalorder %s2400_s22, 0  ;;  %p177_p4 = scmp.eq.s32.totalorder %s1976_s24, 1 }
   0x6   : > { %s2996_s23 = smov (%p25_p0, %s24_s23), 0  ;;  %s86_s27 = sadd.s32 1, %s2388_s19 }
   0x7   : > { %p2465_p3 = por %p94_p2, %p93_p1  ;;  %s83_s26 = ssub.s32 %s2396_s21, %s2996_s23 }
   0x8   : > { %p84_p5 = scmp.eq.s32.totalorder %s83_s26, 0  ;;  %p2472_p6 = por %p177_p4, %p93_p1 }
   0x9   : > { %p1981_p7 = scmp.ge.s32.totalorder %s2400_s22, 2 }
   0xa   : > { %s2477_s29 = scalar_select %p84_p5, %s2388_s19, %s86_s27  }
   0xb   : > { %217 = sbr.rel (%p1981_p7) target bundleno = 58 (0x3a), region = 24 }
  0x12   : > { %220 = sbr.rel (!%p2465_p3) target bundleno = 38 (0x26), region = 28  ;;  %s222_s30 = sand.u32 (%p2465_p3), 1, %s2388_s19  }
  0x13   : > { %s2110_s6 = sshll.u32 (%p2465_p3), %s2396_s21, 4  ;;  %s1982_s7 = sshll.u32 (%p2465_p3), %s222_s30, 8 }
  0x14   : > { %s2487_s10 = scalar_lea.vmem (%p2465_p3), %s2985_s2, %s2110_s6  ;;  %s2492_s11 = scalar_lea.vmem (%p2465_p3), [#allocation2], %s1982_s7 }
  0x15   : > { %v240_v0 = vld [vmem:[%s2487_s10] sm:$0xff] (%p2465_p3)  ;;  %v242_v1 = vld [vmem:[%s2487_s10 + $0x8] sm:$0xff] (%p2465_p3) }
  0x16   : > { %v244_v2 = vld [vmem:[%s2487_s10 + $0x20] sm:$0xff] (%p2465_p3)  ;;  %241 = vst [vmem:[%s2492_s11] sm:$0xff] (%p2465_p3), %v240_v0  ;;  %243 = vst [vmem:[%s2492_s11 + $0x8] sm:$0xff] (%p2465_p3), %v242_v1  ;;  %v246_v3 = vld [vmem:[%s2487_s10 + $0x28] sm:$0xff] (%p2465_p3) }
  0x17   : > { %245 = vst [vmem:[%s2492_s11 + $0x10] sm:$0xff] (%p2465_p3), %v244_v2  ;;  %v248_v4 = vld [vmem:[%s2487_s10 + $0x40] sm:$0xff] (%p2465_p3)  ;;  %v250_v5 = vld [vmem:[%s2487_s10 + $0x48] sm:$0xff] (%p2465_p3)  ;;  %247 = vst [vmem:[%s2492_s11 + $0x18] sm:$0xff] (%p2465_p3), %v246_v3 }
  0x18   : > { %249 = vst [vmem:[%s2492_s11 + $0x20] sm:$0xff] (%p2465_p3), %v248_v4  ;;  %251 = vst [vmem:[%s2492_s11 + $0x28] sm:$0xff] (%p2465_p3), %v250_v5  ;;  %v252_v6 = vld [vmem:[%s2487_s10 + $0x60] sm:$0xff] (%p2465_p3)  ;;  %v254_v7 = vld [vmem:[%s2487_s10 + $0x68] sm:$0xff] (%p2465_p3) }
  0x19   : > { %v256_v8 = vld [vmem:[%s2487_s10 + $0x80] sm:$0xff]  ;;  %253 = vst [vmem:[%s2492_s11 + $0x30] sm:$0xff] %v252_v6  ;;  %255 = vst [vmem:[%s2492_s11 + $0x38] sm:$0xff] %v254_v7  ;;  %v258_v9 = vld [vmem:[%s2487_s10 + $0x88] sm:$0xff] }
  0x1a   : > { %257 = vst [vmem:[%s2492_s11 + $0x40] sm:$0xff] %v256_v8  ;;  %v260_v10 = vld [vmem:[%s2487_s10 + $0xa0] sm:$0xff]  ;;  %v262_v11 = vld [vmem:[%s2487_s10 + $0xa8] sm:$0xff]  ;;  %259 = vst [vmem:[%s2492_s11 + $0x48] sm:$0xff] %v258_v9 }
  0x1b   : > { %261 = vst [vmem:[%s2492_s11 + $0x50] sm:$0xff] %v260_v10  ;;  %263 = vst [vmem:[%s2492_s11 + $0x58] sm:$0xff] %v262_v11  ;;  %v264_v12 = vld [vmem:[%s2487_s10 + $0xc0] sm:$0xff]  ;;  %v266_v13 = vld [vmem:[%s2487_s10 + $0xc8] sm:$0xff] }
  0x1c   : > { %v268_v14 = vld [vmem:[%s2487_s10 + $0xe0] sm:$0xff]  ;;  %265 = vst [vmem:[%s2492_s11 + $0x60] sm:$0xff] %v264_v12  ;;  %267 = vst [vmem:[%s2492_s11 + $0x68] sm:$0xff] %v266_v13  ;;  %v270_v15 = vld [vmem:[%s2487_s10 + $0xe8] sm:$0xff] }
  0x1d   : > { %269 = vst [vmem:[%s2492_s11 + $0x70] sm:$0xff] %v268_v14  ;;  %v272_v16 = vld [vmem:[%s2487_s10 + $0x100] sm:$0xff]  ;;  %v274_v17 = vld [vmem:[%s2487_s10 + $0x108] sm:$0xff]  ;;  %271 = vst [vmem:[%s2492_s11 + $0x78] sm:$0xff] %v270_v15 }
  0x1e   : > { %273 = vst [vmem:[%s2492_s11 + $0x80] sm:$0xff] %v272_v16  ;;  %275 = vst [vmem:[%s2492_s11 + $0x88] sm:$0xff] %v274_v17  ;;  %v276_v18 = vld [vmem:[%s2487_s10 + $0x120] sm:$0xff]  ;;  %v278_v19 = vld [vmem:[%s2487_s10 + $0x128] sm:$0xff] }
  0x1f   : > { %v280_v20 = vld [vmem:[%s2487_s10 + $0x140] sm:$0xff]  ;;  %277 = vst [vmem:[%s2492_s11 + $0x90] sm:$0xff] %v276_v18  ;;  %279 = vst [vmem:[%s2492_s11 + $0x98] sm:$0xff] %v278_v19  ;;  %v282_v21 = vld [vmem:[%s2487_s10 + $0x148] sm:$0xff] }
  0x20   : > { %281 = vst [vmem:[%s2492_s11 + $0xa0] sm:$0xff] %v280_v20  ;;  %v284_v22 = vld [vmem:[%s2487_s10 + $0x160] sm:$0xff]  ;;  %v286_v23 = vld [vmem:[%s2487_s10 + $0x168] sm:$0xff]  ;;  %283 = vst [vmem:[%s2492_s11 + $0xa8] sm:$0xff] %v282_v21 }
  0x21   : > { %285 = vst [vmem:[%s2492_s11 + $0xb0] sm:$0xff] %v284_v22  ;;  %287 = vst [vmem:[%s2492_s11 + $0xb8] sm:$0xff] %v286_v23  ;;  %v288_v24 = vld [vmem:[%s2487_s10 + $0x180] sm:$0xff]  ;;  %v290_v25 = vld [vmem:[%s2487_s10 + $0x188] sm:$0xff] }
  0x22   : > { %v292_v26 = vld [vmem:[%s2487_s10 + $0x1a0] sm:$0xff]  ;;  %289 = vst [vmem:[%s2492_s11 + $0xc0] sm:$0xff] %v288_v24  ;;  %291 = vst [vmem:[%s2492_s11 + $0xc8] sm:$0xff] %v290_v25  ;;  %v294_v27 = vld [vmem:[%s2487_s10 + $0x1a8] sm:$0xff] }
  0x23   : > { %293 = vst [vmem:[%s2492_s11 + $0xd0] sm:$0xff] %v292_v26  ;;  %v296_v28 = vld [vmem:[%s2487_s10 + $0x1c0] sm:$0xff]  ;;  %v298_v29 = vld [vmem:[%s2487_s10 + $0x1c8] sm:$0xff]  ;;  %295 = vst [vmem:[%s2492_s11 + $0xd8] sm:$0xff] %v294_v27 }
  0x24   : > { %297 = vst [vmem:[%s2492_s11 + $0xe0] sm:$0xff] %v296_v28  ;;  %299 = vst [vmem:[%s2492_s11 + $0xe8] sm:$0xff] %v298_v29  ;;  %v300_v30 = vld [vmem:[%s2487_s10 + $0x1e0] sm:$0xff]  ;;  %v302_v31 = vld [vmem:[%s2487_s10 + $0x1e8] sm:$0xff] }
  0x25   : > { %301 = vst [vmem:[%s2492_s11 + $0xf0] sm:$0xff] %v300_v30  ;;  %303 = vst [vmem:[%s2492_s11 + $0xf8] sm:$0xff] %v302_v31 }
  0x26 PF: > { %309 = sbr.rel (!%p2465_p3) target bundleno = 58 (0x3a), region = 51  ;;  %s311_s12 = sand.u32 (%p2465_p3), 1, %s2388_s19  }
  0x27   : > { %s2111_s13 = sshll.u32 (%p2465_p3), %s2396_s21, 4  ;;  %s1985_s14 = sshll.u32 (%p2465_p3), %s311_s12, 8 }
  0x28   : > { %s2562_s17 = scalar_lea.vmem (%p2465_p3), %s2986_s3, %s2111_s13  ;;  %s2567_s24 = scalar_lea.vmem (%p2465_p3), [#allocation3], %s1985_s14 }
  0x29   : > { %v329_v32 = vld [vmem:[%s2562_s17] sm:$0xff] (%p2465_p3)  ;;  %v331_v33 = vld [vmem:[%s2562_s17 + $0x8] sm:$0xff] (%p2465_p3) }
  0x2a   : > { %v333_v34 = vld [vmem:[%s2562_s17 + $0x20] sm:$0xff] (%p2465_p3)  ;;  %330 = vst [vmem:[%s2567_s24] sm:$0xff] (%p2465_p3), %v329_v32  ;;  %332 = vst [vmem:[%s2567_s24 + $0x8] sm:$0xff] (%p2465_p3), %v331_v33  ;;  %v335_v35 = vld [vmem:[%s2562_s17 + $0x28] sm:$0xff] (%p2465_p3) }
  0x2b   : > { %334 = vst [vmem:[%s2567_s24 + $0x10] sm:$0xff] (%p2465_p3), %v333_v34  ;;  %v337_v36 = vld [vmem:[%s2562_s17 + $0x40] sm:$0xff] (%p2465_p3)  ;;  %v339_v37 = vld [vmem:[%s2562_s17 + $0x48] sm:$0xff] (%p2465_p3)  ;;  %336 = vst [vmem:[%s2567_s24 + $0x18] sm:$0xff] (%p2465_p3), %v335_v35 }
  0x2c   : > { %338 = vst [vmem:[%s2567_s24 + $0x20] sm:$0xff] (%p2465_p3), %v337_v36  ;;  %340 = vst [vmem:[%s2567_s24 + $0x28] sm:$0xff] (%p2465_p3), %v339_v37  ;;  %v341_v38 = vld [vmem:[%s2562_s17 + $0x60] sm:$0xff] (%p2465_p3)  ;;  %v343_v39 = vld [vmem:[%s2562_s17 + $0x68] sm:$0xff] (%p2465_p3) }
  0x2d   : > { %v345_v40 = vld [vmem:[%s2562_s17 + $0x80] sm:$0xff]  ;;  %342 = vst [vmem:[%s2567_s24 + $0x30] sm:$0xff] %v341_v38  ;;  %344 = vst [vmem:[%s2567_s24 + $0x38] sm:$0xff] %v343_v39  ;;  %v347_v41 = vld [vmem:[%s2562_s17 + $0x88] sm:$0xff] }
  0x2e   : > { %346 = vst [vmem:[%s2567_s24 + $0x40] sm:$0xff] %v345_v40  ;;  %v349_v42 = vld [vmem:[%s2562_s17 + $0xa0] sm:$0xff]  ;;  %v351_v43 = vld [vmem:[%s2562_s17 + $0xa8] sm:$0xff]  ;;  %348 = vst [vmem:[%s2567_s24 + $0x48] sm:$0xff] %v347_v41 }
  0x2f   : > { %350 = vst [vmem:[%s2567_s24 + $0x50] sm:$0xff] %v349_v42  ;;  %352 = vst [vmem:[%s2567_s24 + $0x58] sm:$0xff] %v351_v43  ;;  %v353_v44 = vld [vmem:[%s2562_s17 + $0xc0] sm:$0xff]  ;;  %v355_v45 = vld [vmem:[%s2562_s17 + $0xc8] sm:$0xff] }
  0x30   : > { %v357_v46 = vld [vmem:[%s2562_s17 + $0xe0] sm:$0xff]  ;;  %354 = vst [vmem:[%s2567_s24 + $0x60] sm:$0xff] %v353_v44  ;;  %356 = vst [vmem:[%s2567_s24 + $0x68] sm:$0xff] %v355_v45  ;;  %v359_v47 = vld [vmem:[%s2562_s17 + $0xe8] sm:$0xff] }
  0x31   : > { %358 = vst [vmem:[%s2567_s24 + $0x70] sm:$0xff] %v357_v46  ;;  %v361_v48 = vld [vmem:[%s2562_s17 + $0x100] sm:$0xff]  ;;  %v363_v49 = vld [vmem:[%s2562_s17 + $0x108] sm:$0xff]  ;;  %360 = vst [vmem:[%s2567_s24 + $0x78] sm:$0xff] %v359_v47 }
  0x32   : > { %362 = vst [vmem:[%s2567_s24 + $0x80] sm:$0xff] %v361_v48  ;;  %364 = vst [vmem:[%s2567_s24 + $0x88] sm:$0xff] %v363_v49  ;;  %v365_v50 = vld [vmem:[%s2562_s17 + $0x120] sm:$0xff]  ;;  %v367_v51 = vld [vmem:[%s2562_s17 + $0x128] sm:$0xff] }
  0x33   : > { %v369_v52 = vld [vmem:[%s2562_s17 + $0x140] sm:$0xff]  ;;  %366 = vst [vmem:[%s2567_s24 + $0x90] sm:$0xff] %v365_v50  ;;  %368 = vst [vmem:[%s2567_s24 + $0x98] sm:$0xff] %v367_v51  ;;  %v371_v53 = vld [vmem:[%s2562_s17 + $0x148] sm:$0xff] }
  0x34   : > { %370 = vst [vmem:[%s2567_s24 + $0xa0] sm:$0xff] %v369_v52  ;;  %v373_v54 = vld [vmem:[%s2562_s17 + $0x160] sm:$0xff]  ;;  %v375_v55 = vld [vmem:[%s2562_s17 + $0x168] sm:$0xff]  ;;  %372 = vst [vmem:[%s2567_s24 + $0xa8] sm:$0xff] %v371_v53 }
  0x35   : > { %374 = vst [vmem:[%s2567_s24 + $0xb0] sm:$0xff] %v373_v54  ;;  %376 = vst [vmem:[%s2567_s24 + $0xb8] sm:$0xff] %v375_v55  ;;  %v377_v56 = vld [vmem:[%s2562_s17 + $0x180] sm:$0xff]  ;;  %v379_v57 = vld [vmem:[%s2562_s17 + $0x188] sm:$0xff] }
  0x36   : > { %v381_v58 = vld [vmem:[%s2562_s17 + $0x1a0] sm:$0xff]  ;;  %378 = vst [vmem:[%s2567_s24 + $0xc0] sm:$0xff] %v377_v56  ;;  %380 = vst [vmem:[%s2567_s24 + $0xc8] sm:$0xff] %v379_v57  ;;  %v383_v59 = vld [vmem:[%s2562_s17 + $0x1a8] sm:$0xff] }
  0x37   : > { %382 = vst [vmem:[%s2567_s24 + $0xd0] sm:$0xff] %v381_v58  ;;  %v385_v60 = vld [vmem:[%s2562_s17 + $0x1c0] sm:$0xff]  ;;  %v387_v61 = vld [vmem:[%s2562_s17 + $0x1c8] sm:$0xff]  ;;  %384 = vst [vmem:[%s2567_s24 + $0xd8] sm:$0xff] %v383_v59 }
  0x38   : > { %386 = vst [vmem:[%s2567_s24 + $0xe0] sm:$0xff] %v385_v60  ;;  %388 = vst [vmem:[%s2567_s24 + $0xe8] sm:$0xff] %v387_v61  ;;  %v389_v62 = vld [vmem:[%s2562_s17 + $0x1e0] sm:$0xff]  ;;  %v391_v63 = vld [vmem:[%s2562_s17 + $0x1e8] sm:$0xff] }
  0x39   : > { %390 = vst [vmem:[%s2567_s24 + $0xf0] sm:$0xff] %v389_v62  ;;  %392 = vst [vmem:[%s2567_s24 + $0xf8] sm:$0xff] %v391_v63 }
  0x3a PF: > { %p1988_p8 = scmp.ge.s32.totalorder %s2400_s22, 1  ;;  %p405_p9 = scmp.lt.s32.totalorder %s2400_s22, 3 }
  0x3c   : > { %p406_p10 = pnand %p1988_p8, %p405_p9 }
  0x3d   : > { %s412_s25 = sand.u32 (!%p406_p10), 1, %s2384_s18   ;;  %v2402_v0 = vmov (!%p406_p10), 0   ;;  %v2298_v35 = vld [vmem:[%s2984_s1] sm:$0xff] (!%p406_p10)   ;;  %v2305_v44 = vld [vmem:[%s2984_s1 + $0x8] sm:$0xff] (!%p406_p10)   ;;  %v2312_v53 = vld [vmem:[%s2984_s1 + $0x10] sm:$0xff] (!%p406_p10)  }
  0x3e   : > { %409 = sbr.rel (%p406_p10) target bundleno = 445 (0x1bd), region = 78  ;;  %s2633_s26 = sshll.u32 (!%p406_p10), %s412_s25, 8  ;;  %821 = vmatprep.mubr.bf16.mxu0 (!%p406_p10), %v2402_v0  ;;  %934 = vmatprep.mubr.bf16.mxu1 (!%p406_p10), %v2402_v0  ;;  %v2319_v62 = vld [vmem:[%s2984_s1 + $0x18] sm:$0xff] (!%p406_p10)  }
  0x3f   : > { %s2638_s27 = scalar_lea.vmem (!%p406_p10), [#allocation3], %s2633_s26  ;;  %s2667_s18 = scalar_lea.vmem (!%p406_p10), [#allocation2], %s2633_s26 }
  0x40   : > { %v2250_v1 = vld [vmem:[%s2638_s27 + $0x4] ss:$16 sps:$4 sm:$0xff] (!%p406_p10)   ;;  %v2252_v2 = vld [vmem:[%s2638_s27 + $0xc] ss:$16 sps:$4 sm:$0xff] (!%p406_p10)   ;;  %v2254_v3 = vld [vmem:[%s2638_s27] ss:$16 sps:$4 sm:$0xff] (!%p406_p10)  }
  0x41   : > { %789 = vmatprep.subr.bf16.mxu0 (!%p406_p10), %v2250_v1  ;;  %v2255_v4 = vld [vmem:[%s2638_s27 + $0x8] ss:$16 sps:$4 sm:$0xff] (!%p406_p10)   ;;  %902 = vmatprep.subr.bf16.mxu1 (!%p406_p10), %v2252_v2  ;;  %v2256_v5 = vld [vmem:[%s2638_s27 + $0x24] ss:$16 sps:$4 sm:$0xff] (!%p406_p10)   ;;  %v2258_v6 = vld [vmem:[%s2638_s27 + $0x2c] ss:$16 sps:$4 sm:$0xff] (!%p406_p10)  }
  0x42   : > { %790 = vmatpush1.bf16.msra.mxu0 (!%p406_p10), %v2254_v3  ;;  %903 = vmatpush1.bf16.msra.mxu1 (!%p406_p10), %v2255_v4  ;;  %v2260_v7 = vld [vmem:[%s2638_s27 + $0x20] ss:$16 sps:$4 sm:$0xff] (!%p406_p10)   ;;  %v2261_v8 = vld [vmem:[%s2638_s27 + $0x28] ss:$16 sps:$4 sm:$0xff] (!%p406_p10)   ;;  %v2262_v9 = vld [vmem:[%s2638_s27 + $0x44] ss:$16 sps:$4 sm:$0xff] (!%p406_p10)  }
  0x43   : > { %791 = vmatprep.subr.bf16.mxu0 (!%p406_p10), %v2256_v5  ;;  %904 = vmatprep.subr.bf16.mxu1 (!%p406_p10), %v2258_v6  ;;  %v2264_v10 = vld [vmem:[%s2638_s27 + $0x4c] ss:$16 sps:$4 sm:$0xff] (!%p406_p10)   ;;  %v2266_v11 = vld [vmem:[%s2638_s27 + $0x40] ss:$16 sps:$4 sm:$0xff] (!%p406_p10)   ;;  %v2267_v12 = vld [vmem:[%s2638_s27 + $0x48] ss:$16 sps:$4 sm:$0xff] (!%p406_p10)  }
  0x44   : > { %v2268_v13 = vld [vmem:[%s2638_s27 + $0x64] ss:$16 sps:$4 sm:$0xff] (!%p406_p10)   ;;  %v2270_v14 = vld [vmem:[%s2638_s27 + $0x6c] ss:$16 sps:$4 sm:$0xff] (!%p406_p10)   ;;  %v2272_v15 = vld [vmem:[%s2638_s27 + $0x60] ss:$16 sps:$4 sm:$0xff] (!%p406_p10)  }
  0x45   : > { %v2273_v16 = vld [vmem:[%s2638_s27 + $0x68] ss:$16 sps:$4 sm:$0xff]   ;;  %v2274_v17 = vld [vmem:[%s2638_s27 + $0x84] ss:$16 sps:$4 sm:$0xff]   ;;  %v2276_v18 = vld [vmem:[%s2638_s27 + $0x8c] ss:$16 sps:$4 sm:$0xff]  }
  0x46   : > { %792 = vmatpush1.bf16.msra.mxu0 %v2260_v7  ;;  %905 = vmatpush1.bf16.msra.mxu1 %v2261_v8  ;;  %v2278_v19 = vld [vmem:[%s2638_s27 + $0x80] ss:$16 sps:$4 sm:$0xff]   ;;  %v2279_v20 = vld [vmem:[%s2638_s27 + $0x88] ss:$16 sps:$4 sm:$0xff]   ;;  %v2280_v21 = vld [vmem:[%s2638_s27 + $0xa4] ss:$16 sps:$4 sm:$0xff]  }
  0x47   : > { %793 = vmatprep.subr.bf16.mxu0 %v2262_v9  ;;  %906 = vmatprep.subr.bf16.mxu1 %v2264_v10  ;;  %v2282_v22 = vld [vmem:[%s2638_s27 + $0xac] ss:$16 sps:$4 sm:$0xff]   ;;  %v2284_v23 = vld [vmem:[%s2638_s27 + $0xa0] ss:$16 sps:$4 sm:$0xff]   ;;  %v2285_v24 = vld [vmem:[%s2638_s27 + $0xa8] ss:$16 sps:$4 sm:$0xff]  }
  0x48   : > { %v2286_v25 = vld [vmem:[%s2638_s27 + $0xc4] ss:$16 sps:$4 sm:$0xff]   ;;  %v2288_v26 = vld [vmem:[%s2638_s27 + $0xcc] ss:$16 sps:$4 sm:$0xff]   ;;  %v2290_v27 = vld [vmem:[%s2638_s27 + $0xc0] ss:$16 sps:$4 sm:$0xff]  }
  0x49   : > { %v2291_v28 = vld [vmem:[%s2638_s27 + $0xc8] ss:$16 sps:$4 sm:$0xff]   ;;  %v2292_v29 = vld [vmem:[%s2638_s27 + $0xe4] ss:$16 sps:$4 sm:$0xff]   ;;  %v2294_v30 = vld [vmem:[%s2638_s27 + $0xec] ss:$16 sps:$4 sm:$0xff]  }
  0x4a   : > { %794 = vmatpush1.bf16.msra.mxu0 %v2266_v11  ;;  %907 = vmatpush1.bf16.msra.mxu1 %v2267_v12  ;;  %v2296_v31 = vld [vmem:[%s2638_s27 + $0xe0] ss:$16 sps:$4 sm:$0xff]   ;;  %v2297_v32 = vld [vmem:[%s2638_s27 + $0xe8] ss:$16 sps:$4 sm:$0xff]   ;;  %v2301_v33 = vld [vmem:[%s2667_s18 + $0x4] ss:$16 sps:$4 sm:$0xff]  }
  0x4b   : > { %795 = vmatprep.subr.bf16.mxu0 %v2268_v13  ;;  %908 = vmatprep.subr.bf16.mxu1 %v2270_v14  ;;  %v2304_v34 = vld [vmem:[%s2667_s18 + $0xc] ss:$16 sps:$4 sm:$0xff]   ;;  %v2299_v36 = vld [vmem:[%s2667_s18] ss:$16 sps:$4 sm:$0xff]   ;;  %v2302_v37 = vld [vmem:[%s2667_s18 + $0x8] ss:$16 sps:$4 sm:$0xff]  }
  0x4c   : > { %v2308_v38 = vld [vmem:[%s2667_s18 + $0x24] ss:$16 sps:$4 sm:$0xff]   ;;  %v2311_v39 = vld [vmem:[%s2667_s18 + $0x2c] ss:$16 sps:$4 sm:$0xff]   ;;  %v2306_v40 = vld [vmem:[%s2667_s18 + $0x20] ss:$16 sps:$4 sm:$0xff]  }
  0x4d   : > { %v2309_v41 = vld [vmem:[%s2667_s18 + $0x28] ss:$16 sps:$4 sm:$0xff]   ;;  %v2315_v42 = vld [vmem:[%s2667_s18 + $0x44] ss:$16 sps:$4 sm:$0xff]   ;;  %v2318_v43 = vld [vmem:[%s2667_s18 + $0x4c] ss:$16 sps:$4 sm:$0xff]  }
  0x4e   : > { %796 = vmatpush1.bf16.msra.mxu0 %v2272_v15  ;;  %909 = vmatpush1.bf16.msra.mxu1 %v2273_v16  ;;  %v2313_v45 = vld [vmem:[%s2667_s18 + $0x40] ss:$16 sps:$4 sm:$0xff]   ;;  %v2316_v46 = vld [vmem:[%s2667_s18 + $0x48] ss:$16 sps:$4 sm:$0xff]   ;;  %v2322_v47 = vld [vmem:[%s2667_s18 + $0x64] ss:$16 sps:$4 sm:$0xff]  }
  0x4f   : > { %797 = vmatprep.subr.bf16.mxu0 %v2274_v17  ;;  %910 = vmatprep.subr.bf16.mxu1 %v2276_v18  ;;  %v2325_v48 = vld [vmem:[%s2667_s18 + $0x6c] ss:$16 sps:$4 sm:$0xff]   ;;  %v2320_v49 = vld [vmem:[%s2667_s18 + $0x60] ss:$16 sps:$4 sm:$0xff]   ;;  %v2323_v50 = vld [vmem:[%s2667_s18 + $0x68] ss:$16 sps:$4 sm:$0xff]   ;;  %v1451_v18 = vlaneseq }
  0x50   : > { %v2329_v51 = vld [vmem:[%s2667_s18 + $0x84] ss:$16 sps:$4 sm:$0xff]   ;;  %v2332_v52 = vld [vmem:[%s2667_s18 + $0x8c] ss:$16 sps:$4 sm:$0xff]   ;;  %v2327_v54 = vld [vmem:[%s2667_s18 + $0x80] ss:$16 sps:$4 sm:$0xff]  }
  0x51   : > { %v2330_v55 = vld [vmem:[%s2667_s18 + $0x88] ss:$16 sps:$4 sm:$0xff]   ;;  %v2336_v56 = vld [vmem:[%s2667_s18 + $0xa4] ss:$16 sps:$4 sm:$0xff]   ;;  %v2339_v57 = vld [vmem:[%s2667_s18 + $0xac] ss:$16 sps:$4 sm:$0xff]  }
  0x52   : > { %798 = vmatpush1.bf16.msra.mxu0 %v2278_v19  ;;  %911 = vmatpush1.bf16.msra.mxu1 %v2279_v20  ;;  %v2334_v58 = vld [vmem:[%s2667_s18 + $0xa0] ss:$16 sps:$4 sm:$0xff]   ;;  %v2337_v59 = vld [vmem:[%s2667_s18 + $0xa8] ss:$16 sps:$4 sm:$0xff]   ;;  %v2343_v60 = vld [vmem:[%s2667_s18 + $0xc4] ss:$16 sps:$4 sm:$0xff]  }
  0x53   : > { %799 = vmatprep.subr.bf16.mxu0 %v2280_v21  ;;  %912 = vmatprep.subr.bf16.mxu1 %v2282_v22  ;;  %v2346_v61 = vld [vmem:[%s2667_s18 + $0xcc] ss:$16 sps:$4 sm:$0xff]   ;;  %v2341_v63 = vld [vmem:[%s2667_s18 + $0xc0] ss:$16 sps:$4 sm:$0xff]   ;;  %v2344_v1 = vld [vmem:[%s2667_s18 + $0xc8] ss:$16 sps:$4 sm:$0xff]  }
  0x54   : > { %v2350_v2 = vld [vmem:[%s2667_s18 + $0xe4] ss:$16 sps:$4 sm:$0xff]   ;;  %v2353_v3 = vld [vmem:[%s2667_s18 + $0xec] ss:$16 sps:$4 sm:$0xff]   ;;  %v2348_v4 = vld [vmem:[%s2667_s18 + $0xe0] ss:$16 sps:$4 sm:$0xff]  }
  0x55   : > { %v2351_v5 = vld [vmem:[%s2667_s18 + $0xe8] ss:$16 sps:$4 sm:$0xff]   ;;  %v2326_v6 = vld [vmem:[%s2984_s1 + $0x20] sm:$0xff]   ;;  %v2340_v8 = vld [vmem:[%s2984_s1 + $0x30] sm:$0xff]   ;;  %s1992_s27 = sshll.u32 %s2392_s20, 2  ;;  %v1452_v19 = vshrl.u32 %v1451_v18, 7 }
  0x56   : > { %800 = vmatpush1.bf16.msra.mxu0 %v2284_v23  ;;  %913 = vmatpush1.bf16.msra.mxu1 %v2285_v24  ;;  %v2333_v7 = vld [vmem:[%s2984_s1 + $0x28] sm:$0xff]   ;;  %v2347_v9 = vld [vmem:[%s2984_s1 + $0x38] sm:$0xff]   ;;  %v2354_v10 = vld [vmem:[%s2983_s0] sm:$0xff]   ;;  %p478_p11 = scmp.lt.s32.totalorder %s1992_s27, 7  ;;  %s2806_s7 = scalar_lea.vmem [#allocation4], %s2633_s26 }
  0x57   : > { %801 = vmatprep.subr.bf16.mxu0 %v2286_v25  ;;  %914 = vmatprep.subr.bf16.mxu1 %v2288_v26  ;;  %v2355_v11 = vld [vmem:[%s2983_s0 + $0x8] sm:$0xff]   ;;  %v2356_v12 = vld [vmem:[%s2983_s0 + $0x10] sm:$0xff]   ;;  %v2357_v13 = vld [vmem:[%s2983_s0 + $0x18] sm:$0xff]   ;;  %v1453_v20 = vsub.s32 0, %v1452_v19  ;;  %v1461_v21 = vsub.s32 2, %v1452_v19  ;;  %v1457_v23 = vsub.s32 1, %v1452_v19 }
  0x58   : > { %v2358_v14 = vld [vmem:[%s2983_s0 + $0x20] sm:$0xff]   ;;  %v2359_v15 = vld [vmem:[%s2983_s0 + $0x28] sm:$0xff]   ;;  %v2360_v16 = vld [vmem:[%s2983_s0 + $0x30] sm:$0xff]   ;;  %s2998_s27 = smov (!%p478_p11, %s1992_s27), 7  ;;  %s2144_s26 = sshll.u32 (%p2472_p6), %s2392_s20, 4 }
  0x59   : > { %v2361_v17 = vld [vmem:[%s2983_s0 + $0x38] sm:$0xff]   ;;  %s480_s6 = scalar_lea.vmem %s2987_s4, %s2998_s27  ;;  %s2905_s10 = scalar_lea.vmem (%p2472_p6), %s2988_s5, %s2144_s26 }
  0x5a   : > { %802 = vmatpush1.bf16.msra.mxu0 %v2290_v27  ;;  %915 = vmatpush1.bf16.msra.mxu1 %v2291_v28  ;;  %v1449_v22 = vld [vmem:[%s480_s6] sm:$0xf] }
  0x5b   : > { %803 = vmatprep.subr.bf16.mxu0 %v2292_v29  ;;  %916 = vmatprep.subr.bf16.mxu1 %v2294_v30  ;;  %v2789_v24 = vrot.slane %v1449_v22, %v1453_v20  ;;  %v2791_v25 = vrot.slane %v1449_v22, %v1461_v21  ;;  %v2793_v26 = vrot.slane %v1449_v22, %v1457_v23 }
  0x5e   : > { %804 = vmatpush1.bf16.msra.mxu0 %v2296_v31  ;;  %917 = vmatpush1.bf16.msra.mxu1 %v2297_v32 }
  0x5f   : > { %1223 = vmatprep.subr.bf16.mxu0 %v2301_v33  ;;  %1336 = vmatprep.subr.bf16.mxu1 %v2304_v34 }
  0x61   : > { %822 = vmatmul.mubr.bf16.vlgmr.msra.gmra.mrb[0].mxu0 %v2298_v35  ;;  %935 = vmatmul.mubr.bf16.vlgmr.msra.gmra.mrb[0].mxu1 %v2298_v35 }
  0x62   : > { %1224 = vmatpush1.bf16.msra.mxu0 %v2299_v36  ;;  %1337 = vmatpush1.bf16.msra.mxu1 %v2302_v37 }
  0x63   : > { %831 = vmatprep.mubr.bf16.mxu0 %v2402_v0  ;;  %944 = vmatprep.mubr.bf16.mxu1 %v2402_v0 }
  0x64   : > { %1225 = vmatprep.subr.bf16.mxu0 %v2308_v38  ;;  %1338 = vmatprep.subr.bf16.mxu1 %v2311_v39 }
  0x66   : > { %1226 = vmatpush1.bf16.msra.mxu0 %v2306_v40  ;;  %1339 = vmatpush1.bf16.msra.mxu1 %v2309_v41 }
  0x67   : > { %1227 = vmatprep.subr.bf16.mxu0 %v2315_v42  ;;  %1340 = vmatprep.subr.bf16.mxu1 %v2318_v43 }
  0x69   : > { %832 = vmatmul.mubr.bf16.gmra.mrb[4].mxu0 %v2305_v44  ;;  %945 = vmatmul.mubr.bf16.gmra.mrb[4].mxu1 %v2305_v44 }
  0x6a   : > { %841 = vmatprep.mubr.bf16.mxu0 %v2402_v0  ;;  %954 = vmatprep.mubr.bf16.mxu1 %v2402_v0 }
  0x6b   : > { %1228 = vmatpush1.bf16.msra.mxu0 %v2313_v45  ;;  %1341 = vmatpush1.bf16.msra.mxu1 %v2316_v46 }
  0x6c   : > { %1229 = vmatprep.subr.bf16.mxu0 %v2322_v47  ;;  %1342 = vmatprep.subr.bf16.mxu1 %v2325_v48 }
  0x6f   : > { %1230 = vmatpush1.bf16.msra.mxu0 %v2320_v49  ;;  %1343 = vmatpush1.bf16.msra.mxu1 %v2323_v50 }
  0x70   : > { %1231 = vmatprep.subr.bf16.mxu0 %v2329_v51  ;;  %1344 = vmatprep.subr.bf16.mxu1 %v2332_v52 }
  0x71   : > { %842 = vmatmul.mubr.bf16.gmra.mrb[8].mxu0 %v2312_v53  ;;  %955 = vmatmul.mubr.bf16.gmra.mrb[8].mxu1 %v2312_v53 }
  0x72   : > { %851 = vmatprep.mubr.bf16.mxu0 %v2402_v0  ;;  %964 = vmatprep.mubr.bf16.mxu1 %v2402_v0 }
  0x73   : > { %1232 = vmatpush1.bf16.msra.mxu0 %v2327_v54  ;;  %1345 = vmatpush1.bf16.msra.mxu1 %v2330_v55 }
  0x74   : > { %1233 = vmatprep.subr.bf16.mxu0 %v2336_v56  ;;  %1346 = vmatprep.subr.bf16.mxu1 %v2339_v57 }
  0x77   : > { %1234 = vmatpush1.bf16.msra.mxu0 %v2334_v58  ;;  %1347 = vmatpush1.bf16.msra.mxu1 %v2337_v59 }
  0x78   : > { %1235 = vmatprep.subr.bf16.mxu0 %v2343_v60  ;;  %1348 = vmatprep.subr.bf16.mxu1 %v2346_v61 }
  0x79   : > { %852 = vmatmul.mubr.bf16.gmra.mrb[12].mxu0 %v2319_v62  ;;  %965 = vmatmul.mubr.bf16.gmra.mrb[12].mxu1 %v2319_v62 }
  0x7a   : > { %861 = vmatprep.mubr.bf16.mxu0 %v2402_v0  ;;  %974 = vmatprep.mubr.bf16.mxu1 %v2402_v0 }
  0x7b   : > { %1236 = vmatpush1.bf16.msra.mxu0 %v2341_v63  ;;  %1349 = vmatpush1.bf16.msra.mxu1 %v2344_v1 }
  0x7c   : > { %1237 = vmatprep.subr.bf16.mxu0 %v2350_v2  ;;  %1350 = vmatprep.subr.bf16.mxu1 %v2353_v3 }
  0x7f   : > { %1238 = vmatpush1.bf16.msra.mxu0 %v2348_v4  ;;  %1351 = vmatpush1.bf16.msra.mxu1 %v2351_v5 }
  0x81   : > { %862 = vmatmul.mubr.bf16.gmra.mrb[16].mxu0 %v2326_v6  ;;  %975 = vmatmul.mubr.bf16.gmra.mrb[16].mxu1 %v2326_v6 }
  0x82   : > { %871 = vmatprep.mubr.bf16.mxu0 %v2402_v0  ;;  %984 = vmatprep.mubr.bf16.mxu1 %v2402_v0 }
  0x89   : > { %872 = vmatmul.mubr.bf16.gmra.mrb[20].mxu0 %v2333_v7  ;;  %985 = vmatmul.mubr.bf16.gmra.mrb[20].mxu1 %v2333_v7 }
  0x8a   : > { %881 = vmatprep.mubr.bf16.mxu0 %v2402_v0  ;;  %994 = vmatprep.mubr.bf16.mxu1 %v2402_v0 }
  0x91   : > { %882 = vmatmul.mubr.bf16.gmra.mrb[24].mxu0 %v2340_v8  ;;  %995 = vmatmul.mubr.bf16.gmra.mrb[24].mxu1 %v2340_v8 }
  0x92   : > { %891 = vmatprep.mubr.bf16.mxu0 %v2402_v0  ;;  %1004 = vmatprep.mubr.bf16.mxu1 %v2402_v0 }
  0x99   : > { %892 = vmatmul.mubr.bf16.gmra.mrb[28].mxu0 %v2347_v9  ;;  %1005 = vmatmul.mubr.bf16.gmra.mrb[28].mxu1 %v2347_v9 }
  0x9a   : > { %1255 = vmatprep.mubr.bf16.mxu0 %v2402_v0  ;;  %1368 = vmatprep.mubr.bf16.mxu1 %v2402_v0 }
  0xa1   : > { %1256 = vmatmul.mubr.bf16.vlgmr.msra.gmra.mrb[0].mxu0 %v2354_v10  ;;  %1369 = vmatmul.mubr.bf16.vlgmr.msra.gmra.mrb[0].mxu1 %v2354_v10 }
  0xa2   : > { %1265 = vmatprep.mubr.bf16.mxu0 %v2402_v0  ;;  %1378 = vmatprep.mubr.bf16.mxu1 %v2402_v0 }
  0xa9   : > { %1266 = vmatmul.mubr.bf16.gmra.mrb[4].mxu0 %v2355_v11  ;;  %1379 = vmatmul.mubr.bf16.gmra.mrb[4].mxu1 %v2355_v11 }
  0xaa   : > { %1275 = vmatprep.mubr.bf16.mxu0 %v2402_v0  ;;  %1388 = vmatprep.mubr.bf16.mxu1 %v2402_v0 }
  0xb1   : > { %1276 = vmatmul.mubr.bf16.gmra.mrb[8].mxu0 %v2356_v12  ;;  %1389 = vmatmul.mubr.bf16.gmra.mrb[8].mxu1 %v2356_v12 }
  0xb2   : > { %1285 = vmatprep.mubr.bf16.mxu0 %v2402_v0  ;;  %1398 = vmatprep.mubr.bf16.mxu1 %v2402_v0 }
  0xb9   : > { %1286 = vmatmul.mubr.bf16.gmra.mrb[12].mxu0 %v2357_v13  ;;  %1399 = vmatmul.mubr.bf16.gmra.mrb[12].mxu1 %v2357_v13 }
  0xba   : > { %1295 = vmatprep.mubr.bf16.mxu0 %v2402_v0  ;;  %1408 = vmatprep.mubr.bf16.mxu1 %v2402_v0 }
  0xc1   : > { %1296 = vmatmul.mubr.bf16.gmra.mrb[16].mxu0 %v2358_v14  ;;  %1409 = vmatmul.mubr.bf16.gmra.mrb[16].mxu1 %v2358_v14 }
  0xc2   : > { %1305 = vmatprep.mubr.bf16.mxu0 %v2402_v0  ;;  %1418 = vmatprep.mubr.bf16.mxu1 %v2402_v0 }
  0xc9   : > { %1306 = vmatmul.mubr.bf16.gmra.mrb[20].mxu0 %v2359_v15  ;;  %1419 = vmatmul.mubr.bf16.gmra.mrb[20].mxu1 %v2359_v15 }
  0xca   : > { %1315 = vmatprep.mubr.bf16.mxu0 %v2402_v0  ;;  %1428 = vmatprep.mubr.bf16.mxu1 %v2402_v0 }
  0xd1   : > { %1316 = vmatmul.mubr.bf16.gmra.mrb[24].mxu0 %v2360_v16  ;;  %1429 = vmatmul.mubr.bf16.gmra.mrb[24].mxu1 %v2360_v16 }
  0xd2   : > { %1325 = vmatprep.mubr.bf16.mxu0 %v2402_v0  ;;  %1438 = vmatprep.mubr.bf16.mxu1 %v2402_v0  ;;  %v1465_v0 = vsub.s32 3, %v1452_v19 }
  0xd4   : > { %v2795_v27 = vrot.slane %v1449_v22, %v1465_v0 }
  0xd9   : > { %1326 = vmatmul.mubr.bf16.gmra.mrb[28].mxu0 %v2361_v17  ;;  %1439 = vmatmul.mubr.bf16.gmra.mrb[28].mxu1 %v2361_v17 }
 0x174   : > { %v1257_v28 = vpop.f32.mrb[0].mxu0  ;;  %v1370_v29 = vpop.f32.mrb[0].mxu1 }
 0x175   : > { %v1471_v30 = vadd.f32 %v2789_v24, %v1257_v28  ;;  %v1473_v31 = vadd.f32 %v2791_v25, %v1370_v29  ;;  %v1259_v32 = vpop.f32.mrb[1].mxu0  ;;  %v1372_v33 = vpop.f32.mrb[1].mxu1 }
 0x176   : > { %v1472_v34 = vadd.f32 %v2793_v26, %v1259_v32  ;;  %v1474_v35 = vadd.f32 %v2795_v27, %v1372_v33  ;;  %v1261_v36 = vpop.f32.mrb[2].mxu0  ;;  %v1374_v37 = vpop.f32.mrb[2].mxu1 }
 0x177   : > { %v1475_v38 = vadd.f32 %v2789_v24, %v1261_v36  ;;  %v1477_v39 = vadd.f32 %v2791_v25, %v1374_v37  ;;  %v1263_v40 = vpop.f32.mrb[3].mxu0  ;;  %v1376_v41 = vpop.f32.mrb[3].mxu1 }
 0x178   : > { %v2112_v42 = vpack.c.bf16 %v1472_v34, %v1471_v30  ;;  %v2113_v43 = vpack.c.bf16 %v1474_v35, %v1473_v31  ;;  %v1476_v44 = vadd.f32 %v2793_v26, %v1263_v40  ;;  %v1478_v45 = vadd.f32 %v2795_v27, %v1376_v41 }
 0x17a   : > { %1727 = vst [vmem:[%s2806_s7] sm:$0xff] %v2112_v42  ;;  %1728 = vst [vmem:[%s2806_s7 + $0x8] sm:$0xff] %v2113_v43  ;;  %v2114_v46 = vpack.c.bf16 %v1476_v44, %v1475_v38  ;;  %v2115_v47 = vpack.c.bf16 %v1478_v45, %v1477_v39 }
 0x17c   : > { %1729 = vst [vmem:[%s2806_s7 + $0x10] sm:$0xff] %v2114_v46  ;;  %1730 = vst [vmem:[%s2806_s7 + $0x18] sm:$0xff] %v2115_v47  ;;  %v1267_v48 = vpop.f32.mrb[4].mxu0  ;;  %v1380_v49 = vpop.f32.mrb[4].mxu1 }
 0x17d   : > { %v1479_v50 = vadd.f32 %v2789_v24, %v1267_v48  ;;  %v1481_v51 = vadd.f32 %v2791_v25, %v1380_v49  ;;  %v1269_v52 = vpop.f32.mrb[5].mxu0  ;;  %v1382_v53 = vpop.f32.mrb[5].mxu1 }
 0x17e   : > { %v1480_v54 = vadd.f32 %v2793_v26, %v1269_v52  ;;  %v1482_v55 = vadd.f32 %v2795_v27, %v1382_v53  ;;  %v1271_v56 = vpop.f32.mrb[6].mxu0  ;;  %v1384_v57 = vpop.f32.mrb[6].mxu1 }
 0x17f   : > { %v1483_v58 = vadd.f32 %v2789_v24, %v1271_v56  ;;  %v1485_v59 = vadd.f32 %v2791_v25, %v1384_v57  ;;  %v1273_v60 = vpop.f32.mrb[7].mxu0  ;;  %v1386_v61 = vpop.f32.mrb[7].mxu1 }
 0x180   : > { %v2116_v62 = vpack.c.bf16 %v1480_v54, %v1479_v50  ;;  %v2117_v63 = vpack.c.bf16 %v1482_v55, %v1481_v51  ;;  %v1484_v1 = vadd.f32 %v2793_v26, %v1273_v60  ;;  %v1486_v2 = vadd.f32 %v2795_v27, %v1386_v61 }
 0x182   : > { %1731 = vst [vmem:[%s2806_s7 + $0x20] sm:$0xff] %v2116_v62  ;;  %1732 = vst [vmem:[%s2806_s7 + $0x28] sm:$0xff] %v2117_v63  ;;  %v2118_v3 = vpack.c.bf16 %v1484_v1, %v1483_v58  ;;  %v2119_v4 = vpack.c.bf16 %v1486_v2, %v1485_v59 }
 0x184   : > { %1733 = vst [vmem:[%s2806_s7 + $0x30] sm:$0xff] %v2118_v3  ;;  %1734 = vst [vmem:[%s2806_s7 + $0x38] sm:$0xff] %v2119_v4  ;;  %v1277_v5 = vpop.f32.mrb[8].mxu0  ;;  %v1390_v6 = vpop.f32.mrb[8].mxu1 }
 0x185   : > { %v1487_v7 = vadd.f32 %v2789_v24, %v1277_v5  ;;  %v1489_v8 = vadd.f32 %v2791_v25, %v1390_v6  ;;  %v1279_v9 = vpop.f32.mrb[9].mxu0  ;;  %v1392_v10 = vpop.f32.mrb[9].mxu1 }
 0x186   : > { %v1488_v11 = vadd.f32 %v2793_v26, %v1279_v9  ;;  %v1490_v12 = vadd.f32 %v2795_v27, %v1392_v10  ;;  %v1281_v13 = vpop.f32.mrb[10].mxu0  ;;  %v1394_v14 = vpop.f32.mrb[10].mxu1 }
 0x187   : > { %v1491_v15 = vadd.f32 %v2789_v24, %v1281_v13  ;;  %v1493_v16 = vadd.f32 %v2791_v25, %v1394_v14  ;;  %v1283_v17 = vpop.f32.mrb[11].mxu0  ;;  %v1396_v18 = vpop.f32.mrb[11].mxu1 }
 0x188   : > { %v2120_v19 = vpack.c.bf16 %v1488_v11, %v1487_v7  ;;  %v2121_v20 = vpack.c.bf16 %v1490_v12, %v1489_v8  ;;  %v1492_v21 = vadd.f32 %v2793_v26, %v1283_v17  ;;  %v1494_v22 = vadd.f32 %v2795_v27, %v1396_v18 }
 0x18a   : > { %1735 = vst [vmem:[%s2806_s7 + $0x40] sm:$0xff] %v2120_v19  ;;  %1736 = vst [vmem:[%s2806_s7 + $0x48] sm:$0xff] %v2121_v20  ;;  %v2122_v23 = vpack.c.bf16 %v1492_v21, %v1491_v15  ;;  %v2123_v0 = vpack.c.bf16 %v1494_v22, %v1493_v16 }
 0x18c   : > { %1737 = vst [vmem:[%s2806_s7 + $0x50] sm:$0xff] %v2122_v23  ;;  %1738 = vst [vmem:[%s2806_s7 + $0x58] sm:$0xff] %v2123_v0  ;;  %v1287_v28 = vpop.f32.mrb[12].mxu0  ;;  %v1400_v29 = vpop.f32.mrb[12].mxu1 }
 0x18d   : > { %v1495_v30 = vadd.f32 %v2789_v24, %v1287_v28  ;;  %v1497_v31 = vadd.f32 %v2791_v25, %v1400_v29  ;;  %v1289_v32 = vpop.f32.mrb[13].mxu0  ;;  %v1402_v33 = vpop.f32.mrb[13].mxu1 }
 0x18e   : > { %v1496_v34 = vadd.f32 %v2793_v26, %v1289_v32  ;;  %v1498_v35 = vadd.f32 %v2795_v27, %v1402_v33  ;;  %v1291_v36 = vpop.f32.mrb[14].mxu0  ;;  %v1404_v37 = vpop.f32.mrb[14].mxu1 }
 0x18f   : > { %v1499_v38 = vadd.f32 %v2789_v24, %v1291_v36  ;;  %v1501_v39 = vadd.f32 %v2791_v25, %v1404_v37  ;;  %v1293_v40 = vpop.f32.mrb[15].mxu0  ;;  %v1406_v41 = vpop.f32.mrb[15].mxu1 }
 0x190   : > { %v2124_v42 = vpack.c.bf16 %v1496_v34, %v1495_v30  ;;  %v2125_v43 = vpack.c.bf16 %v1498_v35, %v1497_v31  ;;  %v1500_v44 = vadd.f32 %v2793_v26, %v1293_v40  ;;  %v1502_v45 = vadd.f32 %v2795_v27, %v1406_v41 }
 0x192   : > { %1739 = vst [vmem:[%s2806_s7 + $0x60] sm:$0xff] %v2124_v42  ;;  %1740 = vst [vmem:[%s2806_s7 + $0x68] sm:$0xff] %v2125_v43  ;;  %v2126_v46 = vpack.c.bf16 %v1500_v44, %v1499_v38  ;;  %v2127_v47 = vpack.c.bf16 %v1502_v45, %v1501_v39 }
 0x194   : > { %1741 = vst [vmem:[%s2806_s7 + $0x70] sm:$0xff] %v2126_v46  ;;  %1742 = vst [vmem:[%s2806_s7 + $0x78] sm:$0xff] %v2127_v47  ;;  %v1297_v48 = vpop.f32.mrb[16].mxu0  ;;  %v1410_v49 = vpop.f32.mrb[16].mxu1 }
 0x195   : > { %v1503_v50 = vadd.f32 %v2789_v24, %v1297_v48  ;;  %v1505_v51 = vadd.f32 %v2791_v25, %v1410_v49  ;;  %v1299_v52 = vpop.f32.mrb[17].mxu0  ;;  %v1412_v53 = vpop.f32.mrb[17].mxu1 }
 0x196   : > { %v1504_v54 = vadd.f32 %v2793_v26, %v1299_v52  ;;  %v1506_v55 = vadd.f32 %v2795_v27, %v1412_v53  ;;  %v1301_v56 = vpop.f32.mrb[18].mxu0  ;;  %v1414_v57 = vpop.f32.mrb[18].mxu1 }
 0x197   : > { %v1507_v58 = vadd.f32 %v2789_v24, %v1301_v56  ;;  %v1509_v59 = vadd.f32 %v2791_v25, %v1414_v57  ;;  %v1303_v60 = vpop.f32.mrb[19].mxu0  ;;  %v1416_v61 = vpop.f32.mrb[19].mxu1 }
 0x198   : > { %v2128_v62 = vpack.c.bf16 %v1504_v54, %v1503_v50  ;;  %v2129_v63 = vpack.c.bf16 %v1506_v55, %v1505_v51  ;;  %v1508_v1 = vadd.f32 %v2793_v26, %v1303_v60  ;;  %v1510_v2 = vadd.f32 %v2795_v27, %v1416_v61 }
 0x19a   : > { %1743 = vst [vmem:[%s2806_s7 + $0x80] sm:$0xff] %v2128_v62  ;;  %1744 = vst [vmem:[%s2806_s7 + $0x88] sm:$0xff] %v2129_v63  ;;  %v2130_v3 = vpack.c.bf16 %v1508_v1, %v1507_v58  ;;  %v2131_v4 = vpack.c.bf16 %v1510_v2, %v1509_v59 }
 0x19c   : > { %1745 = vst [vmem:[%s2806_s7 + $0x90] sm:$0xff] %v2130_v3  ;;  %1746 = vst [vmem:[%s2806_s7 + $0x98] sm:$0xff] %v2131_v4  ;;  %v1307_v5 = vpop.f32.mrb[20].mxu0  ;;  %v1420_v6 = vpop.f32.mrb[20].mxu1 }
 0x19d   : > { %v1511_v7 = vadd.f32 %v2789_v24, %v1307_v5  ;;  %v1513_v8 = vadd.f32 %v2791_v25, %v1420_v6  ;;  %v1309_v9 = vpop.f32.mrb[21].mxu0  ;;  %v1422_v10 = vpop.f32.mrb[21].mxu1  ;;  %v1792_v5 = vld [vmem:[%s2806_s7 + $0x20] sm:$0xff] (%p2472_p6)  ;;  %v1794_v6 = vld [vmem:[%s2806_s7 + $0x28] sm:$0xff] (%p2472_p6) }
 0x19e   : > { %v1512_v11 = vadd.f32 %v2793_v26, %v1309_v9  ;;  %v1514_v12 = vadd.f32 %v2795_v27, %v1422_v10  ;;  %v1311_v13 = vpop.f32.mrb[22].mxu0  ;;  %v1424_v14 = vpop.f32.mrb[22].mxu1  ;;  %1793 = vst [vmem:[%s2905_s10 + $0x40] sm:$0xff] (%p2472_p6), %v1792_v5  ;;  %1795 = vst [vmem:[%s2905_s10 + $0x48] sm:$0xff] (%p2472_p6), %v1794_v6  ;;  %v1800_v9 = vld [vmem:[%s2806_s7 + $0x40] sm:$0xff] (%p2472_p6)  ;;  %v1802_v10 = vld [vmem:[%s2806_s7 + $0x48] sm:$0xff] (%p2472_p6) }
 0x19f   : > { %v1515_v15 = vadd.f32 %v2789_v24, %v1311_v13  ;;  %v1517_v16 = vadd.f32 %v2791_v25, %v1424_v14  ;;  %v1313_v17 = vpop.f32.mrb[23].mxu0  ;;  %v1426_v18 = vpop.f32.mrb[23].mxu1  ;;  %1801 = vst [vmem:[%s2905_s10 + $0x80] sm:$0xff] (%p2472_p6), %v1800_v9  ;;  %1803 = vst [vmem:[%s2905_s10 + $0x88] sm:$0xff] (%p2472_p6), %v1802_v10  ;;  %v1808_v13 = vld [vmem:[%s2806_s7 + $0x60] sm:$0xff] (%p2472_p6)  ;;  %v1810_v14 = vld [vmem:[%s2806_s7 + $0x68] sm:$0xff] (%p2472_p6) }
 0x1a0   : > { %v2132_v19 = vpack.c.bf16 %v1512_v11, %v1511_v7  ;;  %v2133_v20 = vpack.c.bf16 %v1514_v12, %v1513_v8  ;;  %v1516_v21 = vadd.f32 %v2793_v26, %v1313_v17  ;;  %v1518_v22 = vadd.f32 %v2795_v27, %v1426_v18  ;;  %v1796_v7 = vld [vmem:[%s2806_s7 + $0x30] sm:$0xff] (%p2472_p6)  ;;  %v1798_v8 = vld [vmem:[%s2806_s7 + $0x38] sm:$0xff] (%p2472_p6)  ;;  %1809 = vst [vmem:[%s2905_s10 + $0xc0] sm:$0xff] (%p2472_p6), %v1808_v13 }
 0x1a1   : > { %1797 = vst [vmem:[%s2905_s10 + $0x60] sm:$0xff] (%p2472_p6), %v1796_v7  ;;  %1799 = vst [vmem:[%s2905_s10 + $0x68] sm:$0xff] (%p2472_p6), %v1798_v8  ;;  %v1804_v11 = vld [vmem:[%s2806_s7 + $0x50] sm:$0xff] (%p2472_p6)  ;;  %v1806_v12 = vld [vmem:[%s2806_s7 + $0x58] sm:$0xff] (%p2472_p6) }
 0x1a2   : > { %1747 = vst [vmem:[%s2806_s7 + $0xa0] sm:$0xff] %v2132_v19  ;;  %1748 = vst [vmem:[%s2806_s7 + $0xa8] sm:$0xff] %v2133_v20  ;;  %v2134_v23 = vpack.c.bf16 %v1516_v21, %v1515_v15  ;;  %v2135_v0 = vpack.c.bf16 %v1518_v22, %v1517_v16  ;;  %v1812_v15 = vld [vmem:[%s2806_s7 + $0x70] sm:$0xff] (%p2472_p6)  ;;  %v1814_v16 = vld [vmem:[%s2806_s7 + $0x78] sm:$0xff] (%p2472_p6) }
 0x1a3   : > { %1805 = vst [vmem:[%s2905_s10 + $0xa0] sm:$0xff] (%p2472_p6), %v1804_v11  ;;  %1807 = vst [vmem:[%s2905_s10 + $0xa8] sm:$0xff] (%p2472_p6), %v1806_v12  ;;  %v1816_v17 = vld [vmem:[%s2806_s7 + $0x80] sm:$0xff] (%p2472_p6)  ;;  %v1818_v18 = vld [vmem:[%s2806_s7 + $0x88] sm:$0xff] (%p2472_p6) }
 0x1a4   : > { %1749 = vst [vmem:[%s2806_s7 + $0xb0] sm:$0xff] %v2134_v23  ;;  %1750 = vst [vmem:[%s2806_s7 + $0xb8] sm:$0xff] %v2135_v0  ;;  %v1317_v28 = vpop.f32.mrb[24].mxu0  ;;  %v1430_v29 = vpop.f32.mrb[24].mxu1  ;;  %v1820_v19 = vld [vmem:[%s2806_s7 + $0x90] sm:$0xff] (%p2472_p6)  ;;  %v1822_v20 = vld [vmem:[%s2806_s7 + $0x98] sm:$0xff] (%p2472_p6) }
 0x1a5   : > { %v1519_v30 = vadd.f32 %v2789_v24, %v1317_v28  ;;  %v1521_v31 = vadd.f32 %v2791_v25, %v1430_v29  ;;  %v1319_v32 = vpop.f32.mrb[25].mxu0  ;;  %v1432_v33 = vpop.f32.mrb[25].mxu1  ;;  %1811 = vst [vmem:[%s2905_s10 + $0xc8] sm:$0xff] (%p2472_p6), %v1810_v14  ;;  %1813 = vst [vmem:[%s2905_s10 + $0xe0] sm:$0xff] (%p2472_p6), %v1812_v15 }
 0x1a6   : > { %v1520_v34 = vadd.f32 %v2793_v26, %v1319_v32  ;;  %v1522_v35 = vadd.f32 %v2795_v27, %v1432_v33  ;;  %v1321_v36 = vpop.f32.mrb[26].mxu0  ;;  %v1434_v37 = vpop.f32.mrb[26].mxu1  ;;  %1815 = vst [vmem:[%s2905_s10 + $0xe8] sm:$0xff] (%p2472_p6), %v1814_v16  ;;  %1817 = vst [vmem:[%s2905_s10 + $0x100] sm:$0xff] (%p2472_p6), %v1816_v17 }
 0x1a7   : > { %v1523_v38 = vadd.f32 %v2789_v24, %v1321_v36  ;;  %v1525_v39 = vadd.f32 %v2791_v25, %v1434_v37  ;;  %v1323_v40 = vpop.f32.mrb[27].mxu0  ;;  %v1436_v41 = vpop.f32.mrb[27].mxu1  ;;  %1819 = vst [vmem:[%s2905_s10 + $0x108] sm:$0xff] (%p2472_p6), %v1818_v18  ;;  %1821 = vst [vmem:[%s2905_s10 + $0x120] sm:$0xff] (%p2472_p6), %v1820_v19 }
 0x1a8   : > { %v2136_v42 = vpack.c.bf16 %v1520_v34, %v1519_v30  ;;  %v2137_v43 = vpack.c.bf16 %v1522_v35, %v1521_v31  ;;  %v1524_v44 = vadd.f32 %v2793_v26, %v1323_v40  ;;  %v1526_v45 = vadd.f32 %v2795_v27, %v1436_v41  ;;  %1823 = vst [vmem:[%s2905_s10 + $0x128] sm:$0xff] (%p2472_p6), %v1822_v20 }
 0x1a9   : > { %v1824_v21 = vld [vmem:[%s2806_s7 + $0xa0] sm:$0xff] (%p2472_p6)  ;;  %v1826_v22 = vld [vmem:[%s2806_s7 + $0xa8] sm:$0xff] (%p2472_p6) }
 0x1aa   : > { %1751 = vst [vmem:[%s2806_s7 + $0xc0] sm:$0xff] %v2136_v42  ;;  %1752 = vst [vmem:[%s2806_s7 + $0xc8] sm:$0xff] %v2137_v43  ;;  %v2138_v46 = vpack.c.bf16 %v1524_v44, %v1523_v38  ;;  %v2139_v47 = vpack.c.bf16 %v1526_v45, %v1525_v39 }
 0x1ab   : > { %1825 = vst [vmem:[%s2905_s10 + $0x140] sm:$0xff] (%p2472_p6), %v1824_v21  ;;  %v1828_v23 = vld [vmem:[%s2806_s7 + $0xb0] sm:$0xff] (%p2472_p6)  ;;  %v1830_v0 = vld [vmem:[%s2806_s7 + $0xb8] sm:$0xff] (%p2472_p6)  ;;  %1827 = vst [vmem:[%s2905_s10 + $0x148] sm:$0xff] (%p2472_p6), %v1826_v22 }
 0x1ac   : > { %1753 = vst [vmem:[%s2806_s7 + $0xd0] sm:$0xff] %v2138_v46  ;;  %1754 = vst [vmem:[%s2806_s7 + $0xd8] sm:$0xff] %v2139_v47  ;;  %v1327_v48 = vpop.f32.mrb[28].mxu0  ;;  %v1440_v49 = vpop.f32.mrb[28].mxu1 }
 0x1ad   : > { %v1527_v50 = vadd.f32 %v2789_v24, %v1327_v48  ;;  %v1529_v51 = vadd.f32 %v2791_v25, %v1440_v49  ;;  %v1329_v52 = vpop.f32.mrb[29].mxu0  ;;  %v1442_v53 = vpop.f32.mrb[29].mxu1  ;;  %1829 = vst [vmem:[%s2905_s10 + $0x160] sm:$0xff] (%p2472_p6), %v1828_v23  ;;  %1831 = vst [vmem:[%s2905_s10 + $0x168] sm:$0xff] (%p2472_p6), %v1830_v0 }
 0x1ae   : > { %v1528_v54 = vadd.f32 %v2793_v26, %v1329_v52  ;;  %v1530_v55 = vadd.f32 %v2795_v27, %v1442_v53  ;;  %v1331_v56 = vpop.f32.mrb[30].mxu0  ;;  %v1444_v57 = vpop.f32.mrb[30].mxu1  ;;  %1765 = sbr.rel (!%p2472_p6) target bundleno = 445 (0x1bd), region = 90 }
 0x1af   : > { %v1531_v58 = vadd.f32 %v2789_v24, %v1331_v56  ;;  %v1533_v59 = vadd.f32 %v2791_v25, %v1444_v57  ;;  %v1333_v60 = vpop.f32.mrb[31].mxu0  ;;  %v1446_v61 = vpop.f32.mrb[31].mxu1  ;;  %v1784_v24 = vld [vmem:[%s2806_s7] sm:$0xff] (%p2472_p6)  ;;  %v1786_v25 = vld [vmem:[%s2806_s7 + $0x8] sm:$0xff] (%p2472_p6) }
 0x1b0   : > { %v2140_v62 = vpack.c.bf16 %v1528_v54, %v1527_v50  ;;  %v2141_v63 = vpack.c.bf16 %v1530_v55, %v1529_v51  ;;  %v1532_v1 = vadd.f32 %v2793_v26, %v1333_v60  ;;  %v1534_v2 = vadd.f32 %v2795_v27, %v1446_v61  ;;  %v1788_v26 = vld [vmem:[%s2806_s7 + $0x10] sm:$0xff] (%p2472_p6)  ;;  %v1790_v27 = vld [vmem:[%s2806_s7 + $0x18] sm:$0xff] (%p2472_p6)  ;;  %1785 = vst [vmem:[%s2905_s10] sm:$0xff] (%p2472_p6), %v1784_v24 }
 0x1b1   : > { %1787 = vst [vmem:[%s2905_s10 + $0x8] sm:$0xff] (%p2472_p6), %v1786_v25  ;;  %1789 = vst [vmem:[%s2905_s10 + $0x20] sm:$0xff] (%p2472_p6), %v1788_v26  ;;  %v1832_v28 = vld [vmem:[%s2806_s7 + $0xc0] sm:$0xff] (%p2472_p6)  ;;  %v1834_v29 = vld [vmem:[%s2806_s7 + $0xc8] sm:$0xff] (%p2472_p6) }
 0x1b2   : > { %1755 = vst [vmem:[%s2806_s7 + $0xe0] sm:$0xff] %v2140_v62  ;;  %1756 = vst [vmem:[%s2806_s7 + $0xe8] sm:$0xff] %v2141_v63  ;;  %v2142_v3 = vpack.c.bf16 %v1532_v1, %v1531_v58  ;;  %v2143_v4 = vpack.c.bf16 %v1534_v2, %v1533_v59 }
 0x1b3   : > { %1791 = vst [vmem:[%s2905_s10 + $0x28] sm:$0xff] (%p2472_p6), %v1790_v27  ;;  %v1836_v30 = vld [vmem:[%s2806_s7 + $0xd0] sm:$0xff] (%p2472_p6)  ;;  %1833 = vst [vmem:[%s2905_s10 + $0x180] sm:$0xff] (%p2472_p6), %v1832_v28  ;;  %v1838_v31 = vld [vmem:[%s2806_s7 + $0xd8] sm:$0xff] (%p2472_p6) }
 0x1b4   : > { %1757 = vst [vmem:[%s2806_s7 + $0xf0] sm:$0xff] %v2142_v3  ;;  %1758 = vst [vmem:[%s2806_s7 + $0xf8] sm:$0xff] %v2143_v4 }
 0x1b5   : > { %1835 = vst [vmem:[%s2905_s10 + $0x188] sm:$0xff] %v1834_v29  ;;  %1837 = vst [vmem:[%s2905_s10 + $0x1a0] sm:$0xff] %v1836_v30 }
 0x1b6   : > { %1839 = vst [vmem:[%s2905_s10 + $0x1a8] sm:$0xff] %v1838_v31 }
 0x1b9   : > { %v1840_v32 = vld [vmem:[%s2806_s7 + $0xe0] sm:$0xff]  ;;  %v1842_v33 = vld [vmem:[%s2806_s7 + $0xe8] sm:$0xff] }
 0x1ba   : > { %1841 = vst [vmem:[%s2905_s10 + $0x1c0] sm:$0xff] %v1840_v32  ;;  %1843 = vst [vmem:[%s2905_s10 + $0x1c8] sm:$0xff] %v1842_v33 }
 0x1bb   : > { %v1844_v34 = vld [vmem:[%s2806_s7 + $0xf0] sm:$0xff]  ;;  %v1846_v35 = vld [vmem:[%s2806_s7 + $0xf8] sm:$0xff] }
 0x1bc   : > { %1845 = vst [vmem:[%s2905_s10 + $0x1e0] sm:$0xff] %v1844_v34  ;;  %1847 = vst [vmem:[%s2905_s10 + $0x1e8] sm:$0xff] %v1846_v35 }
 0x1bd PF: > { %s15_s22 = sadd.s32 1, %s2400_s22   ;;  %s2991_s18 = smov %s2388_s19 }
 0x1be   : > { %p12_p12 = scmp.ge.s32.totalorder %s15_s22, 4   ;;  %s2992_s19 = smov %s2477_s29 }
 0x1bf   : > { %s2993_s20 = smov %s2396_s21  ;;  %s2994_s21 = smov %s2996_s23 }
 0x1c0   :  { %14 = sbr.rel (!%p12_p12) target bundleno = 3 (0x3), region = 161 }

// kernel: lstm_model_forward.6
= control target key start
LH: loop header
LB: loop body
LE: loop exit
PB: predicated region body
PF: predicated region fallthrough
CT: control target
= control target key end

     0   :  { %s7216_s0 = inlined_call_operand.vmem [shape: bf16[8,16,1024], index: 0, kind: input, shape index: {}, may-alias: {0,1}]   ;;  %s7217_s1 = inlined_call_operand.vmem [shape: bf16[8,16,1024], index: 1, kind: input, shape index: {}, may-alias: {0,1}]   ;;  %s7218_s2 = inlined_call_operand.vmem [shape: bf16[128,512], index: 2, kind: input, shape index: {}]   ;;  %s7219_s3 = inlined_call_operand.vmem [shape: bf16[128,512], index: 3, kind: input, shape index: {}]   ;;  %s7220_s4 = inlined_call_operand.vmem [shape: bf16[2,16,128], index: 4, kind: input, shape index: {}]   ;;  %s7221_s5 = inlined_call_operand.vmem [shape: f32[2,16,128], index: 5, kind: input, shape index: {}]   ;;  %s7222_s6 = inlined_call_operand.vmem [shape: bf16[8,16,128], index: 6, kind: output, shape index: {0}]   ;;  %s7223_s7 = inlined_call_operand.vmem [shape: bf16[8,16,128], index: 7, kind: output, shape index: {1}]   ;;  %s7224_s8 = inlined_call_operand.vmem [shape: f32[2,16,128], index: 8, kind: output, shape index: {2}]   ;;  %s7225_s9 = inlined_call_operand.vmem [shape: f32[2,16,128], index: 9, kind: output, shape index: {3}]  }
   0x1   :  { %v5268_v0 = vld [vmem:[%s7216_s0] sm:$0xff]  ;;  %v5273_v1 = vld [vmem:[%s7216_s0 + $0x8] sm:$0xff]  ;;  %v5428_v32 = vld [vmem:[%s7217_s1 + $0x10] sm:$0xff] }
   0x2   :  { %v5278_v2 = vld [vmem:[%s7216_s0 + $0x20] sm:$0xff]  ;;  %v5283_v3 = vld [vmem:[%s7216_s0 + $0x28] sm:$0xff]  ;;  %7352 = vst [vmem:[#allocation51_spill] sm:$0xff] %v5428_v32  ;;  %v5433_v33 = vld [vmem:[%s7217_s1 + $0x18] sm:$0xff] }
   0x3   :  { %v5288_v4 = vld [vmem:[%s7216_s0 + $0x40] sm:$0xff]  ;;  %v5293_v5 = vld [vmem:[%s7216_s0 + $0x48] sm:$0xff]  ;;  %7353 = vst [vmem:[#allocation52_spill] sm:$0xff] %v5433_v33  ;;  %v5438_v34 = vld [vmem:[%s7217_s1 + $0x30] sm:$0xff] }
   0x4   :  { %7324 = vst [vmem:[#allocation23_spill] sm:$0xff] %v5288_v4  ;;  %7325 = vst [vmem:[#allocation24_spill] sm:$0xff] %v5293_v5  ;;  %v5298_v6 = vld [vmem:[%s7216_s0 + $0x60] sm:$0xff]  ;;  %v5303_v7 = vld [vmem:[%s7216_s0 + $0x68] sm:$0xff] }
   0x5   :  { %7326 = vst [vmem:[#allocation25_spill] sm:$0xff] %v5298_v6  ;;  %7327 = vst [vmem:[#allocation26_spill] sm:$0xff] %v5303_v7  ;;  %v5308_v8 = vld [vmem:[%s7216_s0 + $0x80] sm:$0xff]  ;;  %v5313_v9 = vld [vmem:[%s7216_s0 + $0x88] sm:$0xff] }
   0x6   :  { %7328 = vst [vmem:[#allocation27_spill] sm:$0xff] %v5308_v8  ;;  %7329 = vst [vmem:[#allocation28_spill] sm:$0xff] %v5313_v9  ;;  %v5318_v10 = vld [vmem:[%s7216_s0 + $0xa0] sm:$0xff]  ;;  %v5323_v11 = vld [vmem:[%s7216_s0 + $0xa8] sm:$0xff] }
   0x7   :  { %7330 = vst [vmem:[#allocation29_spill] sm:$0xff] %v5318_v10  ;;  %7331 = vst [vmem:[#allocation30_spill] sm:$0xff] %v5323_v11  ;;  %v5328_v12 = vld [vmem:[%s7216_s0 + $0xc0] sm:$0xff]  ;;  %v5333_v13 = vld [vmem:[%s7216_s0 + $0xc8] sm:$0xff] }
   0x8   :  { %7332 = vst [vmem:[#allocation31_spill] sm:$0xff] %v5328_v12  ;;  %7333 = vst [vmem:[#allocation32_spill] sm:$0xff] %v5333_v13  ;;  %v5338_v14 = vld [vmem:[%s7216_s0 + $0xe0] sm:$0xff]  ;;  %v5343_v15 = vld [vmem:[%s7216_s0 + $0xe8] sm:$0xff] }
   0x9   :  { %7334 = vst [vmem:[#allocation33_spill] sm:$0xff] %v5338_v14  ;;  %7335 = vst [vmem:[#allocation34_spill] sm:$0xff] %v5343_v15  ;;  %v5348_v16 = vld [vmem:[%s7216_s0 + $0x100] sm:$0xff]  ;;  %v5353_v17 = vld [vmem:[%s7216_s0 + $0x108] sm:$0xff] }
   0xa   :  { %7336 = vst [vmem:[#allocation35_spill] sm:$0xff] %v5348_v16  ;;  %7337 = vst [vmem:[#allocation36_spill] sm:$0xff] %v5353_v17  ;;  %v5358_v18 = vld [vmem:[%s7216_s0 + $0x120] sm:$0xff]  ;;  %v5363_v19 = vld [vmem:[%s7216_s0 + $0x128] sm:$0xff] }
   0xb   :  { %7338 = vst [vmem:[#allocation37_spill] sm:$0xff] %v5358_v18  ;;  %7339 = vst [vmem:[#allocation38_spill] sm:$0xff] %v5363_v19  ;;  %v5368_v20 = vld [vmem:[%s7216_s0 + $0x140] sm:$0xff]  ;;  %v5373_v21 = vld [vmem:[%s7216_s0 + $0x148] sm:$0xff] }
   0xc   :  { %7340 = vst [vmem:[#allocation39_spill] sm:$0xff] %v5368_v20  ;;  %7341 = vst [vmem:[#allocation40_spill] sm:$0xff] %v5373_v21  ;;  %v5378_v22 = vld [vmem:[%s7216_s0 + $0x160] sm:$0xff]  ;;  %v5383_v23 = vld [vmem:[%s7216_s0 + $0x168] sm:$0xff] }
   0xd   :  { %7342 = vst [vmem:[#allocation41_spill] sm:$0xff] %v5378_v22  ;;  %7343 = vst [vmem:[#allocation42_spill] sm:$0xff] %v5383_v23  ;;  %v5388_v24 = vld [vmem:[%s7216_s0 + $0x180] sm:$0xff]  ;;  %v5393_v25 = vld [vmem:[%s7216_s0 + $0x188] sm:$0xff] }
   0xe   :  { %7344 = vst [vmem:[#allocation43_spill] sm:$0xff] %v5388_v24  ;;  %7345 = vst [vmem:[#allocation44_spill] sm:$0xff] %v5393_v25  ;;  %v5398_v26 = vld [vmem:[%s7216_s0 + $0x1a0] sm:$0xff]  ;;  %v5403_v27 = vld [vmem:[%s7216_s0 + $0x1a8] sm:$0xff] }
   0xf   :  { %7346 = vst [vmem:[#allocation45_spill] sm:$0xff] %v5398_v26  ;;  %7347 = vst [vmem:[#allocation46_spill] sm:$0xff] %v5403_v27  ;;  %v5408_v28 = vld [vmem:[%s7216_s0 + $0x1c0] sm:$0xff]  ;;  %v5413_v29 = vld [vmem:[%s7216_s0 + $0x1c8] sm:$0xff] }
  0x10   :  { %7348 = vst [vmem:[#allocation47_spill] sm:$0xff] %v5408_v28  ;;  %7349 = vst [vmem:[#allocation48_spill] sm:$0xff] %v5413_v29  ;;  %v5418_v30 = vld [vmem:[%s7216_s0 + $0x1e0] sm:$0xff]  ;;  %v5423_v31 = vld [vmem:[%s7216_s0 + $0x1e8] sm:$0xff] }
  0x11   :  { %7350 = vst [vmem:[#allocation49_spill] sm:$0xff] %v5418_v30  ;;  %7351 = vst [vmem:[#allocation50_spill] sm:$0xff] %v5423_v31  ;;  %v5443_v35 = vld [vmem:[%s7217_s1 + $0x38] sm:$0xff]  ;;  %v5448_v36 = vld [vmem:[%s7217_s1 + $0x50] sm:$0xff] }
  0x12   :  { %7354 = vst [vmem:[#allocation53_spill] sm:$0xff] %v5438_v34  ;;  %7355 = vst [vmem:[#allocation54_spill] sm:$0xff] %v5443_v35  ;;  %v5453_v37 = vld [vmem:[%s7217_s1 + $0x58] sm:$0xff]  ;;  %v5458_v38 = vld [vmem:[%s7217_s1 + $0x70] sm:$0xff] }
  0x13   :  { %7356 = vst [vmem:[#allocation55_spill] sm:$0xff] %v5448_v36  ;;  %7357 = vst [vmem:[#allocation56_spill] sm:$0xff] %v5453_v37  ;;  %v5463_v39 = vld [vmem:[%s7217_s1 + $0x78] sm:$0xff]  ;;  %v5468_v40 = vld [vmem:[%s7217_s1 + $0x90] sm:$0xff] }
  0x14   :  { %7358 = vst [vmem:[#allocation57_spill] sm:$0xff] %v5458_v38  ;;  %7359 = vst [vmem:[#allocation58_spill] sm:$0xff] %v5463_v39  ;;  %v5473_v41 = vld [vmem:[%s7217_s1 + $0x98] sm:$0xff]  ;;  %v5478_v42 = vld [vmem:[%s7217_s1 + $0xb0] sm:$0xff] }
  0x15   :  { %7360 = vst [vmem:[#allocation59_spill] sm:$0xff] %v5468_v40  ;;  %7361 = vst [vmem:[#allocation60_spill] sm:$0xff] %v5473_v41  ;;  %v5483_v43 = vld [vmem:[%s7217_s1 + $0xb8] sm:$0xff]  ;;  %v5488_v44 = vld [vmem:[%s7217_s1 + $0xd0] sm:$0xff] }
  0x16   :  { %7362 = vst [vmem:[#allocation61_spill] sm:$0xff] %v5478_v42  ;;  %7363 = vst [vmem:[#allocation62_spill] sm:$0xff] %v5483_v43  ;;  %v5493_v45 = vld [vmem:[%s7217_s1 + $0xd8] sm:$0xff]  ;;  %v5498_v46 = vld [vmem:[%s7217_s1 + $0xf0] sm:$0xff] }
  0x17   :  { %7364 = vst [vmem:[#allocation63_spill] sm:$0xff] %v5488_v44  ;;  %7365 = vst [vmem:[#allocation64_spill] sm:$0xff] %v5493_v45  ;;  %v5503_v47 = vld [vmem:[%s7217_s1 + $0xf8] sm:$0xff]  ;;  %v5508_v48 = vld [vmem:[%s7217_s1 + $0x110] sm:$0xff] }
  0x18   :  { %7366 = vst [vmem:[#allocation65_spill] sm:$0xff] %v5498_v46  ;;  %7367 = vst [vmem:[#allocation66_spill] sm:$0xff] %v5503_v47  ;;  %v5513_v49 = vld [vmem:[%s7217_s1 + $0x118] sm:$0xff]  ;;  %v5518_v50 = vld [vmem:[%s7217_s1 + $0x130] sm:$0xff] }
  0x19   :  { %7368 = vst [vmem:[#allocation67_spill] sm:$0xff] %v5508_v48  ;;  %7369 = vst [vmem:[#allocation68_spill] sm:$0xff] %v5513_v49  ;;  %v5523_v51 = vld [vmem:[%s7217_s1 + $0x138] sm:$0xff]  ;;  %v5528_v52 = vld [vmem:[%s7217_s1 + $0x150] sm:$0xff] }
  0x1a   :  { %7370 = vst [vmem:[#allocation69_spill] sm:$0xff] %v5518_v50  ;;  %7371 = vst [vmem:[#allocation70_spill] sm:$0xff] %v5523_v51  ;;  %v5533_v53 = vld [vmem:[%s7217_s1 + $0x158] sm:$0xff]  ;;  %v5538_v54 = vld [vmem:[%s7217_s1 + $0x170] sm:$0xff] }
  0x1b   :  { %7372 = vst [vmem:[#allocation71_spill] sm:$0xff] %v5528_v52  ;;  %7373 = vst [vmem:[#allocation72_spill] sm:$0xff] %v5533_v53  ;;  %v5543_v55 = vld [vmem:[%s7217_s1 + $0x178] sm:$0xff]  ;;  %v5548_v56 = vld [vmem:[%s7217_s1 + $0x190] sm:$0xff] }
  0x1c   :  { %7374 = vst [vmem:[#allocation73_spill] sm:$0xff] %v5538_v54  ;;  %7375 = vst [vmem:[#allocation74_spill] sm:$0xff] %v5543_v55  ;;  %v5553_v57 = vld [vmem:[%s7217_s1 + $0x198] sm:$0xff]  ;;  %v5558_v58 = vld [vmem:[%s7217_s1 + $0x1b0] sm:$0xff] }
  0x1d   :  { %7376 = vst [vmem:[#allocation75_spill] sm:$0xff] %v5548_v56  ;;  %7377 = vst [vmem:[#allocation76_spill] sm:$0xff] %v5553_v57  ;;  %v5563_v59 = vld [vmem:[%s7217_s1 + $0x1b8] sm:$0xff]  ;;  %v5568_v60 = vld [vmem:[%s7217_s1 + $0x1d0] sm:$0xff] }
  0x1e   :  { %7378 = vst [vmem:[#allocation77_spill] sm:$0xff] %v5558_v58  ;;  %7379 = vst [vmem:[#allocation78_spill] sm:$0xff] %v5563_v59  ;;  %v5573_v61 = vld [vmem:[%s7217_s1 + $0x1d8] sm:$0xff]  ;;  %v5578_v62 = vld [vmem:[%s7217_s1 + $0x1f0] sm:$0xff] }
  0x1f   :  { %v5583_v63 = vld [vmem:[%s7217_s1 + $0x1f8] sm:$0xff]  ;;  %v227_v35 = vld [vmem:[%s7218_s2] sm:$0xf]  ;;  %v229_v33 = vld [vmem:[%s7218_s2 + $0x10] sm:$0xf] }
  0x20   :  { %228 = vst [vmem:[#allocation2] sm:$0xf] %v227_v35  ;;  %230 = vst [vmem:[#allocation2 + $0x4] sm:$0xf] %v229_v33  ;;  %v231_v34 = vld [vmem:[%s7218_s2 + $0x4] sm:$0xf] }
  0x21   :  { %v233_v32 = vld [vmem:[%s7218_s2 + $0x14] sm:$0xf]  ;;  %v235_v31 = vld [vmem:[%s7218_s2 + $0x8] sm:$0xf]  ;;  %232 = vst [vmem:[#allocation2 + $0x8] sm:$0xf] %v231_v34 }
  0x22   :  { %234 = vst [vmem:[#allocation2 + $0xc] sm:$0xf] %v233_v32  ;;  %236 = vst [vmem:[#allocation2 + $0x10] sm:$0xf] %v235_v31  ;;  %v237_v35 = vld [vmem:[%s7218_s2 + $0x18] sm:$0xf] }
  0x23   :  { %v239_v33 = vld [vmem:[%s7218_s2 + $0xc] sm:$0xf]  ;;  %v241_v29 = vld [vmem:[%s7218_s2 + $0x1c] sm:$0xff]   ;;  %238 = vst [vmem:[#allocation2 + $0x14] sm:$0xf] %v237_v35 }
  0x24   :  { %240 = vst [vmem:[#allocation2 + $0x18] sm:$0xf] %v239_v33  ;;  %242 = vst [vmem:[#allocation2 + $0x1c] sm:$0xff] %v241_v29   ;;  %v245_v32 = vld [vmem:[%s7218_s2 + $0x30] sm:$0xf] }
  0x25   :  { %v247_v31 = vld [vmem:[%s7218_s2 + $0x24] sm:$0xf]  ;;  %v249_v34 = vld [vmem:[%s7218_s2 + $0x34] sm:$0xf]  ;;  %246 = vst [vmem:[#allocation2 + $0x24] sm:$0xf] %v245_v32 }
  0x26   :  { %248 = vst [vmem:[#allocation2 + $0x28] sm:$0xf] %v247_v31  ;;  %250 = vst [vmem:[#allocation2 + $0x2c] sm:$0xf] %v249_v34  ;;  %v251_v35 = vld [vmem:[%s7218_s2 + $0x28] sm:$0xf] }
  0x27   :  { %v253_v29 = vld [vmem:[%s7218_s2 + $0x38] sm:$0xf]  ;;  %v255_v33 = vld [vmem:[%s7218_s2 + $0x2c] sm:$0xf]  ;;  %252 = vst [vmem:[#allocation2 + $0x30] sm:$0xf] %v251_v35 }
  0x28   :  { %254 = vst [vmem:[#allocation2 + $0x34] sm:$0xf] %v253_v29  ;;  %256 = vst [vmem:[#allocation2 + $0x38] sm:$0xf] %v255_v33  ;;  %v257_v32 = vld [vmem:[%s7218_s2 + $0x3c] sm:$0xff]  }
  0x29   :  { %v261_v31 = vld [vmem:[%s7218_s2 + $0x50] sm:$0xf]  ;;  %v263_v34 = vld [vmem:[%s7218_s2 + $0x44] sm:$0xf]  ;;  %258 = vst [vmem:[#allocation2 + $0x3c] sm:$0xff] %v257_v32  }
  0x2a   :  { %262 = vst [vmem:[#allocation2 + $0x44] sm:$0xf] %v261_v31  ;;  %264 = vst [vmem:[#allocation2 + $0x48] sm:$0xf] %v263_v34  ;;  %v265_v35 = vld [vmem:[%s7218_s2 + $0x54] sm:$0xf] }
  0x2b   :  { %v267_v29 = vld [vmem:[%s7218_s2 + $0x48] sm:$0xf]  ;;  %v269_v33 = vld [vmem:[%s7218_s2 + $0x58] sm:$0xf]  ;;  %266 = vst [vmem:[#allocation2 + $0x4c] sm:$0xf] %v265_v35 }
  0x2c   :  { %268 = vst [vmem:[#allocation2 + $0x50] sm:$0xf] %v267_v29  ;;  %270 = vst [vmem:[#allocation2 + $0x54] sm:$0xf] %v269_v33  ;;  %v271_v32 = vld [vmem:[%s7218_s2 + $0x4c] sm:$0xf] }
  0x2d   :  { %v273_v31 = vld [vmem:[%s7218_s2 + $0x5c] sm:$0xff]   ;;  %v277_v34 = vld [vmem:[%s7218_s2 + $0x70] sm:$0xf]  ;;  %272 = vst [vmem:[#allocation2 + $0x58] sm:$0xf] %v271_v32 }
  0x2e   :  { %274 = vst [vmem:[#allocation2 + $0x5c] sm:$0xff] %v273_v31   ;;  %278 = vst [vmem:[#allocation2 + $0x64] sm:$0xf] %v277_v34  ;;  %v279_v35 = vld [vmem:[%s7218_s2 + $0x64] sm:$0xf]  ;;  %v289_v34 = vld [vmem:[%s7218_s2 + $0x7c] sm:$0xff]  }
  0x2f   :  { %v281_v29 = vld [vmem:[%s7218_s2 + $0x74] sm:$0xf]  ;;  %v283_v33 = vld [vmem:[%s7218_s2 + $0x68] sm:$0xf]  ;;  %280 = vst [vmem:[#allocation2 + $0x68] sm:$0xf] %v279_v35 }
  0x30   :  { %282 = vst [vmem:[#allocation2 + $0x6c] sm:$0xf] %v281_v29  ;;  %284 = vst [vmem:[#allocation2 + $0x70] sm:$0xf] %v283_v33  ;;  %v285_v32 = vld [vmem:[%s7218_s2 + $0x78] sm:$0xf] }
  0x31   :  { %v287_v31 = vld [vmem:[%s7218_s2 + $0x6c] sm:$0xf]  ;;  %286 = vst [vmem:[#allocation2 + $0x74] sm:$0xf] %v285_v32  ;;  %290 = vst [vmem:[#allocation2 + $0x7c] sm:$0xff] %v289_v34  }
  0x32   :  { %288 = vst [vmem:[#allocation2 + $0x78] sm:$0xf] %v287_v31  ;;  %v293_v35 = vld [vmem:[%s7218_s2 + $0x90] sm:$0xf]  ;;  %v295_v29 = vld [vmem:[%s7218_s2 + $0x84] sm:$0xf] }
  0x33   :  { %v297_v33 = vld [vmem:[%s7218_s2 + $0x94] sm:$0xf]  ;;  %294 = vst [vmem:[#allocation2 + $0x84] sm:$0xf] %v293_v35  ;;  %296 = vst [vmem:[#allocation2 + $0x88] sm:$0xf] %v295_v29 }
  0x34   :  { %298 = vst [vmem:[#allocation2 + $0x8c] sm:$0xf] %v297_v33  ;;  %v299_v32 = vld [vmem:[%s7218_s2 + $0x88] sm:$0xf]  ;;  %v301_v31 = vld [vmem:[%s7218_s2 + $0x98] sm:$0xf] }
  0x35   :  { %v303_v34 = vld [vmem:[%s7218_s2 + $0x8c] sm:$0xf]  ;;  %300 = vst [vmem:[#allocation2 + $0x90] sm:$0xf] %v299_v32  ;;  %302 = vst [vmem:[#allocation2 + $0x94] sm:$0xf] %v301_v31 }
  0x36   :  { %304 = vst [vmem:[#allocation2 + $0x98] sm:$0xf] %v303_v34  ;;  %v305_v35 = vld [vmem:[%s7218_s2 + $0x9c] sm:$0xff]   ;;  %v309_v29 = vld [vmem:[%s7218_s2 + $0xb0] sm:$0xf] }
  0x37   :  { %v311_v33 = vld [vmem:[%s7218_s2 + $0xa4] sm:$0xf]  ;;  %306 = vst [vmem:[#allocation2 + $0x9c] sm:$0xff] %v305_v35   ;;  %310 = vst [vmem:[#allocation2 + $0xa4] sm:$0xf] %v309_v29  ;;  %v321_v29 = vld [vmem:[%s7218_s2 + $0xbc] sm:$0xff]  }
  0x38   :  { %312 = vst [vmem:[#allocation2 + $0xa8] sm:$0xf] %v311_v33  ;;  %v313_v32 = vld [vmem:[%s7218_s2 + $0xb4] sm:$0xf]  ;;  %v315_v31 = vld [vmem:[%s7218_s2 + $0xa8] sm:$0xf] }
  0x39   :  { %v317_v34 = vld [vmem:[%s7218_s2 + $0xb8] sm:$0xf]  ;;  %314 = vst [vmem:[#allocation2 + $0xac] sm:$0xf] %v313_v32  ;;  %316 = vst [vmem:[#allocation2 + $0xb0] sm:$0xf] %v315_v31 }
  0x3a   :  { %318 = vst [vmem:[#allocation2 + $0xb4] sm:$0xf] %v317_v34  ;;  %v319_v35 = vld [vmem:[%s7218_s2 + $0xac] sm:$0xf]  ;;  %v325_v33 = vld [vmem:[%s7218_s2 + $0xd0] sm:$0xf] }
  0x3b   :  { %320 = vst [vmem:[#allocation2 + $0xb8] sm:$0xf] %v319_v35  ;;  %322 = vst [vmem:[#allocation2 + $0xbc] sm:$0xff] %v321_v29   ;;  %v327_v32 = vld [vmem:[%s7218_s2 + $0xc4] sm:$0xf] }
  0x3c   :  { %326 = vst [vmem:[#allocation2 + $0xc4] sm:$0xf] %v325_v33  ;;  %v329_v31 = vld [vmem:[%s7218_s2 + $0xd4] sm:$0xf]  ;;  %v331_v34 = vld [vmem:[%s7218_s2 + $0xc8] sm:$0xf] }
  0x3d   :  { %328 = vst [vmem:[#allocation2 + $0xc8] sm:$0xf] %v327_v32  ;;  %330 = vst [vmem:[#allocation2 + $0xcc] sm:$0xf] %v329_v31  ;;  %v333_v35 = vld [vmem:[%s7218_s2 + $0xd8] sm:$0xf] }
  0x3e   :  { %332 = vst [vmem:[#allocation2 + $0xd0] sm:$0xf] %v331_v34  ;;  %v335_v29 = vld [vmem:[%s7218_s2 + $0xcc] sm:$0xf]  ;;  %v337_v33 = vld [vmem:[%s7218_s2 + $0xdc] sm:$0xff]  }
  0x3f   :  { %334 = vst [vmem:[#allocation2 + $0xd4] sm:$0xf] %v333_v35  ;;  %336 = vst [vmem:[#allocation2 + $0xd8] sm:$0xf] %v335_v29  ;;  %v341_v32 = vld [vmem:[%s7218_s2 + $0xf0] sm:$0xf] }
  0x40   :  { %338 = vst [vmem:[#allocation2 + $0xdc] sm:$0xff] %v337_v33   ;;  %v343_v31 = vld [vmem:[%s7218_s2 + $0xe4] sm:$0xf]  ;;  %v345_v34 = vld [vmem:[%s7218_s2 + $0xf4] sm:$0xf] }
  0x41   :  { %342 = vst [vmem:[#allocation2 + $0xe4] sm:$0xf] %v341_v32  ;;  %344 = vst [vmem:[#allocation2 + $0xe8] sm:$0xf] %v343_v31  ;;  %v347_v35 = vld [vmem:[%s7218_s2 + $0xe8] sm:$0xf] }
  0x42   :  { %346 = vst [vmem:[#allocation2 + $0xec] sm:$0xf] %v345_v34  ;;  %v349_v29 = vld [vmem:[%s7218_s2 + $0xf8] sm:$0xf]  ;;  %v351_v33 = vld [vmem:[%s7218_s2 + $0xec] sm:$0xf] }
  0x43   :  { %348 = vst [vmem:[#allocation2 + $0xf0] sm:$0xf] %v347_v35  ;;  %350 = vst [vmem:[#allocation2 + $0xf4] sm:$0xf] %v349_v29  ;;  %v353_v32 = vld [vmem:[%s7218_s2 + $0xfc] sm:$0xf] }
  0x44   :  { %352 = vst [vmem:[#allocation2 + $0xf8] sm:$0xf] %v351_v33  ;;  %354 = vst [vmem:[#allocation2 + $0xfc] sm:$0xf] %v353_v32 }
  0x45   :  { %513 = vsyncadd [#allocation8], 4096  ;;  %v532_v31 = vld [vmem:[%s7219_s3] sm:$0xf]  ;;  %v534_v34 = vld [vmem:[%s7219_s3 + $0x10] sm:$0xf] }
  0x46   :  { %533 = vst [vmem:[#allocation3] sm:$0xf] %v532_v31  ;;  %535 = vst [vmem:[#allocation3 + $0x4] sm:$0xf] %v534_v34  ;;  %v536_v35 = vld [vmem:[%s7219_s3 + $0x4] sm:$0xf] }
  0x47   :  { %v538_v29 = vld [vmem:[%s7219_s3 + $0x14] sm:$0xf]  ;;  %v540_v33 = vld [vmem:[%s7219_s3 + $0x8] sm:$0xf]  ;;  %537 = vst [vmem:[#allocation3 + $0x8] sm:$0xf] %v536_v35 }
  0x48   :  { %539 = vst [vmem:[#allocation3 + $0xc] sm:$0xf] %v538_v29  ;;  %541 = vst [vmem:[#allocation3 + $0x10] sm:$0xf] %v540_v33  ;;  %v542_v32 = vld [vmem:[%s7219_s3 + $0x18] sm:$0xf] }
  0x49   :  { %v544_v31 = vld [vmem:[%s7219_s3 + $0xc] sm:$0xf]  ;;  %v546_v34 = vld [vmem:[%s7219_s3 + $0x1c] sm:$0xff]   ;;  %543 = vst [vmem:[#allocation3 + $0x14] sm:$0xf] %v542_v32 }
  0x4a   :  { %545 = vst [vmem:[#allocation3 + $0x18] sm:$0xf] %v544_v31  ;;  %547 = vst [vmem:[#allocation3 + $0x1c] sm:$0xff] %v546_v34   ;;  %v550_v35 = vld [vmem:[%s7219_s3 + $0x30] sm:$0xf] }
  0x4b   :  { %v552_v29 = vld [vmem:[%s7219_s3 + $0x24] sm:$0xf]  ;;  %v554_v33 = vld [vmem:[%s7219_s3 + $0x34] sm:$0xf]  ;;  %551 = vst [vmem:[#allocation3 + $0x24] sm:$0xf] %v550_v35 }
  0x4c   :  { %553 = vst [vmem:[#allocation3 + $0x28] sm:$0xf] %v552_v29  ;;  %555 = vst [vmem:[#allocation3 + $0x2c] sm:$0xf] %v554_v33  ;;  %v556_v32 = vld [vmem:[%s7219_s3 + $0x28] sm:$0xf] }
  0x4d   :  { %v558_v31 = vld [vmem:[%s7219_s3 + $0x38] sm:$0xf]  ;;  %v560_v34 = vld [vmem:[%s7219_s3 + $0x2c] sm:$0xf]  ;;  %557 = vst [vmem:[#allocation3 + $0x30] sm:$0xf] %v556_v32 }
  0x4e   :  { %559 = vst [vmem:[#allocation3 + $0x34] sm:$0xf] %v558_v31  ;;  %561 = vst [vmem:[#allocation3 + $0x38] sm:$0xf] %v560_v34  ;;  %v562_v35 = vld [vmem:[%s7219_s3 + $0x3c] sm:$0xff]  }
  0x4f   :  { %v566_v29 = vld [vmem:[%s7219_s3 + $0x50] sm:$0xf]  ;;  %v568_v33 = vld [vmem:[%s7219_s3 + $0x44] sm:$0xf]  ;;  %563 = vst [vmem:[#allocation3 + $0x3c] sm:$0xff] %v562_v35  }
  0x50   :  { %567 = vst [vmem:[#allocation3 + $0x44] sm:$0xf] %v566_v29  ;;  %569 = vst [vmem:[#allocation3 + $0x48] sm:$0xf] %v568_v33  ;;  %v570_v32 = vld [vmem:[%s7219_s3 + $0x54] sm:$0xf] }
  0x51   :  { %v572_v31 = vld [vmem:[%s7219_s3 + $0x48] sm:$0xf]  ;;  %v574_v34 = vld [vmem:[%s7219_s3 + $0x58] sm:$0xf]  ;;  %571 = vst [vmem:[#allocation3 + $0x4c] sm:$0xf] %v570_v32 }
  0x52   :  { %573 = vst [vmem:[#allocation3 + $0x50] sm:$0xf] %v572_v31  ;;  %575 = vst [vmem:[#allocation3 + $0x54] sm:$0xf] %v574_v34  ;;  %v576_v35 = vld [vmem:[%s7219_s3 + $0x4c] sm:$0xf] }
  0x53   :  { %v578_v29 = vld [vmem:[%s7219_s3 + $0x5c] sm:$0xff]   ;;  %v582_v33 = vld [vmem:[%s7219_s3 + $0x70] sm:$0xf]  ;;  %577 = vst [vmem:[#allocation3 + $0x58] sm:$0xf] %v576_v35 }
  0x54   :  { %579 = vst [vmem:[#allocation3 + $0x5c] sm:$0xff] %v578_v29   ;;  %583 = vst [vmem:[#allocation3 + $0x64] sm:$0xf] %v582_v33  ;;  %v584_v32 = vld [vmem:[%s7219_s3 + $0x64] sm:$0xf]  ;;  %v594_v33 = vld [vmem:[%s7219_s3 + $0x7c] sm:$0xff]  }
  0x55   :  { %v586_v31 = vld [vmem:[%s7219_s3 + $0x74] sm:$0xf]  ;;  %v588_v34 = vld [vmem:[%s7219_s3 + $0x68] sm:$0xf]  ;;  %585 = vst [vmem:[#allocation3 + $0x68] sm:$0xf] %v584_v32 }
  0x56   :  { %587 = vst [vmem:[#allocation3 + $0x6c] sm:$0xf] %v586_v31  ;;  %589 = vst [vmem:[#allocation3 + $0x70] sm:$0xf] %v588_v34  ;;  %v590_v35 = vld [vmem:[%s7219_s3 + $0x78] sm:$0xf] }
  0x57   :  { %v592_v29 = vld [vmem:[%s7219_s3 + $0x6c] sm:$0xf]  ;;  %591 = vst [vmem:[#allocation3 + $0x74] sm:$0xf] %v590_v35  ;;  %595 = vst [vmem:[#allocation3 + $0x7c] sm:$0xff] %v594_v33  }
  0x58   :  { %593 = vst [vmem:[#allocation3 + $0x78] sm:$0xf] %v592_v29  ;;  %v598_v32 = vld [vmem:[%s7219_s3 + $0x90] sm:$0xf]  ;;  %v600_v31 = vld [vmem:[%s7219_s3 + $0x84] sm:$0xf] }
  0x59   :  { %v602_v34 = vld [vmem:[%s7219_s3 + $0x94] sm:$0xf]  ;;  %599 = vst [vmem:[#allocation3 + $0x84] sm:$0xf] %v598_v32  ;;  %601 = vst [vmem:[#allocation3 + $0x88] sm:$0xf] %v600_v31 }
  0x5a   :  { %603 = vst [vmem:[#allocation3 + $0x8c] sm:$0xf] %v602_v34  ;;  %v604_v35 = vld [vmem:[%s7219_s3 + $0x88] sm:$0xf]  ;;  %v606_v29 = vld [vmem:[%s7219_s3 + $0x98] sm:$0xf] }
  0x5b   :  { %v608_v33 = vld [vmem:[%s7219_s3 + $0x8c] sm:$0xf]  ;;  %605 = vst [vmem:[#allocation3 + $0x90] sm:$0xf] %v604_v35  ;;  %607 = vst [vmem:[#allocation3 + $0x94] sm:$0xf] %v606_v29 }
  0x5c   :  { %609 = vst [vmem:[#allocation3 + $0x98] sm:$0xf] %v608_v33  ;;  %v610_v32 = vld [vmem:[%s7219_s3 + $0x9c] sm:$0xff]   ;;  %v614_v31 = vld [vmem:[%s7219_s3 + $0xb0] sm:$0xf] }
  0x5d   :  { %v616_v34 = vld [vmem:[%s7219_s3 + $0xa4] sm:$0xf]  ;;  %611 = vst [vmem:[#allocation3 + $0x9c] sm:$0xff] %v610_v32   ;;  %615 = vst [vmem:[#allocation3 + $0xa4] sm:$0xf] %v614_v31  ;;  %v626_v31 = vld [vmem:[%s7219_s3 + $0xbc] sm:$0xff]  }
  0x5e   :  { %617 = vst [vmem:[#allocation3 + $0xa8] sm:$0xf] %v616_v34  ;;  %v618_v35 = vld [vmem:[%s7219_s3 + $0xb4] sm:$0xf]  ;;  %v620_v29 = vld [vmem:[%s7219_s3 + $0xa8] sm:$0xf] }
  0x5f   :  { %v622_v33 = vld [vmem:[%s7219_s3 + $0xb8] sm:$0xf]  ;;  %619 = vst [vmem:[#allocation3 + $0xac] sm:$0xf] %v618_v35  ;;  %621 = vst [vmem:[#allocation3 + $0xb0] sm:$0xf] %v620_v29 }
  0x60   :  { %623 = vst [vmem:[#allocation3 + $0xb4] sm:$0xf] %v622_v33  ;;  %v624_v32 = vld [vmem:[%s7219_s3 + $0xac] sm:$0xf]  ;;  %v630_v34 = vld [vmem:[%s7219_s3 + $0xd0] sm:$0xf] }
  0x61   :  { %625 = vst [vmem:[#allocation3 + $0xb8] sm:$0xf] %v624_v32  ;;  %627 = vst [vmem:[#allocation3 + $0xbc] sm:$0xff] %v626_v31   ;;  %v632_v35 = vld [vmem:[%s7219_s3 + $0xc4] sm:$0xf] }
  0x62   :  { %631 = vst [vmem:[#allocation3 + $0xc4] sm:$0xf] %v630_v34  ;;  %v634_v29 = vld [vmem:[%s7219_s3 + $0xd4] sm:$0xf]  ;;  %v636_v33 = vld [vmem:[%s7219_s3 + $0xc8] sm:$0xf] }
  0x63   :  { %633 = vst [vmem:[#allocation3 + $0xc8] sm:$0xf] %v632_v35  ;;  %635 = vst [vmem:[#allocation3 + $0xcc] sm:$0xf] %v634_v29  ;;  %v638_v32 = vld [vmem:[%s7219_s3 + $0xd8] sm:$0xf] }
  0x64   :  { %637 = vst [vmem:[#allocation3 + $0xd0] sm:$0xf] %v636_v33  ;;  %v640_v31 = vld [vmem:[%s7219_s3 + $0xcc] sm:$0xf]  ;;  %v642_v34 = vld [vmem:[%s7219_s3 + $0xdc] sm:$0xff]  }
  0x65   :  { %639 = vst [vmem:[#allocation3 + $0xd4] sm:$0xf] %v638_v32  ;;  %641 = vst [vmem:[#allocation3 + $0xd8] sm:$0xf] %v640_v31  ;;  %v646_v35 = vld [vmem:[%s7219_s3 + $0xf0] sm:$0xf] }
  0x66   :  { %643 = vst [vmem:[#allocation3 + $0xdc] sm:$0xff] %v642_v34   ;;  %v648_v29 = vld [vmem:[%s7219_s3 + $0xe4] sm:$0xf]  ;;  %v650_v33 = vld [vmem:[%s7219_s3 + $0xf4] sm:$0xf] }
  0x67   :  { %647 = vst [vmem:[#allocation3 + $0xe4] sm:$0xf] %v646_v35  ;;  %649 = vst [vmem:[#allocation3 + $0xe8] sm:$0xf] %v648_v29  ;;  %v652_v32 = vld [vmem:[%s7219_s3 + $0xe8] sm:$0xf] }
  0x68   :  { %651 = vst [vmem:[#allocation3 + $0xec] sm:$0xf] %v650_v33  ;;  %v654_v31 = vld [vmem:[%s7219_s3 + $0xf8] sm:$0xf]  ;;  %v656_v34 = vld [vmem:[%s7219_s3 + $0xec] sm:$0xf] }
  0x69   :  { %653 = vst [vmem:[#allocation3 + $0xf0] sm:$0xf] %v652_v32  ;;  %655 = vst [vmem:[#allocation3 + $0xf4] sm:$0xf] %v654_v31  ;;  %v658_v35 = vld [vmem:[%s7219_s3 + $0xfc] sm:$0xf] }
  0x6a   :  { %657 = vst [vmem:[#allocation3 + $0xf8] sm:$0xf] %v656_v34  ;;  %659 = vst [vmem:[#allocation3 + $0xfc] sm:$0xf] %v658_v35 }
  0x6b   :  { %818 = vsyncadd [#allocation8 + $0x1], 4096  ;;  %v5930_v29 = vld [vmem:[%s7220_s4] sm:$0xff] }
  0x6c   :  { %861 = vsyncadd [#allocation8 + $0x2], 128  ;;  %v5935_v33 = vld [vmem:[%s7220_s4 + $0x8] sm:$0xff] }
  0x6d   :  { %905 = vsyncadd [#allocation8 + $0x3], 128  ;;  %v5940_v32 = vld [vmem:[%s7221_s5] sm:$0xff]  ;;  %v5945_v31 = vld [vmem:[%s7221_s5 + $0x8] sm:$0xff] }
  0x6e   :  { %950 = vsyncadd [#allocation8 + $0x4], 256  ;;  %v5950_v34 = vld [vmem:[%s7221_s5 + $0x10] sm:$0xff]  ;;  %v5955_v35 = vld [vmem:[%s7221_s5 + $0x18] sm:$0xff] }
  0x6f   :  { %7380 = vst [vmem:[#allocation79_spill] sm:$0xff] %v5950_v34  ;;  %7381 = vst [vmem:[#allocation80_spill] sm:$0xff] %v5955_v35 }
  0x70   :  { %996 = vsyncadd [#allocation8 + $0x5], 256 }
  0x71   :  { %5202 = dma.done.wait [#allocation8], 4096 }
  0x72   :  { %5203 = vsyncadd [#allocation8], 4294963200 }
  0x73   :  { %5204 = dma.done.wait [#allocation8 + $0x1], 4096 }
  0x74   :  { %5205 = vsyncadd [#allocation8 + $0x1], 4294963200 }
  0x75   :  { %5206 = dma.done.wait [#allocation8 + $0x2], 128 }
  0x76   :  { %5207 = vsyncadd [#allocation8 + $0x2], 4294967168 }
  0x77   :  { %5208 = dma.done.wait [#allocation8 + $0x3], 128 }
  0x78   :  { %5209 = vsyncadd [#allocation8 + $0x3], 4294967168 }
  0x79   :  { %5210 = dma.done.wait [#allocation8 + $0x4], 256 }
  0x7a   :  { %5211 = vsyncadd [#allocation8 + $0x4], 4294967040 }
  0x7b   :  { %5212 = dma.done.wait [#allocation8 + $0x5], 256 }
  0x7c   :  { %5213 = vsyncadd [#allocation8 + $0x5], 4294967040  ;;  %v7239_v30 = vmov 0   ;;  %v5959_v28 = vld [vmem:[#allocation2 + $0x8] sm:$0xff]  ;;  %v5961_v39 = vld [vmem:[#allocation2] sm:$0xff]  ;;  %v7392_v11 = vmov 0  }
  0x7d   :  { %1096 = vmatprep.mubr.bf16.mxu0 %v7239_v30  ;;  %1139 = vmatprep.mubr.bf16.mxu1 %v7239_v30  ;;  %v5963_v37 = vld [vmem:[#allocation2 + $0x28] sm:$0xff]  ;;  %v5967_v38 = vld [vmem:[#allocation2 + $0x18] sm:$0xff]  ;;  %v5970_v36 = vld [vmem:[#allocation2 + $0x20] sm:$0xff] }
  0x7e   :  { %1064 = vmatprep.subr.bf16.mxu0 %v5959_v28  ;;  %1107 = vmatprep.subr.bf16.mxu1 %v5967_v38  ;;  %v5973_v27 = vld [vmem:[#allocation2 + $0x10] sm:$0xff]  ;;  %v5975_v30 = vld [vmem:[#allocation2 + $0x38] sm:$0xff]  ;;  %v5977_v25 = vld [vmem:[#allocation2 + $0x48] sm:$0xff] }
  0x7f   :  { %1065 = vmatpush1.bf16.msra.mxu0 %v5961_v39  ;;  %1108 = vmatpush1.bf16.msra.mxu1 %v5973_v27  ;;  %v5981_v26 = vld [vmem:[#allocation2 + $0x30] sm:$0xff]  ;;  %v5984_v24 = vld [vmem:[#allocation2 + $0x58] sm:$0xff]  ;;  %v5987_v43 = vld [vmem:[#allocation2 + $0x40] sm:$0xff] }
  0x80   :  { %1066 = vmatprep.subr.bf16.mxu0 %v5963_v37  ;;  %1109 = vmatprep.subr.bf16.mxu1 %v5975_v30  ;;  %v5989_v41 = vld [vmem:[#allocation2 + $0x68] sm:$0xff]  ;;  %v5993_v42 = vld [vmem:[#allocation2 + $0x50] sm:$0xff]  ;;  %v5996_v40 = vld [vmem:[#allocation2 + $0x78] sm:$0xff] }
  0x81   :  { %v5999_v23 = vld [vmem:[#allocation2 + $0x60] sm:$0xff]  ;;  %v6001_v21 = vld [vmem:[#allocation2 + $0x88] sm:$0xff]  ;;  %v6005_v22 = vld [vmem:[#allocation2 + $0x70] sm:$0xff] }
  0x82   :  { %7382 = vst [vmem:[#allocation81_spill] sm:$0xff] %v6005_v22  ;;  %v6008_v20 = vld [vmem:[#allocation2 + $0x98] sm:$0xff]  ;;  %v6011_v47 = vld [vmem:[#allocation2 + $0x80] sm:$0xff]  ;;  %v6013_v45 = vld [vmem:[#allocation2 + $0xa8] sm:$0xff] }
  0x83   :  { %1067 = vmatpush1.bf16.msra.mxu0 %v5970_v36  ;;  %1110 = vmatpush1.bf16.msra.mxu1 %v5981_v26  ;;  %7383 = vst [vmem:[#allocation82_spill] sm:$0xff] %v6008_v20  ;;  %v6017_v46 = vld [vmem:[#allocation2 + $0x90] sm:$0xff]  ;;  %v6020_v44 = vld [vmem:[#allocation2 + $0xb8] sm:$0xff]  ;;  %v6023_v19 = vld [vmem:[#allocation2 + $0xa0] sm:$0xff] }
  0x84   :  { %1068 = vmatprep.subr.bf16.mxu0 %v5977_v25  ;;  %1111 = vmatprep.subr.bf16.mxu1 %v5984_v24  ;;  %7384 = vst [vmem:[#allocation83_spill] sm:$0xff] %v6017_v46  ;;  %7385 = vst [vmem:[#allocation84_spill] sm:$0xff] %v6020_v44  ;;  %v6025_v17 = vld [vmem:[#allocation2 + $0xc8] sm:$0xff]  ;;  %v6029_v18 = vld [vmem:[#allocation2 + $0xb0] sm:$0xff] }
  0x85   :  { %7386 = vst [vmem:[#allocation85_spill] sm:$0xff] %v6029_v18  ;;  %v6032_v16 = vld [vmem:[#allocation2 + $0xd8] sm:$0xff]  ;;  %v6035_v51 = vld [vmem:[#allocation2 + $0xc0] sm:$0xff]  ;;  %v6037_v49 = vld [vmem:[#allocation2 + $0xe8] sm:$0xff] }
  0x86   :  { %7387 = vst [vmem:[#allocation86_spill] sm:$0xff] %v6032_v16  ;;  %v6041_v50 = vld [vmem:[#allocation2 + $0xd0] sm:$0xff]  ;;  %v6044_v48 = vld [vmem:[#allocation2 + $0xf8] sm:$0xff]  ;;  %v6047_v15 = vld [vmem:[#allocation2 + $0xe0] sm:$0xff] }
  0x87   :  { %1069 = vmatpush1.bf16.msra.mxu0 %v5987_v43  ;;  %1112 = vmatpush1.bf16.msra.mxu1 %v5993_v42  ;;  %7388 = vst [vmem:[#allocation87_spill] sm:$0xff] %v6041_v50  ;;  %7389 = vst [vmem:[#allocation88_spill] sm:$0xff] %v6044_v48  ;;  %v6049_v13 = vld [vmem:[#allocation3 + $0x8] sm:$0xff]  ;;  %v6053_v14 = vld [vmem:[#allocation2 + $0xf0] sm:$0xff] }
  0x88   :  { %1070 = vmatprep.subr.bf16.mxu0 %v5989_v41  ;;  %1113 = vmatprep.subr.bf16.mxu1 %v5996_v40  ;;  %7390 = vst [vmem:[#allocation89_spill] sm:$0xff] %v6053_v14  ;;  %v6056_v12 = vld [vmem:[#allocation3 + $0x18] sm:$0xff]  ;;  %v6059_v55 = vld [vmem:[#allocation3] sm:$0xff]  ;;  %v6061_v53 = vld [vmem:[#allocation3 + $0x28] sm:$0xff] }
  0x89   :  { %7391 = vst [vmem:[#allocation90_spill] sm:$0xff] %v6056_v12  ;;  %v6066_v54 = vld [vmem:[#allocation3 + $0x10] sm:$0xff]  ;;  %v6069_v52 = vld [vmem:[#allocation3 + $0x38] sm:$0xff]  ;;  %v6073_v9 = vld [vmem:[#allocation3 + $0x20] sm:$0xff] }
  0x8a   :  { %v6076_v10 = vld [vmem:[#allocation3 + $0x48] sm:$0xff]  ;;  %v6081_v8 = vld [vmem:[#allocation3 + $0x30] sm:$0xff]  ;;  %v6084_v59 = vld [vmem:[#allocation3 + $0x58] sm:$0xff] }
  0x8b   :  { %1071 = vmatpush1.bf16.msra.mxu0 %v5999_v23  ;;  %1114 = vmatpush1.bf16.msra.mxu1 %v6005_v22  ;;  %v6087_v57 = vld [vmem:[#allocation3 + $0x40] sm:$0xff]  ;;  %v6089_v58 = vld [vmem:[#allocation3 + $0x68] sm:$0xff]  ;;  %v6096_v56 = vld [vmem:[#allocation3 + $0x78] sm:$0xff] }
  0x8c   :  { %1072 = vmatprep.subr.bf16.mxu0 %v6001_v21  ;;  %1115 = vmatprep.subr.bf16.mxu1 %v6008_v20  ;;  %7393 = vst [vmem:[#allocation91_spill] sm:$0xff] %v6089_v58  ;;  %7395 = vst [vmem:[#allocation93_spill] sm:$0xff] %v6096_v56  ;;  %v6099_v7 = vld [vmem:[#allocation3 + $0x60] sm:$0xff]  ;;  %v6101_v5 = vld [vmem:[#allocation3 + $0x88] sm:$0xff] }
  0x8d   :  { %7396 = vst [vmem:[#allocation94_spill] sm:$0xff] %v6099_v7  ;;  %7397 = vst [vmem:[#allocation95_spill] sm:$0xff] %v6101_v5  ;;  %v6105_v6 = vld [vmem:[#allocation3 + $0x70] sm:$0xff]  ;;  %v6108_v4 = vld [vmem:[#allocation3 + $0x98] sm:$0xff] }
  0x8e   :  { %7398 = vst [vmem:[#allocation96_spill] sm:$0xff] %v6105_v6  ;;  %7399 = vst [vmem:[#allocation97_spill] sm:$0xff] %v6108_v4  ;;  %v6111_v35 = vld [vmem:[#allocation3 + $0x80] sm:$0xff]  ;;  %v6113_v34 = vld [vmem:[#allocation3 + $0xa8] sm:$0xff] }
  0x8f   :  { %1073 = vmatpush1.bf16.msra.mxu0 %v6011_v47  ;;  %1116 = vmatpush1.bf16.msra.mxu1 %v6017_v46  ;;  %7400 = vst [vmem:[#allocation98_spill] sm:$0xff] %v6111_v35  ;;  %7401 = vst [vmem:[#allocation99_spill] sm:$0xff] %v6113_v34 }
  0x90   :  { %1074 = vmatprep.subr.bf16.mxu0 %v6013_v45  ;;  %1117 = vmatprep.subr.bf16.mxu1 %v6020_v44 }
  0x93   :  { %1075 = vmatpush1.bf16.msra.mxu0 %v6023_v19  ;;  %1118 = vmatpush1.bf16.msra.mxu1 %v6029_v18 }
  0x94   :  { %1076 = vmatprep.subr.bf16.mxu0 %v6025_v17  ;;  %1119 = vmatprep.subr.bf16.mxu1 %v6032_v16 }
  0x97   :  { %1077 = vmatpush1.bf16.msra.mxu0 %v6035_v51  ;;  %1120 = vmatpush1.bf16.msra.mxu1 %v6041_v50 }
  0x98   :  { %1078 = vmatprep.subr.bf16.mxu0 %v6037_v49  ;;  %1121 = vmatprep.subr.bf16.mxu1 %v6044_v48 }
  0x9b   :  { %1079 = vmatpush1.bf16.msra.mxu0 %v6047_v15  ;;  %1122 = vmatpush1.bf16.msra.mxu1 %v6053_v14 }
  0x9c   :  { %1261 = vmatprep.subr.bf16.mxu0 %v6049_v13  ;;  %1304 = vmatprep.subr.bf16.mxu1 %v6056_v12 }
  0x9e   :  { %1097 = vmatmul.mubr.bf16.vlgmr.msra.gmra.mrb[0].mxu0 %v5930_v29  ;;  %1140 = vmatmul.mubr.bf16.vlgmr.msra.gmra.mrb[0].mxu1 %v5930_v29  ;;  %v6093_v29 = vld [vmem:[#allocation3 + $0x50] sm:$0xff] }
  0x9f   :  { %1262 = vmatpush1.bf16.msra.mxu0 %v6059_v55  ;;  %1293 = vmatprep.mubr.bf16.mxu0 %v7392_v11  ;;  %7394 = vst [vmem:[#allocation92_spill] sm:$0xff] %v6093_v29 }
  0xa0   :  { %1263 = vmatprep.subr.bf16.mxu0 %v6061_v53  ;;  %1305 = vmatpush1.bf16.msra.mxu1 %v6066_v54 }
  0xa1   :  { %1336 = vmatprep.mubr.bf16.mxu1 %v7392_v11  ;;  %1306 = vmatprep.subr.bf16.mxu1 %v6069_v52 }
  0xa3   :  { %1264 = vmatpush1.bf16.msra.mxu0 %v6073_v9 }
  0xa4   :  { %1265 = vmatprep.subr.bf16.mxu0 %v6076_v10  ;;  %1307 = vmatpush1.bf16.msra.mxu1 %v6081_v8 }
  0xa5   :  { %1308 = vmatprep.subr.bf16.mxu1 %v6084_v59 }
  0xa7   :  { %1266 = vmatpush1.bf16.msra.mxu0 %v6087_v57 }
  0xa8   :  { %1267 = vmatprep.subr.bf16.mxu0 %v6089_v58  ;;  %1309 = vmatpush1.bf16.msra.mxu1 %v6093_v29  ;;  %v6117_v58 = vld [vmem:[#allocation3 + $0x90] sm:$0xff]  ;;  %v6125_v29 = vld [vmem:[#allocation3 + $0xc8] sm:$0xff] }
  0xa9   :  { %1310 = vmatprep.subr.bf16.mxu1 %v6096_v56  ;;  %v6120_v56 = vld [vmem:[#allocation3 + $0xb8] sm:$0xff]  ;;  %7404 = vst [vmem:[#allocation102_spill] sm:$0xff] %v6125_v29 }
  0xaa   :  { %7402 = vst [vmem:[#allocation100_spill] sm:$0xff] %v6120_v56 }
  0xab   :  { %1268 = vmatpush1.bf16.msra.mxu0 %v6099_v7  ;;  %v6123_v7 = vld [vmem:[#allocation3 + $0xa0] sm:$0xff] }
  0xac   :  { %1269 = vmatprep.subr.bf16.mxu0 %v6101_v5  ;;  %1311 = vmatpush1.bf16.msra.mxu1 %v6105_v6  ;;  %7403 = vst [vmem:[#allocation101_spill] sm:$0xff] %v6123_v7  ;;  %v6129_v5 = vld [vmem:[#allocation3 + $0xb0] sm:$0xff]  ;;  %v6137_v6 = vld [vmem:[#allocation3 + $0xe8] sm:$0xff] }
  0xad   :  { %1312 = vmatprep.subr.bf16.mxu1 %v6108_v4  ;;  %v6132_v4 = vld [vmem:[#allocation3 + $0xd8] sm:$0xff] }
  0xaf   :  { %1270 = vmatpush1.bf16.msra.mxu0 %v6111_v35  ;;  %v6135_v35 = vld [vmem:[#allocation3 + $0xc0] sm:$0xff] }
  0xb0   :  { %1271 = vmatprep.subr.bf16.mxu0 %v6113_v34  ;;  %1313 = vmatpush1.bf16.msra.mxu1 %v6117_v58  ;;  %v6141_v34 = vld [vmem:[#allocation3 + $0xd0] sm:$0xff] }
  0xb1   :  { %1314 = vmatprep.subr.bf16.mxu1 %v6120_v56  ;;  %v6144_v56 = vld [vmem:[#allocation3 + $0xf8] sm:$0xff] }
  0xb3   :  { %1272 = vmatpush1.bf16.msra.mxu0 %v6123_v7  ;;  %v6147_v7 = vld [vmem:[#allocation3 + $0xe0] sm:$0xff] }
  0xb4   :  { %1273 = vmatprep.subr.bf16.mxu0 %v6125_v29  ;;  %1315 = vmatpush1.bf16.msra.mxu1 %v6129_v5  ;;  %v6151_v29 = vld [vmem:[#allocation3 + $0xf0] sm:$0xff] }
  0xb5   :  { %1316 = vmatprep.subr.bf16.mxu1 %v6132_v4 }
  0xb7   :  { %1274 = vmatpush1.bf16.msra.mxu0 %v6135_v35 }
  0xb8   :  { %1275 = vmatprep.subr.bf16.mxu0 %v6137_v6  ;;  %1317 = vmatpush1.bf16.msra.mxu1 %v6141_v34 }
  0xb9   :  { %1318 = vmatprep.subr.bf16.mxu1 %v6144_v56 }
  0xbb   :  { %1276 = vmatpush1.bf16.msra.mxu0 %v6147_v7 }
  0xbc   :  { %1459 = vmatprep.subr.bf16.mxu0 %v5959_v28  ;;  %1319 = vmatpush1.bf16.msra.mxu1 %v6151_v29 }
  0xbd   :  { %1502 = vmatprep.subr.bf16.mxu1 %v5967_v38 }
  0xbe   :  { %1294 = vmatmul.mubr.bf16.vlgmr.msra.gmra.mrb[4].mxu0 %v5935_v33 }
  0xbf   :  { %1460 = vmatpush1.bf16.msra.mxu0 %v5961_v39  ;;  %1491 = vmatprep.mubr.bf16.mxu0 %v7392_v11 }
  0xc0   :  { %1337 = vmatmul.mubr.bf16.vlgmr.msra.gmra.mrb[4].mxu1 %v5935_v33  ;;  %1461 = vmatprep.subr.bf16.mxu0 %v5963_v37 }
  0xc1   :  { %1503 = vmatpush1.bf16.msra.mxu1 %v5973_v27  ;;  %1534 = vmatprep.mubr.bf16.mxu1 %v7392_v11 }
  0xc2   :  { %1504 = vmatprep.subr.bf16.mxu1 %v5975_v30 }
  0xc3   :  { %1462 = vmatpush1.bf16.msra.mxu0 %v5970_v36 }
  0xc4   :  { %1463 = vmatprep.subr.bf16.mxu0 %v5977_v25 }
  0xc5   :  { %1505 = vmatpush1.bf16.msra.mxu1 %v5981_v26 }
  0xc6   :  { %1506 = vmatprep.subr.bf16.mxu1 %v5984_v24 }
  0xc7   :  { %1464 = vmatpush1.bf16.msra.mxu0 %v5987_v43 }
  0xc8   :  { %1465 = vmatprep.subr.bf16.mxu0 %v5989_v41 }
  0xc9   :  { %1507 = vmatpush1.bf16.msra.mxu1 %v5993_v42 }
  0xca   :  { %1508 = vmatprep.subr.bf16.mxu1 %v5996_v40 }
  0xcb   :  { %1466 = vmatpush1.bf16.msra.mxu0 %v5999_v23 }
  0xcc   :  { %1467 = vmatprep.subr.bf16.mxu0 %v6001_v21  ;;  %v1028_v21 = vunpack.c.l.bf16 %v5278_v2 }
  0xcd   :  { %1509 = vmatpush1.bf16.msra.mxu1 %v6005_v22 }
  0xce   :  { %1510 = vmatprep.subr.bf16.mxu1 %v6008_v20  ;;  %v1031_v20 = vunpack.c.h.bf16 %v5283_v3 }
  0xcf   :  { %1468 = vmatpush1.bf16.msra.mxu0 %v6011_v47  ;;  %v1029_v47 = vunpack.c.h.bf16 %v5278_v2 }
  0xd0   :  { %1469 = vmatprep.subr.bf16.mxu0 %v6013_v45 }
  0xd1   :  { %1511 = vmatpush1.bf16.msra.mxu1 %v6017_v46 }
  0xd2   :  { %1512 = vmatprep.subr.bf16.mxu1 %v6020_v44 }
  0xd3   :  { %1470 = vmatpush1.bf16.msra.mxu0 %v6023_v19  ;;  %v1025_v19 = vunpack.c.h.bf16 %v5268_v0 }
  0xd4   :  { %1471 = vmatprep.subr.bf16.mxu0 %v6025_v17  ;;  %v1024_v17 = vunpack.c.l.bf16 %v5268_v0 }
  0xd5   :  { %1513 = vmatpush1.bf16.msra.mxu1 %v6029_v18 }
  0xd6   :  { %1514 = vmatprep.subr.bf16.mxu1 %v6032_v16 }
  0xd7   :  { %1472 = vmatpush1.bf16.msra.mxu0 %v6035_v51 }
  0xd8   :  { %1473 = vmatprep.subr.bf16.mxu0 %v6037_v49 }
  0xd9   :  { %1515 = vmatpush1.bf16.msra.mxu1 %v6041_v50 }
  0xda   :  { %1516 = vmatprep.subr.bf16.mxu1 %v6044_v48 }
  0xdb   :  { %1474 = vmatpush1.bf16.msra.mxu0 %v6047_v15 }
  0xdc   :  { %1657 = vmatprep.subr.bf16.mxu0 %v6049_v13 }
  0xdd   :  { %1517 = vmatpush1.bf16.msra.mxu1 %v6053_v14  ;;  %v1027_v14 = vunpack.c.h.bf16 %v5273_v1 }
  0xde   :  { %1700 = vmatprep.subr.bf16.mxu1 %v6056_v12 }
 0x171   :  { %v1098_v45 = vpop.f32.mrb[0].mxu0  ;;  %v1141_v15 = vpop.f32.mrb[0].mxu1 }
 0x172   :  { %v1150_v49 = vadd.f32 %v1098_v45, %v1024_v17  ;;  %v1100_v51 = vpop.f32.mrb[1].mxu0  ;;  %v1143_v12 = vpop.f32.mrb[1].mxu1  ;;  %v1026_v17 = vunpack.c.l.bf16 %v5273_v1 }
 0x173   :  { %v1151_v33 = vadd.f32 %v1100_v51, %v1025_v19  ;;  %v1102_v48 = vpop.f32.mrb[2].mxu0  ;;  %v1145_v46 = vpop.f32.mrb[2].mxu1  ;;  %v1153_v19 = vadd.f32 %v1143_v12, %v1027_v14 }
 0x174   :  { %v4397_v50 = vmul.f32 -1.442695, %v1150_v49  ;;  %v1154_v13 = vadd.f32 %v1102_v48, %v1028_v21  ;;  %v1104_v16 = vpop.f32.mrb[3].mxu0  ;;  %v1147_v22 = vpop.f32.mrb[3].mxu1  ;;  %v1030_v48 = vunpack.c.l.bf16 %v5283_v3  ;;  %v1152_v45 = vadd.f32 %v1141_v15, %v1026_v17 }
 0x175   :  { %v4399_v18 = vmul.f32 -1.442695, %v1151_v33  ;;  %v1155_v44 = vadd.f32 %v1104_v16, %v1029_v47  ;;  %v1157_v21 = vadd.f32 %v1147_v22, %v1031_v20  ;;  %v4401_v49 = vmul.f32 -1.442695, %v1153_v19 }
 0x176   :  { %4690 = vpow2.f32 %v4397_v50  ;;  %v4398_v0 = vmul.f32 -1.442695, %v1154_v13  ;;  %v1156_v51 = vadd.f32 %v1145_v46, %v1030_v48  ;;  %v1221_v17 = vunpack.c.l.bf16 %v5568_v60 }
 0x177   :  { %4692 = vpow2.f32 %v4399_v18  ;;  %v4400_v2 = vmul.f32 -1.442695, %v1155_v44  ;;  %v4402_v16 = vmul.f32 -1.442695, %v1157_v21  ;;  %v1222_v21 = vunpack.c.h.bf16 %v5568_v60 }
 0x178   :  { %4694 = vpow2.f32 %v4398_v0 }
 0x179   :  { %4696 = vpow2.f32 %v4400_v2 }
 0x17a   :  { %4698 = vtanh.f32 %v1152_v45 }
 0x17b   :  { %4700 = vpow2.f32 %v4401_v49 }
 0x17c   :  { %4702 = vtanh.f32 %v1156_v51 }
 0x17d   :  { %4704 = vpow2.f32 %v4402_v16  ;;  %v1225_v16 = vunpack.c.l.bf16 %v5578_v62 }
 0x180   :  { %v4691_v50 = vpop.eup %4690 }
 0x181   :  { %v4693_v47 = vpop.eup %4692  ;;  %v1164_v33 = vadd.f32 1.0, %v4691_v50 }
 0x182   :  { %v4695_v18 = vpop.eup %4694  ;;  %v1176_v44 = vadd.f32 1.0, %v4693_v47 }
 0x183   :  { %v4697_v1 = vpop.eup %4696  ;;  %4706 = vrcp.f32 %v1164_v33  ;;  %v1165_v12 = vadd.f32 1.0, %v4695_v18  ;;  %v1226_v18 = vunpack.c.h.bf16 %v5578_v62 }
 0x184   :  { %4708 = vrcp.f32 %v1176_v44  ;;  %v1177_v14 = vadd.f32 1.0, %v4697_v1  ;;  %v4699_v3 = vpop.eup %4698 }
 0x185   :  { %4710 = vrcp.f32 %v1165_v12  ;;  %v4701_v20 = vpop.eup %4700 }
 0x186   :  { %4712 = vrcp.f32 %v1177_v14  ;;  %v4703_v22 = vpop.eup %4702  ;;  %v1190_v2 = vadd.f32 1.0, %v4701_v20 }
 0x187   :  { %v4705_v46 = vpop.eup %4704 }
 0x188   :  { %v1191_v51 = vadd.f32 1.0, %v4705_v46  ;;  %4714 = vrcp.f32 %v1190_v2  ;;  %v1228_v2 = vunpack.c.h.bf16 %v5583_v63 }
 0x18d   :  { %v4707_v15 = vpop.eup %4706 }
 0x18e   :  { %v4709_v13 = vpop.eup %4708  ;;  %v1198_v0 = vmul.f32 %v4707_v15, %v4699_v3 }
 0x18f   :  { %v4711_v19 = vpop.eup %4710  ;;  %v1196_v48 = vmul.f32 %v4709_v13, %v5940_v32 }
 0x190   :  { %v4713_v45 = vpop.eup %4712  ;;  %v1199_v49 = vmul.f32 %v4711_v19, %v4703_v22 }
 0x191   :  { %v1197_v50 = vmul.f32 %v4713_v45, %v5945_v31  ;;  %v6206_v47 = vadd.f32 %v1198_v0, %v1196_v48  ;;  %v1295_v33 = vpop.f32.mrb[4].mxu0  ;;  %v1224_v31 = vunpack.c.h.bf16 %v5573_v61  ;;  %v1223_v48 = vunpack.c.l.bf16 %v5573_v61 }
 0x192   :  { %v1347_v44 = vadd.f32 %v1295_v33, %v1221_v17  ;;  %v1297_v1 = vpop.f32.mrb[5].mxu0  ;;  %v1227_v45 = vunpack.c.l.bf16 %v5583_v63 }
 0x193   :  { %4716 = vtanh.f32 %v6206_v47  ;;  %v6210_v32 = vadd.f32 %v1199_v49, %v1197_v50  ;;  %v1348_v60 = vadd.f32 %v1297_v1, %v1222_v21  ;;  %v1299_v12 = vpop.f32.mrb[6].mxu0  ;;  %v1338_v14 = vpop.f32.mrb[4].mxu1 }
 0x194   :  { %4718 = vrcp.f32 %v1191_v51  ;;  %v4405_v3 = vmul.f32 -1.442695, %v1347_v44  ;;  %v1351_v20 = vadd.f32 %v1299_v12, %v1225_v16  ;;  %v1301_v22 = vpop.f32.mrb[7].mxu0  ;;  %v1340_v46 = vpop.f32.mrb[5].mxu1  ;;  %v1349_v51 = vadd.f32 %v1338_v14, %v1223_v48 }
 0x195   :  { %4720 = vtanh.f32 %v6210_v32  ;;  %v4407_v62 = vmul.f32 -1.442695, %v1348_v60  ;;  %v1352_v15 = vadd.f32 %v1301_v22, %v1226_v18  ;;  %v1342_v13 = vpop.f32.mrb[6].mxu1  ;;  %v1350_v21 = vadd.f32 %v1340_v46, %v1224_v31  ;;  %v4715_v16 = vpop.eup %4714 }
 0x196   :  { %4722 = vpow2.f32 %v4405_v3  ;;  %v4406_v0 = vmul.f32 -1.442695, %v1351_v20  ;;  %v1344_v17 = vpop.f32.mrb[7].mxu1  ;;  %v1353_v18 = vadd.f32 %v1342_v13, %v1227_v45  ;;  %v7406_v45 = vld [vmem:[#allocation91_spill] sm:$0xff] }
 0x197   :  { %4724 = vpow2.f32 %v4407_v62  ;;  %v4408_v19 = vmul.f32 -1.442695, %v1352_v15  ;;  %v1354_v49 = vadd.f32 %v1344_v17, %v1228_v2  ;;  %v4409_v50 = vmul.f32 -1.442695, %v1350_v21 }
 0x198   :  { %4726 = vpow2.f32 %v4406_v0 }
 0x199   :  { %4728 = vpow2.f32 %v4408_v19  ;;  %v4410_v1 = vmul.f32 -1.442695, %v1354_v49 }
 0x19a   :  { %4730 = vtanh.f32 %v1349_v51  ;;  %v7408_v51 = vld [vmem:[#allocation79_spill] sm:$0xff] }
 0x19b   :  { %4732 = vpow2.f32 %v4409_v50 }
 0x19c   :  { %4734 = vtanh.f32 %v1353_v18  ;;  %v7409_v18 = vld [vmem:[#allocation80_spill] sm:$0xff] }
 0x19d   :  { %v4717_v33 = vpop.eup %4716  ;;  %4736 = vpow2.f32 %v4410_v1 }
 0x19e   :  { %v4719_v44 = vpop.eup %4718  ;;  %v1204_v3 = vmul.f32 %v4717_v33, %v4715_v16 }
 0x19f   :  { %v4721_v60 = vpop.eup %4720 }
 0x1a0   :  { %v4723_v12 = vpop.eup %4722  ;;  %v1205_v20 = vmul.f32 %v4721_v60, %v4719_v44  ;;  %v7411_v60 = vld [vmem:[#allocation96_spill] sm:$0xff] }
 0x1a1   :  { %v4725_v61 = vpop.eup %4724  ;;  %v1361_v22 = vadd.f32 1.0, %v4723_v12  ;;  %v7412_v12 = vld [vmem:[#allocation95_spill] sm:$0xff] }
 0x1a2   :  { %v4727_v31 = vpop.eup %4726  ;;  %v1373_v46 = vadd.f32 1.0, %v4725_v61  ;;  %v1206_v63 = vpack.c.bf16 %v1205_v20, %v1204_v3  ;;  %v7413_v3 = vld [vmem:[#allocation97_spill] sm:$0xff]  ;;  %v7414_v61 = vld [vmem:[#allocation98_spill] sm:$0xff] }
 0x1a3   :  { %v4729_v14 = vpop.eup %4728  ;;  %4738 = vrcp.f32 %v1361_v22  ;;  %v1362_v62 = vadd.f32 1.0, %v4727_v31  ;;  %v7415_v22 = vld [vmem:[#allocation99_spill] sm:$0xff]  ;;  %v7416_v31 = vld [vmem:[#allocation100_spill] sm:$0xff] }
 0x1a4   :  { %4740 = vrcp.f32 %v1373_v46  ;;  %v1374_v15 = vadd.f32 1.0, %v4729_v14  ;;  %4599 = vst [vmem:[%s7222_s6] sm:$0xff] %v1206_v63   ;;  %1492 = vmatmul.mubr.bf16.vlgmr.msra.gmra.mrb[8].mxu0 %v1206_v63  ;;  %1535 = vmatmul.mubr.bf16.vlgmr.msra.gmra.mrb[8].mxu1 %v1206_v63  ;;  %v4731_v13 = vpop.eup %4730  ;;  %v7417_v46 = vld [vmem:[#allocation101_spill] sm:$0xff]  ;;  %v7418_v63 = vld [vmem:[#allocation102_spill] sm:$0xff] }
 0x1a5   :  { %4742 = vrcp.f32 %v1362_v62  ;;  %1658 = vmatpush1.bf16.msra.mxu0 %v6059_v55  ;;  %1701 = vmatpush1.bf16.msra.mxu1 %v6066_v54  ;;  %v4733_v0 = vpop.eup %4732 }
 0x1a6   :  { %4744 = vrcp.f32 %v1374_v15  ;;  %1659 = vmatprep.subr.bf16.mxu0 %v6061_v53  ;;  %1702 = vmatprep.subr.bf16.mxu1 %v6069_v52  ;;  %v4735_v55 = vpop.eup %4734  ;;  %v7405_v53 = vld [vmem:[#allocation92_spill] sm:$0xff]  ;;  %v1387_v21 = vadd.f32 1.0, %v4733_v0 }
 0x1a7   :  { %1689 = vmatprep.mubr.bf16.mxu0 %v7392_v11  ;;  %1732 = vmatprep.mubr.bf16.mxu1 %v7392_v11  ;;  %v4737_v2 = vpop.eup %4736 }
 0x1a8   :  { %v1388_v33 = vadd.f32 1.0, %v4737_v2  ;;  %4746 = vrcp.f32 %v1387_v21  ;;  %v7430_v21 = vld [vmem:[#allocation25_spill] sm:$0xff] }
 0x1a9   :  { %1660 = vmatpush1.bf16.msra.mxu0 %v6073_v9  ;;  %1703 = vmatpush1.bf16.msra.mxu1 %v6081_v8  ;;  %v7407_v9 = vld [vmem:[#allocation93_spill] sm:$0xff] }
 0x1aa   :  { %1661 = vmatprep.subr.bf16.mxu0 %v6076_v10  ;;  %1704 = vmatprep.subr.bf16.mxu1 %v6084_v59 }
 0x1ad   :  { %v4739_v17 = vpop.eup %4738  ;;  %1662 = vmatpush1.bf16.msra.mxu0 %v6087_v57  ;;  %1705 = vmatpush1.bf16.msra.mxu1 %v7405_v53  ;;  %v7410_v57 = vld [vmem:[#allocation94_spill] sm:$0xff] }
 0x1ae   :  { %v4741_v19 = vpop.eup %4740  ;;  %v1395_v48 = vmul.f32 %v4739_v17, %v4731_v13  ;;  %1663 = vmatprep.subr.bf16.mxu0 %v7406_v45  ;;  %1706 = vmatprep.subr.bf16.mxu1 %v7407_v9  ;;  %v7429_v17 = vld [vmem:[#allocation23_spill] sm:$0xff]  ;;  %v1423_v45 = vunpack.c.l.bf16 %v7430_v21 }
 0x1af   :  { %v4743_v49 = vpop.eup %4742  ;;  %v1393_v16 = vmul.f32 %v4741_v19, %v7408_v51  ;;  %v1419_v19 = vunpack.c.l.bf16 %v7429_v17 }
 0x1b0   :  { %v4745_v10 = vpop.eup %4744  ;;  %v1396_v50 = vmul.f32 %v4743_v49, %v4735_v55 }
 0x1b1   :  { %v1394_v44 = vmul.f32 %v4745_v10, %v7409_v18  ;;  %v6236_v1 = vadd.f32 %v1395_v48, %v1393_v16  ;;  %1664 = vmatpush1.bf16.msra.mxu0 %v7410_v57  ;;  %1707 = vmatpush1.bf16.msra.mxu1 %v7411_v60  ;;  %v1420_v48 = vunpack.c.h.bf16 %v7429_v17  ;;  %v1424_v16 = vunpack.c.h.bf16 %v7430_v21 }
 0x1b2   :  { %1665 = vmatprep.subr.bf16.mxu0 %v7412_v12  ;;  %1708 = vmatprep.subr.bf16.mxu1 %v7413_v3  ;;  %v4747_v14 = vpop.eup %4746 }
 0x1b3   :  { %4748 = vtanh.f32 %v6236_v1  ;;  %v6243_v20 = vadd.f32 %v1396_v50, %v1394_v44 }
 0x1b4   :  { %4750 = vrcp.f32 %v1388_v33 }
 0x1b5   :  { %4752 = vtanh.f32 %v6243_v20  ;;  %1666 = vmatpush1.bf16.msra.mxu0 %v7414_v61  ;;  %1709 = vmatpush1.bf16.msra.mxu1 %v6117_v58 }
 0x1b6   :  { %1667 = vmatprep.subr.bf16.mxu0 %v7415_v22  ;;  %1710 = vmatprep.subr.bf16.mxu1 %v7416_v31 }
 0x1b9   :  { %1668 = vmatpush1.bf16.msra.mxu0 %v7417_v46  ;;  %1711 = vmatpush1.bf16.msra.mxu1 %v6129_v5 }
 0x1ba   :  { %1669 = vmatprep.subr.bf16.mxu0 %v7418_v63  ;;  %1712 = vmatprep.subr.bf16.mxu1 %v6132_v4 }
 0x1bd   :  { %v4749_v62 = vpop.eup %4748  ;;  %1670 = vmatpush1.bf16.msra.mxu0 %v6135_v35  ;;  %1713 = vmatpush1.bf16.msra.mxu1 %v6141_v34  ;;  %v6311_v35 = vld [vmem:[#allocation2 + $0xe0] sm:$0xff] }
 0x1be   :  { %v4751_v15 = vpop.eup %4750  ;;  %1671 = vmatprep.subr.bf16.mxu0 %v6137_v6  ;;  %1714 = vmatprep.subr.bf16.mxu1 %v6144_v56  ;;  %v1401_v0 = vmul.f32 %v4749_v62, %v4747_v14  ;;  %v7419_v6 = vld [vmem:[#allocation81_spill] sm:$0xff]  ;;  %v7431_v14 = vld [vmem:[#allocation24_spill] sm:$0xff] }
 0x1bf   :  { %v4753_v13 = vpop.eup %4752  ;;  %v1422_v62 = vunpack.c.h.bf16 %v7431_v14 }
 0x1c0   :  { %v1402_v55 = vmul.f32 %v4753_v13, %v4751_v15 }
 0x1c1   :  { %1672 = vmatpush1.bf16.msra.mxu0 %v6147_v7  ;;  %1715 = vmatpush1.bf16.msra.mxu1 %v6151_v29  ;;  %v7420_v7 = vld [vmem:[#allocation82_spill] sm:$0xff]  ;;  %v6314_v29 = vld [vmem:[#allocation3 + $0x8] sm:$0xff] }
 0x1c2   :  { %v1403_v2 = vpack.c.bf16 %v1402_v55, %v1401_v0  ;;  %1855 = vmatprep.subr.bf16.mxu0 %v5959_v28  ;;  %1898 = vmatprep.subr.bf16.mxu1 %v5967_v38  ;;  %v7425_v28 = vld [vmem:[#allocation87_spill] sm:$0xff]  ;;  %v7432_v0 = vld [vmem:[#allocation26_spill] sm:$0xff] }
 0x1c3   :  { %v6293_v38 = vld [vmem:[#allocation2 + $0x80] sm:$0xff]  ;;  %v1426_v55 = vunpack.c.h.bf16 %v7432_v0 }
 0x1c4   :  { %4675 = vst [vmem:[%s7223_s7 + $0x38] sm:$0xff] %v1403_v2   ;;  %1690 = vmatmul.mubr.bf16.vlgmr.msra.gmra.mrb[12].mxu0 %v1403_v2  ;;  %1733 = vmatmul.mubr.bf16.vlgmr.msra.gmra.mrb[12].mxu1 %v1403_v2 }
 0x1c5   :  { %1856 = vmatpush1.bf16.msra.mxu0 %v5961_v39  ;;  %1899 = vmatpush1.bf16.msra.mxu1 %v5973_v27  ;;  %v7421_v27 = vld [vmem:[#allocation83_spill] sm:$0xff]  ;;  %v6296_v39 = vld [vmem:[#allocation2 + $0xa8] sm:$0xff] }
 0x1c6   :  { %1857 = vmatprep.subr.bf16.mxu0 %v5963_v37  ;;  %1900 = vmatprep.subr.bf16.mxu1 %v5975_v30  ;;  %v7426_v30 = vld [vmem:[#allocation88_spill] sm:$0xff]  ;;  %v7428_v37 = vld [vmem:[#allocation90_spill] sm:$0xff] }
 0x1c7   :  { %1887 = vmatprep.mubr.bf16.mxu0 %v7392_v11  ;;  %1930 = vmatprep.mubr.bf16.mxu1 %v7392_v11 }
 0x1c9   :  { %1858 = vmatpush1.bf16.msra.mxu0 %v5970_v36  ;;  %1901 = vmatpush1.bf16.msra.mxu1 %v5981_v26  ;;  %v7422_v26 = vld [vmem:[#allocation84_spill] sm:$0xff]  ;;  %v7427_v36 = vld [vmem:[#allocation89_spill] sm:$0xff] }
 0x1ca   :  { %1859 = vmatprep.subr.bf16.mxu0 %v5977_v25  ;;  %1902 = vmatprep.subr.bf16.mxu1 %v5984_v24  ;;  %v7423_v25 = vld [vmem:[#allocation85_spill] sm:$0xff]  ;;  %v7424_v24 = vld [vmem:[#allocation86_spill] sm:$0xff] }
 0x1cd   :  { %1860 = vmatpush1.bf16.msra.mxu0 %v5987_v43  ;;  %1903 = vmatpush1.bf16.msra.mxu1 %v5993_v42  ;;  %v6305_v42 = vld [vmem:[#allocation2 + $0xc0] sm:$0xff]  ;;  %v6308_v43 = vld [vmem:[#allocation2 + $0xe8] sm:$0xff] }
 0x1ce   :  { %1861 = vmatprep.subr.bf16.mxu0 %v5989_v41  ;;  %1904 = vmatprep.subr.bf16.mxu1 %v5996_v40  ;;  %v6299_v40 = vld [vmem:[#allocation2 + $0xa0] sm:$0xff]  ;;  %v6302_v41 = vld [vmem:[#allocation2 + $0xc8] sm:$0xff] }
 0x1d1   :  { %1862 = vmatpush1.bf16.msra.mxu0 %v5999_v23  ;;  %1905 = vmatpush1.bf16.msra.mxu1 %v7419_v6  ;;  %v6290_v23 = vld [vmem:[#allocation2 + $0x88] sm:$0xff]  ;;  %v1421_v6 = vunpack.c.l.bf16 %v7431_v14 }
 0x1d2   :  { %1906 = vmatprep.subr.bf16.mxu1 %v7420_v7  ;;  %1863 = vmatprep.subr.bf16.mxu0 %v6290_v23 }
 0x1d5   :  { %1907 = vmatpush1.bf16.msra.mxu1 %v7421_v27  ;;  %1864 = vmatpush1.bf16.msra.mxu0 %v6293_v38 }
 0x1d6   :  { %1908 = vmatprep.subr.bf16.mxu1 %v7422_v26  ;;  %1865 = vmatprep.subr.bf16.mxu0 %v6296_v39 }
 0x1d9   :  { %1909 = vmatpush1.bf16.msra.mxu1 %v7423_v25  ;;  %1866 = vmatpush1.bf16.msra.mxu0 %v6299_v40 }
 0x1da   :  { %1910 = vmatprep.subr.bf16.mxu1 %v7424_v24  ;;  %1867 = vmatprep.subr.bf16.mxu0 %v6302_v41  ;;  %v1425_v24 = vunpack.c.l.bf16 %v7432_v0 }
 0x1dd   :  { %1911 = vmatpush1.bf16.msra.mxu1 %v7425_v28  ;;  %1868 = vmatpush1.bf16.msra.mxu0 %v6305_v42 }
 0x1de   :  { %1912 = vmatprep.subr.bf16.mxu1 %v7426_v30  ;;  %1869 = vmatprep.subr.bf16.mxu0 %v6308_v43 }
 0x1e1   :  { %1913 = vmatpush1.bf16.msra.mxu1 %v7427_v36  ;;  %1870 = vmatpush1.bf16.msra.mxu0 %v6311_v35 }
 0x1e2   :  { %2096 = vmatprep.subr.bf16.mxu1 %v7428_v37  ;;  %2053 = vmatprep.subr.bf16.mxu0 %v6314_v29 }
 0x277   :  { %v1493_v49 = vpop.f32.mrb[8].mxu0  ;;  %v1536_v51 = vpop.f32.mrb[8].mxu1 }
 0x278   :  { %v1545_v10 = vadd.f32 %v1493_v49, %v1419_v19  ;;  %v1495_v50 = vpop.f32.mrb[9].mxu0  ;;  %v1538_v33 = vpop.f32.mrb[9].mxu1  ;;  %v1547_v26 = vadd.f32 %v1536_v51, %v1421_v6 }
 0x279   :  { %v1546_v18 = vadd.f32 %v1495_v50, %v1420_v48  ;;  %v1497_v44 = vpop.f32.mrb[10].mxu0  ;;  %v1540_v57 = vpop.f32.mrb[10].mxu1  ;;  %v1548_v7 = vadd.f32 %v1538_v33, %v1422_v62  ;;  %v7434_v62 = vld [vmem:[#allocation77_spill] sm:$0xff] }
 0x27a   :  { %v4415_v12 = vmul.f32 -1.442695, %v1545_v10  ;;  %v1549_v61 = vadd.f32 %v1497_v44, %v1423_v45  ;;  %v1499_v22 = vpop.f32.mrb[11].mxu0  ;;  %v1542_v46 = vpop.f32.mrb[11].mxu1  ;;  %v1551_v17 = vadd.f32 %v1540_v57, %v1425_v24  ;;  %v7433_v44 = vld [vmem:[#allocation75_spill] sm:$0xff]  ;;  %v1622_v6 = vunpack.c.h.bf16 %v7434_v62 }
 0x27b   :  { %v4417_v63 = vmul.f32 -1.442695, %v1546_v18  ;;  %v1550_v15 = vadd.f32 %v1499_v22, %v1424_v16  ;;  %v1552_v27 = vadd.f32 %v1542_v46, %v1426_v55  ;;  %v4419_v25 = vmul.f32 -1.442695, %v1548_v7 }
 0x27c   :  { %4754 = vpow2.f32 %v4415_v12  ;;  %v4416_v13 = vmul.f32 -1.442695, %v1549_v61  ;;  %v1617_v12 = vunpack.c.l.bf16 %v7433_v44  ;;  %v1618_v46 = vunpack.c.h.bf16 %v7433_v44 }
 0x27d   :  { %4756 = vpow2.f32 %v4417_v63  ;;  %v4418_v2 = vmul.f32 -1.442695, %v1550_v15  ;;  %v4420_v28 = vmul.f32 -1.442695, %v1552_v27  ;;  %v1621_v15 = vunpack.c.l.bf16 %v7434_v62 }
 0x27e   :  { %4758 = vpow2.f32 %v4416_v13 }
 0x27f   :  { %4760 = vpow2.f32 %v4418_v2 }
 0x280   :  { %4762 = vtanh.f32 %v1547_v26 }
 0x281   :  { %4764 = vpow2.f32 %v4419_v25 }
 0x282   :  { %4766 = vpow2.f32 %v4420_v28 }
 0x286   :  { %v4755_v30 = vpop.eup %4754 }
 0x287   :  { %v4757_v36 = vpop.eup %4756  ;;  %v1559_v37 = vadd.f32 1.0, %v4755_v30 }
 0x288   :  { %v1571_v19 = vadd.f32 1.0, %v4757_v36  ;;  %v4759_v48 = vpop.eup %4758 }
 0x289   :  { %4768 = vrcp.f32 %v1559_v37  ;;  %v1560_v21 = vadd.f32 1.0, %v4759_v48  ;;  %v4761_v45 = vpop.eup %4760 }
 0x28a   :  { %4770 = vrcp.f32 %v1571_v19  ;;  %v1572_v49 = vadd.f32 1.0, %v4761_v45  ;;  %v4763_v51 = vpop.eup %4762 }
 0x28b   :  { %4772 = vtanh.f32 %v1551_v17  ;;  %v4765_v16 = vpop.eup %4764 }
 0x28c   :  { %4774 = vrcp.f32 %v1560_v21  ;;  %v4767_v10 = vpop.eup %4766  ;;  %v1585_v22 = vadd.f32 1.0, %v4765_v16 }
 0x28d   :  { %4776 = vrcp.f32 %v1572_v49  ;;  %v1586_v14 = vadd.f32 1.0, %v4767_v10  ;;  %v7435_v49 = vld [vmem:[#allocation76_spill] sm:$0xff] }
 0x28e   :  { %4778 = vrcp.f32 %v1585_v22  ;;  %v1619_v10 = vunpack.c.l.bf16 %v7435_v49 }
 0x28f   :  { %4780 = vrcp.f32 %v1586_v14 }
 0x293   :  { %v4769_v50 = vpop.eup %4768 }
 0x294   :  { %v4771_v33 = vpop.eup %4770  ;;  %v1593_v18 = vmul.f32 %v4769_v50, %v4763_v51  ;;  %v1620_v51 = vunpack.c.h.bf16 %v7435_v49 }
 0x295   :  { %v4773_v57 = vpop.eup %4772  ;;  %v1591_v61 = vmul.f32 %v4771_v33, %v6206_v47  ;;  %v7436_v33 = vld [vmem:[#allocation78_spill] sm:$0xff] }
 0x296   :  { %v4775_v63 = vpop.eup %4774  ;;  %v1623_v44 = vunpack.c.l.bf16 %v7436_v33 }
 0x297   :  { %v6329_v13 = vadd.f32 %v1593_v18, %v1591_v61  ;;  %v1594_v0 = vmul.f32 %v4775_v63, %v4773_v57  ;;  %v1691_v55 = vpop.f32.mrb[12].mxu0  ;;  %v1734_v2 = vpop.f32.mrb[12].mxu1  ;;  %v1624_v18 = vunpack.c.h.bf16 %v7436_v33  ;;  %v6373_v33 = vld [vmem:[#allocation3 + $0x88] sm:$0xff] }
 0x298   :  { %v4777_v7 = vpop.eup %4776  ;;  %v1743_v27 = vadd.f32 %v1691_v55, %v1617_v12  ;;  %v1693_v26 = vpop.f32.mrb[13].mxu0  ;;  %v1745_v57 = vadd.f32 %v1734_v2, %v1619_v10  ;;  %v6341_v2 = vld [vmem:[#allocation3] sm:$0xff] }
 0x299   :  { %v1736_v25 = vpop.f32.mrb[13].mxu1  ;;  %v1592_v47 = vmul.f32 %v4777_v7, %v6210_v32  ;;  %v1744_v24 = vadd.f32 %v1693_v26, %v1618_v46  ;;  %v1695_v28 = vpop.f32.mrb[14].mxu0  ;;  %4782 = vtanh.f32 %v6329_v13 }
 0x29a   :  { %v1738_v30 = vpop.f32.mrb[14].mxu1  ;;  %v4425_v36 = vmul.f32 -1.442695, %v1743_v27  ;;  %v1747_v37 = vadd.f32 %v1695_v28, %v1621_v15  ;;  %v1697_v17 = vpop.f32.mrb[15].mxu0  ;;  %v1746_v50 = vadd.f32 %v1736_v25, %v1620_v51  ;;  %v6343_v28 = vld [vmem:[#allocation3 + $0x28] sm:$0xff] }
 0x29b   :  { %v1740_v19 = vpop.f32.mrb[15].mxu1  ;;  %v6334_v48 = vadd.f32 %v1594_v0, %v1592_v47  ;;  %v4427_v21 = vmul.f32 -1.442695, %v1744_v24  ;;  %v1748_v45 = vadd.f32 %v1697_v17, %v1622_v6  ;;  %v4779_v12 = vpop.eup %4778  ;;  %v1749_v62 = vadd.f32 %v1738_v30, %v1623_v44  ;;  %v6354_v17 = vld [vmem:[#allocation3 + $0x48] sm:$0xff] }
 0x29c   :  { %4784 = vpow2.f32 %v4425_v36  ;;  %v4426_v16 = vmul.f32 -1.442695, %v1747_v37  ;;  %v4781_v61 = vpop.eup %4780  ;;  %v4429_v22 = vmul.f32 -1.442695, %v1746_v50  ;;  %v1750_v46 = vadd.f32 %v1740_v19, %v1624_v18  ;;  %v6352_v37 = vld [vmem:[#allocation3 + $0x20] sm:$0xff] }
 0x29d   :  { %4786 = vtanh.f32 %v6334_v48  ;;  %v4428_v32 = vmul.f32 -1.442695, %v1748_v45  ;;  %v6364_v45 = vld [vmem:[#allocation3 + $0x68] sm:$0xff] }
 0x29e   :  { %4788 = vpow2.f32 %v4427_v21  ;;  %v4430_v6 = vmul.f32 -1.442695, %v1750_v46  ;;  %v6410_v46 = vld [vmem:[#allocation3 + $0xe0] sm:$0xff] }
 0x29f   :  { %4790 = vpow2.f32 %v4426_v16 }
 0x2a0   :  { %4792 = vpow2.f32 %v4428_v32 }
 0x2a1   :  { %4794 = vtanh.f32 %v1745_v57 }
 0x2a2   :  { %4796 = vpow2.f32 %v4429_v22 }
 0x2a3   :  { %v4783_v63 = vpop.eup %4782 }
 0x2a4   :  { %v1599_v7 = vmul.f32 %v4783_v63, %v4779_v12 }
 0x2a6   :  { %v4785_v14 = vpop.eup %4784 }
 0x2a7   :  { %v4787_v15 = vpop.eup %4786  ;;  %v1757_v0 = vadd.f32 1.0, %v4785_v14 }
 0x2a8   :  { %v4789_v55 = vpop.eup %4788  ;;  %v1600_v27 = vmul.f32 %v4787_v15, %v4781_v61 }
 0x2a9   :  { %4798 = vrcp.f32 %v1757_v0  ;;  %v1769_v26 = vadd.f32 1.0, %v4789_v55  ;;  %v4791_v25 = vpop.eup %4790  ;;  %v6427_v0 = vld [vmem:[#allocation2] sm:$0xff]  ;;  %v6429_v55 = vld [vmem:[#allocation2 + $0x10] sm:$0xff] }
 0x2aa   :  { %4800 = vtanh.f32 %v1749_v62  ;;  %v1601_v47 = vpack.c.bf16 %v1600_v27, %v1599_v7  ;;  %v1758_v24 = vadd.f32 1.0, %v4791_v25  ;;  %v4793_v30 = vpop.eup %4792  ;;  %v6435_v7 = vld [vmem:[#allocation2 + $0x38] sm:$0xff]  ;;  %v6439_v27 = vld [vmem:[#allocation2 + $0x20] sm:$0xff]  ;;  %v6445_v25 = vld [vmem:[#allocation2 + $0x48] sm:$0xff] }
 0x2ab   :  { %4802 = vrcp.f32 %v1769_v26  ;;  %v1770_v36 = vadd.f32 1.0, %v4793_v30  ;;  %v4795_v19 = vpop.eup %4794  ;;  %v6441_v26 = vld [vmem:[#allocation2 + $0x30] sm:$0xff] }
 0x2ac   :  { %4804 = vpow2.f32 %v4430_v6  ;;  %4676 = vst [vmem:[%s7222_s6 + $0x8] sm:$0xff] %v1601_v47   ;;  %1888 = vmatmul.mubr.bf16.vlgmr.msra.gmra.mrb[16].mxu0 %v1601_v47  ;;  %1931 = vmatmul.mubr.bf16.vlgmr.msra.gmra.mrb[16].mxu1 %v1601_v47  ;;  %v4797_v21 = vpop.eup %4796  ;;  %v6433_v6 = vld [vmem:[#allocation2 + $0x28] sm:$0xff]  ;;  %v6447_v47 = vld [vmem:[#allocation2 + $0x58] sm:$0xff]  ;;  %v6453_v30 = vld [vmem:[#allocation2 + $0x50] sm:$0xff] }
 0x2ad   :  { %4806 = vrcp.f32 %v1758_v24  ;;  %2054 = vmatpush1.bf16.msra.mxu0 %v6341_v2  ;;  %2097 = vmatpush1.bf16.msra.mxu1 %v6066_v54  ;;  %v1783_v50 = vadd.f32 1.0, %v4797_v21  ;;  %v6451_v24 = vld [vmem:[#allocation2 + $0x40] sm:$0xff] }
 0x2ae   :  { %2055 = vmatprep.subr.bf16.mxu0 %v6343_v28  ;;  %2098 = vmatprep.subr.bf16.mxu1 %v6069_v52  ;;  %4808 = vrcp.f32 %v1770_v36  ;;  %v6362_v52 = vld [vmem:[#allocation3 + $0x40] sm:$0xff]  ;;  %v6457_v36 = vld [vmem:[#allocation2 + $0x68] sm:$0xff] }
 0x2af   :  { %2085 = vmatprep.mubr.bf16.mxu0 %v7392_v11  ;;  %2128 = vmatprep.mubr.bf16.mxu1 %v7392_v11  ;;  %4810 = vrcp.f32 %v1783_v50  ;;  %v6463_v21 = vld [vmem:[#allocation2 + $0x60] sm:$0xff] }
 0x2b1   :  { %2056 = vmatpush1.bf16.msra.mxu0 %v6352_v37  ;;  %2099 = vmatpush1.bf16.msra.mxu1 %v6081_v8 }
 0x2b2   :  { %2057 = vmatprep.subr.bf16.mxu0 %v6354_v17  ;;  %2100 = vmatprep.subr.bf16.mxu1 %v6084_v59  ;;  %v6371_v59 = vld [vmem:[#allocation3 + $0x60] sm:$0xff] }
 0x2b3   :  { %v4799_v54 = vpop.eup %4798 }
 0x2b4   :  { %v4801_v49 = vpop.eup %4800  ;;  %v1791_v51 = vmul.f32 %v4799_v54, %v4795_v19  ;;  %v6459_v19 = vld [vmem:[#allocation2 + $0x78] sm:$0xff]  ;;  %v6465_v54 = vld [vmem:[#allocation2 + $0x70] sm:$0xff] }
 0x2b5   :  { %v4803_v16 = vpop.eup %4802  ;;  %2058 = vmatpush1.bf16.msra.mxu0 %v6362_v52  ;;  %2101 = vmatpush1.bf16.msra.mxu1 %v7405_v53 }
 0x2b6   :  { %v4805_v32 = vpop.eup %4804  ;;  %v1789_v8 = vmul.f32 %v4803_v16, %v6236_v1  ;;  %2059 = vmatprep.subr.bf16.mxu0 %v6364_v45  ;;  %2102 = vmatprep.subr.bf16.mxu1 %v7407_v9  ;;  %v6382_v9 = vld [vmem:[#allocation3 + $0x80] sm:$0xff]  ;;  %v6384_v1 = vld [vmem:[#allocation3 + $0xa8] sm:$0xff]  ;;  %v6478_v16 = vld [vmem:[#allocation2 + $0xb8] sm:$0xff] }
 0x2b7   :  { %v4807_v10 = vpop.eup %4806  ;;  %v1784_v57 = vadd.f32 1.0, %v4805_v32  ;;  %v6482_v32 = vld [vmem:[#allocation2 + $0xb0] sm:$0xff] }
 0x2b8   :  { %v6375_v18 = vadd.f32 %v1791_v51, %v1789_v8  ;;  %v1792_v44 = vmul.f32 %v4807_v10, %v4801_v49  ;;  %v4809_v12 = vpop.eup %4808  ;;  %v6470_v49 = vld [vmem:[#allocation2 + $0x98] sm:$0xff]  ;;  %v6474_v51 = vld [vmem:[#allocation2 + $0x90] sm:$0xff]  ;;  %7437 = vst [vmem:[#allocation92_spill] sm:$0xff] %v6482_v32 }
 0x2b9   :  { %2060 = vmatpush1.bf16.msra.mxu0 %v6371_v59  ;;  %2103 = vmatpush1.bf16.msra.mxu1 %v7411_v60  ;;  %v1790_v53 = vmul.f32 %v4809_v12, %v6243_v20  ;;  %v6394_v60 = vld [vmem:[#allocation3 + $0xa0] sm:$0xff]  ;;  %v4811_v22 = vpop.eup %4810  ;;  %v7444_v10 = vld [vmem:[#allocation29_spill] sm:$0xff] }
 0x2ba   :  { %2061 = vmatprep.subr.bf16.mxu0 %v6373_v33  ;;  %2104 = vmatprep.subr.bf16.mxu1 %v7413_v3  ;;  %4812 = vtanh.f32 %v6375_v18  ;;  %v6396_v3 = vld [vmem:[#allocation3 + $0xc8] sm:$0xff]  ;;  %v6402_v20 = vld [vmem:[#allocation3 + $0xc0] sm:$0xff]  ;;  %v1819_v50 = vunpack.c.l.bf16 %v7444_v10  ;;  %v1820_v12 = vunpack.c.h.bf16 %v7444_v10 }
 0x2bb   :  { %v6387_v61 = vadd.f32 %v1792_v44, %v1790_v53  ;;  %4814 = vrcp.f32 %v1784_v57 }
 0x2bd   :  { %2062 = vmatpush1.bf16.msra.mxu0 %v6382_v9  ;;  %2105 = vmatpush1.bf16.msra.mxu1 %v6117_v58  ;;  %4816 = vtanh.f32 %v6387_v61  ;;  %v6404_v58 = vld [vmem:[#allocation3 + $0xe8] sm:$0xff] }
 0x2be   :  { %2063 = vmatprep.subr.bf16.mxu0 %v6384_v1  ;;  %2106 = vmatprep.subr.bf16.mxu1 %v7416_v31 }
 0x2c1   :  { %2064 = vmatpush1.bf16.msra.mxu0 %v6394_v60  ;;  %2107 = vmatpush1.bf16.msra.mxu1 %v6129_v5  ;;  %v6412_v5 = vld [vmem:[#allocation3 + $0xf0] sm:$0xff] }
 0x2c2   :  { %2065 = vmatprep.subr.bf16.mxu0 %v6396_v3  ;;  %2108 = vmatprep.subr.bf16.mxu1 %v6132_v4 }
 0x2c4   :  { %v4813_v31 = vpop.eup %4812 }
 0x2c5   :  { %2066 = vmatpush1.bf16.msra.mxu0 %v6402_v20  ;;  %2109 = vmatpush1.bf16.msra.mxu1 %v6141_v34  ;;  %v4815_v63 = vpop.eup %4814  ;;  %v1797_v14 = vmul.f32 %v4813_v31, %v4811_v22  ;;  %v6423_v34 = vld [vmem:[#allocation2 + $0x18] sm:$0xff] }
 0x2c6   :  { %2067 = vmatprep.subr.bf16.mxu0 %v6404_v58  ;;  %2110 = vmatprep.subr.bf16.mxu1 %v6144_v56  ;;  %v6421_v56 = vld [vmem:[#allocation2 + $0x8] sm:$0xff] }
 0x2c7   :  { %v4817_v4 = vpop.eup %4816 }
 0x2c8   :  { %v1798_v62 = vmul.f32 %v4817_v4, %v4815_v63 }
 0x2c9   :  { %2068 = vmatpush1.bf16.msra.mxu0 %v6410_v46  ;;  %2111 = vmatpush1.bf16.msra.mxu1 %v6412_v5 }
 0x2ca   :  { %v1799_v15 = vpack.c.bf16 %v1798_v62, %v1797_v14  ;;  %2251 = vmatprep.subr.bf16.mxu0 %v6421_v56  ;;  %2294 = vmatprep.subr.bf16.mxu1 %v6423_v34 }
 0x2cc   :  { %4677 = vst [vmem:[%s7223_s7 + $0x30] sm:$0xff] %v1799_v15   ;;  %2086 = vmatmul.mubr.bf16.vlgmr.msra.gmra.mrb[20].mxu0 %v1799_v15  ;;  %2129 = vmatmul.mubr.bf16.vlgmr.msra.gmra.mrb[20].mxu1 %v1799_v15 }
 0x2cd   :  { %2283 = vmatprep.mubr.bf16.mxu0 %v7392_v11  ;;  %2326 = vmatprep.mubr.bf16.mxu1 %v7392_v11 }
 0x2ce   :  { %2252 = vmatpush1.bf16.msra.mxu0 %v6427_v0  ;;  %2295 = vmatpush1.bf16.msra.mxu1 %v6429_v55 }
 0x2cf   :  { %2253 = vmatprep.subr.bf16.mxu0 %v6433_v6  ;;  %2296 = vmatprep.subr.bf16.mxu1 %v6435_v7 }
 0x2d2   :  { %2254 = vmatpush1.bf16.msra.mxu0 %v6439_v27  ;;  %2297 = vmatpush1.bf16.msra.mxu1 %v6441_v26 }
 0x2d3   :  { %2255 = vmatprep.subr.bf16.mxu0 %v6445_v25  ;;  %2298 = vmatprep.subr.bf16.mxu1 %v6447_v47 }
 0x2d6   :  { %2256 = vmatpush1.bf16.msra.mxu0 %v6451_v24  ;;  %2299 = vmatpush1.bf16.msra.mxu1 %v6453_v30 }
 0x2d7   :  { %2257 = vmatprep.subr.bf16.mxu0 %v6457_v36  ;;  %2300 = vmatprep.subr.bf16.mxu1 %v6459_v19 }
 0x2da   :  { %2258 = vmatpush1.bf16.msra.mxu0 %v6463_v21  ;;  %2301 = vmatpush1.bf16.msra.mxu1 %v6465_v54 }
 0x2db   :  { %2259 = vmatprep.subr.bf16.mxu0 %v6290_v23  ;;  %2302 = vmatprep.subr.bf16.mxu1 %v6470_v49  ;;  %v6486_v23 = vld [vmem:[#allocation2 + $0xd8] sm:$0xff] }
 0x2dc   :  { %7438 = vst [vmem:[#allocation91_spill] sm:$0xff] %v6486_v23 }
 0x2de   :  { %2260 = vmatpush1.bf16.msra.mxu0 %v6293_v38  ;;  %2303 = vmatpush1.bf16.msra.mxu1 %v6474_v51  ;;  %v6490_v38 = vld [vmem:[#allocation2 + $0xd0] sm:$0xff] }
 0x2df   :  { %2261 = vmatprep.subr.bf16.mxu0 %v6296_v39  ;;  %2304 = vmatprep.subr.bf16.mxu1 %v6478_v16  ;;  %7439 = vst [vmem:[#allocation93_spill] sm:$0xff] %v6490_v38  ;;  %v6494_v39 = vld [vmem:[#allocation2 + $0xf8] sm:$0xff] }
 0x2e0   :  { %7440 = vst [vmem:[#allocation79_spill] sm:$0xff] %v6494_v39 }
 0x2e2   :  { %2262 = vmatpush1.bf16.msra.mxu0 %v6299_v40  ;;  %2305 = vmatpush1.bf16.msra.mxu1 %v6482_v32  ;;  %v6498_v40 = vld [vmem:[#allocation2 + $0xf0] sm:$0xff] }
 0x2e3   :  { %2263 = vmatprep.subr.bf16.mxu0 %v6302_v41  ;;  %2306 = vmatprep.subr.bf16.mxu1 %v6486_v23  ;;  %7441 = vst [vmem:[#allocation80_spill] sm:$0xff] %v6498_v40  ;;  %v6502_v41 = vld [vmem:[#allocation3 + $0x18] sm:$0xff] }
 0x2e4   :  { %7442 = vst [vmem:[#allocation94_spill] sm:$0xff] %v6502_v41 }
 0x2e6   :  { %2264 = vmatpush1.bf16.msra.mxu0 %v6305_v42  ;;  %2307 = vmatpush1.bf16.msra.mxu1 %v6490_v38  ;;  %v7443_v42 = vld [vmem:[#allocation27_spill] sm:$0xff] }
 0x2e7   :  { %2265 = vmatprep.subr.bf16.mxu0 %v6308_v43  ;;  %2308 = vmatprep.subr.bf16.mxu1 %v6494_v39  ;;  %v1815_v43 = vunpack.c.l.bf16 %v7443_v42  ;;  %v1816_v8 = vunpack.c.h.bf16 %v7443_v42 }
 0x2ea   :  { %2266 = vmatpush1.bf16.msra.mxu0 %v6311_v35  ;;  %2309 = vmatpush1.bf16.msra.mxu1 %v6498_v40  ;;  %v7445_v40 = vld [vmem:[#allocation28_spill] sm:$0xff] }
 0x2eb   :  { %2449 = vmatprep.subr.bf16.mxu0 %v6314_v29  ;;  %2492 = vmatprep.subr.bf16.mxu1 %v6502_v41  ;;  %v1818_v39 = vunpack.c.h.bf16 %v7445_v40  ;;  %v1817_v10 = vunpack.c.l.bf16 %v7445_v40 }
 0x37f   :  { %v1889_v44 = vpop.f32.mrb[16].mxu0  ;;  %v1932_v35 = vpop.f32.mrb[16].mxu1 }
 0x380   :  { %v1941_v57 = vadd.f32 %v1889_v44, %v1815_v43  ;;  %v1891_v53 = vpop.f32.mrb[17].mxu0  ;;  %v1934_v22 = vpop.f32.mrb[17].mxu1  ;;  %v7446_v44 = vld [vmem:[#allocation30_spill] sm:$0xff] }
 0x381   :  { %v1942_v29 = vadd.f32 %v1891_v53, %v1816_v8  ;;  %v1893_v31 = vpop.f32.mrb[18].mxu0  ;;  %v1936_v63 = vpop.f32.mrb[18].mxu1  ;;  %v1944_v43 = vadd.f32 %v1934_v22, %v1818_v39  ;;  %v1822_v8 = vunpack.c.h.bf16 %v7446_v44  ;;  %v1821_v53 = vunpack.c.l.bf16 %v7446_v44 }
 0x382   :  { %v4435_v4 = vmul.f32 -1.442695, %v1941_v57  ;;  %v1945_v14 = vadd.f32 %v1893_v31, %v1819_v50  ;;  %v1895_v62 = vpop.f32.mrb[19].mxu0  ;;  %v1938_v15 = vpop.f32.mrb[19].mxu1  ;;  %v1943_v50 = vadd.f32 %v1932_v35, %v1817_v10 }
 0x383   :  { %v4437_v41 = vmul.f32 -1.442695, %v1942_v29  ;;  %v1946_v42 = vadd.f32 %v1895_v62, %v1820_v12  ;;  %v4439_v57 = vmul.f32 -1.442695, %v1944_v43  ;;  %v1948_v31 = vadd.f32 %v1938_v15, %v1822_v8  ;;  %v7447_v43 = vld [vmem:[#allocation71_spill] sm:$0xff] }
 0x384   :  { %4818 = vpow2.f32 %v4435_v4  ;;  %v4436_v38 = vmul.f32 -1.442695, %v1945_v14  ;;  %v1947_v29 = vadd.f32 %v1936_v63, %v1821_v53  ;;  %v2013_v44 = vunpack.c.l.bf16 %v7447_v43 }
 0x385   :  { %4820 = vpow2.f32 %v4437_v41  ;;  %v4438_v23 = vmul.f32 -1.442695, %v1946_v42  ;;  %v4440_v41 = vmul.f32 -1.442695, %v1948_v31 }
 0x386   :  { %4822 = vpow2.f32 %v4436_v38 }
 0x387   :  { %4824 = vpow2.f32 %v4438_v23 }
 0x388   :  { %4826 = vtanh.f32 %v1943_v50  ;;  %v2014_v50 = vunpack.c.h.bf16 %v7447_v43 }
 0x389   :  { %4828 = vpow2.f32 %v4439_v57 }
 0x38a   :  { %4830 = vtanh.f32 %v1947_v29  ;;  %v7448_v29 = vld [vmem:[#allocation73_spill] sm:$0xff] }
 0x38e   :  { %v4819_v32 = vpop.eup %4818 }
 0x38f   :  { %v4821_v12 = vpop.eup %4820  ;;  %v1955_v4 = vadd.f32 1.0, %v4819_v32 }
 0x390   :  { %v1967_v14 = vadd.f32 1.0, %v4821_v12  ;;  %v4823_v40 = vpop.eup %4822  ;;  %v2017_v12 = vunpack.c.l.bf16 %v7448_v29 }
 0x391   :  { %4832 = vrcp.f32 %v1955_v4  ;;  %v1956_v38 = vadd.f32 1.0, %v4823_v40  ;;  %v4825_v39 = vpop.eup %4824 }
 0x392   :  { %4834 = vrcp.f32 %v1967_v14  ;;  %v1968_v23 = vadd.f32 1.0, %v4825_v39  ;;  %v4827_v35 = vpop.eup %4826 }
 0x393   :  { %4836 = vpow2.f32 %v4440_v41  ;;  %v4829_v22 = vpop.eup %4828 }
 0x394   :  { %4838 = vrcp.f32 %v1956_v38  ;;  %v4831_v63 = vpop.eup %4830  ;;  %v1981_v53 = vadd.f32 1.0, %v4829_v22  ;;  %v2018_v38 = vunpack.c.h.bf16 %v7448_v29 }
 0x395   :  { %4840 = vrcp.f32 %v1968_v23 }
 0x396   :  { %4842 = vrcp.f32 %v1981_v53 }
 0x39b   :  { %v4833_v62 = vpop.eup %4832 }
 0x39c   :  { %v4835_v15 = vpop.eup %4834  ;;  %v1989_v42 = vmul.f32 %v4833_v62, %v4827_v35 }
 0x39d   :  { %v4837_v32 = vpop.eup %4836  ;;  %v1987_v10 = vmul.f32 %v4835_v15, %v6329_v13 }
 0x39e   :  { %v4839_v8 = vpop.eup %4838  ;;  %v1982_v41 = vadd.f32 1.0, %v4837_v32 }
 0x39f   :  { %v6516_v57 = vadd.f32 %v1989_v42, %v1987_v10  ;;  %v1990_v31 = vmul.f32 %v4839_v8, %v4831_v63  ;;  %v4841_v4 = vpop.eup %4840  ;;  %v2087_v14 = vpop.f32.mrb[20].mxu0 }
 0x3a0   :  { %v2130_v40 = vpop.f32.mrb[20].mxu1  ;;  %v1988_v39 = vmul.f32 %v4841_v4, %v6334_v48  ;;  %v2139_v13 = vadd.f32 %v2087_v14, %v2013_v44  ;;  %v2089_v23 = vpop.f32.mrb[21].mxu0  ;;  %v7449_v48 = vld [vmem:[#allocation72_spill] sm:$0xff] }
 0x3a1   :  { %v2132_v35 = vpop.f32.mrb[21].mxu1  ;;  %v2140_v22 = vadd.f32 %v2089_v23, %v2014_v50  ;;  %v2091_v62 = vpop.f32.mrb[22].mxu0  ;;  %4844 = vtanh.f32 %v6516_v57  ;;  %v2016_v44 = vunpack.c.h.bf16 %v7449_v48  ;;  %v2015_v50 = vunpack.c.l.bf16 %v7449_v48 }
 0x3a2   :  { %v2134_v15 = vpop.f32.mrb[22].mxu1  ;;  %v6522_v63 = vadd.f32 %v1990_v31, %v1988_v39  ;;  %v4445_v42 = vmul.f32 -1.442695, %v2139_v13  ;;  %v2143_v10 = vadd.f32 %v2091_v62, %v2017_v12  ;;  %v2093_v32 = vpop.f32.mrb[23].mxu0  ;;  %4846 = vrcp.f32 %v1982_v41  ;;  %v7450_v31 = vld [vmem:[#allocation74_spill] sm:$0xff] }
 0x3a3   :  { %v2136_v43 = vpop.f32.mrb[23].mxu1  ;;  %v4447_v8 = vmul.f32 -1.442695, %v2140_v22  ;;  %v2144_v29 = vadd.f32 %v2093_v32, %v2018_v38  ;;  %v2142_v14 = vadd.f32 %v2132_v35, %v2016_v44  ;;  %v2020_v39 = vunpack.c.h.bf16 %v7450_v31  ;;  %v4843_v41 = vpop.eup %4842 }
 0x3a4   :  { %4848 = vtanh.f32 %v6522_v63  ;;  %v4446_v4 = vmul.f32 -1.442695, %v2143_v10  ;;  %v2019_v12 = vunpack.c.l.bf16 %v7450_v31  ;;  %v2141_v13 = vadd.f32 %v2130_v40, %v2015_v50  ;;  %v6531_v50 = vld [vmem:[#allocation3 + $0x38] sm:$0xff] }
 0x3a5   :  { %4850 = vpow2.f32 %v4445_v42  ;;  %v4448_v53 = vmul.f32 -1.442695, %v2144_v29  ;;  %v4449_v23 = vmul.f32 -1.442695, %v2142_v14  ;;  %v2146_v22 = vadd.f32 %v2136_v43, %v2020_v39  ;;  %v6540_v39 = vld [vmem:[#allocation3 + $0x30] sm:$0xff] }
 0x3a6   :  { %4852 = vpow2.f32 %v4447_v8  ;;  %v2145_v32 = vadd.f32 %v2134_v15, %v2019_v12  ;;  %v6542_v12 = vld [vmem:[#allocation3 + $0x58] sm:$0xff] }
 0x3a7   :  { %4854 = vpow2.f32 %v4446_v4  ;;  %v4450_v44 = vmul.f32 -1.442695, %v2146_v22 }
 0x3a8   :  { %4856 = vpow2.f32 %v4448_v53  ;;  %v6529_v53 = vld [vmem:[#allocation3 + $0x10] sm:$0xff] }
 0x3a9   :  { %4858 = vtanh.f32 %v2141_v13  ;;  %v6552_v13 = vld [vmem:[#allocation3 + $0x78] sm:$0xff] }
 0x3aa   :  { %4860 = vpow2.f32 %v4449_v23 }
 0x3ab   :  { %v4845_v38 = vpop.eup %4844  ;;  %4862 = vtanh.f32 %v2145_v32 }
 0x3ac   :  { %v4847_v62 = vpop.eup %4846  ;;  %v1995_v8 = vmul.f32 %v4845_v38, %v4843_v41 }
 0x3ae   :  { %v4849_v10 = vpop.eup %4848 }
 0x3af   :  { %v4851_v42 = vpop.eup %4850  ;;  %v1996_v29 = vmul.f32 %v4849_v10, %v4847_v62  ;;  %v6561_v10 = vld [vmem:[#allocation3 + $0x98] sm:$0xff] }
 0x3b0   :  { %v4853_v48 = vpop.eup %4852  ;;  %v2153_v35 = vadd.f32 1.0, %v4851_v42 }
 0x3b1   :  { %v2165_v4 = vadd.f32 1.0, %v4853_v48  ;;  %v1997_v31 = vpack.c.bf16 %v1996_v29, %v1995_v8  ;;  %v4855_v40 = vpop.eup %4854 }
 0x3b2   :  { %4864 = vrcp.f32 %v2153_v35  ;;  %v2154_v15 = vadd.f32 1.0, %v4855_v40  ;;  %v4857_v43 = vpop.eup %4856  ;;  %v6569_v35 = vld [vmem:[#allocation3 + $0x90] sm:$0xff] }
 0x3b3   :  { %4866 = vrcp.f32 %v2165_v4  ;;  %4678 = vst [vmem:[%s7222_s6 + $0x10] sm:$0xff] %v1997_v31   ;;  %2284 = vmatmul.mubr.bf16.vlgmr.msra.gmra.mrb[24].mxu0 %v1997_v31  ;;  %2327 = vmatmul.mubr.bf16.vlgmr.msra.gmra.mrb[24].mxu1 %v1997_v31  ;;  %v2166_v14 = vadd.f32 1.0, %v4857_v43 }
 0x3b4   :  { %4868 = vpow2.f32 %v4450_v44  ;;  %2450 = vmatpush1.bf16.msra.mxu0 %v6341_v2  ;;  %2493 = vmatpush1.bf16.msra.mxu1 %v6529_v53  ;;  %v4859_v2 = vpop.eup %4858  ;;  %v6572_v44 = vld [vmem:[#allocation3 + $0xb8] sm:$0xff] }
 0x3b5   :  { %4870 = vrcp.f32 %v2154_v15  ;;  %2451 = vmatprep.subr.bf16.mxu0 %v6343_v28  ;;  %2494 = vmatprep.subr.bf16.mxu1 %v6531_v50  ;;  %v6550_v28 = vld [vmem:[#allocation3 + $0x50] sm:$0xff]  ;;  %v4861_v41 = vpop.eup %4860 }
 0x3b6   :  { %2481 = vmatprep.mubr.bf16.mxu0 %v7392_v11  ;;  %2524 = vmatprep.mubr.bf16.mxu1 %v7392_v11  ;;  %4872 = vrcp.f32 %v2166_v14  ;;  %v4863_v38 = vpop.eup %4862  ;;  %v2179_v8 = vadd.f32 1.0, %v4861_v41 }
 0x3b8   :  { %2452 = vmatpush1.bf16.msra.mxu0 %v6352_v37  ;;  %2495 = vmatpush1.bf16.msra.mxu1 %v6540_v39  ;;  %4874 = vrcp.f32 %v2179_v8 }
 0x3b9   :  { %2453 = vmatprep.subr.bf16.mxu0 %v6354_v17  ;;  %2496 = vmatprep.subr.bf16.mxu1 %v6542_v12  ;;  %v6558_v17 = vld [vmem:[#allocation3 + $0x70] sm:$0xff] }
 0x3bc   :  { %v4865_v23 = vpop.eup %4864  ;;  %2454 = vmatpush1.bf16.msra.mxu0 %v6362_v52  ;;  %2497 = vmatpush1.bf16.msra.mxu1 %v6550_v28 }
 0x3bd   :  { %v4867_v22 = vpop.eup %4866  ;;  %v2187_v37 = vmul.f32 %v4865_v23, %v4859_v2  ;;  %2455 = vmatprep.subr.bf16.mxu0 %v6364_v45  ;;  %2498 = vmatprep.subr.bf16.mxu1 %v6552_v13 }
 0x3be   :  { %v4869_v62 = vpop.eup %4868  ;;  %v2185_v32 = vmul.f32 %v4867_v22, %v6375_v18 }
 0x3bf   :  { %v4871_v42 = vpop.eup %4870  ;;  %v2180_v45 = vadd.f32 1.0, %v4869_v62 }
 0x3c0   :  { %v6563_v29 = vadd.f32 %v2187_v37, %v2185_v32  ;;  %v2188_v52 = vmul.f32 %v4871_v42, %v4863_v38  ;;  %2456 = vmatpush1.bf16.msra.mxu0 %v6371_v59  ;;  %2499 = vmatpush1.bf16.msra.mxu1 %v6558_v17  ;;  %v4873_v48 = vpop.eup %4872  ;;  %v6581_v59 = vld [vmem:[#allocation3 + $0xb0] sm:$0xff] }
 0x3c1   :  { %2457 = vmatprep.subr.bf16.mxu0 %v6373_v33  ;;  %2500 = vmatprep.subr.bf16.mxu1 %v6561_v10  ;;  %v2186_v18 = vmul.f32 %v4873_v48, %v6387_v61  ;;  %v6584_v33 = vld [vmem:[#allocation3 + $0xd8] sm:$0xff] }
 0x3c2   :  { %4876 = vtanh.f32 %v6563_v29  ;;  %v6592_v61 = vld [vmem:[#allocation3 + $0xf8] sm:$0xff] }
 0x3c3   :  { %v6575_v4 = vadd.f32 %v2188_v52, %v2186_v18  ;;  %4878 = vrcp.f32 %v2180_v45  ;;  %v7459_v52 = vld [vmem:[#allocation32_spill] sm:$0xff] }
 0x3c4   :  { %2458 = vmatpush1.bf16.msra.mxu0 %v6382_v9  ;;  %2501 = vmatpush1.bf16.msra.mxu1 %v6569_v35  ;;  %v6590_v9 = vld [vmem:[#allocation3 + $0xd0] sm:$0xff]  ;;  %v2214_v48 = vunpack.c.h.bf16 %v7459_v52 }
 0x3c5   :  { %2459 = vmatprep.subr.bf16.mxu0 %v6384_v1  ;;  %2502 = vmatprep.subr.bf16.mxu1 %v6572_v44  ;;  %4880 = vtanh.f32 %v6575_v4  ;;  %v4875_v1 = vpop.eup %4874 }
 0x3c8   :  { %2460 = vmatpush1.bf16.msra.mxu0 %v6394_v60  ;;  %2503 = vmatpush1.bf16.msra.mxu1 %v6581_v59 }
 0x3c9   :  { %2461 = vmatprep.subr.bf16.mxu0 %v6396_v3  ;;  %2504 = vmatprep.subr.bf16.mxu1 %v6584_v33 }
 0x3cc   :  { %2462 = vmatpush1.bf16.msra.mxu0 %v6402_v20  ;;  %2505 = vmatpush1.bf16.msra.mxu1 %v6590_v9  ;;  %v4877_v60 = vpop.eup %4876 }
 0x3cd   :  { %2463 = vmatprep.subr.bf16.mxu0 %v6404_v58  ;;  %2506 = vmatprep.subr.bf16.mxu1 %v6592_v61  ;;  %v4879_v31 = vpop.eup %4878  ;;  %v2193_v3 = vmul.f32 %v4877_v60, %v4875_v1  ;;  %v7451_v58 = vld [vmem:[#allocation92_spill] sm:$0xff]  ;;  %v2213_v60 = vunpack.c.l.bf16 %v7459_v52 }
 0x3cf   :  { %v4881_v40 = vpop.eup %4880 }
 0x3d0   :  { %2464 = vmatpush1.bf16.msra.mxu0 %v6410_v46  ;;  %2507 = vmatpush1.bf16.msra.mxu1 %v6412_v5  ;;  %v2194_v15 = vmul.f32 %v4881_v40, %v4879_v31  ;;  %v7452_v46 = vld [vmem:[#allocation91_spill] sm:$0xff]  ;;  %v7453_v5 = vld [vmem:[#allocation93_spill] sm:$0xff]  ;;  %v7460_v40 = vld [vmem:[#allocation34_spill] sm:$0xff] }
 0x3d1   :  { %2647 = vmatprep.subr.bf16.mxu0 %v6421_v56  ;;  %2690 = vmatprep.subr.bf16.mxu1 %v6423_v34  ;;  %v7454_v56 = vld [vmem:[#allocation79_spill] sm:$0xff]  ;;  %v7455_v34 = vld [vmem:[#allocation80_spill] sm:$0xff] }
 0x3d2   :  { %v2195_v20 = vpack.c.bf16 %v2194_v15, %v2193_v3  ;;  %v2218_v3 = vunpack.c.h.bf16 %v7460_v40  ;;  %v2217_v15 = vunpack.c.l.bf16 %v7460_v40 }
 0x3d4   :  { %4679 = vst [vmem:[%s7223_s7 + $0x28] sm:$0xff] %v2195_v20   ;;  %2482 = vmatmul.mubr.bf16.vlgmr.msra.gmra.mrb[28].mxu0 %v2195_v20  ;;  %2525 = vmatmul.mubr.bf16.vlgmr.msra.gmra.mrb[28].mxu1 %v2195_v20 }
 0x3d5   :  { %2648 = vmatpush1.bf16.msra.mxu0 %v6427_v0  ;;  %2691 = vmatpush1.bf16.msra.mxu1 %v6429_v55  ;;  %v7456_v0 = vld [vmem:[#allocation94_spill] sm:$0xff]  ;;  %v6630_v55 = vld [vmem:[#allocation2 + $0x88] sm:$0xff] }
 0x3d6   :  { %2649 = vmatprep.subr.bf16.mxu0 %v6433_v6  ;;  %2692 = vmatprep.subr.bf16.mxu1 %v6435_v7  ;;  %v6633_v6 = vld [vmem:[#allocation2 + $0x80] sm:$0xff]  ;;  %v6636_v7 = vld [vmem:[#allocation2 + $0xa8] sm:$0xff] }
 0x3d7   :  { %2679 = vmatprep.mubr.bf16.mxu0 %v7392_v11  ;;  %2722 = vmatprep.mubr.bf16.mxu1 %v7392_v11 }
 0x3d9   :  { %2650 = vmatpush1.bf16.msra.mxu0 %v6439_v27  ;;  %2693 = vmatpush1.bf16.msra.mxu1 %v6441_v26  ;;  %v6639_v27 = vld [vmem:[#allocation2 + $0xa0] sm:$0xff]  ;;  %v6642_v26 = vld [vmem:[#allocation2 + $0xc8] sm:$0xff] }
 0x3da   :  { %2651 = vmatprep.subr.bf16.mxu0 %v6445_v25  ;;  %2694 = vmatprep.subr.bf16.mxu1 %v6447_v47  ;;  %v6645_v25 = vld [vmem:[#allocation2 + $0xc0] sm:$0xff]  ;;  %v6648_v47 = vld [vmem:[#allocation2 + $0xe8] sm:$0xff] }
 0x3dd   :  { %2652 = vmatpush1.bf16.msra.mxu0 %v6451_v24  ;;  %2695 = vmatpush1.bf16.msra.mxu1 %v6453_v30  ;;  %v6651_v24 = vld [vmem:[#allocation2 + $0xe0] sm:$0xff]  ;;  %v6654_v30 = vld [vmem:[#allocation3 + $0x8] sm:$0xff] }
 0x3de   :  { %2653 = vmatprep.subr.bf16.mxu0 %v6457_v36  ;;  %2696 = vmatprep.subr.bf16.mxu1 %v6459_v19  ;;  %v7457_v36 = vld [vmem:[#allocation31_spill] sm:$0xff] }
 0x3df   :  { %v2211_v19 = vunpack.c.l.bf16 %v7457_v36 }
 0x3e1   :  { %2654 = vmatpush1.bf16.msra.mxu0 %v6463_v21  ;;  %2697 = vmatpush1.bf16.msra.mxu1 %v6465_v54  ;;  %v2212_v21 = vunpack.c.h.bf16 %v7457_v36  ;;  %v7458_v54 = vld [vmem:[#allocation33_spill] sm:$0xff] }
 0x3e2   :  { %2698 = vmatprep.subr.bf16.mxu1 %v6470_v49  ;;  %2655 = vmatprep.subr.bf16.mxu0 %v6630_v55  ;;  %v2215_v49 = vunpack.c.l.bf16 %v7458_v54  ;;  %v2216_v43 = vunpack.c.h.bf16 %v7458_v54 }
 0x3e5   :  { %2699 = vmatpush1.bf16.msra.mxu1 %v6474_v51  ;;  %2656 = vmatpush1.bf16.msra.mxu0 %v6633_v6 }
 0x3e6   :  { %2700 = vmatprep.subr.bf16.mxu1 %v6478_v16  ;;  %2657 = vmatprep.subr.bf16.mxu0 %v6636_v7 }
 0x3e9   :  { %2701 = vmatpush1.bf16.msra.mxu1 %v7451_v58  ;;  %2658 = vmatpush1.bf16.msra.mxu0 %v6639_v27 }
 0x3ea   :  { %2702 = vmatprep.subr.bf16.mxu1 %v7452_v46  ;;  %2659 = vmatprep.subr.bf16.mxu0 %v6642_v26 }
 0x3ed   :  { %2703 = vmatpush1.bf16.msra.mxu1 %v7453_v5  ;;  %2660 = vmatpush1.bf16.msra.mxu0 %v6645_v25 }
 0x3ee   :  { %2704 = vmatprep.subr.bf16.mxu1 %v7454_v56  ;;  %2661 = vmatprep.subr.bf16.mxu0 %v6648_v47 }
 0x3f1   :  { %2705 = vmatpush1.bf16.msra.mxu1 %v7455_v34  ;;  %2662 = vmatpush1.bf16.msra.mxu0 %v6651_v24 }
 0x3f2   :  { %2888 = vmatprep.subr.bf16.mxu1 %v7456_v0  ;;  %2845 = vmatprep.subr.bf16.mxu0 %v6654_v30 }
 0x486   :  { %v2285_v51 = vpop.f32.mrb[24].mxu0  ;;  %v2328_v16 = vpop.f32.mrb[24].mxu1 }
 0x487   :  { %v2337_v14 = vadd.f32 %v2285_v51, %v2211_v19  ;;  %v2287_v2 = vpop.f32.mrb[25].mxu0  ;;  %v2330_v41 = vpop.f32.mrb[25].mxu1  ;;  %v2339_v20 = vadd.f32 %v2328_v16, %v2213_v60 }
 0x488   :  { %v2338_v38 = vadd.f32 %v2287_v2, %v2212_v21  ;;  %v2289_v23 = vpop.f32.mrb[26].mxu0  ;;  %v2332_v22 = vpop.f32.mrb[26].mxu1  ;;  %v2340_v31 = vadd.f32 %v2330_v41, %v2214_v48 }
 0x489   :  { %v4455_v37 = vmul.f32 -1.442695, %v2337_v14  ;;  %v2341_v62 = vadd.f32 %v2289_v23, %v2215_v49  ;;  %v2291_v32 = vpop.f32.mrb[27].mxu0  ;;  %v2334_v42 = vpop.f32.mrb[27].mxu1  ;;  %v2343_v5 = vadd.f32 %v2332_v22, %v2217_v15 }
 0x48a   :  { %v4457_v8 = vmul.f32 -1.442695, %v2338_v38  ;;  %v2342_v45 = vadd.f32 %v2291_v32, %v2216_v43  ;;  %v4459_v58 = vmul.f32 -1.442695, %v2340_v31  ;;  %v2344_v46 = vadd.f32 %v2334_v42, %v2218_v3  ;;  %v7461_v32 = vld [vmem:[#allocation67_spill] sm:$0xff] }
 0x48b   :  { %4882 = vpow2.f32 %v4455_v37  ;;  %v4456_v18 = vmul.f32 -1.442695, %v2341_v62  ;;  %v2409_v42 = vunpack.c.l.bf16 %v7461_v32  ;;  %v2410_v48 = vunpack.c.h.bf16 %v7461_v32 }
 0x48c   :  { %4884 = vpow2.f32 %v4457_v8  ;;  %v4458_v1 = vmul.f32 -1.442695, %v2342_v45  ;;  %v4460_v36 = vmul.f32 -1.442695, %v2344_v46 }
 0x48d   :  { %4886 = vpow2.f32 %v4456_v18 }
 0x48e   :  { %4888 = vpow2.f32 %v4458_v1  ;;  %v7462_v1 = vld [vmem:[#allocation69_spill] sm:$0xff] }
 0x48f   :  { %4890 = vtanh.f32 %v2339_v20  ;;  %v2413_v60 = vunpack.c.l.bf16 %v7462_v1  ;;  %v2414_v15 = vunpack.c.h.bf16 %v7462_v1 }
 0x490   :  { %4892 = vpow2.f32 %v4459_v58 }
 0x491   :  { %4894 = vtanh.f32 %v2343_v5 }
 0x495   :  { %v4883_v56 = vpop.eup %4882 }
 0x496   :  { %v4885_v34 = vpop.eup %4884  ;;  %v2351_v0 = vadd.f32 1.0, %v4883_v56 }
 0x497   :  { %v2363_v19 = vadd.f32 1.0, %v4885_v34  ;;  %v4887_v21 = vpop.eup %4886 }
 0x498   :  { %4896 = vrcp.f32 %v2351_v0  ;;  %v2352_v54 = vadd.f32 1.0, %v4887_v21  ;;  %v4889_v49 = vpop.eup %4888 }
 0x499   :  { %4898 = vrcp.f32 %v2363_v19  ;;  %v2364_v51 = vadd.f32 1.0, %v4889_v49  ;;  %v4891_v16 = vpop.eup %4890 }
 0x49a   :  { %4900 = vpow2.f32 %v4460_v36  ;;  %v4893_v43 = vpop.eup %4892 }
 0x49b   :  { %4902 = vrcp.f32 %v2352_v54  ;;  %v4895_v14 = vpop.eup %4894  ;;  %v2377_v62 = vadd.f32 1.0, %v4893_v43  ;;  %v7463_v54 = vld [vmem:[#allocation68_spill] sm:$0xff] }
 0x49c   :  { %4904 = vrcp.f32 %v2364_v51  ;;  %v2412_v49 = vunpack.c.h.bf16 %v7463_v54 }
 0x49d   :  { %4906 = vrcp.f32 %v2377_v62 }
 0x4a2   :  { %v4897_v2 = vpop.eup %4896 }
 0x4a3   :  { %v4899_v41 = vpop.eup %4898  ;;  %v2385_v38 = vmul.f32 %v4897_v2, %v4891_v16 }
 0x4a4   :  { %v4901_v23 = vpop.eup %4900  ;;  %v2383_v22 = vmul.f32 %v4899_v41, %v6516_v57  ;;  %v7464_v41 = vld [vmem:[#allocation70_spill] sm:$0xff] }
 0x4a5   :  { %v4903_v37 = vpop.eup %4902  ;;  %v2378_v18 = vadd.f32 1.0, %v4901_v23  ;;  %v2415_v23 = vunpack.c.l.bf16 %v7464_v41 }
 0x4a6   :  { %v6667_v8 = vadd.f32 %v2385_v38, %v2383_v22  ;;  %v2386_v52 = vmul.f32 %v4903_v37, %v4895_v14  ;;  %v4905_v45 = vpop.eup %4904  ;;  %v2411_v14 = vunpack.c.l.bf16 %v7463_v54  ;;  %v2416_v38 = vunpack.c.h.bf16 %v7464_v41 }
 0x4a7   :  { %v2384_v31 = vmul.f32 %v4905_v45, %v6522_v63  ;;  %v2483_v40 = vpop.f32.mrb[28].mxu0  ;;  %v2526_v3 = vpop.f32.mrb[28].mxu1 }
 0x4a8   :  { %v2535_v57 = vadd.f32 %v2483_v40, %v2409_v42  ;;  %v2485_v20 = vpop.f32.mrb[29].mxu0  ;;  %v2528_v58 = vpop.f32.mrb[29].mxu1  ;;  %4908 = vtanh.f32 %v6667_v8  ;;  %v2537_v37 = vadd.f32 %v2526_v3, %v2411_v14  ;;  %v6713_v14 = vld [vmem:[#allocation3 + $0x88] sm:$0xff] }
 0x4a9   :  { %v6674_v46 = vadd.f32 %v2386_v52, %v2384_v31  ;;  %v2536_v5 = vadd.f32 %v2485_v20, %v2410_v48  ;;  %v2487_v56 = vpop.f32.mrb[30].mxu0  ;;  %v2530_v34 = vpop.f32.mrb[30].mxu1  ;;  %4910 = vrcp.f32 %v2378_v18  ;;  %v2538_v2 = vadd.f32 %v2528_v58, %v2412_v49  ;;  %v6681_v58 = vld [vmem:[#allocation3] sm:$0xff] }
 0x4aa   :  { %v4465_v0 = vmul.f32 -1.442695, %v2535_v57  ;;  %v2539_v36 = vadd.f32 %v2487_v56, %v2413_v60  ;;  %v2489_v19 = vpop.f32.mrb[31].mxu0  ;;  %v2532_v63 = vpop.f32.mrb[31].mxu1  ;;  %v2541_v48 = vadd.f32 %v2530_v34, %v2415_v23 }
 0x4ab   :  { %4912 = vtanh.f32 %v6674_v46  ;;  %v4467_v21 = vmul.f32 -1.442695, %v2536_v5  ;;  %v2540_v51 = vadd.f32 %v2489_v19, %v2414_v15  ;;  %v4907_v22 = vpop.eup %4906  ;;  %v4469_v32 = vmul.f32 -1.442695, %v2538_v2  ;;  %v6683_v5 = vld [vmem:[#allocation3 + $0x28] sm:$0xff] }
 0x4ac   :  { %4914 = vpow2.f32 %v4465_v0  ;;  %v4466_v16 = vmul.f32 -1.442695, %v2539_v36  ;;  %v2542_v42 = vadd.f32 %v2532_v63, %v2416_v38  ;;  %v6692_v36 = vld [vmem:[#allocation3 + $0x20] sm:$0xff]  ;;  %v6694_v19 = vld [vmem:[#allocation3 + $0x48] sm:$0xff] }
 0x4ad   :  { %4916 = vpow2.f32 %v4467_v21  ;;  %v4468_v43 = vmul.f32 -1.442695, %v2540_v51  ;;  %v6702_v63 = vld [vmem:[#allocation3 + $0x40] sm:$0xff]  ;;  %v6704_v21 = vld [vmem:[#allocation3 + $0x68] sm:$0xff] }
 0x4ae   :  { %4918 = vpow2.f32 %v4466_v16  ;;  %v4470_v15 = vmul.f32 -1.442695, %v2542_v42 }
 0x4af   :  { %4920 = vpow2.f32 %v4468_v43 }
 0x4b0   :  { %4922 = vtanh.f32 %v2537_v37  ;;  %v6724_v37 = vld [vmem:[#allocation3 + $0xa8] sm:$0xff] }
 0x4b1   :  { %4924 = vpow2.f32 %v4469_v32  ;;  %v6750_v32 = vld [vmem:[#allocation3 + $0xe0] sm:$0xff] }
 0x4b2   :  { %v4909_v62 = vpop.eup %4908  ;;  %4926 = vtanh.f32 %v2541_v48 }
 0x4b3   :  { %v4911_v52 = vpop.eup %4910  ;;  %v2391_v1 = vmul.f32 %v4909_v62, %v4907_v22 }
 0x4b5   :  { %v4913_v45 = vpop.eup %4912 }
 0x4b6   :  { %v4915_v18 = vpop.eup %4914  ;;  %v2392_v60 = vmul.f32 %v4913_v45, %v4911_v52 }
 0x4b7   :  { %v4917_v31 = vpop.eup %4916  ;;  %v2549_v40 = vadd.f32 1.0, %v4915_v18 }
 0x4b8   :  { %v2561_v57 = vadd.f32 1.0, %v4917_v31  ;;  %v2393_v20 = vpack.c.bf16 %v2392_v60, %v2391_v1  ;;  %v4919_v3 = vpop.eup %4918  ;;  %v6767_v1 = vld [vmem:[#allocation2] sm:$0xff]  ;;  %v6769_v60 = vld [vmem:[#allocation2 + $0x10] sm:$0xff]  ;;  %v6773_v31 = vld [vmem:[#allocation2 + $0x28] sm:$0xff] }
 0x4b9   :  { %4928 = vrcp.f32 %v2549_v40  ;;  %v2550_v56 = vadd.f32 1.0, %v4919_v3  ;;  %v4921_v34 = vpop.eup %4920  ;;  %v6775_v40 = vld [vmem:[#allocation2 + $0x38] sm:$0xff] }
 0x4ba   :  { %4930 = vrcp.f32 %v2561_v57  ;;  %4680 = vst [vmem:[%s7222_s6 + $0x18] sm:$0xff] %v2393_v20   ;;  %2680 = vmatmul.mubr.bf16.vlgmr.msra.gmra.mrb[32].mxu0 %v2393_v20  ;;  %2723 = vmatmul.mubr.bf16.vlgmr.msra.gmra.mrb[32].mxu1 %v2393_v20  ;;  %v2562_v0 = vadd.f32 1.0, %v4921_v34  ;;  %v6781_v57 = vld [vmem:[#allocation2 + $0x30] sm:$0xff]  ;;  %v6785_v20 = vld [vmem:[#allocation2 + $0x48] sm:$0xff]  ;;  %v6787_v3 = vld [vmem:[#allocation2 + $0x58] sm:$0xff] }
 0x4bb   :  { %4932 = vpow2.f32 %v4470_v15  ;;  %2846 = vmatpush1.bf16.msra.mxu0 %v6681_v58  ;;  %2889 = vmatpush1.bf16.msra.mxu1 %v6529_v53  ;;  %v4923_v53 = vpop.eup %4922  ;;  %v6779_v15 = vld [vmem:[#allocation2 + $0x20] sm:$0xff]  ;;  %v6793_v34 = vld [vmem:[#allocation2 + $0x50] sm:$0xff] }
 0x4bc   :  { %4934 = vrcp.f32 %v2550_v56  ;;  %2847 = vmatprep.subr.bf16.mxu0 %v6683_v5  ;;  %2890 = vmatprep.subr.bf16.mxu1 %v6531_v50  ;;  %v4925_v50 = vpop.eup %4924  ;;  %v6791_v56 = vld [vmem:[#allocation2 + $0x40] sm:$0xff] }
 0x4bd   :  { %2877 = vmatprep.mubr.bf16.mxu0 %v7392_v11  ;;  %2920 = vmatprep.mubr.bf16.mxu1 %v7392_v11  ;;  %4936 = vrcp.f32 %v2562_v0  ;;  %v4927_v54 = vpop.eup %4926  ;;  %v2575_v41 = vadd.f32 1.0, %v4925_v50  ;;  %v6797_v0 = vld [vmem:[#allocation2 + $0x68] sm:$0xff]  ;;  %v6803_v50 = vld [vmem:[#allocation2 + $0x60] sm:$0xff] }
 0x4bf   :  { %2848 = vmatpush1.bf16.msra.mxu0 %v6692_v36  ;;  %2891 = vmatpush1.bf16.msra.mxu1 %v6540_v39  ;;  %v6710_v39 = vld [vmem:[#allocation3 + $0x60] sm:$0xff]  ;;  %4938 = vrcp.f32 %v2575_v41 }
 0x4c0   :  { %2849 = vmatprep.subr.bf16.mxu0 %v6694_v19  ;;  %2892 = vmatprep.subr.bf16.mxu1 %v6542_v12 }
 0x4c3   :  { %v4929_v49 = vpop.eup %4928  ;;  %2850 = vmatpush1.bf16.msra.mxu0 %v6702_v63  ;;  %2893 = vmatpush1.bf16.msra.mxu1 %v6550_v28 }
 0x4c4   :  { %v4931_v51 = vpop.eup %4930  ;;  %v2583_v16 = vmul.f32 %v4929_v49, %v4923_v53  ;;  %2851 = vmatprep.subr.bf16.mxu0 %v6704_v21  ;;  %2894 = vmatprep.subr.bf16.mxu1 %v6552_v13  ;;  %v6721_v13 = vld [vmem:[#allocation3 + $0x80] sm:$0xff]  ;;  %v6799_v53 = vld [vmem:[#allocation2 + $0x78] sm:$0xff] }
 0x4c5   :  { %v4933_v12 = vpop.eup %4932  ;;  %v2581_v43 = vmul.f32 %v4931_v51, %v6563_v29  ;;  %v6810_v49 = vld [vmem:[#allocation2 + $0x98] sm:$0xff]  ;;  %v6814_v51 = vld [vmem:[#allocation2 + $0x90] sm:$0xff] }
 0x4c6   :  { %v4935_v2 = vpop.eup %4934  ;;  %v2576_v22 = vadd.f32 1.0, %v4933_v12  ;;  %v6822_v12 = vld [vmem:[#allocation2 + $0xb0] sm:$0xff] }
 0x4c7   :  { %v6715_v38 = vadd.f32 %v2583_v16, %v2581_v43  ;;  %v2584_v23 = vmul.f32 %v4935_v2, %v4927_v54  ;;  %2852 = vmatpush1.bf16.msra.mxu0 %v6710_v39  ;;  %2895 = vmatpush1.bf16.msra.mxu1 %v6558_v17  ;;  %v4937_v28 = vpop.eup %4936  ;;  %v6733_v17 = vld [vmem:[#allocation3 + $0xa0] sm:$0xff]  ;;  %v6805_v54 = vld [vmem:[#allocation2 + $0x70] sm:$0xff]  ;;  %v6818_v16 = vld [vmem:[#allocation2 + $0xb8] sm:$0xff]  ;;  %7465 = vst [vmem:[#allocation96_spill] sm:$0xff] %v6822_v12 }
 0x4c8   :  { %2853 = vmatprep.subr.bf16.mxu0 %v6713_v14  ;;  %2896 = vmatprep.subr.bf16.mxu1 %v6561_v10  ;;  %v2582_v29 = vmul.f32 %v4937_v28, %v6575_v4  ;;  %v6736_v10 = vld [vmem:[#allocation3 + $0xc8] sm:$0xff]  ;;  %v7472_v2 = vld [vmem:[#allocation37_spill] sm:$0xff] }
 0x4c9   :  { %4940 = vtanh.f32 %v6715_v38  ;;  %v6744_v4 = vld [vmem:[#allocation3 + $0xe8] sm:$0xff]  ;;  %v2611_v41 = vunpack.c.l.bf16 %v7472_v2  ;;  %v2612_v28 = vunpack.c.h.bf16 %v7472_v2 }
 0x4ca   :  { %v6727_v62 = vadd.f32 %v2584_v23, %v2582_v29  ;;  %4942 = vrcp.f32 %v2576_v22 }
 0x4cb   :  { %2854 = vmatpush1.bf16.msra.mxu0 %v6721_v13  ;;  %2897 = vmatpush1.bf16.msra.mxu1 %v6569_v35  ;;  %v6742_v35 = vld [vmem:[#allocation3 + $0xc0] sm:$0xff] }
 0x4cc   :  { %2855 = vmatprep.subr.bf16.mxu0 %v6724_v37  ;;  %2898 = vmatprep.subr.bf16.mxu1 %v6572_v44  ;;  %4944 = vtanh.f32 %v6727_v62  ;;  %v4939_v44 = vpop.eup %4938 }
 0x4cf   :  { %2856 = vmatpush1.bf16.msra.mxu0 %v6733_v17  ;;  %2899 = vmatpush1.bf16.msra.mxu1 %v6581_v59  ;;  %v6752_v59 = vld [vmem:[#allocation3 + $0xf0] sm:$0xff] }
 0x4d0   :  { %2857 = vmatprep.subr.bf16.mxu0 %v6736_v10  ;;  %2900 = vmatprep.subr.bf16.mxu1 %v6584_v33 }
 0x4d3   :  { %2858 = vmatpush1.bf16.msra.mxu0 %v6742_v35  ;;  %2901 = vmatpush1.bf16.msra.mxu1 %v6590_v9  ;;  %v4941_v42 = vpop.eup %4940  ;;  %v6761_v9 = vld [vmem:[#allocation2 + $0x8] sm:$0xff] }
 0x4d4   :  { %2859 = vmatprep.subr.bf16.mxu0 %v6744_v4  ;;  %2902 = vmatprep.subr.bf16.mxu1 %v6592_v61  ;;  %v4943_v52 = vpop.eup %4942  ;;  %v2589_v48 = vmul.f32 %v4941_v42, %v4939_v44  ;;  %v6763_v61 = vld [vmem:[#allocation2 + $0x18] sm:$0xff] }
 0x4d6   :  { %v4945_v33 = vpop.eup %4944 }
 0x4d7   :  { %2860 = vmatpush1.bf16.msra.mxu0 %v6750_v32  ;;  %2903 = vmatpush1.bf16.msra.mxu1 %v6752_v59  ;;  %v2590_v45 = vmul.f32 %v4945_v33, %v4943_v52 }
 0x4d8   :  { %3043 = vmatprep.subr.bf16.mxu0 %v6761_v9  ;;  %3086 = vmatprep.subr.bf16.mxu1 %v6763_v61 }
 0x4d9   :  { %v2591_v18 = vpack.c.bf16 %v2590_v45, %v2589_v48 }
 0x4db   :  { %4681 = vst [vmem:[%s7223_s7 + $0x20] sm:$0xff] %v2591_v18   ;;  %2878 = vmatmul.mubr.bf16.vlgmr.msra.gmra.mrb[36].mxu0 %v2591_v18  ;;  %2921 = vmatmul.mubr.bf16.vlgmr.msra.gmra.mrb[36].mxu1 %v2591_v18 }
 0x4dc   :  { %3075 = vmatprep.mubr.bf16.mxu0 %v7392_v11  ;;  %3118 = vmatprep.mubr.bf16.mxu1 %v7392_v11 }
 0x4dd   :  { %3044 = vmatpush1.bf16.msra.mxu0 %v6767_v1  ;;  %3087 = vmatpush1.bf16.msra.mxu1 %v6769_v60 }
 0x4de   :  { %3045 = vmatprep.subr.bf16.mxu0 %v6773_v31  ;;  %3088 = vmatprep.subr.bf16.mxu1 %v6775_v40 }
 0x4e1   :  { %3046 = vmatpush1.bf16.msra.mxu0 %v6779_v15  ;;  %3089 = vmatpush1.bf16.msra.mxu1 %v6781_v57 }
 0x4e2   :  { %3047 = vmatprep.subr.bf16.mxu0 %v6785_v20  ;;  %3090 = vmatprep.subr.bf16.mxu1 %v6787_v3 }
 0x4e5   :  { %3048 = vmatpush1.bf16.msra.mxu0 %v6791_v56  ;;  %3091 = vmatpush1.bf16.msra.mxu1 %v6793_v34 }
 0x4e6   :  { %3049 = vmatprep.subr.bf16.mxu0 %v6797_v0  ;;  %3092 = vmatprep.subr.bf16.mxu1 %v6799_v53 }
 0x4e9   :  { %3050 = vmatpush1.bf16.msra.mxu0 %v6803_v50  ;;  %3093 = vmatpush1.bf16.msra.mxu1 %v6805_v54 }
 0x4ea   :  { %3051 = vmatprep.subr.bf16.mxu0 %v6630_v55  ;;  %3094 = vmatprep.subr.bf16.mxu1 %v6810_v49  ;;  %v6826_v55 = vld [vmem:[#allocation2 + $0xd8] sm:$0xff] }
 0x4eb   :  { %7466 = vst [vmem:[#allocation95_spill] sm:$0xff] %v6826_v55 }
 0x4ed   :  { %3052 = vmatpush1.bf16.msra.mxu0 %v6633_v6  ;;  %3095 = vmatpush1.bf16.msra.mxu1 %v6814_v51  ;;  %v6830_v6 = vld [vmem:[#allocation2 + $0xd0] sm:$0xff] }
 0x4ee   :  { %3053 = vmatprep.subr.bf16.mxu0 %v6636_v7  ;;  %3096 = vmatprep.subr.bf16.mxu1 %v6818_v16  ;;  %7467 = vst [vmem:[#allocation97_spill] sm:$0xff] %v6830_v6  ;;  %v6834_v7 = vld [vmem:[#allocation2 + $0xf8] sm:$0xff] }
 0x4ef   :  { %7468 = vst [vmem:[#allocation98_spill] sm:$0xff] %v6834_v7 }
 0x4f1   :  { %3054 = vmatpush1.bf16.msra.mxu0 %v6639_v27  ;;  %3097 = vmatpush1.bf16.msra.mxu1 %v6822_v12  ;;  %v6838_v27 = vld [vmem:[#allocation2 + $0xf0] sm:$0xff] }
 0x4f2   :  { %3055 = vmatprep.subr.bf16.mxu0 %v6642_v26  ;;  %3098 = vmatprep.subr.bf16.mxu1 %v6826_v55  ;;  %7469 = vst [vmem:[#allocation99_spill] sm:$0xff] %v6838_v27  ;;  %v6842_v26 = vld [vmem:[#allocation3 + $0x18] sm:$0xff] }
 0x4f3   :  { %7470 = vst [vmem:[#allocation100_spill] sm:$0xff] %v6842_v26 }
 0x4f5   :  { %3056 = vmatpush1.bf16.msra.mxu0 %v6645_v25  ;;  %3099 = vmatpush1.bf16.msra.mxu1 %v6830_v6  ;;  %v7471_v25 = vld [vmem:[#allocation35_spill] sm:$0xff] }
 0x4f6   :  { %3057 = vmatprep.subr.bf16.mxu0 %v6648_v47  ;;  %3100 = vmatprep.subr.bf16.mxu1 %v6834_v7  ;;  %v2607_v47 = vunpack.c.l.bf16 %v7471_v25  ;;  %v2608_v43 = vunpack.c.h.bf16 %v7471_v25 }
 0x4f9   :  { %3058 = vmatpush1.bf16.msra.mxu0 %v6651_v24  ;;  %3101 = vmatpush1.bf16.msra.mxu1 %v6838_v27  ;;  %v7473_v27 = vld [vmem:[#allocation36_spill] sm:$0xff] }
 0x4fa   :  { %3241 = vmatprep.subr.bf16.mxu0 %v6654_v30  ;;  %3284 = vmatprep.subr.bf16.mxu1 %v6842_v26  ;;  %v2610_v7 = vunpack.c.h.bf16 %v7473_v27  ;;  %v2609_v2 = vunpack.c.l.bf16 %v7473_v27 }
 0x58d   :  { %v2681_v23 = vpop.f32.mrb[32].mxu0  ;;  %v2724_v24 = vpop.f32.mrb[32].mxu1 }
 0x58e   :  { %v2733_v22 = vadd.f32 %v2681_v23, %v2607_v47  ;;  %v2683_v29 = vpop.f32.mrb[33].mxu0  ;;  %v2726_v44 = vpop.f32.mrb[33].mxu1  ;;  %v7474_v23 = vld [vmem:[#allocation38_spill] sm:$0xff] }
 0x58f   :  { %v2734_v30 = vadd.f32 %v2683_v29, %v2608_v43  ;;  %v2685_v42 = vpop.f32.mrb[34].mxu0  ;;  %v2728_v52 = vpop.f32.mrb[34].mxu1  ;;  %v2736_v47 = vadd.f32 %v2726_v44, %v2610_v7  ;;  %v2614_v43 = vunpack.c.h.bf16 %v7474_v23  ;;  %v2613_v29 = vunpack.c.l.bf16 %v7474_v23 }
 0x590   :  { %v4475_v33 = vmul.f32 -1.442695, %v2733_v22  ;;  %v2737_v48 = vadd.f32 %v2685_v42, %v2611_v41  ;;  %v2687_v45 = vpop.f32.mrb[35].mxu0  ;;  %v2730_v18 = vpop.f32.mrb[35].mxu1  ;;  %v2735_v41 = vadd.f32 %v2724_v24, %v2609_v2 }
 0x591   :  { %v4477_v26 = vmul.f32 -1.442695, %v2734_v30  ;;  %v2738_v25 = vadd.f32 %v2687_v45, %v2612_v28  ;;  %v4479_v22 = vmul.f32 -1.442695, %v2736_v47  ;;  %v2740_v42 = vadd.f32 %v2730_v18, %v2614_v43  ;;  %v7475_v43 = vld [vmem:[#allocation63_spill] sm:$0xff] }
 0x592   :  { %4946 = vpow2.f32 %v4475_v33  ;;  %v4476_v6 = vmul.f32 -1.442695, %v2737_v48  ;;  %v2739_v30 = vadd.f32 %v2728_v52, %v2613_v29  ;;  %v2805_v29 = vunpack.c.l.bf16 %v7475_v43 }
 0x593   :  { %4948 = vpow2.f32 %v4477_v26  ;;  %v4478_v55 = vmul.f32 -1.442695, %v2738_v25  ;;  %v4480_v26 = vmul.f32 -1.442695, %v2740_v42  ;;  %v2806_v42 = vunpack.c.h.bf16 %v7475_v43  ;;  %v7478_v43 = vld [vmem:[#allocation64_spill] sm:$0xff] }
 0x594   :  { %4950 = vpow2.f32 %v4476_v6 }
 0x595   :  { %4952 = vpow2.f32 %v4478_v55 }
 0x596   :  { %4954 = vtanh.f32 %v2735_v41 }
 0x597   :  { %4956 = vpow2.f32 %v4479_v22 }
 0x598   :  { %4958 = vtanh.f32 %v2739_v30 }
 0x59c   :  { %v4947_v12 = vpop.eup %4946 }
 0x59d   :  { %v4949_v28 = vpop.eup %4948  ;;  %v2747_v33 = vadd.f32 1.0, %v4947_v12 }
 0x59e   :  { %v2759_v48 = vadd.f32 1.0, %v4949_v28  ;;  %v4951_v27 = vpop.eup %4950 }
 0x59f   :  { %4960 = vrcp.f32 %v2747_v33  ;;  %v2748_v6 = vadd.f32 1.0, %v4951_v27  ;;  %v4953_v7 = vpop.eup %4952  ;;  %v7476_v33 = vld [vmem:[#allocation65_spill] sm:$0xff] }
 0x5a0   :  { %4962 = vrcp.f32 %v2759_v48  ;;  %v2760_v55 = vadd.f32 1.0, %v4953_v7  ;;  %v4955_v24 = vpop.eup %4954  ;;  %v2810_v7 = vunpack.c.h.bf16 %v7476_v33 }
 0x5a1   :  { %4964 = vpow2.f32 %v4480_v26  ;;  %v4957_v44 = vpop.eup %4956  ;;  %v2809_v26 = vunpack.c.l.bf16 %v7476_v33 }
 0x5a2   :  { %4966 = vrcp.f32 %v2748_v6  ;;  %v4959_v52 = vpop.eup %4958  ;;  %v2773_v23 = vadd.f32 1.0, %v4957_v44 }
 0x5a3   :  { %4968 = vrcp.f32 %v2760_v55 }
 0x5a4   :  { %4970 = vrcp.f32 %v2773_v23  ;;  %v2808_v23 = vunpack.c.h.bf16 %v7478_v43 }
 0x5a9   :  { %v4961_v45 = vpop.eup %4960 }
 0x5aa   :  { %v4963_v18 = vpop.eup %4962  ;;  %v2781_v25 = vmul.f32 %v4961_v45, %v4955_v24 }
 0x5ab   :  { %v4965_v12 = vpop.eup %4964  ;;  %v2779_v2 = vmul.f32 %v4963_v18, %v6667_v8 }
 0x5ac   :  { %v4967_v47 = vpop.eup %4966  ;;  %v2774_v28 = vadd.f32 1.0, %v4965_v12 }
 0x5ad   :  { %v6855_v41 = vadd.f32 %v2781_v25, %v2779_v2  ;;  %v2782_v22 = vmul.f32 %v4967_v47, %v4959_v52  ;;  %v4969_v30 = vpop.eup %4968 }
 0x5ae   :  { %v2780_v48 = vmul.f32 %v4969_v30, %v6674_v46  ;;  %v2879_v27 = vpop.f32.mrb[36].mxu0  ;;  %v2922_v6 = vpop.f32.mrb[36].mxu1 }
 0x5af   :  { %v2931_v8 = vadd.f32 %v2879_v27, %v2805_v29  ;;  %v2881_v55 = vpop.f32.mrb[37].mxu0  ;;  %v2924_v24 = vpop.f32.mrb[37].mxu1  ;;  %4972 = vtanh.f32 %v6855_v41 }
 0x5b0   :  { %v6862_v44 = vadd.f32 %v2782_v22, %v2780_v48  ;;  %v2932_v52 = vadd.f32 %v2881_v55, %v2806_v42  ;;  %v2883_v45 = vpop.f32.mrb[38].mxu0  ;;  %v2926_v18 = vpop.f32.mrb[38].mxu1  ;;  %4974 = vrcp.f32 %v2774_v28  ;;  %v2807_v22 = vunpack.c.l.bf16 %v7478_v43  ;;  %v7479_v48 = vld [vmem:[#allocation66_spill] sm:$0xff] }
 0x5b1   :  { %v4485_v25 = vmul.f32 -1.442695, %v2931_v8  ;;  %v2935_v12 = vadd.f32 %v2883_v45, %v2809_v26  ;;  %v2885_v2 = vpop.f32.mrb[39].mxu0  ;;  %v2928_v46 = vpop.f32.mrb[39].mxu1  ;;  %v2934_v42 = vadd.f32 %v2924_v24, %v2808_v23  ;;  %v2812_v28 = vunpack.c.h.bf16 %v7479_v48 }
 0x5b2   :  { %7477 = vst [vmem:[#allocation101_spill] sm:$0xff] %v6862_v44  ;;  %4976 = vtanh.f32 %v6862_v44  ;;  %v4487_v47 = vmul.f32 -1.442695, %v2932_v52  ;;  %v2936_v29 = vadd.f32 %v2885_v2, %v2810_v7  ;;  %v2811_v26 = vunpack.c.l.bf16 %v7479_v48  ;;  %v4971_v27 = vpop.eup %4970  ;;  %v6882_v48 = vld [vmem:[#allocation3 + $0x58] sm:$0xff] }
 0x5b3   :  { %4978 = vpow2.f32 %v4485_v25  ;;  %v4486_v30 = vmul.f32 -1.442695, %v2935_v12  ;;  %v2933_v8 = vadd.f32 %v2922_v6, %v2807_v22  ;;  %v4489_v52 = vmul.f32 -1.442695, %v2934_v42  ;;  %v6871_v22 = vld [vmem:[#allocation3 + $0x38] sm:$0xff]  ;;  %v6880_v42 = vld [vmem:[#allocation3 + $0x30] sm:$0xff] }
 0x5b4   :  { %4980 = vpow2.f32 %v4487_v47  ;;  %v4488_v33 = vmul.f32 -1.442695, %v2936_v29  ;;  %v2938_v45 = vadd.f32 %v2928_v46, %v2812_v28  ;;  %v2937_v7 = vadd.f32 %v2926_v18, %v2811_v26  ;;  %v6892_v26 = vld [vmem:[#allocation3 + $0x78] sm:$0xff] }
 0x5b5   :  { %4982 = vpow2.f32 %v4486_v30 }
 0x5b6   :  { %4984 = vpow2.f32 %v4488_v33  ;;  %v4490_v23 = vmul.f32 -1.442695, %v2938_v45  ;;  %v6869_v33 = vld [vmem:[#allocation3 + $0x10] sm:$0xff] }
 0x5b7   :  { %4986 = vtanh.f32 %v2933_v8 }
 0x5b8   :  { %4988 = vpow2.f32 %v4489_v52 }
 0x5b9   :  { %v4973_v55 = vpop.eup %4972  ;;  %4990 = vtanh.f32 %v2937_v7  ;;  %v6901_v7 = vld [vmem:[#allocation3 + $0x98] sm:$0xff] }
 0x5ba   :  { %v4975_v44 = vpop.eup %4974  ;;  %v2787_v2 = vmul.f32 %v4973_v55, %v4971_v27 }
 0x5bc   :  { %v4977_v25 = vpop.eup %4976 }
 0x5bd   :  { %v4979_v12 = vpop.eup %4978  ;;  %v2788_v47 = vmul.f32 %v4977_v25, %v4975_v44 }
 0x5be   :  { %v4981_v43 = vpop.eup %4980  ;;  %v2945_v24 = vadd.f32 1.0, %v4979_v12 }
 0x5bf   :  { %v2957_v29 = vadd.f32 1.0, %v4981_v43  ;;  %v2789_v30 = vpack.c.bf16 %v2788_v47, %v2787_v2  ;;  %v4983_v6 = vpop.eup %4982  ;;  %v6909_v43 = vld [vmem:[#allocation3 + $0x90] sm:$0xff] }
 0x5c0   :  { %4992 = vrcp.f32 %v2945_v24  ;;  %v2946_v18 = vadd.f32 1.0, %v4983_v6  ;;  %v4985_v44 = vpop.eup %4984  ;;  %v6912_v24 = vld [vmem:[#allocation3 + $0xb8] sm:$0xff] }
 0x5c1   :  { %4994 = vrcp.f32 %v2957_v29  ;;  %4682 = vst [vmem:[%s7222_s6 + $0x20] sm:$0xff] %v2789_v30   ;;  %3076 = vmatmul.mubr.bf16.vlgmr.msra.gmra.mrb[40].mxu0 %v2789_v30  ;;  %3119 = vmatmul.mubr.bf16.vlgmr.msra.gmra.mrb[40].mxu1 %v2789_v30  ;;  %v2958_v46 = vadd.f32 1.0, %v4985_v44 }
 0x5c2   :  { %4996 = vpow2.f32 %v4490_v23  ;;  %3242 = vmatpush1.bf16.msra.mxu0 %v6681_v58  ;;  %3285 = vmatpush1.bf16.msra.mxu1 %v6869_v33  ;;  %v4987_v58 = vpop.eup %4986 }
 0x5c3   :  { %4998 = vrcp.f32 %v2946_v18  ;;  %3243 = vmatprep.subr.bf16.mxu0 %v6683_v5  ;;  %3286 = vmatprep.subr.bf16.mxu1 %v6871_v22  ;;  %v6890_v5 = vld [vmem:[#allocation3 + $0x50] sm:$0xff]  ;;  %v4989_v28 = vpop.eup %4988 }
 0x5c4   :  { %3273 = vmatprep.mubr.bf16.mxu0 %v7392_v11  ;;  %3316 = vmatprep.mubr.bf16.mxu1 %v7392_v11  ;;  %5000 = vrcp.f32 %v2958_v46  ;;  %v4991_v27 = vpop.eup %4990  ;;  %v2971_v12 = vadd.f32 1.0, %v4989_v28 }
 0x5c6   :  { %3244 = vmatpush1.bf16.msra.mxu0 %v6692_v36  ;;  %3287 = vmatpush1.bf16.msra.mxu1 %v6880_v42  ;;  %5002 = vrcp.f32 %v2971_v12  ;;  %v7488_v12 = vld [vmem:[#allocation40_spill] sm:$0xff] }
 0x5c7   :  { %3245 = vmatprep.subr.bf16.mxu0 %v6694_v19  ;;  %3288 = vmatprep.subr.bf16.mxu1 %v6882_v48  ;;  %v6898_v19 = vld [vmem:[#allocation3 + $0x70] sm:$0xff] }
 0x5ca   :  { %v4993_v8 = vpop.eup %4992  ;;  %3246 = vmatpush1.bf16.msra.mxu0 %v6702_v63  ;;  %3289 = vmatpush1.bf16.msra.mxu1 %v6890_v5 }
 0x5cb   :  { %v4995_v55 = vpop.eup %4994  ;;  %v2979_v36 = vmul.f32 %v4993_v8, %v4987_v58  ;;  %3247 = vmatprep.subr.bf16.mxu0 %v6704_v21  ;;  %3290 = vmatprep.subr.bf16.mxu1 %v6892_v26 }
 0x5cc   :  { %v4997_v52 = vpop.eup %4996  ;;  %v2977_v45 = vmul.f32 %v4995_v55, %v6715_v38 }
 0x5cd   :  { %v4999_v25 = vpop.eup %4998  ;;  %v2972_v21 = vadd.f32 1.0, %v4997_v52 }
 0x5ce   :  { %v6903_v2 = vadd.f32 %v2979_v36, %v2977_v45  ;;  %v2980_v63 = vmul.f32 %v4999_v25, %v4991_v27  ;;  %3248 = vmatpush1.bf16.msra.mxu0 %v6710_v39  ;;  %3291 = vmatpush1.bf16.msra.mxu1 %v6898_v19  ;;  %v5001_v47 = vpop.eup %5000  ;;  %v6921_v39 = vld [vmem:[#allocation3 + $0xb0] sm:$0xff] }
 0x5cf   :  { %3249 = vmatprep.subr.bf16.mxu0 %v6713_v14  ;;  %3292 = vmatprep.subr.bf16.mxu1 %v6901_v7  ;;  %v2978_v38 = vmul.f32 %v5001_v47, %v6727_v62  ;;  %v6924_v14 = vld [vmem:[#allocation3 + $0xd8] sm:$0xff] }
 0x5d0   :  { %5004 = vtanh.f32 %v6903_v2  ;;  %v6932_v62 = vld [vmem:[#allocation3 + $0xf8] sm:$0xff] }
 0x5d1   :  { %v6915_v23 = vadd.f32 %v2980_v63, %v2978_v38  ;;  %5006 = vrcp.f32 %v2972_v21  ;;  %v3006_v63 = vunpack.c.h.bf16 %v7488_v12 }
 0x5d2   :  { %3250 = vmatpush1.bf16.msra.mxu0 %v6721_v13  ;;  %3293 = vmatpush1.bf16.msra.mxu1 %v6909_v43  ;;  %v6930_v13 = vld [vmem:[#allocation3 + $0xd0] sm:$0xff] }
 0x5d3   :  { %3251 = vmatprep.subr.bf16.mxu0 %v6724_v37  ;;  %3294 = vmatprep.subr.bf16.mxu1 %v6912_v24  ;;  %5008 = vtanh.f32 %v6915_v23  ;;  %v5003_v37 = vpop.eup %5002 }
 0x5d6   :  { %3252 = vmatpush1.bf16.msra.mxu0 %v6733_v17  ;;  %3295 = vmatpush1.bf16.msra.mxu1 %v6921_v39 }
 0x5d7   :  { %3253 = vmatprep.subr.bf16.mxu0 %v6736_v10  ;;  %3296 = vmatprep.subr.bf16.mxu1 %v6924_v14 }
 0x5da   :  { %3254 = vmatpush1.bf16.msra.mxu0 %v6742_v35  ;;  %3297 = vmatpush1.bf16.msra.mxu1 %v6930_v13  ;;  %v5005_v17 = vpop.eup %5004 }
 0x5db   :  { %3255 = vmatprep.subr.bf16.mxu0 %v6744_v4  ;;  %3298 = vmatprep.subr.bf16.mxu1 %v6932_v62  ;;  %v5007_v29 = vpop.eup %5006  ;;  %v2985_v10 = vmul.f32 %v5005_v17, %v5003_v37  ;;  %v7480_v4 = vld [vmem:[#allocation96_spill] sm:$0xff]  ;;  %v3005_v37 = vunpack.c.l.bf16 %v7488_v12 }
 0x5dd   :  { %v5009_v30 = vpop.eup %5008 }
 0x5de   :  { %3256 = vmatpush1.bf16.msra.mxu0 %v6750_v32  ;;  %3299 = vmatpush1.bf16.msra.mxu1 %v6752_v59  ;;  %v2986_v6 = vmul.f32 %v5009_v30, %v5007_v29  ;;  %v7481_v32 = vld [vmem:[#allocation95_spill] sm:$0xff]  ;;  %v7482_v59 = vld [vmem:[#allocation97_spill] sm:$0xff]  ;;  %v7489_v29 = vld [vmem:[#allocation42_spill] sm:$0xff] }
 0x5df   :  { %3439 = vmatprep.subr.bf16.mxu0 %v6761_v9  ;;  %3482 = vmatprep.subr.bf16.mxu1 %v6763_v61  ;;  %v7483_v9 = vld [vmem:[#allocation98_spill] sm:$0xff]  ;;  %v7484_v61 = vld [vmem:[#allocation99_spill] sm:$0xff]  ;;  %v3010_v30 = vunpack.c.h.bf16 %v7489_v29 }
 0x5e0   :  { %v2987_v35 = vpack.c.bf16 %v2986_v6, %v2985_v10  ;;  %v3009_v10 = vunpack.c.l.bf16 %v7489_v29 }
 0x5e2   :  { %4683 = vst [vmem:[%s7223_s7 + $0x18] sm:$0xff] %v2987_v35   ;;  %3274 = vmatmul.mubr.bf16.vlgmr.msra.gmra.mrb[44].mxu0 %v2987_v35  ;;  %3317 = vmatmul.mubr.bf16.vlgmr.msra.gmra.mrb[44].mxu1 %v2987_v35 }
 0x5e3   :  { %3440 = vmatpush1.bf16.msra.mxu0 %v6767_v1  ;;  %3483 = vmatpush1.bf16.msra.mxu1 %v6769_v60  ;;  %v7485_v1 = vld [vmem:[#allocation100_spill] sm:$0xff] }
 0x5e4   :  { %3441 = vmatprep.subr.bf16.mxu0 %v6773_v31  ;;  %3484 = vmatprep.subr.bf16.mxu1 %v6775_v40  ;;  %v6970_v60 = vld [vmem:[#allocation2 + $0x88] sm:$0xff]  ;;  %v6973_v31 = vld [vmem:[#allocation2 + $0x80] sm:$0xff] }
 0x5e5   :  { %3471 = vmatprep.mubr.bf16.mxu0 %v7392_v11  ;;  %3514 = vmatprep.mubr.bf16.mxu1 %v7392_v11  ;;  %v6976_v40 = vld [vmem:[#allocation2 + $0xa8] sm:$0xff] }
 0x5e7   :  { %3442 = vmatpush1.bf16.msra.mxu0 %v6779_v15  ;;  %3485 = vmatpush1.bf16.msra.mxu1 %v6781_v57  ;;  %v6979_v15 = vld [vmem:[#allocation2 + $0xa0] sm:$0xff]  ;;  %v6982_v57 = vld [vmem:[#allocation2 + $0xc8] sm:$0xff] }
 0x5e8   :  { %3443 = vmatprep.subr.bf16.mxu0 %v6785_v20  ;;  %3486 = vmatprep.subr.bf16.mxu1 %v6787_v3  ;;  %v6985_v20 = vld [vmem:[#allocation2 + $0xc0] sm:$0xff]  ;;  %v6988_v3 = vld [vmem:[#allocation2 + $0xe8] sm:$0xff] }
 0x5eb   :  { %3444 = vmatpush1.bf16.msra.mxu0 %v6791_v56  ;;  %3487 = vmatpush1.bf16.msra.mxu1 %v6793_v34  ;;  %v6991_v56 = vld [vmem:[#allocation2 + $0xe0] sm:$0xff]  ;;  %v6994_v34 = vld [vmem:[#allocation3 + $0x8] sm:$0xff] }
 0x5ec   :  { %3445 = vmatprep.subr.bf16.mxu0 %v6797_v0  ;;  %3488 = vmatprep.subr.bf16.mxu1 %v6799_v53  ;;  %v7486_v0 = vld [vmem:[#allocation39_spill] sm:$0xff] }
 0x5ed   :  { %v3003_v53 = vunpack.c.l.bf16 %v7486_v0 }
 0x5ef   :  { %3446 = vmatpush1.bf16.msra.mxu0 %v6803_v50  ;;  %3489 = vmatpush1.bf16.msra.mxu1 %v6805_v54  ;;  %v3004_v50 = vunpack.c.h.bf16 %v7486_v0  ;;  %v7487_v54 = vld [vmem:[#allocation41_spill] sm:$0xff] }
 0x5f0   :  { %3490 = vmatprep.subr.bf16.mxu1 %v6810_v49  ;;  %3447 = vmatprep.subr.bf16.mxu0 %v6970_v60  ;;  %v3007_v49 = vunpack.c.l.bf16 %v7487_v54  ;;  %v3008_v18 = vunpack.c.h.bf16 %v7487_v54 }
 0x5f3   :  { %3491 = vmatpush1.bf16.msra.mxu1 %v6814_v51  ;;  %3448 = vmatpush1.bf16.msra.mxu0 %v6973_v31 }
 0x5f4   :  { %3492 = vmatprep.subr.bf16.mxu1 %v6818_v16  ;;  %3449 = vmatprep.subr.bf16.mxu0 %v6976_v40 }
 0x5f7   :  { %3493 = vmatpush1.bf16.msra.mxu1 %v7480_v4  ;;  %3450 = vmatpush1.bf16.msra.mxu0 %v6979_v15 }
 0x5f8   :  { %3494 = vmatprep.subr.bf16.mxu1 %v7481_v32  ;;  %3451 = vmatprep.subr.bf16.mxu0 %v6982_v57 }
 0x5fb   :  { %3495 = vmatpush1.bf16.msra.mxu1 %v7482_v59  ;;  %3452 = vmatpush1.bf16.msra.mxu0 %v6985_v20 }
 0x5fc   :  { %3496 = vmatprep.subr.bf16.mxu1 %v7483_v9  ;;  %3453 = vmatprep.subr.bf16.mxu0 %v6988_v3 }
 0x5ff   :  { %3497 = vmatpush1.bf16.msra.mxu1 %v7484_v61  ;;  %3454 = vmatpush1.bf16.msra.mxu0 %v6991_v56 }
 0x600   :  { %3680 = vmatprep.subr.bf16.mxu1 %v7485_v1  ;;  %3637 = vmatprep.subr.bf16.mxu0 %v6994_v34 }
 0x694   :  { %v3077_v51 = vpop.f32.mrb[40].mxu0  ;;  %v3120_v16 = vpop.f32.mrb[40].mxu1 }
 0x695   :  { %v3129_v44 = vadd.f32 %v3077_v51, %v3003_v53  ;;  %v3079_v46 = vpop.f32.mrb[41].mxu0  ;;  %v3122_v58 = vpop.f32.mrb[41].mxu1  ;;  %v3131_v6 = vadd.f32 %v3120_v16, %v3005_v37  ;;  %v7492_v37 = vld [vmem:[#allocation101_spill] sm:$0xff] }
 0x696   :  { %v3130_v28 = vadd.f32 %v3079_v46, %v3004_v50  ;;  %v3081_v27 = vpop.f32.mrb[42].mxu0  ;;  %v3124_v8 = vpop.f32.mrb[42].mxu1  ;;  %v3132_v17 = vadd.f32 %v3122_v58, %v3006_v63 }
 0x697   :  { %v4495_v55 = vmul.f32 -1.442695, %v3129_v44  ;;  %v3133_v36 = vadd.f32 %v3081_v27, %v3007_v49  ;;  %v3083_v52 = vpop.f32.mrb[43].mxu0  ;;  %v3126_v45 = vpop.f32.mrb[43].mxu1  ;;  %v3135_v32 = vadd.f32 %v3124_v8, %v3009_v10 }
 0x698   :  { %v4497_v25 = vmul.f32 -1.442695, %v3130_v28  ;;  %v3134_v47 = vadd.f32 %v3083_v52, %v3008_v18  ;;  %v4499_v35 = vmul.f32 -1.442695, %v3132_v17  ;;  %v3136_v4 = vadd.f32 %v3126_v45, %v3010_v30 }
 0x699   :  { %5010 = vpow2.f32 %v4495_v55  ;;  %v4496_v21 = vmul.f32 -1.442695, %v3133_v36  ;;  %v7490_v36 = vld [vmem:[#allocation59_spill] sm:$0xff] }
 0x69a   :  { %5012 = vpow2.f32 %v4497_v25  ;;  %v4498_v38 = vmul.f32 -1.442695, %v3134_v47  ;;  %v4500_v1 = vmul.f32 -1.442695, %v3136_v4  ;;  %v3201_v52 = vunpack.c.l.bf16 %v7490_v36 }
 0x69b   :  { %5014 = vpow2.f32 %v4496_v21  ;;  %v3202_v12 = vunpack.c.h.bf16 %v7490_v36  ;;  %v7491_v21 = vld [vmem:[#allocation61_spill] sm:$0xff] }
 0x69c   :  { %5016 = vpow2.f32 %v4498_v38  ;;  %v3205_v38 = vunpack.c.l.bf16 %v7491_v21  ;;  %v3206_v10 = vunpack.c.h.bf16 %v7491_v21 }
 0x69d   :  { %5018 = vtanh.f32 %v3131_v6 }
 0x69e   :  { %5020 = vpow2.f32 %v4499_v35 }
 0x69f   :  { %5022 = vtanh.f32 %v3135_v32 }
 0x6a3   :  { %v5011_v59 = vpop.eup %5010 }
 0x6a4   :  { %v5013_v9 = vpop.eup %5012  ;;  %v3143_v61 = vadd.f32 1.0, %v5011_v59 }
 0x6a5   :  { %v3155_v0 = vadd.f32 1.0, %v5013_v9  ;;  %v5015_v53 = vpop.eup %5014 }
 0x6a6   :  { %5024 = vrcp.f32 %v3143_v61  ;;  %v3144_v50 = vadd.f32 1.0, %v5015_v53  ;;  %v5017_v54 = vpop.eup %5016 }
 0x6a7   :  { %5026 = vrcp.f32 %v3155_v0  ;;  %v3156_v49 = vadd.f32 1.0, %v5017_v54  ;;  %v5019_v51 = vpop.eup %5018  ;;  %v7493_v54 = vld [vmem:[#allocation60_spill] sm:$0xff] }
 0x6a8   :  { %5028 = vpow2.f32 %v4500_v1  ;;  %v5021_v16 = vpop.eup %5020 }
 0x6a9   :  { %5030 = vrcp.f32 %v3144_v50  ;;  %v5023_v18 = vpop.eup %5022  ;;  %v3169_v55 = vadd.f32 1.0, %v5021_v16 }
 0x6aa   :  { %5032 = vrcp.f32 %v3156_v49  ;;  %v3204_v49 = vunpack.c.h.bf16 %v7493_v54 }
 0x6ab   :  { %5034 = vrcp.f32 %v3169_v55 }
 0x6b0   :  { %v5025_v44 = vpop.eup %5024 }
 0x6b1   :  { %v5027_v46 = vpop.eup %5026  ;;  %v3177_v58 = vmul.f32 %v5025_v44, %v5019_v51  ;;  %v3203_v44 = vunpack.c.l.bf16 %v7493_v54 }
 0x6b2   :  { %v5029_v28 = vpop.eup %5028  ;;  %v3175_v27 = vmul.f32 %v5027_v46, %v6855_v41 }
 0x6b3   :  { %v5031_v8 = vpop.eup %5030  ;;  %v3170_v47 = vadd.f32 1.0, %v5029_v28 }
 0x6b4   :  { %v7007_v45 = vadd.f32 %v3177_v58, %v3175_v27  ;;  %v3178_v25 = vmul.f32 %v5031_v8, %v5023_v18  ;;  %v5033_v63 = vpop.eup %5032  ;;  %v7494_v58 = vld [vmem:[#allocation62_spill] sm:$0xff] }
 0x6b5   :  { %v3176_v17 = vmul.f32 %v5033_v63, %v7492_v37  ;;  %v3275_v29 = vpop.f32.mrb[44].mxu0  ;;  %v3318_v30 = vpop.f32.mrb[44].mxu1  ;;  %v3208_v28 = vunpack.c.h.bf16 %v7494_v58  ;;  %v3207_v27 = vunpack.c.l.bf16 %v7494_v58 }
 0x6b6   :  { %v3327_v41 = vadd.f32 %v3275_v29, %v3201_v52  ;;  %v3277_v6 = vpop.f32.mrb[45].mxu0  ;;  %v3320_v35 = vpop.f32.mrb[45].mxu1  ;;  %5036 = vtanh.f32 %v7007_v45  ;;  %v3329_v55 = vadd.f32 %v3318_v30, %v3203_v44  ;;  %v7053_v44 = vld [vmem:[#allocation3 + $0x88] sm:$0xff] }
 0x6b7   :  { %v7014_v4 = vadd.f32 %v3178_v25, %v3176_v17  ;;  %v3328_v32 = vadd.f32 %v3277_v6, %v3202_v12  ;;  %v3279_v59 = vpop.f32.mrb[46].mxu0  ;;  %v3322_v9 = vpop.f32.mrb[46].mxu1  ;;  %5038 = vrcp.f32 %v3170_v47  ;;  %v3330_v46 = vadd.f32 %v3320_v35, %v3204_v49  ;;  %v7021_v35 = vld [vmem:[#allocation3] sm:$0xff] }
 0x6b8   :  { %v4505_v61 = vmul.f32 -1.442695, %v3327_v41  ;;  %v3331_v1 = vadd.f32 %v3279_v59, %v3205_v38  ;;  %v3281_v0 = vpop.f32.mrb[47].mxu0  ;;  %v3324_v53 = vpop.f32.mrb[47].mxu1  ;;  %v3333_v63 = vadd.f32 %v3322_v9, %v3207_v27 }
 0x6b9   :  { %5040 = vtanh.f32 %v7014_v4  ;;  %v4507_v50 = vmul.f32 -1.442695, %v3328_v32  ;;  %v3332_v51 = vadd.f32 %v3281_v0, %v3206_v10  ;;  %v5035_v8 = vpop.eup %5034  ;;  %v4509_v52 = vmul.f32 -1.442695, %v3330_v46  ;;  %v7023_v32 = vld [vmem:[#allocation3 + $0x28] sm:$0xff] }
 0x6ba   :  { %5042 = vpow2.f32 %v4505_v61  ;;  %v4506_v16 = vmul.f32 -1.442695, %v3331_v1  ;;  %v3334_v25 = vadd.f32 %v3324_v53, %v3208_v28  ;;  %v7032_v1 = vld [vmem:[#allocation3 + $0x20] sm:$0xff]  ;;  %v7034_v0 = vld [vmem:[#allocation3 + $0x48] sm:$0xff] }
 0x6bb   :  { %5044 = vpow2.f32 %v4507_v50  ;;  %v4508_v18 = vmul.f32 -1.442695, %v3332_v51  ;;  %v7042_v53 = vld [vmem:[#allocation3 + $0x40] sm:$0xff]  ;;  %v7044_v50 = vld [vmem:[#allocation3 + $0x68] sm:$0xff] }
 0x6bc   :  { %5046 = vpow2.f32 %v4506_v16  ;;  %v4510_v10 = vmul.f32 -1.442695, %v3334_v25 }
 0x6bd   :  { %5048 = vpow2.f32 %v4508_v18 }
 0x6be   :  { %5050 = vtanh.f32 %v3329_v55  ;;  %v7064_v55 = vld [vmem:[#allocation3 + $0xa8] sm:$0xff] }
 0x6bf   :  { %5052 = vpow2.f32 %v4509_v52  ;;  %v7090_v52 = vld [vmem:[#allocation3 + $0xe0] sm:$0xff] }
 0x6c0   :  { %v5037_v36 = vpop.eup %5036  ;;  %5054 = vtanh.f32 %v3333_v63 }
 0x6c1   :  { %v5039_v12 = vpop.eup %5038  ;;  %v3183_v38 = vmul.f32 %v5037_v36, %v5035_v8 }
 0x6c3   :  { %v5041_v47 = vpop.eup %5040 }
 0x6c4   :  { %v5043_v21 = vpop.eup %5042  ;;  %v3184_v37 = vmul.f32 %v5041_v47, %v5039_v12 }
 0x6c5   :  { %v5045_v17 = vpop.eup %5044  ;;  %v3341_v29 = vadd.f32 1.0, %v5043_v21 }
 0x6c6   :  { %v3353_v41 = vadd.f32 1.0, %v5045_v17  ;;  %v3185_v6 = vpack.c.bf16 %v3184_v37, %v3183_v38  ;;  %v5047_v30 = vpop.eup %5046  ;;  %v3803_v38 = vld [vmem:[#allocation2] sm:$0xff]  ;;  %v3805_v37 = vld [vmem:[#allocation2 + $0x10] sm:$0xff]  ;;  %v3808_v17 = vld [vmem:[#allocation2 + $0x28] sm:$0xff] }
 0x6c7   :  { %5056 = vrcp.f32 %v3341_v29  ;;  %v3342_v59 = vadd.f32 1.0, %v5047_v30  ;;  %v5049_v9 = vpop.eup %5048  ;;  %v3810_v29 = vld [vmem:[#allocation2 + $0x38] sm:$0xff] }
 0x6c8   :  { %5058 = vrcp.f32 %v3353_v41  ;;  %4684 = vst [vmem:[%s7222_s6 + $0x28] sm:$0xff] %v3185_v6   ;;  %3472 = vmatmul.mubr.bf16.vlgmr.msra.gmra.mrb[48].mxu0 %v3185_v6  ;;  %3515 = vmatmul.mubr.bf16.vlgmr.msra.gmra.mrb[48].mxu1 %v3185_v6  ;;  %v3354_v61 = vadd.f32 1.0, %v5049_v9  ;;  %v3809_v41 = vld [vmem:[#allocation2 + $0x30] sm:$0xff]  ;;  %v3812_v6 = vld [vmem:[#allocation2 + $0x48] sm:$0xff]  ;;  %v3814_v30 = vld [vmem:[#allocation2 + $0x58] sm:$0xff] }
 0x6c9   :  { %5060 = vpow2.f32 %v4510_v10  ;;  %3638 = vmatpush1.bf16.msra.mxu0 %v7021_v35  ;;  %3681 = vmatpush1.bf16.msra.mxu1 %v6869_v33  ;;  %v5051_v33 = vpop.eup %5050  ;;  %v3807_v10 = vld [vmem:[#allocation2 + $0x20] sm:$0xff]  ;;  %v3813_v9 = vld [vmem:[#allocation2 + $0x50] sm:$0xff] }
 0x6ca   :  { %5062 = vrcp.f32 %v3342_v59  ;;  %3639 = vmatprep.subr.bf16.mxu0 %v7023_v32  ;;  %3682 = vmatprep.subr.bf16.mxu1 %v6871_v22  ;;  %v5053_v22 = vpop.eup %5052  ;;  %v3811_v59 = vld [vmem:[#allocation2 + $0x40] sm:$0xff] }
 0x6cb   :  { %3669 = vmatprep.mubr.bf16.mxu0 %v7392_v11  ;;  %3712 = vmatprep.mubr.bf16.mxu1 %v7392_v11  ;;  %5064 = vrcp.f32 %v3354_v61  ;;  %v5055_v54 = vpop.eup %5054  ;;  %v3367_v58 = vadd.f32 1.0, %v5053_v22  ;;  %v3816_v61 = vld [vmem:[#allocation2 + $0x68] sm:$0xff]  ;;  %v3815_v22 = vld [vmem:[#allocation2 + $0x60] sm:$0xff] }
 0x6cd   :  { %3640 = vmatpush1.bf16.msra.mxu0 %v7032_v1  ;;  %3683 = vmatpush1.bf16.msra.mxu1 %v6880_v42  ;;  %v7050_v42 = vld [vmem:[#allocation3 + $0x60] sm:$0xff]  ;;  %5066 = vrcp.f32 %v3367_v58 }
 0x6ce   :  { %3641 = vmatprep.subr.bf16.mxu0 %v7034_v0  ;;  %3684 = vmatprep.subr.bf16.mxu1 %v6882_v48 }
 0x6d1   :  { %v5057_v49 = vpop.eup %5056  ;;  %3642 = vmatpush1.bf16.msra.mxu0 %v7042_v53  ;;  %3685 = vmatpush1.bf16.msra.mxu1 %v6890_v5 }
 0x6d2   :  { %v5059_v51 = vpop.eup %5058  ;;  %v3375_v16 = vmul.f32 %v5057_v49, %v5051_v33  ;;  %3643 = vmatprep.subr.bf16.mxu0 %v7044_v50  ;;  %3686 = vmatprep.subr.bf16.mxu1 %v6892_v26  ;;  %v7061_v26 = vld [vmem:[#allocation3 + $0x80] sm:$0xff]  ;;  %v3818_v33 = vld [vmem:[#allocation2 + $0x78] sm:$0xff] }
 0x6d3   :  { %v5061_v48 = vpop.eup %5060  ;;  %v3373_v18 = vmul.f32 %v5059_v51, %v6903_v2  ;;  %v3822_v49 = vld [vmem:[#allocation2 + $0x98] sm:$0xff]  ;;  %v3821_v51 = vld [vmem:[#allocation2 + $0x90] sm:$0xff] }
 0x6d4   :  { %v5063_v46 = vpop.eup %5062  ;;  %v3368_v8 = vadd.f32 1.0, %v5061_v48  ;;  %v3825_v48 = vld [vmem:[#allocation2 + $0xb0] sm:$0xff] }
 0x6d5   :  { %v7055_v28 = vadd.f32 %v3375_v16, %v3373_v18  ;;  %v3376_v27 = vmul.f32 %v5063_v46, %v5055_v54  ;;  %3644 = vmatpush1.bf16.msra.mxu0 %v7050_v42  ;;  %3687 = vmatpush1.bf16.msra.mxu1 %v6898_v19  ;;  %v5065_v5 = vpop.eup %5064  ;;  %v7073_v19 = vld [vmem:[#allocation3 + $0xa0] sm:$0xff]  ;;  %v3817_v54 = vld [vmem:[#allocation2 + $0x70] sm:$0xff]  ;;  %v3826_v16 = vld [vmem:[#allocation2 + $0xb8] sm:$0xff] }
 0x6d6   :  { %3645 = vmatprep.subr.bf16.mxu0 %v7053_v44  ;;  %3688 = vmatprep.subr.bf16.mxu1 %v6901_v7  ;;  %v3374_v2 = vmul.f32 %v5065_v5, %v6915_v23  ;;  %v7076_v7 = vld [vmem:[#allocation3 + $0xc8] sm:$0xff]  ;;  %v3830_v18 = vld [vmem:[#allocation2 + $0xd8] sm:$0xff] }
 0x6d7   :  { %5068 = vtanh.f32 %v7055_v28  ;;  %v7084_v23 = vld [vmem:[#allocation3 + $0xe8] sm:$0xff] }
 0x6d8   :  { %v7067_v36 = vadd.f32 %v3376_v27, %v3374_v2  ;;  %5070 = vrcp.f32 %v3368_v8 }
 0x6d9   :  { %3646 = vmatpush1.bf16.msra.mxu0 %v7061_v26  ;;  %3689 = vmatpush1.bf16.msra.mxu1 %v6909_v43  ;;  %v7082_v43 = vld [vmem:[#allocation3 + $0xc0] sm:$0xff] }
 0x6da   :  { %3647 = vmatprep.subr.bf16.mxu0 %v7064_v55  ;;  %3690 = vmatprep.subr.bf16.mxu1 %v6912_v24  ;;  %5072 = vtanh.f32 %v7067_v36  ;;  %v5067_v24 = vpop.eup %5066 }
 0x6dd   :  { %3648 = vmatpush1.bf16.msra.mxu0 %v7073_v19  ;;  %3691 = vmatpush1.bf16.msra.mxu1 %v6921_v39  ;;  %v7092_v39 = vld [vmem:[#allocation3 + $0xf0] sm:$0xff] }
 0x6de   :  { %3649 = vmatprep.subr.bf16.mxu0 %v7076_v7  ;;  %3692 = vmatprep.subr.bf16.mxu1 %v6924_v14 }
 0x6e1   :  { %3650 = vmatpush1.bf16.msra.mxu0 %v7082_v43  ;;  %3693 = vmatpush1.bf16.msra.mxu1 %v6930_v13  ;;  %v5069_v25 = vpop.eup %5068  ;;  %v3804_v13 = vld [vmem:[#allocation2 + $0x8] sm:$0xff] }
 0x6e2   :  { %3651 = vmatprep.subr.bf16.mxu0 %v7084_v23  ;;  %3694 = vmatprep.subr.bf16.mxu1 %v6932_v62  ;;  %v5071_v12 = vpop.eup %5070  ;;  %v3381_v63 = vmul.f32 %v5069_v25, %v5067_v24  ;;  %v3806_v62 = vld [vmem:[#allocation2 + $0x18] sm:$0xff] }
 0x6e4   :  { %v5073_v14 = vpop.eup %5072 }
 0x6e5   :  { %3652 = vmatpush1.bf16.msra.mxu0 %v7090_v52  ;;  %3695 = vmatpush1.bf16.msra.mxu1 %v7092_v39  ;;  %v3382_v47 = vmul.f32 %v5073_v14, %v5071_v12 }
 0x6e6   :  { %3835 = vmatprep.subr.bf16.mxu0 %v3804_v13  ;;  %3878 = vmatprep.subr.bf16.mxu1 %v3806_v62  ;;  %v7497_v62 = vld [vmem:[#allocation44_spill] sm:$0xff] }
 0x6e7   :  { %v3383_v21 = vpack.c.bf16 %v3382_v47, %v3381_v63 }
 0x6e9   :  { %4685 = vst [vmem:[%s7223_s7 + $0x10] sm:$0xff] %v3383_v21   ;;  %3670 = vmatmul.mubr.bf16.vlgmr.msra.gmra.mrb[52].mxu0 %v3383_v21  ;;  %3713 = vmatmul.mubr.bf16.vlgmr.msra.gmra.mrb[52].mxu1 %v3383_v21 }
 0x6ea   :  { %3867 = vmatprep.mubr.bf16.mxu0 %v7392_v11  ;;  %3910 = vmatprep.mubr.bf16.mxu1 %v7392_v11 }
 0x6eb   :  { %3836 = vmatpush1.bf16.msra.mxu0 %v3803_v38  ;;  %3879 = vmatpush1.bf16.msra.mxu1 %v3805_v37  ;;  %v3402_v38 = vunpack.c.h.bf16 %v7497_v62 }
 0x6ec   :  { %3837 = vmatprep.subr.bf16.mxu0 %v3808_v17  ;;  %3880 = vmatprep.subr.bf16.mxu1 %v3810_v29 }
 0x6ef   :  { %3838 = vmatpush1.bf16.msra.mxu0 %v3807_v10  ;;  %3881 = vmatpush1.bf16.msra.mxu1 %v3809_v41  ;;  %v3401_v10 = vunpack.c.l.bf16 %v7497_v62 }
 0x6f0   :  { %3839 = vmatprep.subr.bf16.mxu0 %v3812_v6  ;;  %3882 = vmatprep.subr.bf16.mxu1 %v3814_v30  ;;  %v7498_v6 = vld [vmem:[#allocation46_spill] sm:$0xff] }
 0x6f1   :  { %v3406_v30 = vunpack.c.h.bf16 %v7498_v6 }
 0x6f3   :  { %3840 = vmatpush1.bf16.msra.mxu0 %v3811_v59  ;;  %3883 = vmatpush1.bf16.msra.mxu1 %v3813_v9  ;;  %v3405_v59 = vunpack.c.l.bf16 %v7498_v6 }
 0x6f4   :  { %3841 = vmatprep.subr.bf16.mxu0 %v3816_v61  ;;  %3884 = vmatprep.subr.bf16.mxu1 %v3818_v33 }
 0x6f7   :  { %3842 = vmatpush1.bf16.msra.mxu0 %v3815_v22  ;;  %3885 = vmatpush1.bf16.msra.mxu1 %v3817_v54 }
 0x6f8   :  { %3843 = vmatprep.subr.bf16.mxu0 %v6970_v60  ;;  %3886 = vmatprep.subr.bf16.mxu1 %v3822_v49  ;;  %v3829_v60 = vld [vmem:[#allocation2 + $0xd0] sm:$0xff] }
 0x6fb   :  { %3844 = vmatpush1.bf16.msra.mxu0 %v6973_v31  ;;  %3887 = vmatpush1.bf16.msra.mxu1 %v3821_v51  ;;  %v3834_v31 = vld [vmem:[#allocation2 + $0xf8] sm:$0xff] }
 0x6fc   :  { %3845 = vmatprep.subr.bf16.mxu0 %v6976_v40  ;;  %3888 = vmatprep.subr.bf16.mxu1 %v3826_v16  ;;  %v3833_v40 = vld [vmem:[#allocation2 + $0xf0] sm:$0xff] }
 0x6ff   :  { %3846 = vmatpush1.bf16.msra.mxu0 %v6979_v15  ;;  %3889 = vmatpush1.bf16.msra.mxu1 %v3825_v48  ;;  %v4003_v15 = vld [vmem:[#allocation3 + $0x18] sm:$0xff] }
 0x700   :  { %3847 = vmatprep.subr.bf16.mxu0 %v6982_v57  ;;  %3890 = vmatprep.subr.bf16.mxu1 %v3830_v18  ;;  %v7495_v57 = vld [vmem:[#allocation43_spill] sm:$0xff] }
 0x701   :  { %v3399_v46 = vunpack.c.l.bf16 %v7495_v57  ;;  %v3400_v58 = vunpack.c.h.bf16 %v7495_v57 }
 0x703   :  { %3848 = vmatpush1.bf16.msra.mxu0 %v6985_v20  ;;  %3891 = vmatpush1.bf16.msra.mxu1 %v3829_v60  ;;  %v7496_v20 = vld [vmem:[#allocation45_spill] sm:$0xff] }
 0x704   :  { %3849 = vmatprep.subr.bf16.mxu0 %v6988_v3  ;;  %3892 = vmatprep.subr.bf16.mxu1 %v3834_v31  ;;  %v3403_v27 = vunpack.c.l.bf16 %v7496_v20  ;;  %v3404_v3 = vunpack.c.h.bf16 %v7496_v20 }
 0x707   :  { %3850 = vmatpush1.bf16.msra.mxu0 %v6991_v56  ;;  %3893 = vmatpush1.bf16.msra.mxu1 %v3833_v40 }
 0x708   :  { %4032 = vmatprep.subr.bf16.mxu0 %v6994_v34  ;;  %4075 = vmatprep.subr.bf16.mxu1 %v4003_v15 }
 0x79b   :  { %v3473_v5 = vpop.f32.mrb[48].mxu0  ;;  %v3516_v8 = vpop.f32.mrb[48].mxu1 }
 0x79c   :  { %v3525_v2 = vadd.f32 %v3473_v5, %v3399_v46  ;;  %v3475_v24 = vpop.f32.mrb[49].mxu0  ;;  %v3518_v56 = vpop.f32.mrb[49].mxu1  ;;  %v3527_v9 = vadd.f32 %v3516_v8, %v3401_v10 }
 0x79d   :  { %v3526_v25 = vadd.f32 %v3475_v24, %v3400_v58  ;;  %v3477_v12 = vpop.f32.mrb[50].mxu0  ;;  %v3520_v14 = vpop.f32.mrb[50].mxu1  ;;  %v3528_v41 = vadd.f32 %v3518_v56, %v3402_v38  ;;  %v7499_v24 = vld [vmem:[#allocation55_spill] sm:$0xff] }
 0x79e   :  { %v4515_v34 = vmul.f32 -1.442695, %v3525_v2  ;;  %v3529_v63 = vadd.f32 %v3477_v12, %v3403_v27  ;;  %v3479_v47 = vpop.f32.mrb[51].mxu0  ;;  %v3522_v21 = vpop.f32.mrb[51].mxu1  ;;  %v3531_v22 = vadd.f32 %v3520_v14, %v3405_v59  ;;  %v3597_v56 = vunpack.c.l.bf16 %v7499_v24 }
 0x79f   :  { %v4517_v13 = vmul.f32 -1.442695, %v3526_v25  ;;  %v3530_v37 = vadd.f32 %v3479_v47, %v3404_v3  ;;  %v4519_v61 = vmul.f32 -1.442695, %v3528_v41  ;;  %v3532_v33 = vadd.f32 %v3522_v21, %v3406_v30  ;;  %v7500_v47 = vld [vmem:[#allocation57_spill] sm:$0xff] }
 0x7a0   :  { %5074 = vpow2.f32 %v4515_v34  ;;  %v4516_v17 = vmul.f32 -1.442695, %v3529_v63  ;;  %v3598_v14 = vunpack.c.h.bf16 %v7499_v24  ;;  %v3601_v21 = vunpack.c.l.bf16 %v7500_v47 }
 0x7a1   :  { %5076 = vpow2.f32 %v4517_v13  ;;  %v4518_v29 = vmul.f32 -1.442695, %v3530_v37  ;;  %v4520_v16 = vmul.f32 -1.442695, %v3532_v33  ;;  %v3602_v37 = vunpack.c.h.bf16 %v7500_v47  ;;  %v4002_v47 = vld [vmem:[#allocation3 + $0x10] sm:$0xff] }
 0x7a2   :  { %5078 = vpow2.f32 %v4516_v17 }
 0x7a3   :  { %5080 = vpow2.f32 %v4518_v29 }
 0x7a4   :  { %5082 = vtanh.f32 %v3527_v9 }
 0x7a5   :  { %5084 = vpow2.f32 %v4519_v61 }
 0x7a6   :  { %5086 = vtanh.f32 %v3531_v22  ;;  %v7501_v22 = vld [vmem:[#allocation56_spill] sm:$0xff] }
 0x7aa   :  { %v5075_v54 = vpop.eup %5074 }
 0x7ab   :  { %v5077_v49 = vpop.eup %5076  ;;  %v3539_v51 = vadd.f32 1.0, %v5075_v54  ;;  %v3600_v54 = vunpack.c.h.bf16 %v7501_v22 }
 0x7ac   :  { %v3551_v48 = vadd.f32 1.0, %v5077_v49  ;;  %v5079_v18 = vpop.eup %5078 }
 0x7ad   :  { %5088 = vrcp.f32 %v3539_v51  ;;  %v3540_v60 = vadd.f32 1.0, %v5079_v18  ;;  %v5081_v31 = vpop.eup %5080 }
 0x7ae   :  { %5090 = vrcp.f32 %v3551_v48  ;;  %v3552_v40 = vadd.f32 1.0, %v5081_v31  ;;  %v5083_v15 = vpop.eup %5082  ;;  %v3599_v48 = vunpack.c.l.bf16 %v7501_v22 }
 0x7af   :  { %5092 = vpow2.f32 %v4520_v16  ;;  %v5085_v57 = vpop.eup %5084 }
 0x7b0   :  { %5094 = vrcp.f32 %v3540_v60  ;;  %v5087_v46 = vpop.eup %5086  ;;  %v3565_v2 = vadd.f32 1.0, %v5085_v57  ;;  %v7502_v60 = vld [vmem:[#allocation58_spill] sm:$0xff] }
 0x7b1   :  { %5096 = vrcp.f32 %v3552_v40  ;;  %v3604_v31 = vunpack.c.h.bf16 %v7502_v60  ;;  %v3603_v40 = vunpack.c.l.bf16 %v7502_v60 }
 0x7b2   :  { %5098 = vrcp.f32 %v3565_v2 }
 0x7b7   :  { %v5089_v58 = vpop.eup %5088 }
 0x7b8   :  { %v5091_v20 = vpop.eup %5090  ;;  %v3573_v27 = vmul.f32 %v5089_v58, %v5083_v15 }
 0x7b9   :  { %v5093_v5 = vpop.eup %5092  ;;  %v3571_v8 = vmul.f32 %v5091_v20, %v7007_v45 }
 0x7ba   :  { %v5095_v3 = vpop.eup %5094  ;;  %v3566_v63 = vadd.f32 1.0, %v5093_v5 }
 0x7bb   :  { %v7120_v25 = vadd.f32 %v3573_v27, %v3571_v8  ;;  %v3574_v12 = vmul.f32 %v5095_v3, %v5087_v46  ;;  %v5097_v34 = vpop.eup %5096 }
 0x7bc   :  { %v3572_v13 = vmul.f32 %v5097_v34, %v7014_v4  ;;  %v3671_v62 = vpop.f32.mrb[52].mxu0  ;;  %v3714_v38 = vpop.f32.mrb[52].mxu1 }
 0x7bd   :  { %v3723_v45 = vadd.f32 %v3671_v62, %v3597_v56  ;;  %v3673_v17 = vpop.f32.mrb[53].mxu0  ;;  %v3716_v29 = vpop.f32.mrb[53].mxu1  ;;  %5100 = vtanh.f32 %v7120_v25  ;;  %v3725_v57 = vadd.f32 %v3714_v38, %v3599_v48  ;;  %v4031_v48 = vld [vmem:[#allocation3 + $0xf8] sm:$0xff] }
 0x7be   :  { %v7127_v10 = vadd.f32 %v3574_v12, %v3572_v13  ;;  %v3724_v41 = vadd.f32 %v3673_v17, %v3598_v14  ;;  %v3675_v6 = vpop.f32.mrb[54].mxu0  ;;  %v3718_v30 = vpop.f32.mrb[54].mxu1  ;;  %5102 = vrcp.f32 %v3566_v63  ;;  %v3726_v18 = vadd.f32 %v3716_v29, %v3600_v54  ;;  %v4007_v13 = vld [vmem:[#allocation3 + $0x38] sm:$0xff] }
 0x7bf   :  { %v4525_v59 = vmul.f32 -1.442695, %v3723_v45  ;;  %v3727_v9 = vadd.f32 %v3675_v6, %v3601_v21  ;;  %v3677_v61 = vpop.f32.mrb[55].mxu0  ;;  %v3720_v4 = vpop.f32.mrb[55].mxu1  ;;  %v3729_v5 = vadd.f32 %v3718_v30, %v3603_v40  ;;  %v4006_v45 = vld [vmem:[#allocation3 + $0x30] sm:$0xff]  ;;  %v4011_v17 = vld [vmem:[#allocation3 + $0x58] sm:$0xff] }
 0x7c0   :  { %5104 = vtanh.f32 %v7127_v10  ;;  %v4527_v33 = vmul.f32 -1.442695, %v3724_v41  ;;  %v3728_v49 = vadd.f32 %v3677_v61, %v3602_v37  ;;  %v5099_v15 = vpop.eup %5098  ;;  %v4529_v58 = vmul.f32 -1.442695, %v3726_v18  ;;  %v4015_v6 = vld [vmem:[#allocation3 + $0x78] sm:$0xff] }
 0x7c1   :  { %5106 = vpow2.f32 %v4525_v59  ;;  %v4526_v51 = vmul.f32 -1.442695, %v3727_v9  ;;  %v3730_v20 = vadd.f32 %v3720_v4, %v3604_v31  ;;  %v4019_v4 = vld [vmem:[#allocation3 + $0x98] sm:$0xff] }
 0x7c2   :  { %5108 = vpow2.f32 %v4527_v33  ;;  %v4528_v16 = vmul.f32 -1.442695, %v3728_v49 }
 0x7c3   :  { %5110 = vpow2.f32 %v4526_v51  ;;  %v4530_v14 = vmul.f32 -1.442695, %v3730_v20 }
 0x7c4   :  { %5112 = vpow2.f32 %v4528_v16  ;;  %v4023_v16 = vld [vmem:[#allocation3 + $0xb8] sm:$0xff] }
 0x7c5   :  { %5114 = vtanh.f32 %v3725_v57 }
 0x7c6   :  { %5116 = vpow2.f32 %v4529_v58 }
 0x7c7   :  { %v5101_v46 = vpop.eup %5100  ;;  %5118 = vtanh.f32 %v3729_v5 }
 0x7c8   :  { %v5103_v27 = vpop.eup %5102  ;;  %v3579_v2 = vmul.f32 %v5101_v46, %v5099_v15  ;;  %v7504_v15 = vld [vmem:[#allocation49_spill] sm:$0xff] }
 0x7c9   :  { %v3799_v57 = vunpack.c.l.bf16 %v7504_v15 }
 0x7ca   :  { %v5105_v8 = vpop.eup %5104 }
 0x7cb   :  { %v5107_v3 = vpop.eup %5106  ;;  %v3580_v24 = vmul.f32 %v5105_v8, %v5103_v27 }
 0x7cc   :  { %v5109_v56 = vpop.eup %5108  ;;  %v3737_v12 = vadd.f32 1.0, %v5107_v3 }
 0x7cd   :  { %v3749_v34 = vadd.f32 1.0, %v5109_v56  ;;  %v3581_v63 = vpack.c.bf16 %v3580_v24, %v3579_v2  ;;  %v5111_v21 = vpop.eup %5110 }
 0x7ce   :  { %5120 = vrcp.f32 %v3737_v12  ;;  %v3738_v62 = vadd.f32 1.0, %v5111_v21  ;;  %v5113_v38 = vpop.eup %5112 }
 0x7cf   :  { %5122 = vrcp.f32 %v3749_v34  ;;  %4686 = vst [vmem:[%s7222_s6 + $0x30] sm:$0xff] %v3581_v63   ;;  %3868 = vmatmul.mubr.bf16.vlgmr.msra.gmra.mrb[56].mxu0 %v3581_v63  ;;  %3911 = vmatmul.mubr.bf16.vlgmr.msra.gmra.mrb[56].mxu1 %v3581_v63  ;;  %v3750_v37 = vadd.f32 1.0, %v5113_v38  ;;  %v5115_v29 = vpop.eup %5114  ;;  %v7505_v34 = vld [vmem:[#allocation48_spill] sm:$0xff] }
 0x7d0   :  { %5124 = vpow2.f32 %v4530_v14  ;;  %4033 = vmatpush1.bf16.msra.mxu0 %v7021_v35  ;;  %4076 = vmatpush1.bf16.msra.mxu1 %v4002_v47  ;;  %v4010_v35 = vld [vmem:[#allocation3 + $0x50] sm:$0xff]  ;;  %v5117_v41 = vpop.eup %5116  ;;  %v3798_v63 = vunpack.c.h.bf16 %v7505_v34 }
 0x7d1   :  { %5126 = vrcp.f32 %v3738_v62  ;;  %4034 = vmatprep.subr.bf16.mxu0 %v7023_v32  ;;  %4077 = vmatprep.subr.bf16.mxu1 %v4007_v13  ;;  %v5119_v30 = vpop.eup %5118  ;;  %v3763_v33 = vadd.f32 1.0, %v5117_v41  ;;  %v3797_v62 = vunpack.c.l.bf16 %v7505_v34 }
 0x7d2   :  { %4064 = vmatprep.mubr.bf16.mxu0 %v7392_v11  ;;  %4107 = vmatprep.mubr.bf16.mxu1 %v7392_v11  ;;  %5128 = vrcp.f32 %v3750_v37  ;;  %v4014_v11 = vld [vmem:[#allocation3 + $0x70] sm:$0xff]  ;;  %v7506_v37 = vld [vmem:[#allocation50_spill] sm:$0xff] }
 0x7d3   :  { %5130 = vrcp.f32 %v3763_v33 }
 0x7d4   :  { %4035 = vmatpush1.bf16.msra.mxu0 %v7032_v1  ;;  %4078 = vmatpush1.bf16.msra.mxu1 %v4006_v45  ;;  %v3802_v45 = vunpack.c.h.bf16 %v7506_v37 }
 0x7d5   :  { %4036 = vmatprep.subr.bf16.mxu0 %v7034_v0  ;;  %4079 = vmatprep.subr.bf16.mxu1 %v4011_v17  ;;  %v3801_v17 = vunpack.c.l.bf16 %v7506_v37 }
 0x7d8   :  { %v5121_v32 = vpop.eup %5120  ;;  %4037 = vmatpush1.bf16.msra.mxu0 %v7042_v53  ;;  %4080 = vmatpush1.bf16.msra.mxu1 %v4010_v35 }
 0x7d9   :  { %v5123_v59 = vpop.eup %5122  ;;  %v3771_v9 = vmul.f32 %v5121_v32, %v5115_v29  ;;  %4038 = vmatprep.subr.bf16.mxu0 %v7044_v50  ;;  %4081 = vmatprep.subr.bf16.mxu1 %v4015_v6  ;;  %v4018_v50 = vld [vmem:[#allocation3 + $0x90] sm:$0xff] }
 0x7da   :  { %v5125_v1 = vpop.eup %5124  ;;  %v3769_v61 = vmul.f32 %v5123_v59, %v7055_v28 }
 0x7db   :  { %v5127_v0 = vpop.eup %5126  ;;  %v3764_v49 = vadd.f32 1.0, %v5125_v1 }
 0x7dc   :  { %v7146_v22 = vadd.f32 %v3771_v9, %v3769_v61  ;;  %v3772_v54 = vmul.f32 %v5127_v0, %v5119_v30  ;;  %4039 = vmatpush1.bf16.msra.mxu0 %v7050_v42  ;;  %4082 = vmatpush1.bf16.msra.mxu1 %v4014_v11  ;;  %v5129_v53 = vpop.eup %5128  ;;  %v4022_v42 = vld [vmem:[#allocation3 + $0xb0] sm:$0xff] }
 0x7dd   :  { %4040 = vmatprep.subr.bf16.mxu0 %v7053_v44  ;;  %4083 = vmatprep.subr.bf16.mxu1 %v4019_v4  ;;  %v3770_v51 = vmul.f32 %v5129_v53, %v7067_v36  ;;  %v4027_v44 = vld [vmem:[#allocation3 + $0xd8] sm:$0xff]  ;;  %v4026_v36 = vld [vmem:[#allocation3 + $0xd0] sm:$0xff] }
 0x7de   :  { %5132 = vtanh.f32 %v7146_v22 }
 0x7df   :  { %v7152_v28 = vadd.f32 %v3772_v54, %v3770_v51  ;;  %5134 = vrcp.f32 %v3764_v49 }
 0x7e0   :  { %4041 = vmatpush1.bf16.msra.mxu0 %v7061_v26  ;;  %4084 = vmatpush1.bf16.msra.mxu1 %v4018_v50  ;;  %v5131_v26 = vpop.eup %5130 }
 0x7e1   :  { %4042 = vmatprep.subr.bf16.mxu0 %v7064_v55  ;;  %4085 = vmatprep.subr.bf16.mxu1 %v4023_v16  ;;  %5136 = vtanh.f32 %v7152_v28 }
 0x7e4   :  { %4043 = vmatpush1.bf16.msra.mxu0 %v7073_v19  ;;  %4086 = vmatpush1.bf16.msra.mxu1 %v4022_v42 }
 0x7e5   :  { %4044 = vmatprep.subr.bf16.mxu0 %v7076_v7  ;;  %4087 = vmatprep.subr.bf16.mxu1 %v4027_v44 }
 0x7e8   :  { %4045 = vmatpush1.bf16.msra.mxu0 %v7082_v43  ;;  %4088 = vmatpush1.bf16.msra.mxu1 %v4026_v36  ;;  %v5133_v55 = vpop.eup %5132  ;;  %v7503_v43 = vld [vmem:[#allocation47_spill] sm:$0xff] }
 0x7e9   :  { %4046 = vmatprep.subr.bf16.mxu0 %v7084_v23  ;;  %4089 = vmatprep.subr.bf16.mxu1 %v4031_v48  ;;  %v5135_v18 = vpop.eup %5134  ;;  %v3777_v19 = vmul.f32 %v5133_v55, %v5131_v26  ;;  %v3795_v40 = vunpack.c.l.bf16 %v7503_v43  ;;  %v3796_v23 = vunpack.c.h.bf16 %v7503_v43  ;;  %v7507_v48 = vld [vmem:[#allocation51_spill] sm:$0xff] }
 0x7ea   :  { %v3992_v26 = vunpack.c.l.bf16 %v7507_v48 }
 0x7eb   :  { %v5137_v60 = vpop.eup %5136 }
 0x7ec   :  { %4047 = vmatpush1.bf16.msra.mxu0 %v7090_v52  ;;  %4090 = vmatpush1.bf16.msra.mxu1 %v7092_v39  ;;  %v3778_v31 = vmul.f32 %v5137_v60, %v5135_v18  ;;  %v3800_v52 = vunpack.c.h.bf16 %v7504_v15  ;;  %v3993_v60 = vunpack.c.h.bf16 %v7507_v48 }
 0x7ee   :  { %v3779_v7 = vpack.c.bf16 %v3778_v31, %v3777_v19 }
 0x7f0   :  { %4687 = vst [vmem:[%s7223_s7 + $0x8] sm:$0xff] %v3779_v7   ;;  %4065 = vmatmul.mubr.bf16.vlgmr.msra.gmra.mrb[60].mxu0 %v3779_v7  ;;  %4108 = vmatmul.mubr.bf16.vlgmr.msra.gmra.mrb[60].mxu1 %v3779_v7  ;;  %v7508_v7 = vld [vmem:[#allocation53_spill] sm:$0xff] }
 0x7f1   :  { %v3996_v43 = vunpack.c.l.bf16 %v7508_v7  ;;  %v3997_v15 = vunpack.c.h.bf16 %v7508_v7 }
 0x8a2   :  { %v3869_v46 = vpop.f32.mrb[56].mxu0  ;;  %v3912_v58 = vpop.f32.mrb[56].mxu1 }
 0x8a3   :  { %v3921_v39 = vadd.f32 %v3869_v46, %v3795_v40  ;;  %v3871_v20 = vpop.f32.mrb[57].mxu0  ;;  %v3914_v27 = vpop.f32.mrb[57].mxu1  ;;  %v3923_v29 = vadd.f32 %v3912_v58, %v3797_v62 }
 0x8a4   :  { %v3922_v5 = vadd.f32 %v3871_v20, %v3796_v23  ;;  %v3873_v8 = vpop.f32.mrb[58].mxu0  ;;  %v3916_v3 = vpop.f32.mrb[58].mxu1  ;;  %v3924_v38 = vadd.f32 %v3914_v27, %v3798_v63 }
 0x8a5   :  { %v4535_v2 = vmul.f32 -1.442695, %v3921_v39  ;;  %v3925_v24 = vadd.f32 %v3873_v8, %v3799_v57  ;;  %v3875_v56 = vpop.f32.mrb[59].mxu0  ;;  %v3918_v12 = vpop.f32.mrb[59].mxu1  ;;  %v3927_v6 = vadd.f32 %v3916_v3, %v3801_v17 }
 0x8a6   :  { %v4537_v14 = vmul.f32 -1.442695, %v3922_v5  ;;  %v3926_v47 = vadd.f32 %v3875_v56, %v3800_v52  ;;  %v4539_v35 = vmul.f32 -1.442695, %v3924_v38  ;;  %v3928_v41 = vadd.f32 %v3918_v12, %v3802_v45 }
 0x8a7   :  { %5138 = vpow2.f32 %v4535_v2  ;;  %v4536_v21 = vmul.f32 -1.442695, %v3925_v24  ;;  %v7509_v24 = vld [vmem:[#allocation52_spill] sm:$0xff] }
 0x8a8   :  { %5140 = vpow2.f32 %v4537_v14  ;;  %v4538_v13 = vmul.f32 -1.442695, %v3926_v47  ;;  %v4540_v9 = vmul.f32 -1.442695, %v3928_v41  ;;  %v3995_v56 = vunpack.c.h.bf16 %v7509_v24 }
 0x8a9   :  { %5142 = vpow2.f32 %v4536_v21  ;;  %v3994_v63 = vunpack.c.l.bf16 %v7509_v24  ;;  %v7510_v21 = vld [vmem:[#allocation54_spill] sm:$0xff] }
 0x8aa   :  { %5144 = vpow2.f32 %v4538_v13  ;;  %v3999_v13 = vunpack.c.h.bf16 %v7510_v21  ;;  %v3998_v38 = vunpack.c.l.bf16 %v7510_v21 }
 0x8ab   :  { %5146 = vtanh.f32 %v3923_v29 }
 0x8ac   :  { %5148 = vpow2.f32 %v4539_v35 }
 0x8ad   :  { %5150 = vtanh.f32 %v3927_v6 }
 0x8b1   :  { %v5139_v30 = vpop.eup %5138 }
 0x8b2   :  { %v5141_v32 = vpop.eup %5140  ;;  %v3935_v59 = vadd.f32 1.0, %v5139_v30 }
 0x8b3   :  { %v3947_v11 = vadd.f32 1.0, %v5141_v32  ;;  %v5143_v1 = vpop.eup %5142 }
 0x8b4   :  { %5152 = vrcp.f32 %v3935_v59  ;;  %v3936_v61 = vadd.f32 1.0, %v5143_v1  ;;  %v5145_v4 = vpop.eup %5144 }
 0x8b5   :  { %5154 = vrcp.f32 %v3947_v11  ;;  %v3948_v0 = vadd.f32 1.0, %v5145_v4  ;;  %v5147_v33 = vpop.eup %5146 }
 0x8b6   :  { %5156 = vpow2.f32 %v4540_v9  ;;  %v5149_v54 = vpop.eup %5148 }
 0x8b7   :  { %5158 = vrcp.f32 %v3936_v61  ;;  %v5151_v53 = vpop.eup %5150  ;;  %v3961_v16 = vadd.f32 1.0, %v5149_v54 }
 0x8b8   :  { %5160 = vrcp.f32 %v3948_v0 }
 0x8b9   :  { %5162 = vrcp.f32 %v3961_v16 }
 0x8be   :  { %v5153_v49 = vpop.eup %5152 }
 0x8bf   :  { %v5155_v50 = vpop.eup %5154  ;;  %v3969_v51 = vmul.f32 %v5153_v49, %v5147_v33 }
 0x8c0   :  { %v5157_v42 = vpop.eup %5156  ;;  %v3967_v44 = vmul.f32 %v5155_v50, %v7120_v25 }
 0x8c1   :  { %v5159_v36 = vpop.eup %5158  ;;  %v3962_v31 = vadd.f32 1.0, %v5157_v42 }
 0x8c2   :  { %v3971_v55 = vadd.f32 %v3969_v51, %v3967_v44  ;;  %v3970_v18 = vmul.f32 %v5159_v36, %v5151_v53  ;;  %v5161_v19 = vpop.eup %5160 }
 0x8c3   :  { %v3968_v40 = vmul.f32 %v5161_v19, %v7127_v10  ;;  %v4066_v25 = vpop.f32.mrb[60].mxu0  ;;  %v4109_v23 = vpop.f32.mrb[60].mxu1 }
 0x8c4   :  { %5164 = vtanh.f32 %v3971_v55  ;;  %4197 = vst [vmem:[%s7225_s9] sm:$0xff] %v3971_v55  ;;  %v4118_v57 = vadd.f32 %v4066_v25, %v3992_v26  ;;  %v4068_v46 = vpop.f32.mrb[61].mxu0  ;;  %v4111_v58 = vpop.f32.mrb[61].mxu1  ;;  %v4120_v17 = vadd.f32 %v4109_v23, %v3994_v63 }
 0x8c5   :  { %v3972_v52 = vadd.f32 %v3970_v18, %v3968_v40  ;;  %v4119_v39 = vadd.f32 %v4068_v46, %v3993_v60  ;;  %v4070_v20 = vpop.f32.mrb[62].mxu0  ;;  %v4113_v27 = vpop.f32.mrb[62].mxu1  ;;  %5166 = vrcp.f32 %v3962_v31  ;;  %v4121_v47 = vadd.f32 %v4111_v58, %v3995_v56 }
 0x8c6   :  { %v4545_v5 = vmul.f32 -1.442695, %v4118_v57  ;;  %v4122_v8 = vadd.f32 %v4070_v20, %v3996_v43  ;;  %v4072_v3 = vpop.f32.mrb[63].mxu0  ;;  %v4115_v2 = vpop.f32.mrb[63].mxu1  ;;  %v4124_v6 = vadd.f32 %v4113_v27, %v3998_v38 }
 0x8c7   :  { %5168 = vtanh.f32 %v3972_v52  ;;  %4198 = vst [vmem:[%s7225_s9 + $0x8] sm:$0xff] %v3972_v52  ;;  %v4547_v10 = vmul.f32 -1.442695, %v4119_v39  ;;  %v4123_v12 = vadd.f32 %v4072_v3, %v3997_v15  ;;  %v5163_v62 = vpop.eup %5162  ;;  %v4549_v29 = vmul.f32 -1.442695, %v4121_v47 }
 0x8c8   :  { %5170 = vpow2.f32 %v4545_v5  ;;  %v4546_v14 = vmul.f32 -1.442695, %v4122_v8  ;;  %v4125_v35 = vadd.f32 %v4115_v2, %v3999_v13 }
 0x8c9   :  { %5172 = vpow2.f32 %v4547_v10  ;;  %v4548_v34 = vmul.f32 -1.442695, %v4123_v12 }
 0x8ca   :  { %5174 = vpow2.f32 %v4546_v14  ;;  %v4550_v1 = vmul.f32 -1.442695, %v4125_v35 }
 0x8cb   :  { %5176 = vpow2.f32 %v4548_v34 }
 0x8cc   :  { %5178 = vtanh.f32 %v4120_v17 }
 0x8cd   :  { %5180 = vpow2.f32 %v4549_v29 }
 0x8ce   :  { %v5165_v37 = vpop.eup %5164  ;;  %5182 = vtanh.f32 %v4124_v6 }
 0x8cf   :  { %v3975_v45 = vmul.f32 %v5165_v37, %v5163_v62  ;;  %v5167_v41 = vpop.eup %5166 }
 0x8d1   :  { %v5169_v30 = vpop.eup %5168 }
 0x8d2   :  { %v5171_v32 = vpop.eup %5170  ;;  %v3976_v59 = vmul.f32 %v5169_v30, %v5167_v41 }
 0x8d3   :  { %v5173_v9 = vpop.eup %5172  ;;  %v4132_v11 = vadd.f32 1.0, %v5171_v32 }
 0x8d4   :  { %v3977_v61 = vpack.c.bf16 %v3976_v59, %v3975_v45  ;;  %v4144_v4 = vadd.f32 1.0, %v5173_v9  ;;  %v5175_v0 = vpop.eup %5174 }
 0x8d5   :  { %5184 = vrcp.f32 %v4132_v11  ;;  %v4133_v53 = vadd.f32 1.0, %v5175_v0  ;;  %v5177_v49 = vpop.eup %5176 }
 0x8d6   :  { %4688 = vst [vmem:[%s7222_s6 + $0x38] sm:$0xff] %v3977_v61   ;;  %v4193_v33 = vunpack.c.l.bf16 %v3977_v61  ;;  %v4194_v54 = vunpack.c.h.bf16 %v3977_v61  ;;  %5186 = vrcp.f32 %v4144_v4  ;;  %v4145_v50 = vadd.f32 1.0, %v5177_v49  ;;  %v5179_v51 = vpop.eup %5178 }
 0x8d7   :  { %5188 = vpow2.f32 %v4550_v1  ;;  %v5181_v16 = vpop.eup %5180 }
 0x8d8   :  { %4195 = vst [vmem:[%s7224_s8] sm:$0xff] %v4193_v33  ;;  %4196 = vst [vmem:[%s7224_s8 + $0x8] sm:$0xff] %v4194_v54  ;;  %5190 = vrcp.f32 %v4133_v53  ;;  %v5183_v42 = vpop.eup %5182  ;;  %v4158_v26 = vadd.f32 1.0, %v5181_v16 }
 0x8d9   :  { %5192 = vrcp.f32 %v4145_v50 }
 0x8da   :  { %5194 = vrcp.f32 %v4158_v26 }
 0x8df   :  { %v5185_v44 = vpop.eup %5184 }
 0x8e0   :  { %v5187_v36 = vpop.eup %5186  ;;  %v4166_v48 = vmul.f32 %v5185_v44, %v5179_v51 }
 0x8e1   :  { %v5189_v55 = vpop.eup %5188  ;;  %v4164_v18 = vmul.f32 %v5187_v36, %v7146_v22 }
 0x8e2   :  { %v5191_v60 = vpop.eup %5190  ;;  %v4159_v43 = vadd.f32 1.0, %v5189_v55 }
 0x8e3   :  { %v4168_v19 = vadd.f32 %v4166_v48, %v4164_v18  ;;  %v4167_v31 = vmul.f32 %v5191_v60, %v5183_v42  ;;  %v5193_v7 = vpop.eup %5192 }
 0x8e4   :  { %v4165_v40 = vmul.f32 %v5193_v7, %v7152_v28  ;;  %v5195_v22 = vpop.eup %5194 }
 0x8e5   :  { %5196 = vtanh.f32 %v4168_v19  ;;  %4555 = vst [vmem:[%s7225_s9 + $0x10] sm:$0xff] %v4168_v19 }
 0x8e6   :  { %v4169_v25 = vadd.f32 %v4167_v31, %v4165_v40  ;;  %5198 = vrcp.f32 %v4159_v43 }
 0x8e8   :  { %5200 = vtanh.f32 %v4169_v25  ;;  %4556 = vst [vmem:[%s7225_s9 + $0x18] sm:$0xff] %v4169_v25 }
 0x8ef   :  { %v5197_v23 = vpop.eup %5196 }
 0x8f0   :  { %v4172_v15 = vmul.f32 %v5197_v23, %v5195_v22  ;;  %v5199_v57 = vpop.eup %5198 }
 0x8f2   :  { %v5201_v46 = vpop.eup %5200 }
 0x8f3   :  { %v4173_v58 = vmul.f32 %v5201_v46, %v5199_v57 }
 0x8f5   :  { %v4174_v52 = vpack.c.bf16 %v4173_v58, %v4172_v15 }
 0x8f7   :  { %4674 = vst [vmem:[%s7223_s7] sm:$0xff] %v4174_v52   ;;  %v4199_v39 = vunpack.c.l.bf16 %v4174_v52  ;;  %v4200_v28 = vunpack.c.h.bf16 %v4174_v52 }
 0x8f9   :  { %4553 = vst [vmem:[%s7224_s8 + $0x10] sm:$0xff] %v4199_v39  ;;  %4554 = vst [vmem:[%s7224_s8 + $0x18] sm:$0xff] %v4200_v28 }
 0x8fa   :  { %4239 = vsyncmov [#allocation8] }
 0x8fd   :  { %s4240_s9 = vpop.sfrf %4239 }
 0x8fe   :  { %p4557_p0 = scmp.ne.s32.totalorder %s4240_s9, 0 }
 0x900   :  { %4244 = shalt.err (%p4557_p0)  }
 0x901   :  { %4246 = vsyncmov [#allocation8 + $0x1] }
 0x904   :  { %s4247_s27 = vpop.sfrf %4246 }
 0x905   :  { %p4558_p1 = scmp.ne.s32.totalorder %s4247_s27, 0 }
 0x907   :  { %4251 = shalt.err (%p4558_p1)  }
 0x908   :  { %4253 = vsyncmov [#allocation8 + $0x2] }
 0x90b   :  { %s4254_s7 = vpop.sfrf %4253 }
 0x90c   :  { %p4559_p2 = scmp.ne.s32.totalorder %s4254_s7, 0 }
 0x90e   :  { %4258 = shalt.err (%p4559_p2)  }
 0x90f   :  { %4260 = vsyncmov [#allocation8 + $0x3] }
 0x912   :  { %s4261_s3 = vpop.sfrf %4260 }
 0x913   :  { %p4560_p3 = scmp.ne.s32.totalorder %s4261_s3, 0 }
 0x915   :  { %4265 = shalt.err (%p4560_p3)  }
 0x916   :  { %4267 = vsyncmov [#allocation8 + $0x4] }
 0x919   :  { %s4268_s28 = vpop.sfrf %4267 }
 0x91a   :  { %p4561_p4 = scmp.ne.s32.totalorder %s4268_s28, 0 }
 0x91c   :  { %4272 = shalt.err (%p4561_p4)  }
 0x91d   :  { %4274 = vsyncmov [#allocation8 + $0x5] }
 0x920   :  { %s4275_s8 = vpop.sfrf %4274 }
 0x921   :  { %p4562_p5 = scmp.ne.s32.totalorder %s4275_s8, 0 }
 0x923   :  { %4279 = shalt.err (%p4562_p5)  }

</bundles_post_ra>
